<compile_context>
chip_gen: v6e
topology: v6e:2x2x1
jax: 0.10.0
libtpu: 0.0.40
codegen_flags: <defaults>
</compile_context>

<pallas_src>
import functools

import jax
import jax.numpy as jnp
import numpy as np
from jax import lax
from jax.experimental import pallas as pl
from jax.experimental.pallas import tpu as pltpu


# ----------------------------- Pallas kernel -------------------------------
def _double_conv_kernel(x_ref, w1_ref, s1_ref, w2_ref, s2_ref, o_ref, *, wp):
    """Fused DoubleConv (conv3x3+BN+ReLU twice) for one batch element.

    Layout: the padded image is flattened row-major to (H*wp, C) with channels
    on lanes.  A 3x3 tap (ky,kx) of a valid conv then becomes a row slice at
    offset ky*wp+kx followed by a (M, Cin) @ (Cin, Cout) matmul; the 2 junk
    columns per row (where taps wrap into the next image row) are discarded by
    the caller and never feed a valid output.

    x_ref : (1, n_in, Cin)  bf16   flattened padded input (+ slack rows)
    w1_ref: (9, Cin, Cmid)  bf16   conv1 weights, BN folded, tap-major
    s1_ref: (1, Cmid)       f32    conv1 folded-BN shift
    w2_ref: (9, Cmid, Cout) bf16   conv2 weights, BN+bias folded
    s2_ref: (1, Cout)       f32
    o_ref : (1, m2, Cout)   bf16   m2 = Ho2*wp (junk cols included)
    """
    m2 = o_ref.shape[1]
    m1 = m2 + 2 * wp + 2          # rows of the stage-1 output needed by conv2

    x = x_ref[0]                                    # (n_in, Cin) bf16

    # ---- conv1 (+ folded BN) + ReLU: 9 tap matmuls, f32 accumulation ----
    acc1 = None
    for ky in range(3):
        for kx in range(3):
            off = ky * wp + kx
            c = jnp.dot(x[off:off + m1, :], w1_ref[ky * 3 + kx],
                        preferred_element_type=jnp.float32)
            acc1 = c if acc1 is None else acc1 + c
    # Mid activation stays on-chip; re-quantise to bf16 so conv2 also runs on
    # the native bf16 MXU path (accumulation below remains f32).
    h = jnp.maximum(acc1 + s1_ref[...], 0.0).astype(jnp.bfloat16)   # (m1, Cmid)

    # ---- conv2 (+ folded BN/bias) + ReLU ----
    acc2 = None
    for ky in range(3):
        for kx in range(3):
            off = ky * wp + kx
            c = jnp.dot(h[off:off + m2, :], w2_ref[ky * 3 + kx],
                        preferred_element_type=jnp.float32)
            acc2 = c if acc2 is None else acc2 + c
    out = jnp.maximum(acc2 + s2_ref[...], 0.0)      # (m2, Cout) f32

    o_ref[...] = out[None].astype(o_ref.dtype)      # bf16 writeback


def fused_double_conv(x_flat, w1, s1, w2, s2, *, wp, out_rows):
    """x_flat: (B, n_in, Cin) bf16 flattened padded image (with slack rows)."""
    B, n_in, cin = x_flat.shape
    m2 = out_rows * wp
    m1 = m2 + 2 * wp + 2
    assert n_in >= m1 + 2 * wp + 2, "flattened input needs tap slack rows"
    cout = w2.shape[-1]
    kernel = functools.partial(_double_conv_kernel, wp=wp)
    return pl.pallas_call(
        kernel,
        out_shape=jax.ShapeDtypeStruct((B, m2, cout), jnp.bfloat16),
        grid=(B,),
        in_specs=[
            pl.BlockSpec((1, n_in, cin), lambda b: (b, 0, 0)),
            pl.BlockSpec(w1.shape, lambda b: (0, 0, 0)),
            pl.BlockSpec(s1.shape, lambda b: (0, 0)),
            pl.BlockSpec(w2.shape, lambda b: (0, 0, 0)),
            pl.BlockSpec(s2.shape, lambda b: (0, 0)),
        ],
        out_specs=pl.BlockSpec((1, m2, cout), lambda b: (b, 0, 0)),
        compiler_params=pltpu.CompilerParams(
            dimension_semantics=("parallel",)),
    )(x_flat, w1, s1, w2, s2)


# ------------------------ host-side weight packing ---------------------------
def pack_params(params, eps=1e-5):
    """Fold eval-mode BN into weights/shifts; reshape weights tap-major (once).

    No spatial-size dependence any more (weights are the true 3x3xCinxCout).
    """
    f32 = lambda a: np.asarray(a, np.float32)
    w1, w2, b2 = f32(params["w1"]), f32(params["w2"]), f32(params["b2"])
    g1, be1 = f32(params["bn1_gamma"]), f32(params["bn1_beta"])
    mu1, v1 = f32(params["bn1_mean"]), f32(params["bn1_var"])
    g2, be2 = f32(params["bn2_gamma"]), f32(params["bn2_beta"])
    mu2, v2 = f32(params["bn2_mean"]), f32(params["bn2_var"])

    scale1 = g1 / np.sqrt(v1 + eps)
    shift1 = (be1 - mu1 * scale1).astype(np.float32)          # conv1: no bias
    scale2 = g2 / np.sqrt(v2 + eps)
    shift2 = ((b2 - mu2) * scale2 + be2).astype(np.float32)   # conv2: bias+BN

    w1s = (w1 * scale1[None, None, None, :]).astype(np.float32)  # (3,3,Cin,Cmid)
    w2s = (w2 * scale2[None, None, None, :]).astype(np.float32)  # (3,3,Cmid,Cout)

    w1_bf = jnp.asarray(w1s, jnp.bfloat16)
    w2_bf = jnp.asarray(w2s, jnp.bfloat16)
    k1 = 3 * 3
    return {
        # kernel-side packed params (tap-major)
        "w1": w1_bf.reshape(k1, w1s.shape[2], w1s.shape[3]),
        "s1": jnp.asarray(shift1)[None, :],
        "w2": w2_bf.reshape(k1, w2s.shape[2], w2s.shape[3]),
        "s2": jnp.asarray(shift2)[None, :],
        # HWIO weights for the pure-JAX reference (identical bf16 values)
        "w1_hwio": w1_bf,
        "w2_hwio": w2_bf,
    }


# ------------------------------ JAX glue ------------------------------------
def _bilinear_matrix_np(n_in: int, n_out: int) -> np.ndarray:
    """Host-built interpolation matrix (align_corners=True)."""
    if n_out == 1:
        src = np.zeros((1,), np.float32)
    else:
        src = np.arange(n_out, dtype=np.float32) * (n_in - 1) / (n_out - 1)
    i0 = np.clip(np.floor(src).astype(np.int32), 0, n_in - 1)
    i1 = np.minimum(i0 + 1, n_in - 1)
    frac = (src - i0).astype(np.float32)
    a = np.zeros((n_out, n_in), np.float32)
    a[np.arange(n_out), i0] += 1.0 - frac
    a[np.arange(n_out), i1] += frac
    return a


def _upsample_concat(x1_nchw, x2_nchw):
    """NCHW->NHWC bf16, 2x bilinear upsample of x1 (align_corners), pad to x2,
    concat along channels.  All glue runs in bf16 to cut HBM traffic."""
    x1 = jnp.transpose(x1_nchw, (0, 2, 3, 1)).astype(jnp.bfloat16)
    x2 = jnp.transpose(x2_nchw, (0, 2, 3, 1)).astype(jnp.bfloat16)
    _, H, W, _ = x1.shape
    Ah = jnp.asarray(_bilinear_matrix_np(H, 2 * H), jnp.bfloat16)
    Aw = jnp.asarray(_bilinear_matrix_np(W, 2 * W), jnp.bfloat16)
    x1 = jnp.einsum("oh,bhwc->bowc", Ah, x1,
                    preferred_element_type=jnp.float32).astype(jnp.bfloat16)
    x1 = jnp.einsum("pw,bowc->bopc", Aw, x1,
                    preferred_element_type=jnp.float32).astype(jnp.bfloat16)
    dy = x2.shape[1] - x1.shape[1]
    dx = x2.shape[2] - x1.shape[2]
    if dy or dx:                                        # static; no-op at 2x
        x1 = jnp.pad(x1, ((0, 0), (dy // 2, dy - dy // 2),
                          (dx // 2, dx - dx // 2), (0, 0)))
    return jnp.concatenate([x2, x1], axis=-1)           # (B, H2, W2, Cin) bf16


def up_forward(packed, x1_nchw, x2_nchw):
    """Up.forward(x1, x2) -> NCHW bf16 output (Pallas path)."""
    x = _upsample_concat(x1_nchw, x2_nchw)
    B, H2, W2, Cin = x.shape
    Wp = W2 + 4
    # Single pad: conv1 padding=2 on every side, plus one extra bottom slack
    # row so the flattened-tap slices never read past the buffer.
    x = jnp.pad(x, ((0, 0), (2, 3), (2, 2), (0, 0)))     # (B, H2+5, Wp, Cin)
    x_flat = x.reshape(B, (H2 + 5) * Wp, Cin)            # channels on lanes

    out_flat = fused_double_conv(x_flat, packed["w1"], packed["s1"],
                                 packed["w2"], packed["s2"],
                                 wp=Wp, out_rows=H2)      # (B, H2*Wp, Cout)

    Cout = packed["w2"].shape[-1]
    out = out_flat.reshape(B, H2, Wp, Cout)[:, :, :W2, :]   # drop junk cols
    # TODO(synk): drop this NCHW transpose if the downstream consumer is NHWC.
    return jnp.transpose(out, (0, 3, 1, 2))               # (B, Cout, H2, W2)


# --------------------------- pure-JAX reference -----------------------------
def up_forward_ref(packed, x1_nchw, x2_nchw):
    x = _upsample_concat(x1_nchw, x2_nchw)                 # bf16 NHWC
    x = jnp.pad(x, ((0, 0), (2, 2), (2, 2), (0, 0)))        # conv1 padding=2
    h = lax.conv_general_dilated(
        x, packed["w1_hwio"], (1, 1), "VALID",
        dimension_numbers=("NHWC", "HWIO", "NHWC"),
        preferred_element_type=jnp.float32)
    h = jnp.maximum(h + packed["s1"], 0.0).astype(jnp.bfloat16)
    y = lax.conv_general_dilated(
        h, packed["w2_hwio"], (1, 1), "VALID",
        dimension_numbers=("NHWC", "HWIO", "NHWC"),
        preferred_element_type=jnp.float32)
    y = jnp.maximum(y + packed["s2"], 0.0)
    return jnp.transpose(y, (0, 3, 1, 2)).astype(jnp.bfloat16)


# --------------------------------- main --------------------------------------
if __name__ == "__main__":
    key = jax.random.PRNGKey(0)
    B = 2
    C1 = 4               # channels of x1 (feature being upsampled)
    C2 = 4               # channels of x2 (skip connection)
    H1, W1 = 8, 8        # x1 spatial; x2 spatial = 2x
    in_channels = C1 + C2            # channel dim seen by DoubleConv
    mid_channels = in_channels // 2  # bilinear=True branch
    out_channels = 4

    keys = jax.random.split(key, 12)
    x1 = jax.random.normal(keys[0], (B, C1, H1, W1), jnp.float32)
    x2 = jax.random.normal(keys[1], (B, C2, 2 * H1, 2 * W1), jnp.float32)

    # Deterministic synthetic parameters (HWIO weight layout for NHWC conv).
    params = {
        "w1": 0.1 * jax.random.normal(keys[2], (3, 3, in_channels, mid_channels), jnp.float32),
        "bn1_gamma": 0.5 + jax.random.uniform(keys[3], (mid_channels,), jnp.float32),
        "bn1_beta": 0.1 * jax.random.normal(keys[4], (mid_channels,), jnp.float32),
        "bn1_mean": 0.1 * jax.random.normal(keys[5], (mid_channels,), jnp.float32),
        "bn1_var": 0.5 + jax.random.uniform(keys[6], (mid_channels,), jnp.float32),
        "w2": 0.1 * jax.random.normal(keys[7], (3, 3, mid_channels, out_channels), jnp.float32),
        "b2": 0.1 * jax.random.normal(keys[8], (out_channels,), jnp.float32),
        "bn2_gamma": 0.5 + jax.random.uniform(keys[9], (out_channels,), jnp.float32),
        "bn2_beta": 0.1 * jax.random.normal(keys[10], (out_channels,), jnp.float32),
        "bn2_mean": jnp.zeros((out_channels,), jnp.float32),
        "bn2_var": jnp.ones((out_channels,), jnp.float32),
    }

    # One-time host-side packing: BN fold, bf16 cast, tap-major reshape.
    packed = pack_params(params)

    fwd = jax.jit(functools.partial(up_forward, packed))
    out = jax.block_until_ready(fwd(x1, x2))

    ref = jax.block_until_ready(
        jax.jit(functools.partial(up_forward_ref, packed))(x1, x2))

    assert out.shape == (B, out_channels, 2 * H1, 2 * W1), out.shape
    # Both paths: bf16 inputs/weights, f32 accumulation, bf16 mid activation
    # and bf16 output; only summation order differs, plus at most one bf16 ulp
    # from the final quantisation -> 1e-2 tolerance is comfortable.
    np.testing.assert_allclose(np.asarray(out, np.float32),
                               np.asarray(ref, np.float32),
                               rtol=1e-2, atol=1e-2)
    print("KERNEL_OK")
</pallas_src>

<mosaic_0001>
module attributes {stable_mosaic.version = 11 : i64} {
  func.func @_double_conv_kernel(%arg0: i32, %arg1: memref<1x420x8xbf16, #tpu.memory_space<vmem>>, %arg2: memref<9x8x4xbf16, #tpu.memory_space<vmem>>, %arg3: memref<1x4xf32, #tpu.memory_space<vmem>>, %arg4: memref<9x4x4xbf16, #tpu.memory_space<vmem>>, %arg5: memref<1x4xf32, #tpu.memory_space<vmem>>, %arg6: memref<1x320x4xbf16, #tpu.memory_space<vmem>>) attributes {dimension_semantics = [#tpu.dimension_semantics<parallel>], iteration_bounds = array<i64: 2>, scalar_prefetch = 0 : i64, scratch_operands = 0 : i64, tpu.core_type = #tpu.core_type<tc>, window_params = [{transform_indices = @transform_0, window_bounds = array<i64: 1, 420, 8>}, {pipeline_mode = #tpu.pipeline_mode<synchronous>, transform_indices = @transform_1, window_bounds = array<i64: 9, 8, 4>}, {pipeline_mode = #tpu.pipeline_mode<synchronous>, transform_indices = @transform_2, window_bounds = array<i64: 1, 4>}, {pipeline_mode = #tpu.pipeline_mode<synchronous>, transform_indices = @transform_3, window_bounds = array<i64: 9, 4, 4>}, {pipeline_mode = #tpu.pipeline_mode<synchronous>, transform_indices = @transform_4, window_bounds = array<i64: 1, 4>}, {transform_indices = @transform_5, window_bounds = array<i64: 1, 320, 4>}]} {
    %c0 = arith.constant 0 : index
    %c0_0 = arith.constant 0 : index
    %c0_1 = arith.constant 0 : index
    %0 = vector.load %arg1[%c0, %c0_0, %c0_1] : memref<1x420x8xbf16, #tpu.memory_space<vmem>>, vector<1x420x8xbf16>
    %1 = vector.shape_cast %0 : vector<1x420x8xbf16> to vector<420x8xbf16>
    %2 = vector.extract_strided_slice %1 {offsets = [0, 0], sizes = [362, 8], strides = [1, 1]} : vector<420x8xbf16> to vector<362x8xbf16>
    %c0_2 = arith.constant 0 : index
    %c0_3 = arith.constant 0 : index
    %c0_4 = arith.constant 0 : index
    %3 = vector.load %arg2[%c0_2, %c0_3, %c0_4] : memref<9x8x4xbf16, #tpu.memory_space<vmem>>, vector<1x8x4xbf16>
    %4 = vector.shape_cast %3 : vector<1x8x4xbf16> to vector<8x4xbf16>
    %cst = arith.constant dense<0.000000e+00> : vector<362x4xf32>
    %5 = tpu.matmul %2, %4, %cst {dimension_numbers = #tpu.dot_dimension_numbers<[1], [0], [0], [1], [0, 0, 1, 1], [], []>} : vector<362x8xbf16>, vector<8x4xbf16>, vector<362x4xf32> -> vector<362x4xf32>
    %6 = vector.extract_strided_slice %1 {offsets = [1, 0], sizes = [362, 8], strides = [1, 1]} : vector<420x8xbf16> to vector<362x8xbf16>
    %c1 = arith.constant 1 : index
    %c0_5 = arith.constant 0 : index
    %c0_6 = arith.constant 0 : index
    %7 = vector.load %arg2[%c1, %c0_5, %c0_6] : memref<9x8x4xbf16, #tpu.memory_space<vmem>>, vector<1x8x4xbf16>
    %8 = vector.shape_cast %7 : vector<1x8x4xbf16> to vector<8x4xbf16>
    %cst_7 = arith.constant dense<0.000000e+00> : vector<362x4xf32>
    %9 = tpu.matmul %6, %8, %cst_7 {dimension_numbers = #tpu.dot_dimension_numbers<[1], [0], [0], [1], [0, 0, 1, 1], [], []>} : vector<362x8xbf16>, vector<8x4xbf16>, vector<362x4xf32> -> vector<362x4xf32>
    %10 = arith.addf %5, %9 : vector<362x4xf32>
    %11 = vector.extract_strided_slice %1 {offsets = [2, 0], sizes = [362, 8], strides = [1, 1]} : vector<420x8xbf16> to vector<362x8xbf16>
    %c2 = arith.constant 2 : index
    %c0_8 = arith.constant 0 : index
    %c0_9 = arith.constant 0 : index
    %12 = vector.load %arg2[%c2, %c0_8, %c0_9] : memref<9x8x4xbf16, #tpu.memory_space<vmem>>, vector<1x8x4xbf16>
    %13 = vector.shape_cast %12 : vector<1x8x4xbf16> to vector<8x4xbf16>
    %cst_10 = arith.constant dense<0.000000e+00> : vector<362x4xf32>
    %14 = tpu.matmul %11, %13, %cst_10 {dimension_numbers = #tpu.dot_dimension_numbers<[1], [0], [0], [1], [0, 0, 1, 1], [], []>} : vector<362x8xbf16>, vector<8x4xbf16>, vector<362x4xf32> -> vector<362x4xf32>
    %15 = arith.addf %10, %14 : vector<362x4xf32>
    %16 = vector.extract_strided_slice %1 {offsets = [20, 0], sizes = [362, 8], strides = [1, 1]} : vector<420x8xbf16> to vector<362x8xbf16>
    %c3 = arith.constant 3 : index
    %c0_11 = arith.constant 0 : index
    %c0_12 = arith.constant 0 : index
    %17 = vector.load %arg2[%c3, %c0_11, %c0_12] : memref<9x8x4xbf16, #tpu.memory_space<vmem>>, vector<1x8x4xbf16>
    %18 = vector.shape_cast %17 : vector<1x8x4xbf16> to vector<8x4xbf16>
    %cst_13 = arith.constant dense<0.000000e+00> : vector<362x4xf32>
    %19 = tpu.matmul %16, %18, %cst_13 {dimension_numbers = #tpu.dot_dimension_numbers<[1], [0], [0], [1], [0, 0, 1, 1], [], []>} : vector<362x8xbf16>, vector<8x4xbf16>, vector<362x4xf32> -> vector<362x4xf32>
    %20 = arith.addf %15, %19 : vector<362x4xf32>
    %21 = vector.extract_strided_slice %1 {offsets = [21, 0], sizes = [362, 8], strides = [1, 1]} : vector<420x8xbf16> to vector<362x8xbf16>
    %c4 = arith.constant 4 : index
    %c0_14 = arith.constant 0 : index
    %c0_15 = arith.constant 0 : index
    %22 = vector.load %arg2[%c4, %c0_14, %c0_15] : memref<9x8x4xbf16, #tpu.memory_space<vmem>>, vector<1x8x4xbf16>
    %23 = vector.shape_cast %22 : vector<1x8x4xbf16> to vector<8x4xbf16>
    %cst_16 = arith.constant dense<0.000000e+00> : vector<362x4xf32>
    %24 = tpu.matmul %21, %23, %cst_16 {dimension_numbers = #tpu.dot_dimension_numbers<[1], [0], [0], [1], [0, 0, 1, 1], [], []>} : vector<362x8xbf16>, vector<8x4xbf16>, vector<362x4xf32> -> vector<362x4xf32>
    %25 = arith.addf %20, %24 : vector<362x4xf32>
    %26 = vector.extract_strided_slice %1 {offsets = [22, 0], sizes = [362, 8], strides = [1, 1]} : vector<420x8xbf16> to vector<362x8xbf16>
    %c5 = arith.constant 5 : index
    %c0_17 = arith.constant 0 : index
    %c0_18 = arith.constant 0 : index
    %27 = vector.load %arg2[%c5, %c0_17, %c0_18] : memref<9x8x4xbf16, #tpu.memory_space<vmem>>, vector<1x8x4xbf16>
    %28 = vector.shape_cast %27 : vector<1x8x4xbf16> to vector<8x4xbf16>
    %cst_19 = arith.constant dense<0.000000e+00> : vector<362x4xf32>
    %29 = tpu.matmul %26, %28, %cst_19 {dimension_numbers = #tpu.dot_dimension_numbers<[1], [0], [0], [1], [0, 0, 1, 1], [], []>} : vector<362x8xbf16>, vector<8x4xbf16>, vector<362x4xf32> -> vector<362x4xf32>
    %30 = arith.addf %25, %29 : vector<362x4xf32>
    %31 = vector.extract_strided_slice %1 {offsets = [40, 0], sizes = [362, 8], strides = [1, 1]} : vector<420x8xbf16> to vector<362x8xbf16>
    %c6 = arith.constant 6 : index
    %c0_20 = arith.constant 0 : index
    %c0_21 = arith.constant 0 : index
    %32 = vector.load %arg2[%c6, %c0_20, %c0_21] : memref<9x8x4xbf16, #tpu.memory_space<vmem>>, vector<1x8x4xbf16>
    %33 = vector.shape_cast %32 : vector<1x8x4xbf16> to vector<8x4xbf16>
    %cst_22 = arith.constant dense<0.000000e+00> : vector<362x4xf32>
    %34 = tpu.matmul %31, %33, %cst_22 {dimension_numbers = #tpu.dot_dimension_numbers<[1], [0], [0], [1], [0, 0, 1, 1], [], []>} : vector<362x8xbf16>, vector<8x4xbf16>, vector<362x4xf32> -> vector<362x4xf32>
    %35 = arith.addf %30, %34 : vector<362x4xf32>
    %36 = vector.extract_strided_slice %1 {offsets = [41, 0], sizes = [362, 8], strides = [1, 1]} : vector<420x8xbf16> to vector<362x8xbf16>
    %c7 = arith.constant 7 : index
    %c0_23 = arith.constant 0 : index
    %c0_24 = arith.constant 0 : index
    %37 = vector.load %arg2[%c7, %c0_23, %c0_24] : memref<9x8x4xbf16, #tpu.memory_space<vmem>>, vector<1x8x4xbf16>
    %38 = vector.shape_cast %37 : vector<1x8x4xbf16> to vector<8x4xbf16>
    %cst_25 = arith.constant dense<0.000000e+00> : vector<362x4xf32>
    %39 = tpu.matmul %36, %38, %cst_25 {dimension_numbers = #tpu.dot_dimension_numbers<[1], [0], [0], [1], [0, 0, 1, 1], [], []>} : vector<362x8xbf16>, vector<8x4xbf16>, vector<362x4xf32> -> vector<362x4xf32>
    %40 = arith.addf %35, %39 : vector<362x4xf32>
    %41 = vector.extract_strided_slice %1 {offsets = [42, 0], sizes = [362, 8], strides = [1, 1]} : vector<420x8xbf16> to vector<362x8xbf16>
    %c8 = arith.constant 8 : index
    %c0_26 = arith.constant 0 : index
    %c0_27 = arith.constant 0 : index
    %42 = vector.load %arg2[%c8, %c0_26, %c0_27] : memref<9x8x4xbf16, #tpu.memory_space<vmem>>, vector<1x8x4xbf16>
    %43 = vector.shape_cast %42 : vector<1x8x4xbf16> to vector<8x4xbf16>
    %cst_28 = arith.constant dense<0.000000e+00> : vector<362x4xf32>
    %44 = tpu.matmul %41, %43, %cst_28 {dimension_numbers = #tpu.dot_dimension_numbers<[1], [0], [0], [1], [0, 0, 1, 1], [], []>} : vector<362x8xbf16>, vector<8x4xbf16>, vector<362x4xf32> -> vector<362x4xf32>
    %45 = arith.addf %40, %44 : vector<362x4xf32>
    %c0_29 = arith.constant 0 : index
    %c0_30 = arith.constant 0 : index
    %46 = vector.load %arg3[%c0_29, %c0_30] : memref<1x4xf32, #tpu.memory_space<vmem>>, vector<1x4xf32>
    %47 = vector.broadcast %46 : vector<1x4xf32> to vector<362x4xf32>
    %48 = arith.addf %45, %47 : vector<362x4xf32>
    %cst_31 = arith.constant 0.000000e+00 : f32
    %49 = vector.broadcast %cst_31 : f32 to vector<362x4xf32>
    %50 = arith.maximumf %48, %49 : vector<362x4xf32>
    %51 = arith.truncf %50 : vector<362x4xf32> to vector<362x4xbf16>
    %52 = vector.extract_strided_slice %51 {offsets = [0, 0], sizes = [320, 4], strides = [1, 1]} : vector<362x4xbf16> to vector<320x4xbf16>
    %c0_32 = arith.constant 0 : index
    %c0_33 = arith.constant 0 : index
    %c0_34 = arith.constant 0 : index
    %53 = vector.load %arg4[%c0_32, %c0_33, %c0_34] : memref<9x4x4xbf16, #tpu.memory_space<vmem>>, vector<1x4x4xbf16>
    %54 = vector.shape_cast %53 : vector<1x4x4xbf16> to vector<4x4xbf16>
    %cst_35 = arith.constant dense<0.000000e+00> : vector<320x4xf32>
    %55 = tpu.matmul %52, %54, %cst_35 {dimension_numbers = #tpu.dot_dimension_numbers<[1], [0], [0], [1], [0, 0, 1, 1], [], []>} : vector<320x4xbf16>, vector<4x4xbf16>, vector<320x4xf32> -> vector<320x4xf32>
    %56 = vector.extract_strided_slice %51 {offsets = [1, 0], sizes = [320, 4], strides = [1, 1]} : vector<362x4xbf16> to vector<320x4xbf16>
    %c1_36 = arith.constant 1 : index
    %c0_37 = arith.constant 0 : index
    %c0_38 = arith.constant 0 : index
    %57 = vector.load %arg4[%c1_36, %c0_37, %c0_38] : memref<9x4x4xbf16, #tpu.memory_space<vmem>>, vector<1x4x4xbf16>
    %58 = vector.shape_cast %57 : vector<1x4x4xbf16> to vector<4x4xbf16>
    %cst_39 = arith.constant dense<0.000000e+00> : vector<320x4xf32>
    %59 = tpu.matmul %56, %58, %cst_39 {dimension_numbers = #tpu.dot_dimension_numbers<[1], [0], [0], [1], [0, 0, 1, 1], [], []>} : vector<320x4xbf16>, vector<4x4xbf16>, vector<320x4xf32> -> vector<320x4xf32>
    %60 = arith.addf %55, %59 : vector<320x4xf32>
    %61 = vector.extract_strided_slice %51 {offsets = [2, 0], sizes = [320, 4], strides = [1, 1]} : vector<362x4xbf16> to vector<320x4xbf16>
    %c2_40 = arith.constant 2 : index
    %c0_41 = arith.constant 0 : index
    %c0_42 = arith.constant 0 : index
    %62 = vector.load %arg4[%c2_40, %c0_41, %c0_42] : memref<9x4x4xbf16, #tpu.memory_space<vmem>>, vector<1x4x4xbf16>
    %63 = vector.shape_cast %62 : vector<1x4x4xbf16> to vector<4x4xbf16>
    %cst_43 = arith.constant dense<0.000000e+00> : vector<320x4xf32>
    %64 = tpu.matmul %61, %63, %cst_43 {dimension_numbers = #tpu.dot_dimension_numbers<[1], [0], [0], [1], [0, 0, 1, 1], [], []>} : vector<320x4xbf16>, vector<4x4xbf16>, vector<320x4xf32> -> vector<320x4xf32>
    %65 = arith.addf %60, %64 : vector<320x4xf32>
    %66 = vector.extract_strided_slice %51 {offsets = [20, 0], sizes = [320, 4], strides = [1, 1]} : vector<362x4xbf16> to vector<320x4xbf16>
    %c3_44 = arith.constant 3 : index
    %c0_45 = arith.constant 0 : index
    %c0_46 = arith.constant 0 : index
    %67 = vector.load %arg4[%c3_44, %c0_45, %c0_46] : memref<9x4x4xbf16, #tpu.memory_space<vmem>>, vector<1x4x4xbf16>
    %68 = vector.shape_cast %67 : vector<1x4x4xbf16> to vector<4x4xbf16>
    %cst_47 = arith.constant dense<0.000000e+00> : vector<320x4xf32>
    %69 = tpu.matmul %66, %68, %cst_47 {dimension_numbers = #tpu.dot_dimension_numbers<[1], [0], [0], [1], [0, 0, 1, 1], [], []>} : vector<320x4xbf16>, vector<4x4xbf16>, vector<320x4xf32> -> vector<320x4xf32>
    %70 = arith.addf %65, %69 : vector<320x4xf32>
    %71 = vector.extract_strided_slice %51 {offsets = [21, 0], sizes = [320, 4], strides = [1, 1]} : vector<362x4xbf16> to vector<320x4xbf16>
    %c4_48 = arith.constant 4 : index
    %c0_49 = arith.constant 0 : index
    %c0_50 = arith.constant 0 : index
    %72 = vector.load %arg4[%c4_48, %c0_49, %c0_50] : memref<9x4x4xbf16, #tpu.memory_space<vmem>>, vector<1x4x4xbf16>
    %73 = vector.shape_cast %72 : vector<1x4x4xbf16> to vector<4x4xbf16>
    %cst_51 = arith.constant dense<0.000000e+00> : vector<320x4xf32>
    %74 = tpu.matmul %71, %73, %cst_51 {dimension_numbers = #tpu.dot_dimension_numbers<[1], [0], [0], [1], [0, 0, 1, 1], [], []>} : vector<320x4xbf16>, vector<4x4xbf16>, vector<320x4xf32> -> vector<320x4xf32>
    %75 = arith.addf %70, %74 : vector<320x4xf32>
    %76 = vector.extract_strided_slice %51 {offsets = [22, 0], sizes = [320, 4], strides = [1, 1]} : vector<362x4xbf16> to vector<320x4xbf16>
    %c5_52 = arith.constant 5 : index
    %c0_53 = arith.constant 0 : index
    %c0_54 = arith.constant 0 : index
    %77 = vector.load %arg4[%c5_52, %c0_53, %c0_54] : memref<9x4x4xbf16, #tpu.memory_space<vmem>>, vector<1x4x4xbf16>
    %78 = vector.shape_cast %77 : vector<1x4x4xbf16> to vector<4x4xbf16>
    %cst_55 = arith.constant dense<0.000000e+00> : vector<320x4xf32>
    %79 = tpu.matmul %76, %78, %cst_55 {dimension_numbers = #tpu.dot_dimension_numbers<[1], [0], [0], [1], [0, 0, 1, 1], [], []>} : vector<320x4xbf16>, vector<4x4xbf16>, vector<320x4xf32> -> vector<320x4xf32>
    %80 = arith.addf %75, %79 : vector<320x4xf32>
    %81 = vector.extract_strided_slice %51 {offsets = [40, 0], sizes = [320, 4], strides = [1, 1]} : vector<362x4xbf16> to vector<320x4xbf16>
    %c6_56 = arith.constant 6 : index
    %c0_57 = arith.constant 0 : index
    %c0_58 = arith.constant 0 : index
    %82 = vector.load %arg4[%c6_56, %c0_57, %c0_58] : memref<9x4x4xbf16, #tpu.memory_space<vmem>>, vector<1x4x4xbf16>
    %83 = vector.shape_cast %82 : vector<1x4x4xbf16> to vector<4x4xbf16>
    %cst_59 = arith.constant dense<0.000000e+00> : vector<320x4xf32>
    %84 = tpu.matmul %81, %83, %cst_59 {dimension_numbers = #tpu.dot_dimension_numbers<[1], [0], [0], [1], [0, 0, 1, 1], [], []>} : vector<320x4xbf16>, vector<4x4xbf16>, vector<320x4xf32> -> vector<320x4xf32>
    %85 = arith.addf %80, %84 : vector<320x4xf32>
    %86 = vector.extract_strided_slice %51 {offsets = [41, 0], sizes = [320, 4], strides = [1, 1]} : vector<362x4xbf16> to vector<320x4xbf16>
    %c7_60 = arith.constant 7 : index
    %c0_61 = arith.constant 0 : index
    %c0_62 = arith.constant 0 : index
    %87 = vector.load %arg4[%c7_60, %c0_61, %c0_62] : memref<9x4x4xbf16, #tpu.memory_space<vmem>>, vector<1x4x4xbf16>
    %88 = vector.shape_cast %87 : vector<1x4x4xbf16> to vector<4x4xbf16>
    %cst_63 = arith.constant dense<0.000000e+00> : vector<320x4xf32>
    %89 = tpu.matmul %86, %88, %cst_63 {dimension_numbers = #tpu.dot_dimension_numbers<[1], [0], [0], [1], [0, 0, 1, 1], [], []>} : vector<320x4xbf16>, vector<4x4xbf16>, vector<320x4xf32> -> vector<320x4xf32>
    %90 = arith.addf %85, %89 : vector<320x4xf32>
    %91 = vector.extract_strided_slice %51 {offsets = [42, 0], sizes = [320, 4], strides = [1, 1]} : vector<362x4xbf16> to vector<320x4xbf16>
    %c8_64 = arith.constant 8 : index
    %c0_65 = arith.constant 0 : index
    %c0_66 = arith.constant 0 : index
    %92 = vector.load %arg4[%c8_64, %c0_65, %c0_66] : memref<9x4x4xbf16, #tpu.memory_space<vmem>>, vector<1x4x4xbf16>
    %93 = vector.shape_cast %92 : vector<1x4x4xbf16> to vector<4x4xbf16>
    %cst_67 = arith.constant dense<0.000000e+00> : vector<320x4xf32>
    %94 = tpu.matmul %91, %93, %cst_67 {dimension_numbers = #tpu.dot_dimension_numbers<[1], [0], [0], [1], [0, 0, 1, 1], [], []>} : vector<320x4xbf16>, vector<4x4xbf16>, vector<320x4xf32> -> vector<320x4xf32>
    %95 = arith.addf %90, %94 : vector<320x4xf32>
    %c0_68 = arith.constant 0 : index
    %c0_69 = arith.constant 0 : index
    %96 = vector.load %arg5[%c0_68, %c0_69] : memref<1x4xf32, #tpu.memory_space<vmem>>, vector<1x4xf32>
    %97 = vector.broadcast %96 : vector<1x4xf32> to vector<320x4xf32>
    %98 = arith.addf %95, %97 : vector<320x4xf32>
    %cst_70 = arith.constant 0.000000e+00 : f32
    %99 = vector.broadcast %cst_70 : f32 to vector<320x4xf32>
    %100 = arith.maximumf %98, %99 : vector<320x4xf32>
    %101 = vector.shape_cast %100 : vector<320x4xf32> to vector<1x320x4xf32>
    %102 = arith.truncf %101 : vector<1x320x4xf32> to vector<1x320x4xbf16>
    %c0_71 = arith.constant 0 : index
    %c0_72 = arith.constant 0 : index
    %c0_73 = arith.constant 0 : index
    %103 = vector.load %arg6[%c0_71, %c0_72, %c0_73] : memref<1x320x4xbf16, #tpu.memory_space<vmem>>, vector<1x320x4xbf16>
    tpu.vector_store %arg6[%c0_71, %c0_72, %c0_73], %102 {strides = array<i32>} : memref<1x320x4xbf16, #tpu.memory_space<vmem>>, vector<1x320x4xbf16>,
    return
  }
  func.func @transform_0(%arg0: i32) -> (i32, i32, i32) {
    %c0_i32 = arith.constant 0 : i32
    %c0_i32_0 = arith.constant 0 : i32
    %c0_i32_1 = arith.constant 0 : i32
    return %arg0, %c0_i32, %c0_i32_0 : i32, i32, i32
  }
  func.func @transform_1(%arg0: i32) -> (i32, i32, i32) {
    %c0_i32 = arith.constant 0 : i32
    %c0_i32_0 = arith.constant 0 : i32
    %c0_i32_1 = arith.constant 0 : i32
    %c0_i32_2 = arith.constant 0 : i32
    return %c0_i32, %c0_i32_0, %c0_i32_1 : i32, i32, i32
  }
  func.func @transform_2(%arg0: i32) -> (i32, i32) {
    %c0_i32 = arith.constant 0 : i32
    %c0_i32_0 = arith.constant 0 : i32
    %c0_i32_1 = arith.constant 0 : i32
    return %c0_i32, %c0_i32_0 : i32, i32
  }
  func.func @transform_3(%arg0: i32) -> (i32, i32, i32) {
    %c0_i32 = arith.constant 0 : i32
    %c0_i32_0 = arith.constant 0 : i32
    %c0_i32_1 = arith.constant 0 : i32
    %c0_i32_2 = arith.constant 0 : i32
    return %c0_i32, %c0_i32_0, %c0_i32_1 : i32, i32, i32
  }
  func.func @transform_4(%arg0: i32) -> (i32, i32) {
    %c0_i32 = arith.constant 0 : i32
    %c0_i32_0 = arith.constant 0 : i32
    %c0_i32_1 = arith.constant 0 : i32
    return %c0_i32, %c0_i32_0 : i32, i32
  }
  func.func @transform_5(%arg0: i32) -> (i32, i32, i32) {
    %c0_i32 = arith.constant 0 : i32
    %c0_i32_0 = arith.constant 0 : i32
    %c0_i32_1 = arith.constant 0 : i32
    return %arg0, %c0_i32, %c0_i32_0 : i32, i32, i32
  }
}

</mosaic_0001>

<bundles_post_ra>
// kernel: up_forward.1
= control target key start
LH: loop header
LB: loop body
LE: loop exit
PB: predicated region body
PF: predicated region fallthrough
CT: control target
= control target key end

     0   :  { %s9915_s18 = smov 0   ;;  %s14387_s0 = inlined_call_operand.vmem [shape: bf16[2,420,8], index: 0, kind: input, shape index: {}]   ;;  %s14388_s1 = inlined_call_operand.vmem [shape: bf16[9,8,4], index: 1, kind: input, shape index: {}]   ;;  %s14389_s2 = inlined_call_operand.vmem [shape: f32[1,4], index: 2, kind: input, shape index: {}]   ;;  %s14390_s3 = inlined_call_operand.vmem [shape: bf16[9,4,4], index: 3, kind: input, shape index: {}]   ;;  %s14391_s4 = inlined_call_operand.vmem [shape: f32[1,4], index: 4, kind: input, shape index: {}]   ;;  %s14392_s5 = inlined_call_operand.vmem [shape: bf16[2,320,4], index: 5, kind: output, shape index: {}]  }
   0x1 LB: > { %s7590_s19 = sadd.s32 4294967295, %s9881_s18   ;;  %p7594_p0 = scmp.ge.s32.totalorder %s9881_s18, 1  ;;  %s9881_s18 = sphi %s9915_s18, %s15_s18  }
   0x2   : > { %p187_p1 = scmp.lt.s32.totalorder %s9881_s18, 3 }
   0x4   : > { %p188_p2 = pnand %p7594_p0, %p187_p1 }
   0x6   : > { %191 = sbr.rel (%p188_p2) target bundleno = 1763 (0x6e3), region = 40 }
   0xb   : > { %v7597_v0 = vld [vmem:[%s14388_s1 + $0x4] sm:$0xf]  ;;  %vm649_vm0 = vcmask 1043456   ;;  %p215_p3 = scmp.lt.s32.totalorder %s7590_s19, 1  ;;  %v14432_v1 = vmov 0.0   ;;  %vm9884_vm1 = vmmov 0  }
   0xc   : > { %8536 = vmatprep.subr.bf16.mxu0 %v14432_v1  ;;  %v651_v2 = vsel %vm649_vm0, %v7597_v0, 0  ;;  %8538 = vmatprep.mubr.msk.bf16.mxu0 %vm9884_vm1, %v14432_v1  ;;  %v277_v3 = vld [vmem:[%s14388_s1] sm:$0xf]  ;;  %vm579_vm2 = vcmask 64512   ;;  %vm395_vm3 = vsmask.f32 7424 }
   0xd   : > { %8537 = vmatpush3.bf16.msra.mxu0 %v651_v2  ;;  %s15019_s19 = smov (!%p215_p3, %s7590_s19), 1  ;;  %v917_v4 = vsel %vm649_vm0, %v277_v3, 0  ;;  %9760 = vmatprep.subr.bf16.mxu1 %v14432_v1  ;;  %vm1526_vm4 = vcmask 1045504   ;;  %vm1138_vm5 = vcmask 1046528   ;;  %vm1909_vm6 = vsmask.f32 5376 }
   0xe   : > { %8630 = vmatprep.subr.bf16.mxu0 %v14432_v1  ;;  %9761 = vmatpush3.bf16.msra.mxu1 %v917_v4  ;;  %s9771_s24 = smul.u32 212, %s15019_s19  ;;  %vm2343_vm7 = vcmask 1044480   ;;  %vm4319_vm8 = vcmask 1041408   ;;  %vm4258_vm9 = vcmask 31744   ;;  %vm6522_vm10 = vsmask.f32 3328 }
   0xf   : > { %8644 = vmatprep.mubr.msk.bf16.mxu1 %vm9884_vm1, %v14432_v1  ;;  %8818 = vmatprep.subr.bf16.mxu1 %v14432_v1  ;;  %vm6909_vm11 = vcmask 1042432   ;;  %s9772_s20 = smul.u32 160, %s15019_s19  ;;  %vm7494_vm12 = vcmask 27648  }
  0x10   : > { %s9945_s27 = scalar_lea.vmem %s14387_s0, %s9771_s24 }
  0x11   : > { %v9948_v5 = vld [vmem:[%s9945_s27] sm:$0xff]   ;;  %v9951_v6 = vld [vmem:[%s9945_s27 + $0x8] sm:$0xff]   ;;  %v230_v7 = vld [vmem:[%s9945_s27 + $0x10] sm:$0xf]  ;;  %s14180_s19 = scalar_lea.vmem %s14392_s5, %s9772_s20 }
  0x12   : > { %v231_v8 = vld [vmem:[%s9945_s27 + $0x14] sm:$0xf]  ;;  %v232_v9 = vld [vmem:[%s9945_s27 + $0x18] sm:$0xf]  ;;  %v397_v10 = vshrl.u32 %v9948_v5, 16  ;;  %v399_v11 = vshll.u32 %v9948_v5, 16 }
  0x13   : > { %v404_v12 = vshll.u32 %v9951_v6, 16  ;;  %v9959_v13 = vcombine.low %v230_v7, %v231_v8  ;;  %v233_v14 = vld [vmem:[%s9945_s27 + $0x1c] sm:$0xf]  ;;  %v408_v15 = vshrl.u32 %v9951_v6, 16  ;;  %v234_v28 = vld [vmem:[%s9945_s27 + $0x20] sm:$0xf] }
  0x14   : > { %v9963_v16 = vcombine.low %v232_v9, %v233_v14  ;;  %v401_v17 = vrot.slane %v399_v11, 1  ;;  %v235_v29 = vld [vmem:[%s9945_s27 + $0x24] sm:$0xf]  ;;  %v236_v36 = vld [vmem:[%s9945_s27 + $0x28] sm:$0xf] }
  0x15   : > { %v406_v18 = vrot.slane %v404_v12, 1  ;;  %v9965_v19 = vrot.slane %v404_v12, 3  ;;  %v412_v20 = vshll.u32 %v9959_v13, 16  ;;  %v9968_v21 = vrot.slane %v408_v15, 2  ;;  %v237_v37 = vld [vmem:[%s9945_s27 + $0x2c] sm:$0xf] }
  0x16   : > { %v416_v22 = vshrl.u32 %v9959_v13, 16  ;;  %8645 = vmatmul.mubr.msk.bf16.vlgmr.msra.gmra.mxu1 %vm579_vm2, %v9963_v16  ;;  %v402_v23 = vor.u32 %v401_v17, %v397_v10  ;;  %v9985_v33 = vcombine.low %v234_v28, %v235_v29  ;;  %v420_v35 = vshll.u32 %v9963_v16, 16  ;;  %v238_v44 = vld [vmem:[%s9945_s27 + $0x30] sm:$0xf]  ;;  %v239_v45 = vld [vmem:[%s9945_s27 + $0x34] sm:$0xf] }
  0x17   : > { %v1914_v24 = vrot.slane %v412_v20, 3  ;;  %8648 = vmatprep.mubr.msk.bf16.mxu1 %vm9884_vm1, %v14432_v1  ;;  %v1912_v25 = vor.u32 %v9965_v19, %v9968_v21  ;;  %v410_v31 = vor.u32 %v408_v15, %v406_v18  ;;  %v414_v32 = vrot.slane %v412_v20, 1  ;;  %v240_v52 = vld [vmem:[%s9945_s27 + $0x38] sm:$0xf]  ;;  %v241_v53 = vld [vmem:[%s9945_s27 + $0x3c] sm:$0xf] }
  0x18   : > { %v1913_v26 = vrot.slane %v416_v22, 2  ;;  %v407_v27 = vsel %vm395_vm3, %v402_v23, %v406_v18  ;;  %v422_v39 = vrot.slane %v420_v35, 1  ;;  %v10001_v40 = vcombine.low %v236_v36, %v237_v37  ;;  %v242_v60 = vld [vmem:[%s9945_s27 + $0x40] sm:$0xf]  ;;  %v243_v61 = vld [vmem:[%s9945_s27 + $0x44] sm:$0xf] }
  0x19   : > { %8539 = vmatmul.mubr.msk.bf16.vlgmr.msra.gmra.mxu0 %vm579_vm2, %v407_v27  ;;  %v415_v34 = vsel %vm395_vm3, %v410_v31, %v414_v32  ;;  %v418_v38 = vor.u32 %v416_v22, %v414_v32  ;;  %v14431_v42 = vshrl.u32 %v9963_v16, 16  ;;  %v14430_v43 = vshll.u32 %v9985_v33, 16  ;;  %v244_v7 = vld [vmem:[%s9945_s27 + $0x48] sm:$0xf]  ;;  %v245_v8 = vld [vmem:[%s9945_s27 + $0x4c] sm:$0xf] }
  0x1a   : > { %v9981_v30 = vor.u32 %v1914_v24, %v1913_v26  ;;  %8631 = vmatpush3.bf16.msra.mxu0 %v917_v4  ;;  %8542 = vmatprep.mubr.msk.bf16.mxu0 %vm9884_vm1, %v14432_v1  ;;  %v10019_v48 = vcombine.low %v238_v44, %v239_v45  ;;  %v14429_v50 = vshrl.u32 %v9985_v33, 16  ;;  %v14428_v51 = vshll.u32 %v10001_v40, 16  ;;  %v246_v17 = vld [vmem:[%s9945_s27 + $0x50] sm:$0xf]  ;;  %v247_v18 = vld [vmem:[%s9945_s27 + $0x54] sm:$0xf] }
  0x1b   : > { %8724 = vmatprep.subr.bf16.mxu0 %v14432_v1  ;;  %v423_v41 = vsel %vm395_vm3, %v418_v38, %v422_v39  ;;  %v426_v46 = vor.u32 %v14431_v42, %v422_v39  ;;  %v430_v47 = vrot.slane %v14430_v43, 1  ;;  %v10037_v56 = vcombine.low %v240_v52, %v241_v53  ;;  %v248_v28 = vld [vmem:[%s9945_s27 + $0x58] sm:$0xf]  ;;  %v249_v29 = vld [vmem:[%s9945_s27 + $0x5c] sm:$0xf] }
  0x1c   : > { %v438_v55 = vrot.slane %v14428_v51, 1  ;;  %v14427_v58 = vshrl.u32 %v10001_v40, 16  ;;  %v14426_v59 = vshll.u32 %v10019_v48, 16  ;;  %v10055_v0 = vcombine.low %v242_v60, %v243_v61  ;;  %v250_v39 = vld [vmem:[%s9945_s27 + $0x60] sm:$0xf] }
  0x1d   : > { %v431_v49 = vsel %vm395_vm3, %v426_v46, %v430_v47  ;;  %v434_v54 = vor.u32 %v14429_v50, %v430_v47  ;;  %v14425_v3 = vshrl.u32 %v10019_v48, 16  ;;  %v14424_v4 = vshll.u32 %v10037_v56, 16  ;;  %v252_v53 = vld [vmem:[%s9945_s27 + $0x68] sm:$0xf] }
  0x1e   : > { %8649 = vmatmul.mubr.msk.bf16.gmra.mxu1 %vm579_vm2, %v9985_v33  ;;  %v442_v62 = vor.u32 %v14427_v58, %v438_v55  ;;  %v446_v63 = vrot.slane %v14426_v59, 1  ;;  %v10073_v11 = vcombine.low %v244_v7, %v245_v8  ;;  %v14423_v14 = vshrl.u32 %v10037_v56, 16  ;;  %v254_v8 = vld [vmem:[%s9945_s27 + $0x70] sm:$0xf] }
  0x1f   : > { %8652 = vmatprep.mubr.msk.bf16.mxu1 %vm9884_vm1, %v14432_v1  ;;  %v439_v57 = vsel %vm395_vm3, %v434_v54, %v438_v55  ;;  %v454_v10 = vrot.slane %v14424_v4, 1  ;;  %v14422_v15 = vshll.u32 %v10055_v0, 16  ;;  %v10091_v23 = vcombine.low %v246_v17, %v247_v18  ;;  %v253_v54 = vld [vmem:[%s9945_s27 + $0x6c] sm:$0xf] }
  0x20   : > { %v447_v2 = vsel %vm395_vm3, %v442_v62, %v446_v63  ;;  %v450_v9 = vor.u32 %v14425_v3, %v446_v63  ;;  %v14421_v26 = vshrl.u32 %v10055_v0, 16  ;;  %v14420_v27 = vshll.u32 %v10073_v11, 16 }
  0x21   : > { %8543 = vmatmul.mubr.msk.bf16.gmra.mxu0 %vm579_vm2, %v415_v34  ;;  %v458_v20 = vor.u32 %v14423_v14, %v454_v10  ;;  %v462_v22 = vrot.slane %v14422_v15, 1  ;;  %v10109_v34 = vcombine.low %v248_v28, %v249_v29  ;;  %v14419_v37 = vshrl.u32 %v10073_v11, 16  ;;  %v257_v28 = vld [vmem:[%s9945_s27 + $0x7c] sm:$0xf] }
  0x22   : > { %8546 = vmatprep.mubr.msk.bf16.mxu0 %vm9884_vm1, %v14432_v1  ;;  %v455_v12 = vsel %vm395_vm3, %v450_v9, %v454_v10  ;;  %v470_v32 = vrot.slane %v14420_v27, 1  ;;  %v14418_v38 = vshll.u32 %v10091_v23, 16  ;;  %v10145_v60 = vcombine.low %v252_v53, %v253_v54  ;;  %v255_v9 = vld [vmem:[%s9945_s27 + $0x74] sm:$0xf] }
  0x23   : > { %v463_v24 = vsel %vm395_vm3, %v458_v20, %v462_v22  ;;  %v466_v31 = vor.u32 %v14421_v26, %v462_v22  ;;  %v14416_v52 = vshll.u32 %v10109_v34, 16  ;;  %v14415_v62 = vshrl.u32 %v10109_v34, 16 }
  0x24   : > { %v474_v44 = vor.u32 %v14419_v37, %v470_v32  ;;  %v478_v45 = vrot.slane %v14418_v38, 1  ;;  %v10168_v17 = vcombine.low %v254_v8, %v255_v9  ;;  %v14412_v22 = vshll.u32 %v10145_v60, 16 }
  0x25   : > { %v471_v36 = vsel %vm395_vm3, %v466_v31, %v470_v32  ;;  %v1156_v19 = vrot.slane %v10073_v11, 1 }
  0x26   : > { %8653 = vmatmul.mubr.msk.bf16.gmra.mxu1 %vm579_vm2, %v10001_v40  ;;  %v479_v47 = vsel %vm395_vm3, %v474_v44, %v478_v45  ;;  %v502_v31 = vrot.slane %v14412_v22, 1  ;;  %v258_v44 = vld [vmem:[%s9945_s27 + $0x80] sm:$0xf] }
  0x27   : > { %8656 = vmatprep.mubr.msk.bf16.mxu1 %vm9884_vm1, %v14432_v1 }
  0x29   : > { %8547 = vmatmul.mubr.msk.bf16.gmra.mxu0 %vm579_vm2, %v423_v41  ;;  %v251_v41 = vld [vmem:[%s9945_s27 + $0x64] sm:$0xf] }
  0x2a   : > { %8550 = vmatprep.mubr.msk.bf16.mxu0 %vm9884_vm1, %v14432_v1  ;;  %v10127_v46 = vcombine.low %v250_v39, %v251_v41  ;;  %v14411_v39 = vshrl.u32 %v10145_v60, 16  ;;  %v14410_v41 = vshll.u32 %v10168_v17, 16 }
  0x2c   : > { %v14414_v63 = vshll.u32 %v10127_v46, 16  ;;  %v14413_v20 = vshrl.u32 %v10127_v46, 16  ;;  %v510_v53 = vrot.slane %v14410_v41, 1 }
  0x2e   : > { %8657 = vmatmul.mubr.msk.bf16.gmra.mxu1 %vm579_vm2, %v10019_v48 }
  0x2f   : > { %8660 = vmatprep.mubr.msk.bf16.mxu1 %vm9884_vm1, %v14432_v1 }
  0x31   : > { %8551 = vmatmul.mubr.msk.bf16.gmra.mxu0 %vm579_vm2, %v431_v49  ;;  %v14417_v49 = vshrl.u32 %v10091_v23, 16 }
  0x32   : > { %8554 = vmatprep.mubr.msk.bf16.mxu0 %vm9884_vm1, %v14432_v1 }
  0x33   : > { %v482_v55 = vor.u32 %v14417_v49, %v478_v45  ;;  %v259_v45 = vld [vmem:[%s9945_s27 + $0x84] sm:$0xf] }
  0x34   : > { %v10204_v54 = vcombine.low %v258_v44, %v259_v45 }
  0x36   : > { %8661 = vmatmul.mubr.msk.bf16.gmra.mxu1 %vm579_vm2, %v10037_v56 }
  0x37   : > { %8664 = vmatprep.mubr.msk.bf16.mxu1 %vm9884_vm1, %v14432_v1 }
  0x39   : > { %8555 = vmatmul.mubr.msk.bf16.gmra.mxu0 %vm579_vm2, %v439_v57  ;;  %v486_v57 = vrot.slane %v14416_v52, 1 }
  0x3a   : > { %8558 = vmatprep.mubr.msk.bf16.mxu0 %vm9884_vm1, %v14432_v1 }
  0x3b   : > { %v487_v61 = vsel %vm395_vm3, %v482_v55, %v486_v57  ;;  %v490_v10 = vor.u32 %v14415_v62, %v486_v57  ;;  %v14409_v57 = vshrl.u32 %v10168_v17, 16 }
  0x3d   : > { %v514_v8 = vor.u32 %v14409_v57, %v510_v53 }
  0x3e   : > { %8665 = vmatmul.mubr.msk.bf16.gmra.mxu1 %vm579_vm2, %v10055_v0 }
  0x3f   : > { %8668 = vmatprep.mubr.msk.bf16.mxu1 %vm9884_vm1, %v14432_v1 }
  0x41   : > { %8559 = vmatmul.mubr.msk.bf16.gmra.mxu0 %vm579_vm2, %v447_v2  ;;  %v7691_v2 = vld [vmem:[%s14388_s1 + $0xc] sm:$0xf] }
  0x42   : > { %8562 = vmatprep.mubr.msk.bf16.mxu0 %vm9884_vm1, %v14432_v1  ;;  %v1642_v7 = vsel %vm649_vm0, %v7691_v2, 0  ;;  %v260_v2 = vld [vmem:[%s9945_s27 + $0x88] sm:$0xf] }
  0x43   : > { %8819 = vmatpush3.bf16.msra.mxu1 %v1642_v7  ;;  %v261_v7 = vld [vmem:[%s9945_s27 + $0x8c] sm:$0xf] }
  0x44   : > { %9006 = vmatprep.subr.bf16.mxu1 %v14432_v1 }
  0x46   : > { %8669 = vmatmul.mubr.msk.bf16.gmra.mxu1 %vm579_vm2, %v10073_v11 }
  0x47   : > { %8672 = vmatprep.mubr.msk.bf16.mxu1 %vm9884_vm1, %v14432_v1 }
  0x49   : > { %8563 = vmatmul.mubr.msk.bf16.gmra.mxu0 %vm579_vm2, %v455_v12  ;;  %v494_v12 = vrot.slane %v14414_v63, 1 }
  0x4a   : > { %8566 = vmatprep.mubr.msk.bf16.mxu0 %vm9884_vm1, %v14432_v1 }
  0x4b   : > { %v495_v18 = vsel %vm395_vm3, %v490_v10, %v494_v12  ;;  %v498_v29 = vor.u32 %v14413_v20, %v494_v12  ;;  %v10222_v10 = vcombine.low %v260_v2, %v261_v7  ;;  %v265_v2 = vld [vmem:[%s9945_s27 + $0x9c] sm:$0xf] }
  0x4e   : > { %8673 = vmatmul.mubr.msk.bf16.gmra.mxu1 %vm579_vm2, %v10091_v23 }
  0x4f   : > { %8676 = vmatprep.mubr.msk.bf16.mxu1 %vm9884_vm1, %v14432_v1 }
  0x51   : > { %8567 = vmatmul.mubr.msk.bf16.gmra.mxu0 %vm579_vm2, %v463_v24  ;;  %v256_v24 = vld [vmem:[%s9945_s27 + $0x78] sm:$0xf] }
  0x52   : > { %8570 = vmatprep.mubr.msk.bf16.mxu0 %vm9884_vm1, %v14432_v1  ;;  %v10186_v32 = vcombine.low %v256_v24, %v257_v28  ;;  %v14397_v24 = vshll.u32 %v10204_v54, 16  ;;  %v262_v28 = vld [vmem:[%s9945_s27 + $0x90] sm:$0xf] }
  0x56   : > { %8677 = vmatmul.mubr.msk.bf16.gmra.mxu1 %vm579_vm2, %v10109_v34 }
  0x57   : > { %8680 = vmatprep.mubr.msk.bf16.mxu1 %vm9884_vm1, %v14432_v1 }
  0x59   : > { %8571 = vmatmul.mubr.msk.bf16.gmra.mxu0 %vm579_vm2, %v471_v36  ;;  %v503_v36 = vsel %vm395_vm3, %v498_v29, %v502_v31  ;;  %v263_v29 = vld [vmem:[%s9945_s27 + $0x94] sm:$0xf] }
  0x5a   : > { %8574 = vmatprep.mubr.msk.bf16.mxu0 %vm9884_vm1, %v14432_v1  ;;  %v10240_v44 = vcombine.low %v262_v28, %v263_v29  ;;  %v14394_v28 = vshrl.u32 %v10222_v10, 16 }
  0x5c   : > { %v14395_v29 = vshll.u32 %v10240_v44, 16 }
  0x5e   : > { %8681 = vmatmul.mubr.msk.bf16.gmra.mxu1 %vm579_vm2, %v10127_v46 }
  0x5f   : > { %8684 = vmatprep.mubr.msk.bf16.mxu1 %vm9884_vm1, %v14432_v1 }
  0x61   : > { %8575 = vmatmul.mubr.msk.bf16.gmra.mxu0 %vm579_vm2, %v479_v47  ;;  %v506_v47 = vor.u32 %v14411_v39, %v502_v31 }
  0x62   : > { %8578 = vmatprep.mubr.msk.bf16.mxu0 %vm9884_vm1, %v14432_v1 }
  0x63   : > { %v511_v55 = vsel %vm395_vm3, %v506_v47, %v510_v53  ;;  %v14396_v47 = vshrl.u32 %v10204_v54, 16  ;;  %v14393_v53 = vshll.u32 %v10222_v10, 16 }
  0x66   : > { %8685 = vmatmul.mubr.msk.bf16.gmra.mxu1 %vm579_vm2, %v10145_v60 }
  0x67   : > { %8688 = vmatprep.mubr.msk.bf16.mxu1 %vm9884_vm1, %v14432_v1 }
  0x69   : > { %8579 = vmatmul.mubr.msk.bf16.gmra.mxu0 %vm579_vm2, %v487_v61  ;;  %v14403_v61 = vshll.u32 %v10186_v32, 16 }
  0x6a   : > { %8582 = vmatprep.mubr.msk.bf16.mxu0 %vm9884_vm1, %v14432_v1 }
  0x6b   : > { %v518_v9 = vrot.slane %v14403_v61, 1 }
  0x6d   : > { %v519_v12 = vsel %vm395_vm3, %v514_v8, %v518_v9  ;;  %v534_v8 = vrot.slane %v14393_v53, 1  ;;  %v14400_v53 = vshrl.u32 %v10240_v44, 16 }
  0x6e   : > { %8689 = vmatmul.mubr.msk.bf16.gmra.mxu1 %vm579_vm2, %v10168_v17 }
  0x6f   : > { %8692 = vmatprep.mubr.msk.bf16.mxu1 %vm9884_vm1, %v14432_v1 }
  0x71   : > { %8583 = vmatmul.mubr.msk.bf16.gmra.mxu0 %vm579_vm2, %v495_v18  ;;  %v14398_v18 = vshrl.u32 %v10186_v32, 16 }
  0x72   : > { %8586 = vmatprep.mubr.msk.bf16.mxu0 %vm9884_vm1, %v14432_v1 }
  0x73   : > { %v522_v31 = vor.u32 %v14398_v18, %v518_v9  ;;  %v271_v18 = vld [vmem:[%s9945_s27 + $0xb4] sm:$0xf] }
  0x76   : > { %8693 = vmatmul.mubr.msk.bf16.gmra.mxu1 %vm579_vm2, %v10186_v32 }
  0x77   : > { %8696 = vmatprep.mubr.msk.bf16.mxu1 %vm9884_vm1, %v14432_v1 }
  0x79   : > { %8587 = vmatmul.mubr.msk.bf16.gmra.mxu0 %vm579_vm2, %v503_v36  ;;  %v526_v36 = vrot.slane %v14397_v24, 1  ;;  %v270_v24 = vld [vmem:[%s9945_s27 + $0xb0] sm:$0xf] }
  0x7a   : > { %8590 = vmatprep.mubr.msk.bf16.mxu0 %vm9884_vm1, %v14432_v1 }
  0x7b   : > { %v527_v45 = vsel %vm395_vm3, %v522_v31, %v526_v36  ;;  %v530_v7 = vor.u32 %v14396_v47, %v526_v36  ;;  %v266_v31 = vld [vmem:[%s9945_s27 + $0xa0] sm:$0xf]  ;;  %v267_v36 = vld [vmem:[%s9945_s27 + $0xa4] sm:$0xf] }
  0x7e   : > { %8697 = vmatmul.mubr.msk.bf16.gmra.mxu1 %vm579_vm2, %v10204_v54 }
  0x7f   : > { %8700 = vmatprep.mubr.msk.bf16.mxu1 %vm9884_vm1, %v14432_v1 }
  0x81   : > { %8591 = vmatmul.mubr.msk.bf16.gmra.mxu0 %vm579_vm2, %v511_v55  ;;  %v264_v55 = vld [vmem:[%s9945_s27 + $0x98] sm:$0xf] }
  0x82   : > { %8594 = vmatprep.mubr.msk.bf16.mxu0 %vm9884_vm1, %v14432_v1  ;;  %v10258_v9 = vcombine.low %v264_v55, %v265_v2  ;;  %v542_v55 = vrot.slane %v14395_v29, 1  ;;  %v10276_v2 = vcombine.low %v266_v31, %v267_v36 }
  0x84   : > { %14454 = vst [vmem:[#allocation2_spill] sm:$0xff] %v10258_v9  ;;  %v546_v31 = vor.u32 %v14400_v53, %v542_v55  ;;  %v14402_v47 = vshrl.u32 %v10258_v9, 16  ;;  %v1527_v53 = vrot.slane %v9951_v6, 2 }
  0x86   : > { %8701 = vmatmul.mubr.msk.bf16.gmra.mxu1 %vm579_vm2, %v10222_v10 }
  0x87   : > { %8704 = vmatprep.mubr.msk.bf16.mxu1 %vm9884_vm1, %v14432_v1 }
  0x89   : > { %8595 = vmatmul.mubr.msk.bf16.gmra.mxu0 %vm579_vm2, %v519_v12  ;;  %v535_v12 = vsel %vm395_vm3, %v530_v7, %v534_v8 }
  0x8a   : > { %8598 = vmatprep.mubr.msk.bf16.mxu0 %vm9884_vm1, %v14432_v1 }
  0x8e   : > { %8705 = vmatmul.mubr.msk.bf16.gmra.mxu1 %vm579_vm2, %v10240_v44 }
  0x8f   : > { %8708 = vmatprep.mubr.msk.bf16.mxu1 %vm9884_vm1, %v14432_v1 }
  0x91   : > { %8599 = vmatmul.mubr.msk.bf16.gmra.mxu0 %vm579_vm2, %v527_v45  ;;  %v538_v45 = vor.u32 %v14394_v28, %v534_v8  ;;  %v268_v8 = vld [vmem:[%s9945_s27 + $0xa8] sm:$0xf]  ;;  %v269_v28 = vld [vmem:[%s9945_s27 + $0xac] sm:$0xf] }
  0x92   : > { %8602 = vmatprep.mubr.msk.bf16.mxu0 %vm9884_vm1, %v14432_v1 }
  0x93   : > { %v543_v7 = vsel %vm395_vm3, %v538_v45, %v542_v55  ;;  %v10294_v45 = vcombine.low %v268_v8, %v269_v28  ;;  %v10312_v8 = vcombine.low %v270_v24, %v271_v18 }
  0x95   : > { %v14406_v61 = vshll.u32 %v10312_v8, 16 }
  0x96   : > { %8709 = vmatmul.mubr.msk.bf16.gmra.mxu1 %vm579_vm2, %v10258_v9 }
  0x97   : > { %8712 = vmatprep.mubr.msk.bf16.mxu1 %vm9884_vm1, %v14432_v1 }
  0x99   : > { %8603 = vmatmul.mubr.msk.bf16.gmra.mxu0 %vm579_vm2, %v535_v12  ;;  %v14399_v12 = vshll.u32 %v10258_v9, 16 }
  0x9a   : > { %8606 = vmatprep.mubr.msk.bf16.mxu0 %vm9884_vm1, %v14432_v1 }
  0x9b   : > { %v550_v36 = vrot.slane %v14399_v12, 1 }
  0x9d   : > { %v551_v29 = vsel %vm395_vm3, %v546_v31, %v550_v36  ;;  %v554_v28 = vor.u32 %v14402_v47, %v550_v36  ;;  %v14408_v31 = vshrl.u32 %v10276_v2, 16  ;;  %v1528_v36 = vrot.slane %v9959_v13, 2 }
  0x9e   : > { %8713 = vmatmul.mubr.msk.bf16.gmra.mxu1 %vm579_vm2, %v10276_v2  ;;  %v14407_v47 = vshrl.u32 %v10294_v45, 16 }
  0x9f   : > { %8716 = vmatprep.mubr.msk.bf16.mxu1 %vm9884_vm1, %v14432_v1 }
  0xa1   : > { %8607 = vmatmul.mubr.msk.bf16.gmra.mxu0 %vm579_vm2, %v543_v7  ;;  %v14401_v7 = vshll.u32 %v10276_v2, 16 }
  0xa2   : > { %8610 = vmatprep.mubr.msk.bf16.mxu0 %vm9884_vm1, %v14432_v1 }
  0xa3   : > { %v558_v55 = vrot.slane %v14401_v7, 1 }
  0xa5   : > { %v559_v12 = vsel %vm395_vm3, %v554_v28, %v558_v55  ;;  %v562_v18 = vor.u32 %v14408_v31, %v558_v55  ;;  %v1529_v28 = vsel %vm1526_vm4, %v1527_v53, %v1528_v36  ;;  %v574_v55 = vrot.slane %v14406_v61, 1 }
  0xa6   : > { %8717 = vmatmul.mubr.msk.bf16.gmra.mxu1 %vm579_vm2, %v10294_v45 }
  0xa7   : > { %8720 = vmatprep.mubr.msk.bf16.mxu1 %vm9884_vm1, %v14432_v1 }
  0xa9   : > { %8611 = vmatmul.mubr.msk.bf16.gmra.mxu0 %vm579_vm2, %v551_v29  ;;  %v14404_v29 = vshll.u32 %v10294_v45, 16 }
  0xaa   : > { %8614 = vmatprep.mubr.msk.bf16.mxu0 %vm9884_vm1, %v14432_v1 }
  0xab   : > { %v566_v24 = vrot.slane %v14404_v29, 1  ;;  %v14405_v29 = vshrl.u32 %v10312_v8, 16 }
  0xad   : > { %v567_v7 = vsel %vm395_vm3, %v562_v18, %v566_v24  ;;  %v570_v53 = vor.u32 %v14407_v47, %v566_v24 }
  0xae   : > { %8721 = vmatmul.mubr.msk.bf16.gmra.mxu1 %vm579_vm2, %v10312_v8 }
  0xaf   : > { %8820 = vmatprep.mubr.msk.bf16.mxu1 %vm9884_vm1, %v14432_v1 }
  0xb1   : > { %8615 = vmatmul.mubr.msk.bf16.gmra.mxu0 %vm579_vm2, %v559_v12  ;;  %v1530_v12 = vrot.slane %v9963_v16, 2 }
  0xb2   : > { %8618 = vmatprep.mubr.msk.bf16.mxu0 %vm9884_vm1, %v14432_v1 }
  0xb3   : > { %v1531_v18 = vsel %vm1526_vm4, %v1528_v36, %v1530_v12  ;;  %v578_v36 = vor.u32 %v14405_v29, %v574_v55 }
  0xb6   : > { %8821 = vmatmul.mubr.msk.bf16.vlgmr.msra.gmra.mxu1 %vm579_vm2, %v1529_v28  ;;  %v575_v28 = vsel %vm395_vm3, %v570_v53, %v574_v55  ;;  %v1534_v53 = vrot.slane %v10001_v40, 2  ;;  %v1536_v55 = vrot.slane %v10019_v48, 2 }
  0xb7   : > { %8824 = vmatprep.mubr.msk.bf16.mxu1 %vm9884_vm1, %v14432_v1 }
  0xb9   : > { %8619 = vmatmul.mubr.msk.bf16.gmra.mxu0 %vm579_vm2, %v567_v7  ;;  %v1532_v7 = vrot.slane %v9985_v33, 2 }
  0xba   : > { %8622 = vmatprep.mubr.msk.bf16.mxu0 %vm9884_vm1, %v14432_v1 }
  0xbb   : > { %v1533_v24 = vsel %vm1526_vm4, %v1530_v12, %v1532_v7  ;;  %v7667_v12 = vld [vmem:[%s14388_s1 + $0x8] sm:$0xf] }
  0xbe   : > { %8825 = vmatmul.mubr.msk.bf16.gmra.mxu1 %vm579_vm2, %v1531_v18  ;;  %v1535_v18 = vsel %vm1526_vm4, %v1532_v7, %v1534_v53  ;;  %v1537_v7 = vsel %vm1526_vm4, %v1534_v53, %v1536_v55 }
  0xbf   : > { %8828 = vmatprep.mubr.msk.bf16.mxu1 %vm9884_vm1, %v14432_v1 }
  0xc1   : > { %8623 = vmatmul.mubr.msk.bf16.gmra.mxu0 %vm579_vm2, %v575_v28  ;;  %v1254_v28 = vsel %vm649_vm0, %v7667_v12, 0 }
  0xc2   : > { %8626 = vmatprep.mubr.msk.bf16.mxu0 %vm9884_vm1, %v14432_v1 }
  0xc6   : > { %8829 = vmatmul.mubr.msk.bf16.gmra.mxu1 %vm579_vm2, %v1533_v24 }
  0xc7   : > { %8832 = vmatprep.mubr.msk.bf16.mxu1 %vm9884_vm1, %v14432_v1 }
  0xc9   : > { %8627 = vmatmul.mubr.msk.bf16.gmra.mxu0 %vm579_vm2, %v578_v36  ;;  %v1538_v36 = vrot.slane %v10037_v56, 2 }
  0xca   : > { %8632 = vmatprep.mubr.msk.bf16.mxu0 %vm9884_vm1, %v14432_v1 }
  0xcb   : > { %v1539_v53 = vsel %vm1526_vm4, %v1536_v55, %v1538_v36  ;;  %v1140_v55 = vrot.slane %v9951_v6, 1 }
  0xce   : > { %8833 = vmatmul.mubr.msk.bf16.gmra.mxu1 %vm579_vm2, %v1535_v18 }
  0xcf   : > { %8836 = vmatprep.mubr.msk.bf16.mxu1 %vm9884_vm1, %v14432_v1 }
  0xd1   : > { %8633 = vmatmul.mubr.msk.bf16.vlgmr.msra.gmra.mxu0 %vm579_vm2, %v9948_v5 }
  0xd2   : > { %8725 = vmatpush3.bf16.msra.mxu0 %v1254_v28  ;;  %8636 = vmatprep.mubr.msk.bf16.mxu0 %vm9884_vm1, %v14432_v1 }
  0xd3   : > { %8912 = vmatprep.subr.bf16.mxu0 %v14432_v1 }
  0xd6   : > { %v977_v24 = vpop.f32.mrf.mxu1  ;;  %8837 = vmatmul.mubr.msk.bf16.gmra.mxu1 %vm579_vm2, %v1537_v7 }
  0xd7   : > { %8840 = vmatprep.mubr.msk.bf16.mxu1 %vm9884_vm1, %v14432_v1 }
  0xd8   : > { %v8646_v18 = vpop.f32.mrf.mxu1 }
  0xd9   : > { %v10384_v12 = vpop.f32.mrf.mxu0  ;;  %8637 = vmatmul.mubr.msk.bf16.gmra.mxu0 %vm579_vm2, %v9951_v6  ;;  %v1540_v18 = vrot.slane %v10055_v0, 2 }
  0xda   : > { %v980_v28 = vpop.f32.mrf.mxu1  ;;  %8640 = vmatprep.mubr.msk.bf16.mxu0 %vm9884_vm1, %v14432_v1 }
  0xdb   : > { %v8540_v29 = vpop.f32.mrf.mxu0 }
  0xdc   : > { %v8647_v61 = vpop.f32.mrf.mxu1 }
  0xdd   : > { %v10391_v7 = vpop.f32.mrf.mxu0  ;;  %v1139_v61 = vrot.slane %v9948_v5, 1  ;;  %v1542_v5 = vrot.slane %v10073_v11, 2 }
  0xde   : > { %v10393_v47 = vpop.f32.mrf.mxu1  ;;  %8841 = vmatmul.mubr.msk.bf16.gmra.mxu1 %vm579_vm2, %v1539_v53  ;;  %v1541_v53 = vsel %vm1526_vm4, %v1538_v36, %v1540_v18 }
  0xdf   : > { %8844 = vmatprep.mubr.msk.bf16.mxu1 %vm9884_vm1, %v14432_v1  ;;  %v8541_v31 = vpop.f32.mrf.mxu0  ;;  %v1141_v63 = vsel %vm1138_vm5, %v1139_v61, %v1140_v55  ;;  %v1142_v61 = vrot.slane %v9959_v13, 1 }
  0xe0   : > { %v8650_v57 = vpop.f32.mrf.mxu1 }
  0xe1   : > { %v10399_v41 = vpop.f32.mrf.mxu0  ;;  %8641 = vmatmul.mubr.msk.bf16.gmra.mxu0 %vm579_vm2, %v9959_v13  ;;  %v7716_v57 = vld [vmem:[%s14388_s1 + $0x10] sm:$0xf] }
  0xe2   : > { %v10403_v29 = vpop.f32.mrf.mxu1  ;;  %8726 = vmatprep.mubr.msk.bf16.mxu0 %vm9884_vm1, %v14432_v1 }
  0xe3   : > { %v8544_v39 = vpop.f32.mrf.mxu0 }
  0xe4   : > { %v8651_v31 = vpop.f32.mrf.mxu1  ;;  %v2076_v39 = vsel %vm649_vm0, %v7716_v57, 0 }
  0xe5   : > { %v10413_v22 = vpop.f32.mrf.mxu0 }
  0xe6   : > { %v10415_v20 = vpop.f32.mrf.mxu1  ;;  %8845 = vmatmul.mubr.msk.bf16.gmra.mxu1 %vm579_vm2, %v1541_v53  ;;  %v1543_v53 = vsel %vm1526_vm4, %v1540_v18, %v1542_v5 }
  0xe7   : > { %8848 = vmatprep.mubr.msk.bf16.mxu1 %vm9884_vm1, %v14432_v1  ;;  %v8545_v6 = vpop.f32.mrf.mxu0 }
  0xe8   : > { %v8654_v36 = vpop.f32.mrf.mxu1 }
  0xe9   : > { %v10423_v31 = vpop.f32.mrf.mxu0  ;;  %8727 = vmatmul.mubr.msk.bf16.vlgmr.msra.gmra.mxu0 %vm579_vm2, %v1141_v63  ;;  %v1143_v63 = vsel %vm1138_vm5, %v1140_v55, %v1142_v61 }
  0xea   : > { %v10426_v62 = vpop.f32.mrf.mxu1  ;;  %8913 = vmatpush3.bf16.msra.mxu0 %v2076_v39  ;;  %8730 = vmatprep.mubr.msk.bf16.mxu0 %vm9884_vm1, %v14432_v1  ;;  %v1544_v39 = vrot.slane %v10091_v23, 2 }
  0xeb   : > { %v8548_v52 = vpop.f32.mrf.mxu0  ;;  %9100 = vmatprep.subr.bf16.mxu0 %v14432_v1 }
  0xec   : > { %v8655_v49 = vpop.f32.mrf.mxu1  ;;  %v1545_v55 = vsel %vm1526_vm4, %v1542_v5, %v1544_v39 }
  0xed   : > { %v10433_v57 = vpop.f32.mrf.mxu0 }
  0xee   : > { %v10435_v6 = vpop.f32.mrf.mxu1  ;;  %8849 = vmatmul.mubr.msk.bf16.gmra.mxu1 %vm579_vm2, %v1543_v53  ;;  %v1144_v53 = vrot.slane %v9963_v16, 1 }
  0xef   : > { %8852 = vmatprep.mubr.msk.bf16.mxu1 %vm9884_vm1, %v14432_v1  ;;  %v8549_v36 = vpop.f32.mrf.mxu0 }
  0xf0   : > { %v8658_v38 = vpop.f32.mrf.mxu1 }
  0xf1   : > { %v711_v18 = vpop.f32.mrf.mxu0  ;;  %8731 = vmatmul.mubr.msk.bf16.gmra.mxu0 %vm579_vm2, %v1143_v63  ;;  %v1145_v63 = vsel %vm1138_vm5, %v1142_v61, %v1144_v53 }
  0xf2   : > { %v10443_v49 = vpop.f32.mrf.mxu1  ;;  %v10445_v52 = vadd.f32 %v977_v24, %v711_v18  ;;  %8734 = vmatprep.mubr.msk.bf16.mxu0 %vm9884_vm1, %v14432_v1  ;;  %v1546_v24 = vrot.slane %v10109_v34, 2 }
  0xf3   : > { %v8552_v37 = vpop.f32.mrf.mxu0 }
  0xf4   : > { %v8659_v27 = vpop.f32.mrf.mxu1 }
  0xf5   : > { %v714_v26 = vpop.f32.mrf.mxu0 }
  0xf6   : > { %v10451_v15 = vpop.f32.mrf.mxu1  ;;  %8853 = vmatmul.mubr.msk.bf16.gmra.mxu1 %vm579_vm2, %v1545_v55  ;;  %v10454_v38 = vadd.f32 %v980_v28, %v714_v26  ;;  %v1146_v26 = vrot.slane %v9985_v33, 1  ;;  %v1547_v28 = vsel %vm1526_vm4, %v1544_v39, %v1546_v24 }
  0xf7   : > { %8856 = vmatprep.mubr.msk.bf16.mxu1 %vm9884_vm1, %v14432_v1  ;;  %v8553_v36 = vpop.f32.mrf.mxu0 }
  0xf8   : > { %v8662_v18 = vpop.f32.mrf.mxu1 }
  0xf9   : > { %v719_v14 = vpop.f32.mrf.mxu0  ;;  %8735 = vmatmul.mubr.msk.bf16.gmra.mxu0 %vm579_vm2, %v1145_v63 }
  0xfa   : > { %v10461_v27 = vpop.f32.mrf.mxu1  ;;  %v10464_v37 = vadd.f32 %v10393_v47, %v719_v14  ;;  %8738 = vmatprep.mubr.msk.bf16.mxu0 %vm9884_vm1, %v14432_v1  ;;  %v1147_v14 = vsel %vm1138_vm5, %v1144_v53, %v1146_v26  ;;  %v1548_v47 = vrot.slane %v10127_v46, 2 }
  0xfb   : > { %v8556_v5 = vpop.f32.mrf.mxu0 }
  0xfc   : > { %v8663_v61 = vpop.f32.mrf.mxu1  ;;  %v1549_v53 = vsel %vm1526_vm4, %v1546_v24, %v1548_v47 }
  0xfd   : > { %v722_v55 = vpop.f32.mrf.mxu0 }
  0xfe   : > { %v10470_v36 = vpop.f32.mrf.mxu1  ;;  %8857 = vmatmul.mubr.msk.bf16.gmra.mxu1 %vm579_vm2, %v1547_v28  ;;  %v10474_v63 = vadd.f32 %v10403_v29, %v722_v55  ;;  %v1148_v29 = vrot.slane %v10001_v40, 1 }
  0xff   : > { %8860 = vmatprep.mubr.msk.bf16.mxu1 %vm9884_vm1, %v14432_v1  ;;  %v8557_v18 = vpop.f32.mrf.mxu0 }
 0x100   : > { %v8666_v4 = vpop.f32.mrf.mxu1 }
 0x101   : > { %v727_v39 = vpop.f32.mrf.mxu0  ;;  %8739 = vmatmul.mubr.msk.bf16.gmra.mxu0 %vm579_vm2, %v1147_v14  ;;  %v1550_v14 = vrot.slane %v10145_v60, 2 }
 0x102   : > { %v10481_v5 = vpop.f32.mrf.mxu1  ;;  %v10484_v61 = vadd.f32 %v10415_v20, %v727_v39  ;;  %8742 = vmatprep.mubr.msk.bf16.mxu0 %vm9884_vm1, %v14432_v1  ;;  %v1149_v20 = vsel %vm1138_vm5, %v1146_v26, %v1148_v29 }
 0x103   : > { %v8560_v28 = vpop.f32.mrf.mxu0 }
 0x104   : > { %14455 = vst [vmem:[#allocation3_spill] sm:$0xff] %v10484_v61  ;;  %v8667_v55 = vpop.f32.mrf.mxu1 }
 0x105   : > { %v730_v3 = vpop.f32.mrf.mxu0 }
 0x106   : > { %v10490_v18 = vpop.f32.mrf.mxu1  ;;  %8861 = vmatmul.mubr.msk.bf16.gmra.mxu1 %vm579_vm2, %v1549_v53  ;;  %v10494_v4 = vadd.f32 %v10426_v62, %v730_v3  ;;  %v1150_v3 = vrot.slane %v10019_v48, 1  ;;  %v1551_v62 = vsel %vm1526_vm4, %v1548_v47, %v1550_v14 }
 0x107   : > { %8864 = vmatprep.mubr.msk.bf16.mxu1 %vm9884_vm1, %v14432_v1  ;;  %v8561_v39 = vpop.f32.mrf.mxu0 }
 0x108   : > { %14456 = vst [vmem:[#allocation4_spill] sm:$0xff] %v10494_v4  ;;  %v8670_v59 = vpop.f32.mrf.mxu1 }
 0x109   : > { %v735_v24 = vpop.f32.mrf.mxu0  ;;  %8743 = vmatmul.mubr.msk.bf16.gmra.mxu0 %vm579_vm2, %v1149_v20  ;;  %v1552_v20 = vrot.slane %v10168_v17, 2 }
 0x10a   : > { %v10501_v28 = vpop.f32.mrf.mxu1  ;;  %v10504_v55 = vadd.f32 %v10435_v6, %v735_v24  ;;  %8746 = vmatprep.mubr.msk.bf16.mxu0 %vm9884_vm1, %v14432_v1  ;;  %v1151_v6 = vsel %vm1138_vm5, %v1148_v29, %v1150_v3 }
 0x10b   : > { %v8564_v26 = vpop.f32.mrf.mxu0 }
 0x10c   : > { %14457 = vst [vmem:[#allocation5_spill] sm:$0xff] %v10504_v55  ;;  %v8671_v53 = vpop.f32.mrf.mxu1 }
 0x10d   : > { %v738_v58 = vpop.f32.mrf.mxu0 }
 0x10e   : > { %v10510_v39 = vpop.f32.mrf.mxu1  ;;  %8865 = vmatmul.mubr.msk.bf16.gmra.mxu1 %vm579_vm2, %v1551_v62  ;;  %v10514_v59 = vadd.f32 %v10443_v49, %v738_v58  ;;  %v1152_v58 = vrot.slane %v10037_v56, 1  ;;  %v1553_v49 = vsel %vm1526_vm4, %v1550_v14, %v1552_v20 }
 0x10f   : > { %8868 = vmatprep.mubr.msk.bf16.mxu1 %vm9884_vm1, %v14432_v1  ;;  %v8565_v24 = vpop.f32.mrf.mxu0 }
 0x110   : > { %14458 = vst [vmem:[#allocation6_spill] sm:$0xff] %v10514_v59  ;;  %v8674_v51 = vpop.f32.mrf.mxu1 }
 0x111   : > { %v743_v47 = vpop.f32.mrf.mxu0  ;;  %8747 = vmatmul.mubr.msk.bf16.gmra.mxu0 %vm579_vm2, %v1151_v6  ;;  %v1554_v6 = vrot.slane %v10186_v32, 2 }
 0x112   : > { %v10521_v26 = vpop.f32.mrf.mxu1  ;;  %v10524_v53 = vadd.f32 %v10451_v15, %v743_v47  ;;  %8750 = vmatprep.mubr.msk.bf16.mxu0 %vm9884_vm1, %v14432_v1  ;;  %v1153_v15 = vsel %vm1138_vm5, %v1150_v3, %v1152_v58 }
 0x113   : > { %v8568_v29 = vpop.f32.mrf.mxu0 }
 0x114   : > { %14459 = vst [vmem:[#allocation7_spill] sm:$0xff] %v10524_v53  ;;  %v8675_v62 = vpop.f32.mrf.mxu1 }
 0x115   : > { %v746_v50 = vpop.f32.mrf.mxu0 }
 0x116   : > { %v10530_v24 = vpop.f32.mrf.mxu1  ;;  %8869 = vmatmul.mubr.msk.bf16.gmra.mxu1 %vm579_vm2, %v1553_v49  ;;  %v10534_v51 = vadd.f32 %v10461_v27, %v746_v50  ;;  %v1154_v50 = vrot.slane %v10055_v0, 1  ;;  %v1555_v27 = vsel %vm1526_vm4, %v1552_v20, %v1554_v6  ;;  %v7740_v20 = vld [vmem:[%s14388_s1 + $0x14] sm:$0xf] }
 0x117   : > { %8872 = vmatprep.mubr.msk.bf16.mxu1 %vm9884_vm1, %v14432_v1  ;;  %v8569_v47 = vpop.f32.mrf.mxu0 }
 0x118   : > { %14460 = vst [vmem:[#allocation8_spill] sm:$0xff] %v10534_v51  ;;  %v8678_v43 = vpop.f32.mrf.mxu1 }
 0x119   : > { %v751_v14 = vpop.f32.mrf.mxu0  ;;  %8751 = vmatmul.mubr.msk.bf16.gmra.mxu0 %vm579_vm2, %v1153_v15  ;;  %v1556_v15 = vrot.slane %v10204_v54, 2 }
 0x11a   : > { %v10541_v29 = vpop.f32.mrf.mxu1  ;;  %v10544_v62 = vadd.f32 %v10470_v36, %v751_v14  ;;  %8754 = vmatprep.mubr.msk.bf16.mxu0 %vm9884_vm1, %v14432_v1  ;;  %v1155_v36 = vsel %vm1138_vm5, %v1152_v58, %v1154_v50 }
 0x11b   : > { %v8572_v3 = vpop.f32.mrf.mxu0  ;;  %v1557_v21 = vsel %vm1526_vm4, %v1554_v6, %v1556_v15 }
 0x11c   : > { %14461 = vst [vmem:[#allocation9_spill] sm:$0xff] %v10544_v62  ;;  %v8679_v49 = vpop.f32.mrf.mxu1 }
 0x11d   : > { %v754_v42 = vpop.f32.mrf.mxu0  ;;  %v2459_v49 = vsel %vm649_vm0, %v7740_v20, 0  ;;  %v14463_v20 = vshrl.u32 %v9963_v16, 16 }
 0x11e   : > { %v10550_v47 = vpop.f32.mrf.mxu1  ;;  %8873 = vmatmul.mubr.msk.bf16.gmra.mxu1 %vm579_vm2, %v1555_v27  ;;  %v10554_v43 = vadd.f32 %v10481_v5, %v754_v42  ;;  %v10569_v42 = vsel %vm1909_vm6, %v1912_v25, %v9981_v30  ;;  %v1918_v5 = vrot.slane %v420_v35, 3 }
 0x11f   : > { %8876 = vmatprep.mubr.msk.bf16.mxu1 %vm9884_vm1, %v14432_v1  ;;  %v8573_v14 = vpop.f32.mrf.mxu0  ;;  %9007 = vmatpush3.bf16.msra.mxu1 %v2459_v49 }
 0x120   : > { %14462 = vst [vmem:[#allocation10_spill] sm:$0xff] %v10554_v43  ;;  %v8682_v3 = vpop.f32.mrf.mxu1  ;;  %9194 = vmatprep.subr.bf16.mxu1 %v14432_v1  ;;  %v1917_v14 = vrot.slane %v14463_v20, 2 }
 0x121   : > { %v759_v58 = vpop.f32.mrf.mxu0  ;;  %8755 = vmatmul.mubr.msk.bf16.gmra.mxu0 %vm579_vm2, %v1155_v36 }
 0x122   : > { %v10574_v27 = vpop.f32.mrf.mxu1  ;;  %v10580_v3 = vadd.f32 %v10490_v18, %v759_v58  ;;  %8758 = vmatprep.mubr.msk.bf16.mxu0 %vm9884_vm1, %v14432_v1  ;;  %v1157_v18 = vsel %vm1138_vm5, %v1154_v50, %v1156_v19  ;;  %v1558_v58 = vrot.slane %v10222_v10, 2  ;;  %v1919_v20 = vor.u32 %v1918_v5, %v1917_v14 }
 0x123   : > { %v8576_v25 = vpop.f32.mrf.mxu0  ;;  %v14467_v50 = vshrl.u32 %v9985_v33, 16  ;;  %v14469_v5 = vmov 0.0  }
 0x124   : > { %14464 = vst [vmem:[#allocation11_spill] sm:$0xff] %v10580_v3  ;;  %v8683_v35 = vpop.f32.mrf.mxu1  ;;  %v10598_v25 = vsel %vm1909_vm6, %v9981_v30, %v1919_v20  ;;  %v1158_v30 = vrot.slane %v10091_v23, 1  ;;  %v1559_v14 = vsel %vm1526_vm4, %v1556_v15, %v1558_v58 }
 0x125   : > { %v762_v36 = vpop.f32.mrf.mxu0  ;;  %v14466_v35 = vshll.u32 %v9985_v33, 16 }
 0x126   : > { %v10586_v49 = vpop.f32.mrf.mxu1  ;;  %8877 = vmatmul.mubr.msk.bf16.gmra.mxu1 %vm579_vm2, %v1557_v21  ;;  %v10590_v43 = vadd.f32 %v10501_v28, %v762_v36  ;;  %v1921_v36 = vrot.slane %v14467_v50, 2 }
 0x127   : > { %8880 = vmatprep.mubr.msk.bf16.mxu1 %vm9884_vm1, %v14432_v1  ;;  %v8577_v3 = vpop.f32.mrf.mxu0  ;;  %v1922_v21 = vrot.slane %v14466_v35, 3 }
 0x128   : > { %14465 = vst [vmem:[#allocation12_spill] sm:$0xff] %v10590_v43  ;;  %v8686_v6 = vpop.f32.mrf.mxu1 }
 0x129   : > { %v767_v62 = vpop.f32.mrf.mxu0  ;;  %8759 = vmatmul.mubr.msk.bf16.gmra.mxu0 %vm579_vm2, %v1157_v18  ;;  %v1923_v50 = vor.u32 %v1922_v21, %v1921_v36 }
 0x12a   : > { %v10603_v28 = vpop.f32.mrf.mxu1  ;;  %v10608_v1 = vadd.f32 %v10510_v39, %v767_v62  ;;  %8762 = vmatprep.mubr.msk.bf16.mxu0 %vm9884_vm1, %v14469_v5  ;;  %v1159_v39 = vsel %vm1138_vm5, %v1156_v19, %v1158_v30  ;;  %v1560_v62 = vrot.slane %v10240_v44, 2  ;;  %v14472_v19 = vshrl.u32 %v10001_v40, 16 }
 0x12b   : > { %v8580_v3 = vpop.f32.mrf.mxu0 }
 0x12c   : > { %14468 = vst [vmem:[#allocation13_spill] sm:$0xff] %v10608_v1  ;;  %v8687_v6 = vpop.f32.mrf.mxu1  ;;  %v10625_v3 = vsel %vm1909_vm6, %v1919_v20, %v1923_v50  ;;  %v1561_v20 = vsel %vm1526_vm4, %v1558_v58, %v1560_v62 }
 0x12d   : > { %v770_v35 = vpop.f32.mrf.mxu0  ;;  %v14471_v6 = vshll.u32 %v10001_v40, 16 }
 0x12e   : > { %v10614_v43 = vpop.f32.mrf.mxu1  ;;  %8881 = vmatmul.mubr.msk.bf16.gmra.mxu1 %vm579_vm2, %v1559_v14  ;;  %v10618_v18 = vadd.f32 %v10521_v26, %v770_v35  ;;  %v1925_v35 = vrot.slane %v14472_v19, 2 }
 0x12f   : > { %8884 = vmatprep.mubr.msk.bf16.mxu1 %vm9884_vm1, %v14469_v5  ;;  %v8581_v1 = vpop.f32.mrf.mxu0  ;;  %v1926_v51 = vrot.slane %v14471_v6, 3 }
 0x130   : > { %14470 = vst [vmem:[#allocation14_spill] sm:$0xff] %v10618_v18  ;;  %v8690_v15 = vpop.f32.mrf.mxu1  ;;  %v1160_v1 = vrot.slane %v10109_v34, 1 }
 0x131   : > { %v775_v14 = vpop.f32.mrf.mxu0  ;;  %8763 = vmatmul.mubr.msk.bf16.gmra.mxu0 %vm579_vm2, %v1159_v39  ;;  %v1927_v19 = vor.u32 %v1926_v51, %v1925_v35  ;;  %v1162_v51 = vrot.slane %v10127_v46, 1 }
 0x132   : > { %v10630_v26 = vpop.f32.mrf.mxu1  ;;  %v10635_v18 = vadd.f32 %v10530_v24, %v775_v14  ;;  %8766 = vmatprep.mubr.msk.bf16.mxu0 %vm9884_vm1, %v14469_v5  ;;  %v1161_v24 = vsel %vm1138_vm5, %v1158_v30, %v1160_v1  ;;  %v1562_v14 = vrot.slane %v10258_v9, 2  ;;  %v14476_v30 = vshrl.u32 %v10019_v48, 16 }
 0x133   : > { %v8584_v21 = vpop.f32.mrf.mxu0 }
 0x134   : > { %14473 = vst [vmem:[#allocation15_spill] sm:$0xff] %v10635_v18  ;;  %v8691_v36 = vpop.f32.mrf.mxu1  ;;  %v10652_v21 = vsel %vm1909_vm6, %v1923_v50, %v1927_v19 }
 0x135   : > { %v778_v15 = vpop.f32.mrf.mxu0  ;;  %v14475_v36 = vshll.u32 %v10019_v48, 16 }
 0x136   : > { %v10641_v6 = vpop.f32.mrf.mxu1  ;;  %8885 = vmatmul.mubr.msk.bf16.gmra.mxu1 %vm579_vm2, %v1561_v20  ;;  %v10645_v39 = vadd.f32 %v10541_v29, %v778_v15  ;;  %v1929_v15 = vrot.slane %v14476_v30, 2 }
 0x137   : > { %8888 = vmatprep.mubr.msk.bf16.mxu1 %vm9884_vm1, %v14469_v5  ;;  %v8585_v18 = vpop.f32.mrf.mxu0  ;;  %v1930_v53 = vrot.slane %v14475_v36, 3 }
 0x138   : > { %14474 = vst [vmem:[#allocation16_spill] sm:$0xff] %v10645_v39  ;;  %v8694_v58 = vpop.f32.mrf.mxu1  ;;  %v1563_v18 = vsel %vm1526_vm4, %v1560_v62, %v1562_v14 }
 0x139   : > { %v783_v20 = vpop.f32.mrf.mxu0  ;;  %8767 = vmatmul.mubr.msk.bf16.gmra.mxu0 %vm579_vm2, %v1161_v24  ;;  %v1931_v30 = vor.u32 %v1930_v53, %v1929_v15  ;;  %v1164_v53 = vrot.slane %v10145_v60, 1 }
 0x13a   : > { %v10657_v29 = vpop.f32.mrf.mxu1  ;;  %v10662_v39 = vadd.f32 %v10550_v47, %v783_v20  ;;  %8770 = vmatprep.mubr.msk.bf16.mxu0 %vm9884_vm1, %v14469_v5  ;;  %v1163_v47 = vsel %vm1138_vm5, %v1160_v1, %v1162_v51  ;;  %v1564_v20 = vrot.slane %v10276_v2, 2  ;;  %v14480_v1 = vshrl.u32 %v10037_v56, 16 }
 0x13b   : > { %v8588_v50 = vpop.f32.mrf.mxu0 }
 0x13c   : > { %14477 = vst [vmem:[#allocation17_spill] sm:$0xff] %v10662_v39  ;;  %v8695_v35 = vpop.f32.mrf.mxu1  ;;  %v10679_v50 = vsel %vm1909_vm6, %v1927_v19, %v1931_v30 }
 0x13d   : > { %v786_v58 = vpop.f32.mrf.mxu0  ;;  %v14479_v35 = vshll.u32 %v10037_v56, 16 }
 0x13e   : > { %v10668_v36 = vpop.f32.mrf.mxu1  ;;  %8889 = vmatmul.mubr.msk.bf16.gmra.mxu1 %vm579_vm2, %v1563_v18  ;;  %v10672_v24 = vadd.f32 %v10574_v27, %v786_v58  ;;  %v1933_v58 = vrot.slane %v14480_v1, 2 }
 0x13f   : > { %8892 = vmatprep.mubr.msk.bf16.mxu1 %vm9884_vm1, %v14469_v5  ;;  %v8589_v39 = vpop.f32.mrf.mxu0  ;;  %v1934_v59 = vrot.slane %v14479_v35, 3 }
 0x140   : > { %14478 = vst [vmem:[#allocation18_spill] sm:$0xff] %v10672_v24  ;;  %v8698_v62 = vpop.f32.mrf.mxu1  ;;  %v1565_v39 = vsel %vm1526_vm4, %v1562_v14, %v1564_v20 }
 0x141   : > { %v791_v18 = vpop.f32.mrf.mxu0  ;;  %8771 = vmatmul.mubr.msk.bf16.gmra.mxu0 %vm579_vm2, %v1163_v47  ;;  %v1935_v1 = vor.u32 %v1934_v59, %v1933_v58  ;;  %v1166_v59 = vrot.slane %v10168_v17, 1 }
 0x142   : > { %v10684_v27 = vpop.f32.mrf.mxu1  ;;  %v10689_v24 = vadd.f32 %v10586_v49, %v791_v18  ;;  %8774 = vmatprep.mubr.msk.bf16.mxu0 %vm9884_vm1, %v14469_v5  ;;  %v1165_v49 = vsel %vm1138_vm5, %v1162_v51, %v1164_v53  ;;  %v1566_v18 = vrot.slane %v10294_v45, 2  ;;  %v14484_v51 = vshrl.u32 %v10055_v0, 16 }
 0x143   : > { %v8592_v19 = vpop.f32.mrf.mxu0 }
 0x144   : > { %14481 = vst [vmem:[#allocation19_spill] sm:$0xff] %v10689_v24  ;;  %v8699_v15 = vpop.f32.mrf.mxu1  ;;  %v10706_v19 = vsel %vm1909_vm6, %v1931_v30, %v1935_v1 }
 0x145   : > { %v794_v62 = vpop.f32.mrf.mxu0  ;;  %v14483_v15 = vshll.u32 %v10055_v0, 16 }
 0x146   : > { %v10695_v35 = vpop.f32.mrf.mxu1  ;;  %8893 = vmatmul.mubr.msk.bf16.gmra.mxu1 %vm579_vm2, %v1565_v39  ;;  %v10699_v47 = vadd.f32 %v10603_v28, %v794_v62  ;;  %v1937_v62 = vrot.slane %v14484_v51, 2 }
 0x147   : > { %8896 = vmatprep.mubr.msk.bf16.mxu1 %vm9884_vm1, %v14469_v5  ;;  %v8593_v24 = vpop.f32.mrf.mxu0  ;;  %v1938_v55 = vrot.slane %v14483_v15, 3 }
 0x148   : > { %14482 = vst [vmem:[#allocation20_spill] sm:$0xff] %v10699_v47  ;;  %v8702_v14 = vpop.f32.mrf.mxu1  ;;  %v1567_v24 = vsel %vm1526_vm4, %v1564_v20, %v1566_v18 }
 0x149   : > { %v799_v39 = vpop.f32.mrf.mxu0  ;;  %8775 = vmatmul.mubr.msk.bf16.gmra.mxu0 %vm579_vm2, %v1165_v49  ;;  %v1939_v51 = vor.u32 %v1938_v55, %v1937_v62 }
 0x14a   : > { %v10711_v28 = vpop.f32.mrf.mxu1  ;;  %v10716_v47 = vadd.f32 %v10614_v43, %v799_v39  ;;  %8778 = vmatprep.mubr.msk.bf16.mxu0 %vm9884_vm1, %v14469_v5  ;;  %v1167_v43 = vsel %vm1138_vm5, %v1164_v53, %v1166_v59  ;;  %v1568_v39 = vrot.slane %v10312_v8, 2 }
 0x14b   : > { %v8596_v30 = vpop.f32.mrf.mxu0  ;;  %v10735_v4 = vsel %vm1909_vm6, %v1935_v1, %v1939_v51 }
 0x14c   : > { %14485 = vst [vmem:[#allocation21_spill] sm:$0xff] %v10716_v47  ;;  %v8703_v58 = vpop.f32.mrf.mxu1  ;;  %v272_v30 = vld [vmem:[%s9945_s27 + $0xb8] sm:$0xf]  ;;  %14487 = vst [vmem:[#allocation23_spill] sm:$0xff] %v10735_v4  ;;  %v1569_v1 = vsel %vm1526_vm4, %v1566_v18, %v1568_v39 }
 0x14d   : > { %v802_v49 = vpop.f32.mrf.mxu0  ;;  %v273_v58 = vld [vmem:[%s9945_s27 + $0xbc] sm:$0xf] }
 0x14e   : > { %v10722_v14 = vpop.f32.mrf.mxu1  ;;  %8897 = vmatmul.mubr.msk.bf16.gmra.mxu1 %vm579_vm2, %v1567_v24  ;;  %v10726_v15 = vadd.f32 %v10630_v26, %v802_v49  ;;  %v14488_v24 = vshll.u32 %v10073_v11, 16  ;;  %v14489_v26 = vshrl.u32 %v10073_v11, 16  ;;  %v10751_v62 = vcombine.low %v272_v30, %v273_v58 }
 0x14f   : > { %8900 = vmatprep.mubr.msk.bf16.mxu1 %vm9884_vm1, %v14469_v5  ;;  %v8597_v47 = vpop.f32.mrf.mxu0 }
 0x150   : > { %14486 = vst [vmem:[#allocation22_spill] sm:$0xff] %v10726_v15  ;;  %v8706_v20 = vpop.f32.mrf.mxu1  ;;  %v1942_v61 = vrot.slane %v14488_v24, 3  ;;  %v1941_v49 = vrot.slane %v14489_v26, 2  ;;  %v1168_v47 = vrot.slane %v10186_v32, 1  ;;  %14491 = vst [vmem:[#allocation25_spill] sm:$0xff] %v10751_v62 }
 0x151   : > { %v807_v53 = vpop.f32.mrf.mxu0  ;;  %8779 = vmatmul.mubr.msk.bf16.gmra.mxu0 %vm579_vm2, %v1167_v43 }
 0x152   : > { %v10742_v15 = vpop.f32.mrf.mxu1  ;;  %v10745_v55 = vadd.f32 %v10641_v6, %v807_v53  ;;  %8782 = vmatprep.mubr.msk.bf16.mxu0 %vm9884_vm1, %v14469_v5  ;;  %v1169_v6 = vsel %vm1138_vm5, %v1166_v59, %v1168_v47  ;;  %v1570_v53 = vrot.slane %v10751_v62, 2  ;;  %v1943_v18 = vor.u32 %v1942_v61, %v1941_v49 }
 0x153   : > { %v8600_v20 = vpop.f32.mrf.mxu0  ;;  %v14494_v59 = vshrl.u32 %v10091_v23, 16  ;;  %v1170_v61 = vrot.slane %v10204_v54, 1  ;;  %v14502_v62 = vshll.u32 %v10127_v46, 16 }
 0x154   : > { %14490 = vst [vmem:[#allocation24_spill] sm:$0xff] %v10745_v55  ;;  %v8707_v24 = vpop.f32.mrf.mxu1  ;;  %v10764_v20 = vsel %vm1909_vm6, %v1939_v51, %v1943_v18  ;;  %v1571_v51 = vsel %vm1526_vm4, %v1568_v39, %v1570_v53 }
 0x155   : > { %v810_v26 = vpop.f32.mrf.mxu0  ;;  %v14493_v24 = vshll.u32 %v10091_v23, 16 }
 0x156   : > { %v10753_v4 = vpop.f32.mrf.mxu1  ;;  %8901 = vmatmul.mubr.msk.bf16.gmra.mxu1 %vm579_vm2, %v1569_v1  ;;  %v10757_v43 = vadd.f32 %v10657_v29, %v810_v26  ;;  %v1945_v26 = vrot.slane %v14494_v59, 2 }
 0x157   : > { %8904 = vmatprep.mubr.msk.bf16.mxu1 %vm9884_vm1, %v14469_v5  ;;  %v8601_v30 = vpop.f32.mrf.mxu0  ;;  %v1946_v55 = vrot.slane %v14493_v24, 3 }
 0x158   : > { %14492 = vst [vmem:[#allocation26_spill] sm:$0xff] %v10757_v43  ;;  %v8710_v58 = vpop.f32.mrf.mxu1 }
 0x159   : > { %v815_v1 = vpop.f32.mrf.mxu0  ;;  %8783 = vmatmul.mubr.msk.bf16.gmra.mxu0 %vm579_vm2, %v1169_v6 }
 0x15a   : > { %v10769_v29 = vpop.f32.mrf.mxu1  ;;  %v10774_v43 = vadd.f32 %v10668_v36, %v815_v1  ;;  %8786 = vmatprep.mubr.msk.bf16.mxu0 %vm9884_vm1, %v14469_v5  ;;  %v1171_v36 = vsel %vm1138_vm5, %v1168_v47, %v1170_v61  ;;  %v1947_v1 = vor.u32 %v1946_v55, %v1945_v26 }
 0x15b   : > { %v8604_v49 = vpop.f32.mrf.mxu0 }
 0x15c   : > { %14495 = vst [vmem:[#allocation27_spill] sm:$0xff] %v10774_v43  ;;  %v8711_v30 = vpop.f32.mrf.mxu1  ;;  %v10790_v39 = vsel %vm1909_vm6, %v1943_v18, %v1947_v1 }
 0x15d   : > { %v818_v58 = vpop.f32.mrf.mxu0  ;;  %14497 = vst [vmem:[#allocation29_spill] sm:$0xff] %v10790_v39 }
 0x15e   : > { %v10780_v24 = vpop.f32.mrf.mxu1  ;;  %8905 = vmatmul.mubr.msk.bf16.gmra.mxu1 %vm579_vm2, %v1571_v51  ;;  %v10784_v6 = vadd.f32 %v10684_v27, %v818_v58  ;;  %v1172_v51 = vrot.slane %v10222_v10, 1  ;;  %v14498_v27 = vshll.u32 %v10109_v34, 16  ;;  %v14499_v58 = vshrl.u32 %v10109_v34, 16 }
 0x15f   : > { %8908 = vmatprep.mubr.msk.bf16.mxu1 %vm9884_vm1, %v14469_v5  ;;  %v8605_v59 = vpop.f32.mrf.mxu0 }
 0x160   : > { %14496 = vst [vmem:[#allocation28_spill] sm:$0xff] %v10784_v6  ;;  %v8714_v43 = vpop.f32.mrf.mxu1  ;;  %v1950_v47 = vrot.slane %v14498_v27, 3  ;;  %v1949_v6 = vrot.slane %v14499_v58, 2  ;;  %v2345_v58 = vrot.slane %v9959_v13, 3 }
 0x161   : > { %v823_v49 = vpop.f32.mrf.mxu0  ;;  %8787 = vmatmul.mubr.msk.bf16.gmra.mxu0 %vm579_vm2, %v1171_v36  ;;  %v1173_v36 = vsel %vm1138_vm5, %v1170_v61, %v1172_v51 }
 0x162   : > { %v10794_v30 = vpop.f32.mrf.mxu1  ;;  %v10801_v55 = vadd.f32 %v10695_v35, %v823_v49  ;;  %8790 = vmatprep.mubr.msk.bf16.mxu0 %vm9884_vm1, %v14469_v5  ;;  %v9830_v35 = vld [vmem:[%s9945_s27 + $0x8] sm:$0xff]  }
 0x163   : > { %v8608_v43 = vpop.f32.mrf.mxu0  ;;  %v2344_v49 = vrot.slane %v9830_v35, 3 }
 0x164   : > { %14500 = vst [vmem:[#allocation30_spill] sm:$0xff] %v10801_v55  ;;  %v8715_v18 = vpop.f32.mrf.mxu1  ;;  %v1951_v55 = vor.u32 %v1950_v47, %v1949_v6  ;;  %v1174_v6 = vrot.slane %v10240_v44, 1 }
 0x165   : > { %v826_v26 = vpop.f32.mrf.mxu0 }
 0x166   : > { %v10806_v59 = vpop.f32.mrf.mxu1  ;;  %8909 = vmatmul.mubr.msk.bf16.gmra.mxu1 %vm579_vm2, %v1570_v53  ;;  %v10810_v27 = vadd.f32 %v10711_v28, %v826_v26  ;;  %v10817_v61 = vsel %vm1909_vm6, %v1947_v1, %v1951_v55  ;;  %v1954_v53 = vrot.slane %v14502_v62, 3  ;;  %v14503_v26 = vshrl.u32 %v10127_v46, 16 }
 0x167   : > { %9008 = vmatprep.mubr.msk.bf16.mxu1 %vm9884_vm1, %v14469_v5  ;;  %v8609_v43 = vpop.f32.mrf.mxu0  ;;  %v2346_v1 = vsel %vm2343_vm7, %v2344_v49, %v2345_v58 }
 0x168   : > { %14501 = vst [vmem:[#allocation31_spill] sm:$0xff] %v10810_v27  ;;  %v8718_v18 = vpop.f32.mrf.mxu1  ;;  %v1953_v35 = vrot.slane %v14503_v26, 2 }
 0x169   : > { %v831_v39 = vpop.f32.mrf.mxu0  ;;  %8791 = vmatmul.mubr.msk.bf16.gmra.mxu0 %vm579_vm2, %v1173_v36 }
 0x16a   : > { %v10822_v28 = vpop.f32.mrf.mxu1  ;;  %v10827_v13 = vadd.f32 %v10722_v14, %v831_v39  ;;  %8794 = vmatprep.mubr.msk.bf16.mxu0 %vm9884_vm1, %v14469_v5  ;;  %v1175_v14 = vsel %vm1138_vm5, %v1172_v51, %v1174_v6  ;;  %v2347_v39 = vrot.slane %v9963_v16, 3  ;;  %v1955_v26 = vor.u32 %v1954_v53, %v1953_v35 }
 0x16b   : > { %v8612_v47 = vpop.f32.mrf.mxu0  ;;  %v14508_v51 = vshrl.u32 %v10145_v60, 16  ;;  %v1176_v16 = vrot.slane %v10258_v9, 1 }
 0x16c   : > { %14504 = vst [vmem:[#allocation32_spill] sm:$0xff] %v10827_v13  ;;  %v8719_v62 = vpop.f32.mrf.mxu1  ;;  %v10844_v47 = vsel %vm1909_vm6, %v1951_v55, %v1955_v26  ;;  %v2348_v55 = vsel %vm2343_vm7, %v2345_v58, %v2347_v39 }
 0x16d   : > { %v834_v43 = vpop.f32.mrf.mxu0  ;;  %14506 = vst [vmem:[#allocation34_spill] sm:$0xff] %v10844_v47  ;;  %v14507_v62 = vshll.u32 %v10145_v60, 16 }
 0x16e   : > { %v10833_v18 = vpop.f32.mrf.mxu1  ;;  %9009 = vmatmul.mubr.msk.bf16.vlgmr.msra.gmra.mxu1 %vm579_vm2, %v2346_v1  ;;  %v10837_v36 = vadd.f32 %v10742_v15, %v834_v43  ;;  %v1957_v43 = vrot.slane %v14508_v51, 2 }
 0x16f   : > { %9012 = vmatprep.mubr.msk.bf16.mxu1 %vm9884_vm1, %v14469_v5  ;;  %v8613_v13 = vpop.f32.mrf.mxu0  ;;  %v1958_v27 = vrot.slane %v14507_v62, 3  ;;  %v2349_v62 = vrot.slane %v9985_v33, 3  ;;  %v1178_v33 = vrot.slane %v10276_v2, 1 }
 0x170   : > { %14505 = vst [vmem:[#allocation33_spill] sm:$0xff] %v10837_v36  ;;  %v8722_v49 = vpop.f32.mrf.mxu1 }
 0x171   : > { %v839_v1 = vpop.f32.mrf.mxu0  ;;  %8795 = vmatmul.mubr.msk.bf16.gmra.mxu0 %vm579_vm2, %v1175_v14 }
 0x172   : > { %v10849_v15 = vpop.f32.mrf.mxu1  ;;  %v10854_v36 = vadd.f32 %v10753_v4, %v839_v1  ;;  %8798 = vmatprep.mubr.msk.bf16.mxu0 %vm9884_vm1, %v14469_v5  ;;  %v1177_v4 = vsel %vm1138_vm5, %v1174_v6, %v1176_v16  ;;  %v1959_v1 = vor.u32 %v1958_v27, %v1957_v43  ;;  %v14513_v6 = vshrl.u32 %v10168_v17, 16 }
 0x173   : > { %v8616_v53 = vpop.f32.mrf.mxu0  ;;  %v2350_v27 = vsel %vm2343_vm7, %v2347_v39, %v2349_v62 }
 0x174   : > { %14509 = vst [vmem:[#allocation35_spill] sm:$0xff] %v10854_v36  ;;  %v8723_v35 = vpop.f32.mrf.mxu1  ;;  %v10871_v53 = vsel %vm1909_vm6, %v1955_v26, %v1959_v1 }
 0x175   : > { %v842_v13 = vpop.f32.mrf.mxu0  ;;  %14511 = vst [vmem:[#allocation37_spill] sm:$0xff] %v10871_v53  ;;  %v14512_v35 = vshll.u32 %v10168_v17, 16 }
 0x176   : > { %v10860_v49 = vpop.f32.mrf.mxu1  ;;  %9013 = vmatmul.mubr.msk.bf16.gmra.mxu1 %vm579_vm2, %v2348_v55  ;;  %v10864_v14 = vadd.f32 %v10769_v29, %v842_v13  ;;  %v1961_v13 = vrot.slane %v14513_v6, 2 }
 0x177   : > { %9016 = vmatprep.mubr.msk.bf16.mxu1 %vm9884_vm1, %v14469_v5  ;;  %v8617_v51 = vpop.f32.mrf.mxu0  ;;  %v1962_v36 = vrot.slane %v14512_v35, 3  ;;  %v2351_v35 = vrot.slane %v10001_v40, 3  ;;  %v1180_v40 = vrot.slane %v10294_v45, 1 }
 0x178   : > { %14510 = vst [vmem:[#allocation36_spill] sm:$0xff] %v10864_v14  ;;  %v8822_v58 = vpop.f32.mrf.mxu1 }
 0x179   : > { %v847_v55 = vpop.f32.mrf.mxu0  ;;  %8799 = vmatmul.mubr.msk.bf16.gmra.mxu0 %vm579_vm2, %v1177_v4 }
 0x17a   : > { %v10876_v29 = vpop.f32.mrf.mxu1  ;;  %v10881_v14 = vadd.f32 %v10780_v24, %v847_v55  ;;  %8802 = vmatprep.mubr.msk.bf16.mxu0 %vm9884_vm1, %v14469_v5  ;;  %v1179_v24 = vsel %vm1138_vm5, %v1176_v16, %v1178_v33  ;;  %v1963_v55 = vor.u32 %v1962_v36, %v1961_v13  ;;  %v14518_v16 = vshrl.u32 %v10186_v32, 16 }
 0x17b   : > { %v8620_v26 = vpop.f32.mrf.mxu0  ;;  %v2352_v36 = vsel %vm2343_vm7, %v2349_v62, %v2351_v35 }
 0x17c   : > { %14514 = vst [vmem:[#allocation38_spill] sm:$0xff] %v10881_v14  ;;  %v8823_v43 = vpop.f32.mrf.mxu1  ;;  %v10898_v26 = vsel %vm1909_vm6, %v1959_v1, %v1963_v55 }
 0x17d   : > { %v850_v51 = vpop.f32.mrf.mxu0  ;;  %14516 = vst [vmem:[#allocation40_spill] sm:$0xff] %v10898_v26  ;;  %v14517_v43 = vshll.u32 %v10186_v32, 16 }
 0x17e   : > { %v10887_v58 = vpop.f32.mrf.mxu1  ;;  %9017 = vmatmul.mubr.msk.bf16.gmra.mxu1 %vm579_vm2, %v2350_v27  ;;  %v10891_v4 = vadd.f32 %v10794_v30, %v850_v51  ;;  %v1965_v51 = vrot.slane %v14518_v16, 2 }
 0x17f   : > { %9020 = vmatprep.mubr.msk.bf16.mxu1 %vm9884_vm1, %v14469_v5  ;;  %v8621_v6 = vpop.f32.mrf.mxu0  ;;  %v1966_v14 = vrot.slane %v14517_v43, 3  ;;  %v2353_v43 = vrot.slane %v10019_v48, 3  ;;  %v1182_v48 = vrot.slane %v10312_v8, 1 }
 0x180   : > { %14515 = vst [vmem:[#allocation39_spill] sm:$0xff] %v10891_v4  ;;  %v8826_v39 = vpop.f32.mrf.mxu1 }
 0x181   : > { %v855_v27 = vpop.f32.mrf.mxu0  ;;  %8803 = vmatmul.mubr.msk.bf16.gmra.mxu0 %vm579_vm2, %v1179_v24 }
 0x182   : > { %v10903_v30 = vpop.f32.mrf.mxu1  ;;  %v10908_v4 = vadd.f32 %v10806_v59, %v855_v27  ;;  %8806 = vmatprep.mubr.msk.bf16.mxu0 %vm9884_vm1, %v14469_v5  ;;  %v1181_v59 = vsel %vm1138_vm5, %v1178_v33, %v1180_v40  ;;  %v1967_v27 = vor.u32 %v1966_v14, %v1965_v51  ;;  %v14523_v33 = vshrl.u32 %v10204_v54, 16 }
 0x183   : > { %v8624_v1 = vpop.f32.mrf.mxu0  ;;  %v2354_v14 = vsel %vm2343_vm7, %v2351_v35, %v2353_v43 }
 0x184   : > { %14519 = vst [vmem:[#allocation41_spill] sm:$0xff] %v10908_v4  ;;  %v8827_v13 = vpop.f32.mrf.mxu1  ;;  %v10925_v1 = vsel %vm1909_vm6, %v1963_v55, %v1967_v27 }
 0x185   : > { %v858_v6 = vpop.f32.mrf.mxu0  ;;  %14521 = vst [vmem:[#allocation43_spill] sm:$0xff] %v10925_v1  ;;  %v14522_v13 = vshll.u32 %v10204_v54, 16 }
 0x186   : > { %v10914_v39 = vpop.f32.mrf.mxu1  ;;  %9021 = vmatmul.mubr.msk.bf16.gmra.mxu1 %vm579_vm2, %v2352_v36  ;;  %v10918_v24 = vadd.f32 %v10822_v28, %v858_v6  ;;  %v1969_v6 = vrot.slane %v14523_v33, 2 }
 0x187   : > { %9024 = vmatprep.mubr.msk.bf16.mxu1 %vm9884_vm1, %v14469_v5  ;;  %v8625_v16 = vpop.f32.mrf.mxu0  ;;  %v1970_v4 = vrot.slane %v14522_v13, 3  ;;  %v2355_v13 = vrot.slane %v10037_v56, 3 }
 0x188   : > { %14520 = vst [vmem:[#allocation42_spill] sm:$0xff] %v10918_v24  ;;  %v8830_v62 = vpop.f32.mrf.mxu1 }
 0x189   : > { %v863_v36 = vpop.f32.mrf.mxu0  ;;  %8807 = vmatmul.mubr.msk.bf16.gmra.mxu0 %vm579_vm2, %v1181_v59  ;;  %v2356_v56 = vsel %vm2343_vm7, %v2353_v43, %v2355_v13 }
 0x18a   : > { %v10930_v28 = vpop.f32.mrf.mxu1  ;;  %v10935_v24 = vadd.f32 %v10833_v18, %v863_v36  ;;  %8810 = vmatprep.mubr.msk.bf16.mxu0 %vm9884_vm1, %v14469_v5  ;;  %v1183_v18 = vsel %vm1138_vm5, %v1180_v40, %v1182_v48  ;;  %v1971_v36 = vor.u32 %v1970_v4, %v1969_v6  ;;  %v14528_v40 = vshrl.u32 %v10222_v10, 16 }
 0x18b   : > { %v8628_v55 = vpop.f32.mrf.mxu0 }
 0x18c   : > { %14524 = vst [vmem:[#allocation44_spill] sm:$0xff] %v10935_v24  ;;  %v8831_v51 = vpop.f32.mrf.mxu1  ;;  %v10952_v55 = vsel %vm1909_vm6, %v1967_v27, %v1971_v36 }
 0x18d   : > { %v866_v16 = vpop.f32.mrf.mxu0  ;;  %14526 = vst [vmem:[#allocation46_spill] sm:$0xff] %v10952_v55 }
 0x18e   : > { %v10941_v62 = vpop.f32.mrf.mxu1  ;;  %9025 = vmatmul.mubr.msk.bf16.gmra.mxu1 %vm579_vm2, %v2354_v14  ;;  %v10945_v59 = vadd.f32 %v10849_v15, %v866_v16  ;;  %v14527_v15 = vshll.u32 %v10222_v10, 16 }
 0x18f   : > { %9028 = vmatprep.mubr.msk.bf16.mxu1 %vm9884_vm1, %v14469_v5  ;;  %v8629_v33 = vpop.f32.mrf.mxu0 }
 0x190   : > { %14525 = vst [vmem:[#allocation45_spill] sm:$0xff] %v10945_v59  ;;  %v8834_v35 = vpop.f32.mrf.mxu1  ;;  %v1974_v16 = vrot.slane %v14527_v15, 3  ;;  %v1973_v59 = vrot.slane %v14528_v40, 2 }
 0x191   : > { %v953_v51 = vpop.f32.mrf.mxu0  ;;  %8811 = vmatmul.mubr.msk.bf16.gmra.mxu0 %vm579_vm2, %v1183_v18  ;;  %v2357_v18 = vrot.slane %v10055_v0, 3 }
 0x192   : > { %v10955_v14 = vpop.f32.mrf.mxu1  ;;  %8814 = vmatprep.mubr.msk.bf16.mxu0 %vm9884_vm1, %v14469_v5  ;;  %v1975_v35 = vor.u32 %v1974_v16, %v1973_v59 }
 0x193   : > { %v8634_v4 = vpop.f32.mrf.mxu0  ;;  %v2358_v0 = vsel %vm2343_vm7, %v2355_v13, %v2357_v18 }
 0x194   : > { %v8835_v6 = vpop.f32.mrf.mxu1  ;;  %v10971_v24 = vsel %vm1909_vm6, %v1971_v36, %v1975_v35  ;;  %v14530_v4 = vshll.u32 %v10240_v44, 16  ;;  %v7764_v36 = vld [vmem:[%s14388_s1 + $0x18] sm:$0xf] }
 0x195   : > { %v956_v27 = vpop.f32.mrf.mxu0  ;;  %14529 = vst [vmem:[#allocation47_spill] sm:$0xff] %v10971_v24  ;;  %v2825_v13 = vsel %vm649_vm0, %v7764_v36, 0 }
 0x196   : > { %v10964_v33 = vpop.f32.mrf.mxu1  ;;  %9029 = vmatmul.mubr.msk.bf16.gmra.mxu1 %vm579_vm2, %v2356_v56  ;;  %v1978_v6 = vrot.slane %v14530_v4, 3  ;;  %v14531_v56 = vshrl.u32 %v10240_v44, 16 }
 0x197   : > { %9032 = vmatprep.mubr.msk.bf16.mxu1 %vm9884_vm1, %v14469_v5  ;;  %v8635_v15 = vpop.f32.mrf.mxu0 }
 0x198   : > { %v8838_v40 = vpop.f32.mrf.mxu1  ;;  %v1977_v1 = vrot.slane %v14531_v56, 2 }
 0x199   : > { %v961_v55 = vpop.f32.mrf.mxu0  ;;  %8815 = vmatmul.mubr.msk.bf16.gmra.mxu0 %vm579_vm2, %v1182_v48  ;;  %v2359_v40 = vrot.slane %v10073_v11, 3  ;;  %v14534_v11 = vshrl.u32 %v10258_v9, 16 }
 0x19a   : > { %v10974_v43 = vpop.f32.mrf.mxu1  ;;  %8914 = vmatprep.mubr.msk.bf16.mxu0 %vm9884_vm1, %v14469_v5  ;;  %v1979_v4 = vor.u32 %v1978_v6, %v1977_v1 }
 0x19b   : > { %v8638_v59 = vpop.f32.mrf.mxu0  ;;  %v1981_v1 = vrot.slane %v14534_v11, 2 }
 0x19c   : > { %v8839_v16 = vpop.f32.mrf.mxu1 }
 0x19d   : > { %v10986_v48 = vpop.f32.mrf.mxu0  ;;  %v10996_v16 = vsel %vm1909_vm6, %v1975_v35, %v1979_v4  ;;  %v2360_v35 = vsel %vm2343_vm7, %v2357_v18, %v2359_v40  ;;  %v954_v18 = vadd.f32 %v953_v51, %v10384_v12 }
 0x19e   : > { %v10988_v15 = vpop.f32.mrf.mxu1  ;;  %9033 = vmatmul.mubr.msk.bf16.gmra.mxu1 %vm579_vm2, %v2358_v0  ;;  %14532 = vst [vmem:[#allocation48_spill] sm:$0xff] %v10996_v16  ;;  %v14533_v0 = vshll.u32 %v10258_v9, 16  ;;  %v14536_v9 = vshrl.u32 %v10276_v2, 16 }
 0x19f   : > { %9036 = vmatprep.mubr.msk.bf16.mxu1 %vm9884_vm1, %v14469_v5  ;;  %v8639_v56 = vpop.f32.mrf.mxu0 }
 0x1a0   : > { %v8842_v59 = vpop.f32.mrf.mxu1  ;;  %v1982_v53 = vrot.slane %v14533_v0, 3 }
 0x1a1   : > { %v10998_v24 = vpop.f32.mrf.mxu0  ;;  %8915 = vmatmul.mubr.msk.bf16.vlgmr.msra.gmra.mxu0 %vm579_vm2, %v10569_v42 }
 0x1a2   : > { %v11002_v26 = vpop.f32.mrf.mxu1  ;;  %9101 = vmatpush3.bf16.msra.mxu0 %v2825_v13  ;;  %8918 = vmatprep.mubr.msk.bf16.mxu0 %vm9884_vm1, %v14469_v5  ;;  %v2361_v13 = vrot.slane %v10091_v23, 3  ;;  %v1983_v59 = vor.u32 %v1982_v53, %v1981_v1  ;;  %v1985_v23 = vrot.slane %v14536_v9, 2  ;;  %v957_v1 = vadd.f32 %v956_v27, %v10391_v7 }
 0x1a3   : > { %v8642_v6 = vpop.f32.mrf.mxu0  ;;  %9288 = vmatprep.subr.bf16.mxu0 %v14469_v5  ;;  %v2363_v9 = vrot.slane %v10109_v34, 3 }
 0x1a4   : > { %v8843_v36 = vpop.f32.mrf.mxu1  ;;  %v11022_v6 = vsel %vm1909_vm6, %v1979_v4, %v1983_v59  ;;  %v2362_v12 = vsel %vm2343_vm7, %v2359_v40, %v2361_v13 }
 0x1a5   : > { %v11012_v56 = vpop.f32.mrf.mxu0 }
 0x1a6   : > { %v11014_v42 = vpop.f32.mrf.mxu1  ;;  %9037 = vmatmul.mubr.msk.bf16.gmra.mxu1 %vm579_vm2, %v2360_v35  ;;  %v14535_v35 = vshll.u32 %v10276_v2, 16 }
 0x1a7   : > { %9040 = vmatprep.mubr.msk.bf16.mxu1 %vm9884_vm1, %v14469_v5  ;;  %v8643_v0 = vpop.f32.mrf.mxu0 }
 0x1a8   : > { %v8846_v11 = vpop.f32.mrf.mxu1  ;;  %v1986_v47 = vrot.slane %v14535_v35, 3 }
 0x1a9   : > { %v1290_v36 = vpop.f32.mrf.mxu0  ;;  %8919 = vmatmul.mubr.msk.bf16.gmra.mxu0 %vm579_vm2, %v10598_v25 }
 0x1aa   : > { %v11026_v16 = vpop.f32.mrf.mxu1  ;;  %v1473_v53 = vadd.f32 %v1290_v36, %v954_v18  ;;  %8922 = vmatprep.mubr.msk.bf16.mxu0 %vm9884_vm1, %v14469_v5  ;;  %v1987_v18 = vor.u32 %v1986_v47, %v1985_v23  ;;  %v14538_v47 = vshrl.u32 %v10294_v45, 16 }
 0x1ab   : > { %v8728_v51 = vpop.f32.mrf.mxu0 }
 0x1ac   : > { %v8847_v4 = vpop.f32.mrf.mxu1  ;;  %v11037_v25 = vadd.f32 %v10860_v49, %v1473_v53  ;;  %v962_v51 = vadd.f32 %v961_v55, %v10399_v41  ;;  %v11050_v49 = vsel %vm1909_vm6, %v1983_v59, %v1987_v18  ;;  %v1989_v23 = vrot.slane %v14538_v47, 2 }
 0x1ad   : > { %v1293_v0 = vpop.f32.mrf.mxu0  ;;  %v2364_v41 = vsel %vm2343_vm7, %v2361_v13, %v2363_v9  ;;  %v965_v59 = vadd.f32 %v10986_v48, %v10413_v22  ;;  %v970_v22 = vadd.f32 %v10998_v24, %v10423_v31  ;;  %v14540_v47 = vshrl.u32 %v10312_v8, 16 }
 0x1ae   : > { %v11039_v11 = vpop.f32.mrf.mxu1  ;;  %9041 = vmatmul.mubr.msk.bf16.gmra.mxu1 %vm579_vm2, %v2362_v12  ;;  %v1474_v35 = vadd.f32 %v1293_v0, %v957_v1  ;;  %v14537_v12 = vshll.u32 %v10294_v45, 16 }
 0x1af   : > { %9044 = vmatprep.mubr.msk.bf16.mxu1 %vm9884_vm1, %v14469_v5  ;;  %v8729_v40 = vpop.f32.mrf.mxu0 }
 0x1b0   : > { %v8850_v36 = vpop.f32.mrf.mxu1  ;;  %v11047_v7 = vadd.f32 %v10876_v29, %v1474_v35  ;;  %v1990_v34 = vrot.slane %v14537_v12, 3  ;;  %v2365_v40 = vrot.slane %v10127_v46, 3  ;;  %v14539_v46 = vshll.u32 %v10312_v8, 16 }
 0x1b1   : > { %v1298_v27 = vpop.f32.mrf.mxu0  ;;  %8923 = vmatmul.mubr.msk.bf16.gmra.mxu0 %vm579_vm2, %v10625_v3 }
 0x1b2   : > { %v11054_v53 = vpop.f32.mrf.mxu1  ;;  %v1475_v4 = vadd.f32 %v1298_v27, %v962_v51  ;;  %8926 = vmatprep.mubr.msk.bf16.mxu0 %vm9884_vm1, %v14469_v5  ;;  %v1991_v13 = vor.u32 %v1990_v34, %v1989_v23  ;;  %v1994_v34 = vrot.slane %v14539_v46, 3  ;;  %v1993_v23 = vrot.slane %v14540_v47, 2 }
 0x1b3   : > { %v8732_v29 = vpop.f32.mrf.mxu0  ;;  %v2366_v31 = vsel %vm2343_vm7, %v2363_v9, %v2365_v40 }
 0x1b4   : > { %v8851_v55 = vpop.f32.mrf.mxu1  ;;  %v11066_v3 = vadd.f32 %v10887_v58, %v1475_v4  ;;  %v11080_v48 = vsel %vm1909_vm6, %v1987_v18, %v1991_v13  ;;  %v973_v18 = vadd.f32 %v11012_v56, %v10433_v57  ;;  %v11104_v9 = vor.u32 %v1994_v34, %v1993_v23 }
 0x1b5   : > { %v1301_v1 = vpop.f32.mrf.mxu0 }
 0x1b6   : > { %v11068_v0 = vpop.f32.mrf.mxu1  ;;  %9045 = vmatmul.mubr.msk.bf16.gmra.mxu1 %vm579_vm2, %v2364_v41  ;;  %v1476_v35 = vadd.f32 %v1301_v1, %v965_v59  ;;  %v2367_v59 = vrot.slane %v10145_v60, 3 }
 0x1b7   : > { %9048 = vmatprep.mubr.msk.bf16.mxu1 %vm9884_vm1, %v14469_v5  ;;  %v8733_v36 = vpop.f32.mrf.mxu0 }
 0x1b8   : > { %v8854_v51 = vpop.f32.mrf.mxu1  ;;  %v11077_v58 = vadd.f32 %v10903_v30, %v1476_v35  ;;  %v2368_v60 = vsel %vm2343_vm7, %v2365_v40, %v2367_v59 }
 0x1b9   : > { %v1306_v27 = vpop.f32.mrf.mxu0  ;;  %8927 = vmatmul.mubr.msk.bf16.gmra.mxu0 %vm579_vm2, %v10652_v21 }
 0x1ba   : > { %v11084_v12 = vpop.f32.mrf.mxu1  ;;  %v1477_v4 = vadd.f32 %v1306_v27, %v970_v22  ;;  %8930 = vmatprep.mubr.msk.bf16.mxu0 %vm9884_vm1, %v14469_v5 }
 0x1bb   : > { %v8736_v30 = vpop.f32.mrf.mxu0 }
 0x1bc   : > { %v8855_v24 = vpop.f32.mrf.mxu1  ;;  %v11096_v21 = vadd.f32 %v10914_v39, %v1477_v4  ;;  %v11111_v39 = vsel %vm1909_vm6, %v1991_v13, %v11104_v9 }
 0x1bd   : > { %v1309_v41 = vpop.f32.mrf.mxu0 }
 0x1be   : > { %v11098_v29 = vpop.f32.mrf.mxu1  ;;  %9049 = vmatmul.mubr.msk.bf16.gmra.mxu1 %vm579_vm2, %v2366_v31  ;;  %v1478_v55 = vadd.f32 %v1309_v41, %v973_v18 }
 0x1bf   : > { %9052 = vmatprep.mubr.msk.bf16.mxu1 %vm9884_vm1, %v14469_v5  ;;  %v8737_v1 = vpop.f32.mrf.mxu0 }
 0x1c0   : > { %v8858_v35 = vpop.f32.mrf.mxu1  ;;  %v11107_v57 = vadd.f32 %v10930_v28, %v1478_v55 }
 0x1c1   : > { %v1314_v56 = vpop.f32.mrf.mxu0  ;;  %8931 = vmatmul.mubr.msk.bf16.gmra.mxu0 %vm579_vm2, %v10679_v50  ;;  %v14542_v35 = vld [vmem:[#allocation3_spill] sm:$0xff] }
 0x1c2   : > { %v11115_v36 = vpop.f32.mrf.mxu1  ;;  %v1479_v51 = vadd.f32 %v1314_v56, %v10445_v52  ;;  %8934 = vmatprep.mubr.msk.bf16.mxu0 %vm9884_vm1, %v14469_v5  ;;  %v2369_v52 = vrot.slane %v10168_v17, 3 }
 0x1c3   : > { %v8740_v22 = vpop.f32.mrf.mxu0 }
 0x1c4   : > { %v8859_v28 = vpop.f32.mrf.mxu1  ;;  %v11122_v27 = vadd.f32 %v10941_v62, %v1479_v51 }
 0x1c5   : > { %v1317_v13 = vpop.f32.mrf.mxu0  ;;  %v14543_v28 = vld [vmem:[#allocation4_spill] sm:$0xff] }
 0x1c6   : > { %v11124_v46 = vpop.f32.mrf.mxu1  ;;  %9053 = vmatmul.mubr.msk.bf16.gmra.mxu1 %vm579_vm2, %v2368_v60  ;;  %v1480_v50 = vadd.f32 %v1317_v13, %v10454_v38  ;;  %v2370_v38 = vsel %vm2343_vm7, %v2367_v59, %v2369_v52 }
 0x1c7   : > { %9056 = vmatprep.mubr.msk.bf16.mxu1 %vm9884_vm1, %v14469_v5  ;;  %v8741_v34 = vpop.f32.mrf.mxu0 }
 0x1c8   : > { %v8862_v47 = vpop.f32.mrf.mxu1  ;;  %v11132_v40 = vadd.f32 %v10955_v14, %v1480_v50  ;;  %v2373_v50 = vrot.slane %v10204_v54, 3 }
 0x1c9   : > { %v1322_v23 = vpop.f32.mrf.mxu0  ;;  %8935 = vmatmul.mubr.msk.bf16.gmra.mxu0 %vm579_vm2, %v10706_v19 }
 0x1ca   : > { %v11136_v62 = vpop.f32.mrf.mxu1  ;;  %v1481_v4 = vadd.f32 %v1322_v23, %v10464_v37  ;;  %8938 = vmatprep.mubr.msk.bf16.mxu0 %vm9884_vm1, %v14469_v5  ;;  %v2371_v37 = vrot.slane %v10186_v32, 3 }
 0x1cb   : > { %v8744_v31 = vpop.f32.mrf.mxu0 }
 0x1cc   : > { %v8863_v17 = vpop.f32.mrf.mxu1  ;;  %v11143_v30 = vadd.f32 %v10964_v33, %v1481_v4  ;;  %v14541_v33 = vld [vmem:[#allocation23_spill] sm:$0xff]  ;;  %v14544_v31 = vld [vmem:[#allocation5_spill] sm:$0xff] }
 0x1cd   : > { %v1325_v14 = vpop.f32.mrf.mxu0  ;;  %v2374_v17 = vsel %vm2343_vm7, %v2371_v37, %v2373_v50 }
 0x1ce   : > { %v11145_v24 = vpop.f32.mrf.mxu1  ;;  %9057 = vmatmul.mubr.msk.bf16.gmra.mxu1 %vm579_vm2, %v2370_v38  ;;  %v1482_v19 = vadd.f32 %v1325_v14, %v10474_v63  ;;  %v2372_v63 = vsel %vm2343_vm7, %v2369_v52, %v2371_v37  ;;  %v7811_v52 = vld [vmem:[%s14388_s1 + $0x1c] sm:$0xf] }
 0x1cf   : > { %9060 = vmatprep.mubr.msk.bf16.mxu1 %vm9884_vm1, %v14469_v5  ;;  %v8745_v18 = vpop.f32.mrf.mxu0 }
 0x1d0   : > { %v8866_v41 = vpop.f32.mrf.mxu1  ;;  %v11153_v55 = vadd.f32 %v10974_v43, %v1482_v19 }
 0x1d1   : > { %v1330_v59 = vpop.f32.mrf.mxu0  ;;  %8939 = vmatmul.mubr.msk.bf16.gmra.mxu0 %vm579_vm2, %v14541_v33  ;;  %v2375_v33 = vrot.slane %v10222_v10, 3 }
 0x1d2   : > { %v11157_v1 = vpop.f32.mrf.mxu1  ;;  %v1483_v56 = vadd.f32 %v1330_v59, %v14542_v35  ;;  %8942 = vmatprep.mubr.msk.bf16.mxu0 %vm9884_vm1, %v14469_v5 }
 0x1d3   : > { %v8748_v51 = vpop.f32.mrf.mxu0 }
 0x1d4   : > { %v8867_v32 = vpop.f32.mrf.mxu1  ;;  %v11164_v60 = vadd.f32 %v10988_v15, %v1483_v56  ;;  %v3322_v15 = vsel %vm649_vm0, %v7811_v52, 0 }
 0x1d5   : > { %v1333_v43 = vpop.f32.mrf.mxu0  ;;  %9195 = vmatpush3.bf16.msra.mxu1 %v3322_v15  ;;  %v14547_v32 = vld [vmem:[#allocation7_spill] sm:$0xff] }
 0x1d6   : > { %v11166_v22 = vpop.f32.mrf.mxu1  ;;  %9061 = vmatmul.mubr.msk.bf16.gmra.mxu1 %vm579_vm2, %v2372_v63  ;;  %v1484_v13 = vadd.f32 %v1333_v43, %v14543_v28  ;;  %v2376_v28 = vsel %vm2343_vm7, %v2373_v50, %v2375_v33 }
 0x1d7   : > { %9064 = vmatprep.mubr.msk.bf16.mxu1 %vm9884_vm1, %v14469_v5  ;;  %v8749_v34 = vpop.f32.mrf.mxu0 }
 0x1d8   : > { %v8870_v47 = vpop.f32.mrf.mxu1  ;;  %v11178_v23 = vadd.f32 %v11002_v26, %v1484_v13 }
 0x1d9   : > { %v1338_v4 = vpop.f32.mrf.mxu0  ;;  %8943 = vmatmul.mubr.msk.bf16.gmra.mxu0 %vm579_vm2, %v10764_v20  ;;  %v14545_v20 = vld [vmem:[#allocation6_spill] sm:$0xff]  ;;  %v14548_v47 = vld [vmem:[#allocation8_spill] sm:$0xff] }
 0x1da   : > { %v11182_v38 = vpop.f32.mrf.mxu1  ;;  %v1485_v54 = vadd.f32 %v1338_v4, %v14544_v31  ;;  %8946 = vmatprep.mubr.msk.bf16.mxu0 %vm9884_vm1, %v14469_v5  ;;  %v2377_v4 = vrot.slane %v10240_v44, 3 }
 0x1db   : > { %v8752_v14 = vpop.f32.mrf.mxu0 }
 0x1dc   : > { %v8871_v19 = vpop.f32.mrf.mxu1  ;;  %v11189_v18 = vadd.f32 %v11014_v42, %v1485_v54  ;;  %v14546_v42 = vld [vmem:[#allocation29_spill] sm:$0xff] }
 0x1dd   : > { %v1341_v26 = vpop.f32.mrf.mxu0  ;;  %v14549_v14 = vld [vmem:[#allocation9_spill] sm:$0xff] }
 0x1de   : > { %v11191_v41 = vpop.f32.mrf.mxu1  ;;  %9065 = vmatmul.mubr.msk.bf16.gmra.mxu1 %vm579_vm2, %v2374_v17  ;;  %v1486_v59 = vadd.f32 %v1341_v26, %v14545_v20  ;;  %v2378_v26 = vsel %vm2343_vm7, %v2375_v33, %v2377_v4 }
 0x1df   : > { %9068 = vmatprep.mubr.msk.bf16.mxu1 %vm9884_vm1, %v14469_v5  ;;  %v8753_v35 = vpop.f32.mrf.mxu0 }
 0x1e0   : > { %v8874_v56 = vpop.f32.mrf.mxu1  ;;  %v11199_v37 = vadd.f32 %v11026_v16, %v1486_v59 }
 0x1e1   : > { %v1346_v63 = vpop.f32.mrf.mxu0  ;;  %8947 = vmatmul.mubr.msk.bf16.gmra.mxu0 %vm579_vm2, %v14546_v42 }
 0x1e2   : > { %v11203_v51 = vpop.f32.mrf.mxu1  ;;  %v1487_v43 = vadd.f32 %v1346_v63, %v14547_v32  ;;  %8950 = vmatprep.mubr.msk.bf16.mxu0 %vm9884_vm1, %v14469_v5  ;;  %v14551_v63 = vld [vmem:[#allocation2_spill] sm:$0xff] }
 0x1e3   : > { %v8756_v13 = vpop.f32.mrf.mxu0  ;;  %v2379_v42 = vrot.slane %v14551_v63, 3 }
 0x1e4   : > { %v8875_v10 = vpop.f32.mrf.mxu1  ;;  %v11210_v52 = vadd.f32 %v11039_v11, %v1487_v43 }
 0x1e5   : > { %v1349_v16 = vpop.f32.mrf.mxu0  ;;  %v14553_v10 = vld [vmem:[#allocation11_spill] sm:$0xff] }
 0x1e6   : > { %v11212_v34 = vpop.f32.mrf.mxu1  ;;  %9069 = vmatmul.mubr.msk.bf16.gmra.mxu1 %vm579_vm2, %v2376_v28  ;;  %v1488_v15 = vadd.f32 %v1349_v16, %v14548_v47  ;;  %v2380_v47 = vsel %vm2343_vm7, %v2377_v4, %v2379_v42 }
 0x1e7   : > { %9072 = vmatprep.mubr.msk.bf16.mxu1 %vm9884_vm1, %v14469_v5  ;;  %v8757_v31 = vpop.f32.mrf.mxu0 }
 0x1e8   : > { %v8878_v54 = vpop.f32.mrf.mxu1  ;;  %v11220_v50 = vadd.f32 %v11054_v53, %v1488_v15 }
 0x1e9   : > { %v1354_v17 = vpop.f32.mrf.mxu0  ;;  %8951 = vmatmul.mubr.msk.bf16.gmra.mxu0 %vm579_vm2, %v10817_v61  ;;  %v14550_v61 = vld [vmem:[#allocation10_spill] sm:$0xff] }
 0x1ea   : > { %v11224_v11 = vpop.f32.mrf.mxu1  ;;  %v1489_v19 = vadd.f32 %v1354_v17, %v14549_v14  ;;  %8954 = vmatprep.mubr.msk.bf16.mxu0 %vm9884_vm1, %v14469_v5  ;;  %v14554_v14 = vld [vmem:[#allocation12_spill] sm:$0xff] }
 0x1eb   : > { %v8760_v20 = vpop.f32.mrf.mxu0 }
 0x1ec   : > { %v8879_v44 = vpop.f32.mrf.mxu1  ;;  %v11231_v59 = vadd.f32 %v11068_v0, %v1489_v19  ;;  %v14552_v0 = vld [vmem:[#allocation34_spill] sm:$0xff] }
 0x1ed   : > { %v1357_v53 = vpop.f32.mrf.mxu0 }
 0x1ee   : > { %v11233_v35 = vpop.f32.mrf.mxu1  ;;  %9073 = vmatmul.mubr.msk.bf16.gmra.mxu1 %vm579_vm2, %v2378_v26  ;;  %v1490_v56 = vadd.f32 %v1357_v53, %v14550_v61  ;;  %v2381_v26 = vrot.slane %v10276_v2, 3 }
 0x1ef   : > { %9076 = vmatprep.mubr.msk.bf16.mxu1 %vm9884_vm1, %v14469_v5  ;;  %v8761_v32 = vpop.f32.mrf.mxu0 }
 0x1f0   : > { %v8882_v43 = vpop.f32.mrf.mxu1  ;;  %v11241_v33 = vadd.f32 %v11084_v12, %v1490_v56  ;;  %v14556_v56 = vld [vmem:[#allocation13_spill] sm:$0xff]  ;;  %v2382_v32 = vsel %vm2343_vm7, %v2379_v42, %v2381_v26 }
 0x1f1   : > { %v1362_v28 = vpop.f32.mrf.mxu0  ;;  %8955 = vmatmul.mubr.msk.bf16.gmra.mxu0 %vm579_vm2, %v14552_v0 }
 0x1f2   : > { %v11245_v13 = vpop.f32.mrf.mxu1  ;;  %v1491_v16 = vadd.f32 %v1362_v28, %v14553_v10  ;;  %8958 = vmatprep.mubr.msk.bf16.mxu0 %vm9884_vm1, %v14469_v5  ;;  %v14557_v10 = vld [vmem:[#allocation14_spill] sm:$0xff] }
 0x1f3   : > { %v8764_v15 = vpop.f32.mrf.mxu0 }
 0x1f4   : > { %v8883_v31 = vpop.f32.mrf.mxu1  ;;  %v11252_v54 = vadd.f32 %v11098_v29, %v1491_v16  ;;  %v14555_v29 = vld [vmem:[#allocation37_spill] sm:$0xff] }
 0x1f5   : > { %v1365_v12 = vpop.f32.mrf.mxu0 }
 0x1f6   : > { %v11254_v17 = vpop.f32.mrf.mxu1  ;;  %9077 = vmatmul.mubr.msk.bf16.gmra.mxu1 %vm579_vm2, %v2380_v47  ;;  %v1492_v19 = vadd.f32 %v1365_v12, %v14554_v14  ;;  %v2383_v47 = vrot.slane %v10294_v45, 3 }
 0x1f7   : > { %9080 = vmatprep.mubr.msk.bf16.mxu1 %vm9884_vm1, %v14469_v5  ;;  %v8765_v20 = vpop.f32.mrf.mxu0 }
 0x1f8   : > { %v8886_v44 = vpop.f32.mrf.mxu1  ;;  %v11262_v4 = vadd.f32 %v11115_v36, %v1492_v19  ;;  %v14559_v19 = vld [vmem:[#allocation15_spill] sm:$0xff] }
 0x1f9   : > { %v1370_v53 = vpop.f32.mrf.mxu0  ;;  %8959 = vmatmul.mubr.msk.bf16.gmra.mxu0 %vm579_vm2, %v14555_v29  ;;  %v2384_v44 = vsel %vm2343_vm7, %v2381_v26, %v2383_v47 }
 0x1fa   : > { %v11266_v61 = vpop.f32.mrf.mxu1  ;;  %v1493_v63 = vadd.f32 %v1370_v53, %v14556_v56  ;;  %8962 = vmatprep.mubr.msk.bf16.mxu0 %vm9884_vm1, %v14469_v5 }
 0x1fb   : > { %v8768_v43 = vpop.f32.mrf.mxu0 }
 0x1fc   : > { %v8887_v2 = vpop.f32.mrf.mxu1  ;;  %v11273_v28 = vadd.f32 %v11124_v46, %v1493_v63  ;;  %v14558_v46 = vld [vmem:[#allocation40_spill] sm:$0xff]  ;;  %v2385_v43 = vrot.slane %v10312_v8, 3 }
 0x1fd   : > { %v1373_v36 = vpop.f32.mrf.mxu0  ;;  %v14561_v63 = vld [vmem:[#allocation16_spill] sm:$0xff] }
 0x1fe   : > { %v11275_v0 = vpop.f32.mrf.mxu1  ;;  %9081 = vmatmul.mubr.msk.bf16.gmra.mxu1 %vm579_vm2, %v2382_v32  ;;  %v1494_v16 = vadd.f32 %v1373_v36, %v14557_v10 }
 0x1ff   : > { %9084 = vmatprep.mubr.msk.bf16.mxu1 %vm9884_vm1, %v14469_v5  ;;  %v8769_v15 = vpop.f32.mrf.mxu0 }
 0x200   : > { %v8890_v31 = vpop.f32.mrf.mxu1  ;;  %v11283_v42 = vadd.f32 %v11136_v62, %v1494_v16  ;;  %v14564_v15 = vld [vmem:[#allocation17_spill] sm:$0xff] }
 0x201   : > { %v1378_v12 = vpop.f32.mrf.mxu0  ;;  %8963 = vmatmul.mubr.msk.bf16.gmra.mxu0 %vm579_vm2, %v14558_v46 }
 0x202   : > { %v11287_v14 = vpop.f32.mrf.mxu1  ;;  %v1495_v20 = vadd.f32 %v1378_v12, %v14559_v19  ;;  %8966 = vmatprep.mubr.msk.bf16.mxu0 %vm9884_vm1, %v14469_v5  ;;  %v2386_v12 = vsel %vm2343_vm7, %v2383_v47, %v2385_v43 }
 0x203   : > { %v8772_v53 = vpop.f32.mrf.mxu0 }
 0x204   : > { %v8891_v45 = vpop.f32.mrf.mxu1  ;;  %v11294_v29 = vadd.f32 %v11145_v24, %v1495_v20  ;;  %v14563_v24 = vld [vmem:[#allocation43_spill] sm:$0xff] }
 0x205   : > { %v1381_v62 = vpop.f32.mrf.mxu0  ;;  %v14567_v45 = vld [vmem:[#allocation25_spill] sm:$0xff] }
 0x206   : > { %14560 = vst [vmem:[#allocation23_spill] sm:$0xff] %v11294_v29  ;;  %v11296_v56 = vpop.f32.mrf.mxu1  ;;  %9085 = vmatmul.mubr.msk.bf16.gmra.mxu1 %vm579_vm2, %v2384_v44  ;;  %v1496_v32 = vadd.f32 %v1381_v62, %v14561_v63  ;;  %v14566_v44 = vld [vmem:[#allocation18_spill] sm:$0xff]  ;;  %v2387_v62 = vrot.slane %v14567_v45, 3 }
 0x207   : > { %9088 = vmatprep.mubr.msk.bf16.mxu1 %vm9884_vm1, %v14469_v5  ;;  %v8773_v2 = vpop.f32.mrf.mxu0  ;;  %v9843_v29 = vld [vmem:[%s9945_s27 + $0x44] sm:$0xf] }
 0x208   : > { %v8894_v36 = vpop.f32.mrf.mxu1  ;;  %v11304_v26 = vadd.f32 %v11157_v1, %v1496_v32  ;;  %v14569_v2 = vld [vmem:[#allocation46_spill] sm:$0xff] }
 0x209   : > { %v1386_v10 = vpop.f32.mrf.mxu0  ;;  %8967 = vmatmul.mubr.msk.bf16.gmra.mxu0 %vm579_vm2, %v14563_v24 }
 0x20a   : > { %14562 = vst [vmem:[#allocation3_spill] sm:$0xff] %v11304_v26  ;;  %v11308_v16 = vpop.f32.mrf.mxu1  ;;  %v1497_v31 = vadd.f32 %v1386_v10, %v14564_v15  ;;  %8970 = vmatprep.mubr.msk.bf16.mxu0 %vm9884_vm1, %v14469_v5  ;;  %v14570_v10 = vld [vmem:[#allocation19_spill] sm:$0xff]  ;;  %v2388_v15 = vsel %vm2343_vm7, %v2385_v43, %v2387_v62  ;;  %v9833_v43 = vld [vmem:[%s9945_s27 + $0x1c] sm:$0xf] }
 0x20b   : > { %v8776_v46 = vpop.f32.mrf.mxu0 }
 0x20c   : > { %v8895_v8 = vpop.f32.mrf.mxu1  ;;  %v11315_v19 = vadd.f32 %v11166_v22, %v1497_v31  ;;  %v9831_v31 = vld [vmem:[%s9945_s27 + $0x14] sm:$0xf] }
 0x20d   : > { %v1389_v1 = vpop.f32.mrf.mxu0 }
 0x20e   : > { %14565 = vst [vmem:[#allocation4_spill] sm:$0xff] %v11315_v19  ;;  %v11317_v20 = vpop.f32.mrf.mxu1  ;;  %9089 = vmatmul.mubr.msk.bf16.gmra.mxu1 %vm579_vm2, %v2386_v12  ;;  %v1498_v53 = vadd.f32 %v1389_v1, %v14566_v44  ;;  %v9832_v12 = vld [vmem:[%s9945_s27 + $0x18] sm:$0xf] }
 0x20f   : > { %9092 = vmatprep.mubr.msk.bf16.mxu1 %vm9884_vm1, %v14469_v5  ;;  %v8777_v47 = vpop.f32.mrf.mxu0  ;;  %v11337_v46 = vcombine.low %v9831_v31, %v9832_v12 }
 0x210   : > { %v8898_v63 = vpop.f32.mrf.mxu1  ;;  %v11325_v32 = vadd.f32 %v11182_v38, %v1498_v53  ;;  %v14572_v47 = vld [vmem:[#allocation20_spill] sm:$0xff] }
 0x211   : > { %v1394_v22 = vpop.f32.mrf.mxu0  ;;  %8971 = vmatmul.mubr.msk.bf16.gmra.mxu0 %vm579_vm2, %v14569_v2 }
 0x212   : > { %14568 = vst [vmem:[#allocation5_spill] sm:$0xff] %v11325_v32  ;;  %v11329_v36 = vpop.f32.mrf.mxu1  ;;  %v1499_v24 = vadd.f32 %v1394_v22, %v14570_v10  ;;  %8974 = vmatprep.mubr.msk.bf16.mxu0 %vm9884_vm1, %v14469_v5  ;;  %v9834_v22 = vld [vmem:[%s9945_s27 + $0x20] sm:$0xf]  ;;  %v3094_v10 = vshll.u32 %v11337_v46, 16  ;;  %v9836_v32 = vld [vmem:[%s9945_s27 + $0x28] sm:$0xf] }
 0x213   : > { %v8780_v38 = vpop.f32.mrf.mxu0  ;;  %v11350_v2 = vcombine.low %v9833_v43, %v9834_v22 }
 0x214   : > { %v8899_v8 = vpop.f32.mrf.mxu1  ;;  %v11340_v1 = vadd.f32 %v11191_v41, %v1499_v24  ;;  %v14574_v38 = vld [vmem:[#allocation47_spill] sm:$0xff]  ;;  %v3096_v43 = vrot.slane %v3094_v10, 1  ;;  %v9835_v10 = vld [vmem:[%s9945_s27 + $0x24] sm:$0xf] }
 0x215   : > { %v1397_v44 = vpop.f32.mrf.mxu0  ;;  %v14575_v8 = vld [vmem:[#allocation21_spill] sm:$0xff]  ;;  %v3098_v22 = vshll.u32 %v11350_v2, 16  ;;  %v11376_v19 = vcombine.low %v9835_v10, %v9836_v32 }
 0x216   : > { %14571 = vst [vmem:[#allocation6_spill] sm:$0xff] %v11340_v1  ;;  %v11342_v53 = vpop.f32.mrf.mxu1  ;;  %9093 = vmatmul.mubr.msk.bf16.gmra.mxu1 %vm579_vm2, %v2388_v15  ;;  %v1500_v63 = vadd.f32 %v1397_v44, %v14572_v47  ;;  %v3092_v47 = vshrl.u32 %v11337_v46, 16 }
 0x217   : > { %9096 = vmatprep.mubr.msk.bf16.mxu1 %vm9884_vm1, %v14469_v5  ;;  %v8781_v31 = vpop.f32.mrf.mxu0  ;;  %v3100_v1 = vrot.slane %v3098_v22, 1 }
 0x218   : > { %v8902_v12 = vpop.f32.mrf.mxu1  ;;  %v11354_v41 = vadd.f32 %v11203_v51, %v1500_v63 }
 0x219   : > { %v1402_v24 = vpop.f32.mrf.mxu0  ;;  %8975 = vmatmul.mubr.msk.bf16.gmra.mxu0 %vm579_vm2, %v14574_v38 }
 0x21a   : > { %14573 = vst [vmem:[#allocation29_spill] sm:$0xff] %v11354_v41  ;;  %v11358_v15 = vpop.f32.mrf.mxu1  ;;  %v1501_v44 = vadd.f32 %v1402_v24, %v14575_v8  ;;  %8978 = vmatprep.mubr.msk.bf16.mxu0 %vm9884_vm1, %v14469_v5  ;;  %v14577_v24 = vld [vmem:[#allocation22_spill] sm:$0xff]  ;;  %v3097_v41 = vor.u32 %v3096_v43, %v3092_v47  ;;  %v3102_v47 = vshrl.u32 %v11350_v2, 16 }
 0x21b   : > { %v8784_v51 = vpop.f32.mrf.mxu0 }
 0x21c   : > { %v8903_v63 = vpop.f32.mrf.mxu1  ;;  %v11366_v31 = vadd.f32 %v11212_v34, %v1501_v44  ;;  %v3101_v32 = vsel %vm395_vm3, %v3097_v41, %v3100_v1  ;;  %v3104_v41 = vor.u32 %v3102_v47, %v3100_v1 }
 0x21d   : > { %v1405_v12 = vpop.f32.mrf.mxu0 }
 0x21e   : > { %14576 = vst [vmem:[#allocation7_spill] sm:$0xff] %v11366_v31  ;;  %v11368_v38 = vpop.f32.mrf.mxu1  ;;  %9097 = vmatmul.mubr.msk.bf16.gmra.mxu1 %vm579_vm2, %v2387_v62  ;;  %v1502_v8 = vadd.f32 %v1405_v12, %v14577_v24  ;;  %v14579_v31 = vld [vmem:[#allocation48_spill] sm:$0xff] }
 0x21f   : > { %9196 = vmatprep.mubr.msk.bf16.mxu1 %vm9884_vm1, %v14469_v5  ;;  %v8785_v51 = vpop.f32.mrf.mxu0  ;;  %v14580_v12 = vld [vmem:[#allocation24_spill] sm:$0xff] }
 0x220   : > { %v8906_v63 = vpop.f32.mrf.mxu1  ;;  %v11379_v34 = vadd.f32 %v11224_v11, %v1502_v8  ;;  %v3105_v11 = vshll.u32 %v11376_v19, 16  ;;  %v14582_v51 = vld [vmem:[#allocation26_spill] sm:$0xff] }
 0x221   : > { %v1410_v44 = vpop.f32.mrf.mxu0  ;;  %8979 = vmatmul.mubr.msk.bf16.gmra.mxu0 %vm579_vm2, %v14579_v31 }
 0x222   : > { %14578 = vst [vmem:[#allocation8_spill] sm:$0xff] %v11379_v34  ;;  %v11383_v62 = vpop.f32.mrf.mxu1  ;;  %v1503_v24 = vadd.f32 %v1410_v44, %v14580_v12  ;;  %8982 = vmatprep.mubr.msk.bf16.mxu0 %vm9884_vm1, %v14469_v5  ;;  %v3107_v44 = vrot.slane %v3105_v11, 1  ;;  %v9837_v12 = vld [vmem:[%s9945_s27 + $0x2c] sm:$0xf]  ;;  %v9838_v34 = vld [vmem:[%s9945_s27 + $0x30] sm:$0xf] }
 0x223   : > { %v8788_v43 = vpop.f32.mrf.mxu0  ;;  %v11402_v26 = vcombine.low %v9837_v12, %v9838_v34  ;;  %v3109_v34 = vshrl.u32 %v11376_v19, 16 }
 0x224   : > { %v8907_v22 = vpop.f32.mrf.mxu1  ;;  %v11392_v8 = vadd.f32 %v11233_v35, %v1503_v24  ;;  %v3108_v1 = vsel %vm395_vm3, %v3104_v41, %v3107_v44 }
 0x225   : > { %v1413_v31 = vpop.f32.mrf.mxu0  ;;  %v3111_v41 = vor.u32 %v3109_v34, %v3107_v44 }
 0x226   : > { %14581 = vst [vmem:[#allocation9_spill] sm:$0xff] %v11392_v8  ;;  %v11394_v10 = vpop.f32.mrf.mxu1  ;;  %9197 = vmatmul.mubr.msk.bf16.vlgmr.msra.gmra.mxu1 %vm579_vm2, %v3101_v32  ;;  %v1504_v63 = vadd.f32 %v1413_v31, %v14582_v51  ;;  %v14584_v31 = vld [vmem:[#allocation27_spill] sm:$0xff] }
 0x227   : > { %9200 = vmatprep.mubr.msk.bf16.mxu1 %vm9884_vm1, %v14469_v5  ;;  %v8789_v43 = vpop.f32.mrf.mxu0 }
 0x228   : > { %v8910_v22 = vpop.f32.mrf.mxu1  ;;  %v11405_v35 = vadd.f32 %v11245_v13, %v1504_v63  ;;  %v3112_v13 = vshll.u32 %v11402_v26, 16  ;;  %v14586_v43 = vld [vmem:[#allocation28_spill] sm:$0xff] }
 0x229   : > { %v1418_v24 = vpop.f32.mrf.mxu0  ;;  %8983 = vmatmul.mubr.msk.bf16.gmra.mxu0 %vm579_vm2, %v11022_v6 }
 0x22a   : > { %14583 = vst [vmem:[#allocation10_spill] sm:$0xff] %v11405_v35  ;;  %v11409_v32 = vpop.f32.mrf.mxu1  ;;  %v1505_v51 = vadd.f32 %v1418_v24, %v14584_v31  ;;  %8986 = vmatprep.mubr.msk.bf16.mxu0 %vm9884_vm1, %v14469_v5  ;;  %v3114_v24 = vrot.slane %v3112_v13, 1  ;;  %v9839_v31 = vld [vmem:[%s9945_s27 + $0x34] sm:$0xf]  ;;  %v9840_v35 = vld [vmem:[%s9945_s27 + $0x38] sm:$0xf] }
 0x22b   : > { %v8792_v47 = vpop.f32.mrf.mxu0  ;;  %v11428_v8 = vcombine.low %v9839_v31, %v9840_v35  ;;  %v3116_v35 = vshrl.u32 %v11402_v26, 16 }
 0x22c   : > { %v8911_v11 = vpop.f32.mrf.mxu1  ;;  %v11418_v63 = vadd.f32 %v11254_v17, %v1505_v51  ;;  %v3115_v44 = vsel %vm395_vm3, %v3111_v41, %v3114_v24 }
 0x22d   : > { %v1421_v6 = vpop.f32.mrf.mxu0  ;;  %v3118_v41 = vor.u32 %v3116_v35, %v3114_v24  ;;  %v14592_v24 = vld [vmem:[#allocation32_spill] sm:$0xff] }
 0x22e   : > { %14585 = vst [vmem:[#allocation2_spill] sm:$0xff] %v11418_v63  ;;  %v11420_v12 = vpop.f32.mrf.mxu1  ;;  %9201 = vmatmul.mubr.msk.bf16.gmra.mxu1 %vm579_vm2, %v3108_v1  ;;  %v1506_v22 = vadd.f32 %v1421_v6, %v14586_v43  ;;  %v14588_v6 = vld [vmem:[#allocation30_spill] sm:$0xff] }
 0x22f   : > { %9204 = vmatprep.mubr.msk.bf16.mxu1 %vm9884_vm1, %v14469_v5  ;;  %v8793_v47 = vpop.f32.mrf.mxu0 }
 0x230   : > { %v9010_v11 = vpop.f32.mrf.mxu1  ;;  %v11431_v17 = vadd.f32 %v11266_v61, %v1506_v22  ;;  %v3119_v61 = vshll.u32 %v11428_v8, 16  ;;  %v14590_v47 = vld [vmem:[#allocation31_spill] sm:$0xff] }
 0x231   : > { %v1426_v51 = vpop.f32.mrf.mxu0  ;;  %8987 = vmatmul.mubr.msk.bf16.gmra.mxu0 %vm579_vm2, %v11050_v49 }
 0x232   : > { %14587 = vst [vmem:[#allocation34_spill] sm:$0xff] %v11431_v17  ;;  %v11435_v1 = vpop.f32.mrf.mxu1  ;;  %v1507_v43 = vadd.f32 %v1426_v51, %v14588_v6  ;;  %8990 = vmatprep.mubr.msk.bf16.mxu0 %vm9884_vm1, %v14469_v5  ;;  %v3121_v51 = vrot.slane %v3119_v61, 1  ;;  %v9841_v6 = vld [vmem:[%s9945_s27 + $0x3c] sm:$0xf]  ;;  %v9842_v17 = vld [vmem:[%s9945_s27 + $0x40] sm:$0xf] }
 0x233   : > { %v8796_v34 = vpop.f32.mrf.mxu0  ;;  %v11454_v63 = vcombine.low %v9841_v6, %v9842_v17 }
 0x234   : > { %v9011_v13 = vpop.f32.mrf.mxu1  ;;  %v11444_v22 = vadd.f32 %v11275_v0, %v1507_v43  ;;  %v3122_v17 = vsel %vm395_vm3, %v3118_v41, %v3121_v51 }
 0x235   : > { %v1429_v49 = vpop.f32.mrf.mxu0  ;;  %v3126_v61 = vshll.u32 %v11454_v63, 16 }
 0x236   : > { %14589 = vst [vmem:[#allocation11_spill] sm:$0xff] %v11444_v22  ;;  %v11446_v31 = vpop.f32.mrf.mxu1  ;;  %9205 = vmatmul.mubr.msk.bf16.gmra.mxu1 %vm579_vm2, %v3115_v44  ;;  %v1508_v11 = vadd.f32 %v1429_v49, %v14590_v47  ;;  %v1998_v44 = vshrl.u32 %v14567_v45, 16  ;;  %v2001_v49 = vshll.u32 %v14567_v45, 16 }
 0x237   : > { %9208 = vmatprep.mubr.msk.bf16.mxu1 %vm9884_vm1, %v14469_v5  ;;  %v8797_v34 = vpop.f32.mrf.mxu0  ;;  %v3128_v22 = vrot.slane %v3126_v61, 1 }
 0x238   : > { %v9014_v13 = vpop.f32.mrf.mxu1  ;;  %v11457_v0 = vadd.f32 %v11287_v14, %v1508_v11  ;;  %v3123_v14 = vshrl.u32 %v11428_v8, 16  ;;  %v2000_v34 = vrot.slane %v1998_v44, 2 }
 0x239   : > { %v1434_v43 = vpop.f32.mrf.mxu0  ;;  %8991 = vmatmul.mubr.msk.bf16.gmra.mxu0 %vm579_vm2, %v11080_v48  ;;  %v2003_v13 = vrot.slane %v2001_v49, 3 }
 0x23a   : > { %14591 = vst [vmem:[#allocation12_spill] sm:$0xff] %v11457_v0  ;;  %v11463_v47 = vpop.f32.mrf.mxu1  ;;  %v1509_v35 = vadd.f32 %v1434_v43, %v14592_v24  ;;  %8994 = vmatprep.mubr.msk.bf16.mxu0 %vm9884_vm1, %v14469_v5  ;;  %v14594_v24 = vld [vmem:[#allocation33_spill] sm:$0xff]  ;;  %v3125_v41 = vor.u32 %v3123_v14, %v3121_v51  ;;  %v3130_v51 = vshrl.u32 %v11454_v63, 16 }
 0x23b   : > { %v8800_v48 = vpop.f32.mrf.mxu0 }
 0x23c   : > { %v9015_v11 = vpop.f32.mrf.mxu1  ;;  %v11472_v6 = vadd.f32 %v11296_v56, %v1509_v35  ;;  %v9844_v48 = vld [vmem:[%s9945_s27 + $0x48] sm:$0xf] }
 0x23d   : > { %v1437_v45 = vpop.f32.mrf.mxu0  ;;  %v11482_v11 = vcombine.low %v9843_v29, %v9844_v48  ;;  %v3129_v29 = vsel %vm395_vm3, %v3125_v41, %v3128_v22  ;;  %v14598_v48 = vld [vmem:[#allocation36_spill] sm:$0xff]  ;;  %v3132_v41 = vor.u32 %v3130_v51, %v3128_v22 }
 0x23e   : > { %14593 = vst [vmem:[#allocation37_spill] sm:$0xff] %v11472_v6  ;;  %v11474_v43 = vpop.f32.mrf.mxu1  ;;  %9209 = vmatmul.mubr.msk.bf16.gmra.mxu1 %vm579_vm2, %v3122_v17  ;;  %v1510_v0 = vadd.f32 %v1437_v45, %v14594_v24  ;;  %v2004_v17 = vor.u32 %v2003_v13, %v2000_v34  ;;  %v14596_v24 = vld [vmem:[#allocation35_spill] sm:$0xff] }
 0x23f   : > { %9212 = vmatprep.mubr.msk.bf16.mxu1 %vm9884_vm1, %v14469_v5  ;;  %v8801_v56 = vpop.f32.mrf.mxu0  ;;  %v3137_v51 = vshrl.u32 %v11482_v11, 16 }
 0x240   : > { %v9018_v35 = vpop.f32.mrf.mxu1  ;;  %v11485_v44 = vadd.f32 %v11308_v16, %v1510_v0  ;;  %v3133_v16 = vshll.u32 %v11482_v11, 16  ;;  %v2005_v34 = vsel %vm1909_vm6, %v11104_v9, %v2004_v17 }
 0x241   : > { %v1442_v49 = vpop.f32.mrf.mxu0  ;;  %8995 = vmatmul.mubr.msk.bf16.gmra.mxu0 %vm579_vm2, %v11111_v39 }
 0x242   : > { %14595 = vst [vmem:[#allocation13_spill] sm:$0xff] %v11485_v44  ;;  %v11489_v45 = vpop.f32.mrf.mxu1  ;;  %v1511_v6 = vadd.f32 %v1442_v49, %v14596_v24  ;;  %8998 = vmatprep.mubr.msk.bf16.mxu0 %vm9884_vm1, %v14469_v5  ;;  %v3135_v35 = vrot.slane %v3133_v16, 1  ;;  %v9845_v49 = vld [vmem:[%s9945_s27 + $0x4c] sm:$0xf]  ;;  %v9846_v24 = vld [vmem:[%s9945_s27 + $0x50] sm:$0xf] }
 0x243   : > { %v8804_v0 = vpop.f32.mrf.mxu0 }
 0x244   : > { %v9019_v14 = vpop.f32.mrf.mxu1  ;;  %v11498_v39 = vadd.f32 %v11317_v20, %v1511_v6  ;;  %v11510_v0 = vcombine.low %v9845_v49, %v9846_v24  ;;  %v3136_v22 = vsel %vm395_vm3, %v3132_v41, %v3135_v35  ;;  %v3139_v41 = vor.u32 %v3137_v51, %v3135_v35 }
 0x245   : > { %v1445_v61 = vpop.f32.mrf.mxu0 }
 0x246   : > { %14597 = vst [vmem:[#allocation14_spill] sm:$0xff] %v11498_v39  ;;  %v11502_v13 = vpop.f32.mrf.mxu1  ;;  %9213 = vmatmul.mubr.msk.bf16.gmra.mxu1 %vm579_vm2, %v3129_v29  ;;  %v1512_v56 = vadd.f32 %v1445_v61, %v14598_v48  ;;  %v14600_v61 = vld [vmem:[#allocation38_spill] sm:$0xff]  ;;  %v3140_v16 = vshll.u32 %v11510_v0, 16 }
 0x247   : > { %9216 = vmatprep.mubr.msk.bf16.mxu1 %vm9884_vm1, %v14469_v5  ;;  %v8805_v20 = vpop.f32.mrf.mxu0 }
 0x248   : > { %v9022_v6 = vpop.f32.mrf.mxu1  ;;  %v11513_v14 = vadd.f32 %v11329_v36, %v1512_v56  ;;  %v14602_v20 = vld [vmem:[#allocation39_spill] sm:$0xff] }
 0x249   : > { %v1450_v9 = vpop.f32.mrf.mxu0  ;;  %8999 = vmatmul.mubr.msk.bf16.gmra.mxu0 %vm579_vm2, %v2005_v34 }
 0x24a   : > { %14599 = vst [vmem:[#allocation40_spill] sm:$0xff] %v11513_v14  ;;  %v11516_v29 = vpop.f32.mrf.mxu1  ;;  %v1513_v48 = vadd.f32 %v1450_v9, %v14600_v61  ;;  %9002 = vmatprep.mubr.msk.bf16.mxu0 %vm9884_vm1, %v14469_v5  ;;  %v3142_v9 = vrot.slane %v3140_v16, 1  ;;  %v9847_v61 = vld [vmem:[%s9945_s27 + $0x54] sm:$0xf]  ;;  %v9848_v14 = vld [vmem:[%s9945_s27 + $0x58] sm:$0xf] }
 0x24b   : > { %v8808_v36 = vpop.f32.mrf.mxu0  ;;  %v11535_v39 = vcombine.low %v9847_v61, %v9848_v14  ;;  %v3144_v14 = vshrl.u32 %v11510_v0, 16 }
 0x24c   : > { %v9023_v56 = vpop.f32.mrf.mxu1  ;;  %v11525_v49 = vadd.f32 %v11342_v53, %v1513_v48  ;;  %v3143_v35 = vsel %vm395_vm3, %v3139_v41, %v3142_v9 }
 0x24d   : > { %v1453_v34 = vpop.f32.mrf.mxu0  ;;  %v3147_v51 = vshll.u32 %v11535_v39, 16 }
 0x24e   : > { %14601 = vst [vmem:[#allocation15_spill] sm:$0xff] %v11525_v49  ;;  %v11527_v24 = vpop.f32.mrf.mxu1  ;;  %9217 = vmatmul.mubr.msk.bf16.gmra.mxu1 %vm579_vm2, %v3136_v22  ;;  %v1514_v6 = vadd.f32 %v1453_v34, %v14602_v20  ;;  %v14604_v34 = vld [vmem:[#allocation41_spill] sm:$0xff] }
 0x24f   : > { %9220 = vmatprep.mubr.msk.bf16.mxu1 %vm9884_vm1, %v14469_v5  ;;  %v8809_v36 = vpop.f32.mrf.mxu0 }
 0x250   : > { %v9026_v56 = vpop.f32.mrf.mxu1  ;;  %v11538_v53 = vadd.f32 %v11358_v15, %v1514_v6 }
 0x251   : > { %v1458_v48 = vpop.f32.mrf.mxu0  ;;  %9003 = vmatmul.mubr.msk.bf16.gmra.mxu0 %vm579_vm2, %v2004_v17  ;;  %v7835_v17 = vld [vmem:[%s14388_s1 + $0x20] sm:$0xf] }
 0x252   : > { %14603 = vst [vmem:[#allocation16_spill] sm:$0xff] %v11538_v53  ;;  %v11541_v22 = vpop.f32.mrf.mxu1  ;;  %v1515_v20 = vadd.f32 %v1458_v48, %v14604_v34  ;;  %9102 = vmatprep.mubr.msk.bf16.mxu0 %vm9884_vm1, %v14469_v5  ;;  %v14606_v56 = vld [vmem:[#allocation42_spill] sm:$0xff]  ;;  %v3146_v48 = vor.u32 %v3144_v14, %v3142_v9  ;;  %v3149_v34 = vrot.slane %v3147_v51, 1 }
 0x253   : > { %v8812_v15 = vpop.f32.mrf.mxu0 }
 0x254   : > { %v9027_v16 = vpop.f32.mrf.mxu1  ;;  %v11550_v6 = vadd.f32 %v11368_v38, %v1515_v20  ;;  %v9849_v15 = vld [vmem:[%s9945_s27 + $0x5c] sm:$0xf]  ;;  %v3150_v14 = vsel %vm395_vm3, %v3146_v48, %v3149_v34 }
 0x255   : > { %v1461_v61 = vpop.f32.mrf.mxu0  ;;  %v9850_v16 = vld [vmem:[%s9945_s27 + $0x60] sm:$0xf] }
 0x256   : > { %14605 = vst [vmem:[#allocation43_spill] sm:$0xff] %v11550_v6  ;;  %v11555_v36 = vpop.f32.mrf.mxu1  ;;  %9221 = vmatmul.mubr.msk.bf16.gmra.mxu1 %vm579_vm2, %v3143_v35  ;;  %v1516_v41 = vadd.f32 %v1461_v61, %v14606_v56  ;;  %v11563_v38 = vcombine.low %v9849_v15, %v9850_v16  ;;  %v3704_v6 = vsel %vm649_vm0, %v7835_v17, 0  ;;  %v14608_v61 = vld [vmem:[#allocation44_spill] sm:$0xff] }
 0x257   : > { %9224 = vmatprep.mubr.msk.bf16.mxu1 %vm9884_vm1, %v14469_v5  ;;  %v8813_v20 = vpop.f32.mrf.mxu0 }
 0x258   : > { %v9030_v53 = vpop.f32.mrf.mxu1  ;;  %v11567_v49 = vadd.f32 %v11383_v62, %v1516_v41  ;;  %v3154_v62 = vshll.u32 %v11563_v38, 16  ;;  %v9851_v20 = vld [vmem:[%s9945_s27 + $0x64] sm:$0xf] }
 0x259   : > { %v1466_v44 = vpop.f32.mrf.mxu0  ;;  %9103 = vmatmul.mubr.msk.bf16.vlgmr.msra.gmra.mxu0 %vm579_vm2, %v11337_v46  ;;  %v3151_v53 = vshrl.u32 %v11535_v39, 16 }
 0x25a   : > { %14607 = vst [vmem:[#allocation17_spill] sm:$0xff] %v11567_v49  ;;  %v11571_v35 = vpop.f32.mrf.mxu1  ;;  %v1517_v9 = vadd.f32 %v1466_v44, %v14608_v61  ;;  %9289 = vmatpush3.bf16.msra.mxu0 %v3704_v6  ;;  %9106 = vmatprep.mubr.msk.bf16.mxu0 %vm9884_vm1, %v14469_v5  ;;  %v14609_v44 = vld [vmem:[#allocation45_spill] sm:$0xff]  ;;  %v3156_v16 = vrot.slane %v3154_v62, 1  ;;  %v9852_v61 = vld [vmem:[%s9945_s27 + $0x68] sm:$0xf] }
 0x25b   : > { %v8816_v51 = vpop.f32.mrf.mxu0  ;;  %v3153_v48 = vor.u32 %v3151_v53, %v3149_v34  ;;  %v11590_v49 = vcombine.low %v9851_v20, %v9852_v61  ;;  %v3158_v53 = vshrl.u32 %v11563_v38, 16 }
 0x25c   : > { %v9031_v17 = vpop.f32.mrf.mxu1  ;;  %v11580_v56 = vadd.f32 %v11394_v10, %v1517_v9 }
 0x25d   : > { %v1469_v41 = vpop.f32.mrf.mxu0  ;;  %v3157_v34 = vsel %vm395_vm3, %v3153_v48, %v3156_v16  ;;  %v3160_v48 = vor.u32 %v3158_v53, %v3156_v16  ;;  %v3165_v53 = vshrl.u32 %v11590_v49, 16 }
 0x25e   : > { %v11582_v15 = vpop.f32.mrf.mxu1  ;;  %9225 = vmatmul.mubr.msk.bf16.gmra.mxu1 %vm579_vm2, %v3150_v14  ;;  %v1518_v6 = vadd.f32 %v1469_v41, %v14609_v44 }
 0x25f   : > { %9228 = vmatprep.mubr.msk.bf16.mxu1 %vm9884_vm1, %v14469_v5  ;;  %v8817_v51 = vpop.f32.mrf.mxu0 }
 0x260   : > { %v9034_v17 = vpop.f32.mrf.mxu1  ;;  %v11593_v10 = vadd.f32 %v11409_v32, %v1518_v6  ;;  %v3161_v32 = vshll.u32 %v11590_v49, 16 }
 0x261   : > { %v2112_v9 = vpop.f32.mrf.mxu0  ;;  %9107 = vmatmul.mubr.msk.bf16.gmra.mxu0 %vm579_vm2, %v11350_v2  ;;  %v9853_v17 = vld [vmem:[%s9945_s27 + $0x6c] sm:$0xf] }
 0x262   : > { %14610 = vst [vmem:[#allocation18_spill] sm:$0xff] %v11593_v10  ;;  %v11597_v14 = vpop.f32.mrf.mxu1  ;;  %v2295_v41 = vadd.f32 %v2112_v9, %v11037_v25  ;;  %9110 = vmatprep.mubr.msk.bf16.mxu0 %vm9884_vm1, %v14469_v5  ;;  %v3163_v51 = vrot.slane %v3161_v32, 1  ;;  %v9854_v9 = vld [vmem:[%s9945_s27 + $0x70] sm:$0xf] }
 0x263   : > { %v8916_v62 = vpop.f32.mrf.mxu0  ;;  %v11616_v10 = vcombine.low %v9853_v17, %v9854_v9 }
 0x264   : > { %v9035_v44 = vpop.f32.mrf.mxu1  ;;  %v11606_v6 = vadd.f32 %v11420_v12, %v2295_v41  ;;  %v3164_v16 = vsel %vm395_vm3, %v3160_v48, %v3163_v51  ;;  %v3167_v48 = vor.u32 %v3165_v53, %v3163_v51 }
 0x265   : > { %v2115_v20 = vpop.f32.mrf.mxu0  ;;  %v3172_v53 = vshrl.u32 %v11616_v10, 16 }
 0x266   : > { %v11608_v61 = vpop.f32.mrf.mxu1  ;;  %9229 = vmatmul.mubr.msk.bf16.gmra.mxu1 %vm579_vm2, %v3157_v34  ;;  %v2296_v25 = vadd.f32 %v2115_v20, %v11047_v7 }
 0x267   : > { %9232 = vmatprep.mubr.msk.bf16.mxu1 %vm9884_vm1, %v14469_v5  ;;  %v8917_v62 = vpop.f32.mrf.mxu0 }
 0x268   : > { %v9038_v44 = vpop.f32.mrf.mxu1  ;;  %v11619_v12 = vadd.f32 %v11435_v1, %v2296_v25  ;;  %v3168_v1 = vshll.u32 %v11616_v10, 16 }
 0x269   : > { %v2120_v41 = vpop.f32.mrf.mxu0  ;;  %9111 = vmatmul.mubr.msk.bf16.gmra.mxu0 %vm579_vm2, %v11376_v19  ;;  %v9855_v44 = vld [vmem:[%s9945_s27 + $0x74] sm:$0xf] }
 0x26a   : > { %14611 = vst [vmem:[#allocation25_spill] sm:$0xff] %v11619_v12  ;;  %v11623_v34 = vpop.f32.mrf.mxu1  ;;  %v2297_v7 = vadd.f32 %v2120_v41, %v11066_v3  ;;  %9114 = vmatprep.mubr.msk.bf16.mxu0 %vm9884_vm1, %v14469_v5  ;;  %v3170_v62 = vrot.slane %v3168_v1, 1  ;;  %v9856_v41 = vld [vmem:[%s9945_s27 + $0x78] sm:$0xf] }
 0x26b   : > { %v8920_v32 = vpop.f32.mrf.mxu0  ;;  %v11642_v12 = vcombine.low %v9855_v44, %v9856_v41 }
 0x26c   : > { %v9039_v20 = vpop.f32.mrf.mxu1  ;;  %v11632_v25 = vadd.f32 %v11446_v31, %v2297_v7  ;;  %v3171_v51 = vsel %vm395_vm3, %v3167_v48, %v3170_v62  ;;  %v3174_v48 = vor.u32 %v3172_v53, %v3170_v62 }
 0x26d   : > { %v2123_v17 = vpop.f32.mrf.mxu0  ;;  %v3179_v53 = vshrl.u32 %v11642_v12, 16 }
 0x26e   : > { %v11634_v9 = vpop.f32.mrf.mxu1  ;;  %9233 = vmatmul.mubr.msk.bf16.gmra.mxu1 %vm579_vm2, %v3164_v16  ;;  %v2298_v3 = vadd.f32 %v2123_v17, %v11077_v58 }
 0x26f   : > { %9236 = vmatprep.mubr.msk.bf16.mxu1 %vm9884_vm1, %v14469_v5  ;;  %v8921_v32 = vpop.f32.mrf.mxu0 }
 0x270   : > { %v9042_v20 = vpop.f32.mrf.mxu1  ;;  %v11645_v31 = vadd.f32 %v11463_v47, %v2298_v3  ;;  %v3175_v47 = vshll.u32 %v11642_v12, 16 }
 0x271   : > { %v2128_v7 = vpop.f32.mrf.mxu0  ;;  %9115 = vmatmul.mubr.msk.bf16.gmra.mxu0 %vm579_vm2, %v11402_v26  ;;  %v9857_v20 = vld [vmem:[%s9945_s27 + $0x7c] sm:$0xf] }
 0x272   : > { %14612 = vst [vmem:[#allocation46_spill] sm:$0xff] %v11645_v31  ;;  %v11649_v16 = vpop.f32.mrf.mxu1  ;;  %v2299_v58 = vadd.f32 %v2128_v7, %v11096_v21  ;;  %9118 = vmatprep.mubr.msk.bf16.mxu0 %vm9884_vm1, %v14469_v5  ;;  %v3177_v32 = vrot.slane %v3175_v47, 1  ;;  %v9858_v7 = vld [vmem:[%s9945_s27 + $0x80] sm:$0xf] }
 0x273   : > { %v8924_v1 = vpop.f32.mrf.mxu0  ;;  %v11668_v31 = vcombine.low %v9857_v20, %v9858_v7 }
 0x274   : > { %v9043_v17 = vpop.f32.mrf.mxu1  ;;  %v11658_v3 = vadd.f32 %v11474_v43, %v2299_v58  ;;  %v3178_v62 = vsel %vm395_vm3, %v3174_v48, %v3177_v32  ;;  %v3181_v48 = vor.u32 %v3179_v53, %v3177_v32 }
 0x275   : > { %v2131_v44 = vpop.f32.mrf.mxu0  ;;  %14613 = vst [vmem:[#allocation19_spill] sm:$0xff] %v11668_v31  ;;  %v3186_v53 = vshrl.u32 %v11668_v31, 16 }
 0x276   : > { %v11660_v41 = vpop.f32.mrf.mxu1  ;;  %9237 = vmatmul.mubr.msk.bf16.gmra.mxu1 %vm579_vm2, %v3171_v51  ;;  %v2300_v21 = vadd.f32 %v2131_v44, %v11107_v57 }
 0x277   : > { %9240 = vmatprep.mubr.msk.bf16.mxu1 %vm9884_vm1, %v14469_v5  ;;  %v8925_v1 = vpop.f32.mrf.mxu0 }
 0x278   : > { %v9046_v17 = vpop.f32.mrf.mxu1  ;;  %v11671_v43 = vadd.f32 %v11489_v45, %v2300_v21  ;;  %v3182_v45 = vshll.u32 %v11668_v31, 16 }
 0x279   : > { %v2136_v58 = vpop.f32.mrf.mxu0  ;;  %9119 = vmatmul.mubr.msk.bf16.gmra.mxu0 %vm579_vm2, %v11428_v8  ;;  %v9859_v17 = vld [vmem:[%s9945_s27 + $0x84] sm:$0xf] }
 0x27a   : > { %14614 = vst [vmem:[#allocation20_spill] sm:$0xff] %v11671_v43  ;;  %v11675_v51 = vpop.f32.mrf.mxu1  ;;  %v2301_v57 = vadd.f32 %v2136_v58, %v11122_v27  ;;  %9122 = vmatprep.mubr.msk.bf16.mxu0 %vm9884_vm1, %v14469_v5  ;;  %v3184_v1 = vrot.slane %v3182_v45, 1  ;;  %v9860_v58 = vld [vmem:[%s9945_s27 + $0x88] sm:$0xf] }
 0x27b   : > { %v8928_v47 = vpop.f32.mrf.mxu0  ;;  %v11694_v43 = vcombine.low %v9859_v17, %v9860_v58 }
 0x27c   : > { %v9047_v44 = vpop.f32.mrf.mxu1  ;;  %v11684_v21 = vadd.f32 %v11502_v13, %v2301_v57  ;;  %v3185_v32 = vsel %vm395_vm3, %v3181_v48, %v3184_v1  ;;  %v3188_v48 = vor.u32 %v3186_v53, %v3184_v1 }
 0x27d   : > { %v2139_v20 = vpop.f32.mrf.mxu0  ;;  %v3193_v53 = vshrl.u32 %v11694_v43, 16 }
 0x27e   : > { %v11686_v7 = vpop.f32.mrf.mxu1  ;;  %9241 = vmatmul.mubr.msk.bf16.gmra.mxu1 %vm579_vm2, %v3178_v62  ;;  %v2302_v27 = vadd.f32 %v2139_v20, %v11132_v40 }
 0x27f   : > { %9244 = vmatprep.mubr.msk.bf16.mxu1 %vm9884_vm1, %v14469_v5  ;;  %v8929_v47 = vpop.f32.mrf.mxu0 }
 0x280   : > { %v9050_v44 = vpop.f32.mrf.mxu1  ;;  %v11697_v13 = vadd.f32 %v11516_v29, %v2302_v27  ;;  %v3189_v29 = vshll.u32 %v11694_v43, 16 }
 0x281   : > { %v2144_v57 = vpop.f32.mrf.mxu0  ;;  %9123 = vmatmul.mubr.msk.bf16.gmra.mxu0 %vm579_vm2, %v11454_v63  ;;  %v9861_v44 = vld [vmem:[%s9945_s27 + $0x8c] sm:$0xf] }
 0x282   : > { %14615 = vst [vmem:[#allocation47_spill] sm:$0xff] %v11697_v13  ;;  %v11701_v62 = vpop.f32.mrf.mxu1  ;;  %v2303_v40 = vadd.f32 %v2144_v57, %v11143_v30  ;;  %9126 = vmatprep.mubr.msk.bf16.mxu0 %vm9884_vm1, %v14469_v5  ;;  %v3191_v47 = vrot.slane %v3189_v29, 1  ;;  %v9862_v57 = vld [vmem:[%s9945_s27 + $0x90] sm:$0xf] }
 0x283   : > { %v8932_v45 = vpop.f32.mrf.mxu0  ;;  %v11720_v13 = vcombine.low %v9861_v44, %v9862_v57 }
 0x284   : > { %v9051_v20 = vpop.f32.mrf.mxu1  ;;  %v11710_v27 = vadd.f32 %v11527_v24, %v2303_v40  ;;  %v3192_v1 = vsel %vm395_vm3, %v3188_v48, %v3191_v47  ;;  %v3195_v48 = vor.u32 %v3193_v53, %v3191_v47 }
 0x285   : > { %v2147_v17 = vpop.f32.mrf.mxu0  ;;  %v3200_v53 = vshrl.u32 %v11720_v13, 16 }
 0x286   : > { %v11712_v58 = vpop.f32.mrf.mxu1  ;;  %9245 = vmatmul.mubr.msk.bf16.gmra.mxu1 %vm579_vm2, %v3185_v32  ;;  %v2304_v30 = vadd.f32 %v2147_v17, %v11153_v55 }
 0x287   : > { %9248 = vmatprep.mubr.msk.bf16.mxu1 %vm9884_vm1, %v14469_v5  ;;  %v8933_v45 = vpop.f32.mrf.mxu0 }
 0x288   : > { %v9054_v20 = vpop.f32.mrf.mxu1  ;;  %v11723_v24 = vadd.f32 %v11541_v22, %v2304_v30  ;;  %v3196_v22 = vshll.u32 %v11720_v13, 16 }
 0x289   : > { %v2152_v40 = vpop.f32.mrf.mxu0  ;;  %9127 = vmatmul.mubr.msk.bf16.gmra.mxu0 %vm579_vm2, %v11482_v11  ;;  %v9863_v20 = vld [vmem:[%s9945_s27 + $0x94] sm:$0xf] }
 0x28a   : > { %14616 = vst [vmem:[#allocation21_spill] sm:$0xff] %v11723_v24  ;;  %v11727_v32 = vpop.f32.mrf.mxu1  ;;  %v2305_v55 = vadd.f32 %v2152_v40, %v11164_v60  ;;  %9130 = vmatprep.mubr.msk.bf16.mxu0 %vm9884_vm1, %v14469_v5  ;;  %v3198_v45 = vrot.slane %v3196_v22, 1  ;;  %v9864_v40 = vld [vmem:[%s9945_s27 + $0x98] sm:$0xf] }
 0x28b   : > { %v8936_v29 = vpop.f32.mrf.mxu0  ;;  %v11746_v24 = vcombine.low %v9863_v20, %v9864_v40 }
 0x28c   : > { %v9055_v17 = vpop.f32.mrf.mxu1  ;;  %v11736_v30 = vadd.f32 %v11555_v36, %v2305_v55  ;;  %v3199_v47 = vsel %vm395_vm3, %v3195_v48, %v3198_v45  ;;  %v3202_v48 = vor.u32 %v3200_v53, %v3198_v45 }
 0x28d   : > { %v2155_v44 = vpop.f32.mrf.mxu0  ;;  %v3207_v53 = vshrl.u32 %v11746_v24, 16 }
 0x28e   : > { %v11738_v57 = vpop.f32.mrf.mxu1  ;;  %9249 = vmatmul.mubr.msk.bf16.gmra.mxu1 %vm579_vm2, %v3192_v1  ;;  %v2306_v60 = vadd.f32 %v2155_v44, %v11178_v23 }
 0x28f   : > { %9252 = vmatprep.mubr.msk.bf16.mxu1 %vm9884_vm1, %v14469_v5  ;;  %v8937_v29 = vpop.f32.mrf.mxu0 }
 0x290   : > { %v9058_v17 = vpop.f32.mrf.mxu1  ;;  %v11749_v36 = vadd.f32 %v11571_v35, %v2306_v60  ;;  %v3203_v35 = vshll.u32 %v11746_v24, 16 }
 0x291   : > { %v2160_v55 = vpop.f32.mrf.mxu0  ;;  %9131 = vmatmul.mubr.msk.bf16.gmra.mxu0 %vm579_vm2, %v11510_v0  ;;  %v9865_v17 = vld [vmem:[%s9945_s27 + $0x9c] sm:$0xf] }
 0x292   : > { %14617 = vst [vmem:[#allocation22_spill] sm:$0xff] %v11749_v36  ;;  %v11753_v1 = vpop.f32.mrf.mxu1  ;;  %v2307_v23 = vadd.f32 %v2160_v55, %v11189_v18  ;;  %9134 = vmatprep.mubr.msk.bf16.mxu0 %vm9884_vm1, %v14469_v5  ;;  %v3205_v29 = vrot.slane %v3203_v35, 1  ;;  %v9866_v55 = vld [vmem:[%s9945_s27 + $0xa0] sm:$0xf] }
 0x293   : > { %v8940_v22 = vpop.f32.mrf.mxu0  ;;  %v11772_v36 = vcombine.low %v9865_v17, %v9866_v55 }
 0x294   : > { %v9059_v44 = vpop.f32.mrf.mxu1  ;;  %v11762_v60 = vadd.f32 %v11582_v15, %v2307_v23  ;;  %v3206_v45 = vsel %vm395_vm3, %v3202_v48, %v3205_v29  ;;  %v3209_v48 = vor.u32 %v3207_v53, %v3205_v29 }
 0x295   : > { %v2163_v20 = vpop.f32.mrf.mxu0  ;;  %v3214_v53 = vshrl.u32 %v11772_v36, 16 }
 0x296   : > { %v11764_v40 = vpop.f32.mrf.mxu1  ;;  %9253 = vmatmul.mubr.msk.bf16.gmra.mxu1 %vm579_vm2, %v3199_v47  ;;  %v2308_v18 = vadd.f32 %v2163_v20, %v11199_v37 }
 0x297   : > { %9256 = vmatprep.mubr.msk.bf16.mxu1 %vm9884_vm1, %v14469_v5  ;;  %v8941_v22 = vpop.f32.mrf.mxu0 }
 0x298   : > { %v9062_v44 = vpop.f32.mrf.mxu1  ;;  %v11775_v15 = vadd.f32 %v11597_v14, %v2308_v18  ;;  %v3210_v14 = vshll.u32 %v11772_v36, 16 }
 0x299   : > { %v2168_v23 = vpop.f32.mrf.mxu0  ;;  %9135 = vmatmul.mubr.msk.bf16.gmra.mxu0 %vm579_vm2, %v11535_v39  ;;  %v9867_v44 = vld [vmem:[%s9945_s27 + $0xa4] sm:$0xf] }
 0x29a   : > { %14618 = vst [vmem:[#allocation48_spill] sm:$0xff] %v11775_v15  ;;  %v11779_v47 = vpop.f32.mrf.mxu1  ;;  %v2309_v37 = vadd.f32 %v2168_v23, %v11210_v52  ;;  %9138 = vmatprep.mubr.msk.bf16.mxu0 %vm9884_vm1, %v14469_v5  ;;  %v3212_v22 = vrot.slane %v3210_v14, 1  ;;  %v9868_v23 = vld [vmem:[%s9945_s27 + $0xa8] sm:$0xf] }
 0x29b   : > { %v8944_v35 = vpop.f32.mrf.mxu0  ;;  %v11798_v15 = vcombine.low %v9867_v44, %v9868_v23 }
 0x29c   : > { %v9063_v20 = vpop.f32.mrf.mxu1  ;;  %v11788_v18 = vadd.f32 %v11608_v61, %v2309_v37  ;;  %v3213_v29 = vsel %vm395_vm3, %v3209_v48, %v3212_v22  ;;  %v3216_v48 = vor.u32 %v3214_v53, %v3212_v22 }
 0x29d   : > { %v2171_v17 = vpop.f32.mrf.mxu0  ;;  %v3221_v53 = vshrl.u32 %v11798_v15, 16 }
 0x29e   : > { %v11790_v55 = vpop.f32.mrf.mxu1  ;;  %9257 = vmatmul.mubr.msk.bf16.gmra.mxu1 %vm579_vm2, %v3206_v45  ;;  %v2310_v52 = vadd.f32 %v2171_v17, %v11220_v50 }
 0x29f   : > { %9260 = vmatprep.mubr.msk.bf16.mxu1 %vm9884_vm1, %v14469_v5  ;;  %v8945_v35 = vpop.f32.mrf.mxu0 }
 0x2a0   : > { %v9066_v20 = vpop.f32.mrf.mxu1  ;;  %v11801_v61 = vadd.f32 %v11623_v34, %v2310_v52  ;;  %v3217_v34 = vshll.u32 %v11798_v15, 16 }
 0x2a1   : > { %v2176_v37 = vpop.f32.mrf.mxu0  ;;  %9139 = vmatmul.mubr.msk.bf16.gmra.mxu0 %vm579_vm2, %v11563_v38  ;;  %v9869_v20 = vld [vmem:[%s9945_s27 + $0xac] sm:$0xf] }
 0x2a2   : > { %14619 = vst [vmem:[#allocation24_spill] sm:$0xff] %v11801_v61  ;;  %v11805_v45 = vpop.f32.mrf.mxu1  ;;  %v2311_v50 = vadd.f32 %v2176_v37, %v11231_v59  ;;  %9142 = vmatprep.mubr.msk.bf16.mxu0 %vm9884_vm1, %v14469_v5  ;;  %v3219_v35 = vrot.slane %v3217_v34, 1  ;;  %v9870_v37 = vld [vmem:[%s9945_s27 + $0xb0] sm:$0xf] }
 0x2a3   : > { %v8948_v14 = vpop.f32.mrf.mxu0  ;;  %v11824_v61 = vcombine.low %v9869_v20, %v9870_v37 }
 0x2a4   : > { %v9067_v17 = vpop.f32.mrf.mxu1  ;;  %v11814_v52 = vadd.f32 %v11634_v9, %v2311_v50  ;;  %v3220_v22 = vsel %vm395_vm3, %v3216_v48, %v3219_v35  ;;  %v3223_v48 = vor.u32 %v3221_v53, %v3219_v35 }
 0x2a5   : > { %v2179_v44 = vpop.f32.mrf.mxu0  ;;  %v3228_v53 = vshrl.u32 %v11824_v61, 16 }
 0x2a6   : > { %v11816_v23 = vpop.f32.mrf.mxu1  ;;  %9261 = vmatmul.mubr.msk.bf16.gmra.mxu1 %vm579_vm2, %v3213_v29  ;;  %v2312_v59 = vadd.f32 %v2179_v44, %v11241_v33 }
 0x2a7   : > { %9264 = vmatprep.mubr.msk.bf16.mxu1 %vm9884_vm1, %v14469_v5  ;;  %v8949_v14 = vpop.f32.mrf.mxu0 }
 0x2a8   : > { %v9070_v17 = vpop.f32.mrf.mxu1  ;;  %v11827_v9 = vadd.f32 %v11649_v16, %v2312_v59  ;;  %v3224_v16 = vshll.u32 %v11824_v61, 16 }
 0x2a9   : > { %v2184_v50 = vpop.f32.mrf.mxu0  ;;  %9143 = vmatmul.mubr.msk.bf16.gmra.mxu0 %vm579_vm2, %v11590_v49  ;;  %v9871_v17 = vld [vmem:[%s9945_s27 + $0xb4] sm:$0xf] }
 0x2aa   : > { %v11831_v29 = vpop.f32.mrf.mxu1  ;;  %v2313_v33 = vadd.f32 %v2184_v50, %v11252_v54  ;;  %9146 = vmatprep.mubr.msk.bf16.mxu0 %vm9884_vm1, %v14469_v5  ;;  %v3226_v14 = vrot.slane %v3224_v16, 1  ;;  %v9872_v50 = vld [vmem:[%s9945_s27 + $0xb8] sm:$0xf] }
 0x2ab   : > { %v8952_v34 = vpop.f32.mrf.mxu0 }
 0x2ac   : > { %v9071_v44 = vpop.f32.mrf.mxu1  ;;  %v11840_v59 = vadd.f32 %v11660_v41, %v2313_v33  ;;  %v11850_v34 = vcombine.low %v9871_v17, %v9872_v50  ;;  %v3227_v35 = vsel %vm395_vm3, %v3223_v48, %v3226_v14 }
 0x2ad   : > { %v2187_v20 = vpop.f32.mrf.mxu0 }
 0x2ae   : > { %14620 = vst [vmem:[#allocation26_spill] sm:$0xff] %v11840_v59  ;;  %v11842_v37 = vpop.f32.mrf.mxu1  ;;  %9265 = vmatmul.mubr.msk.bf16.gmra.mxu1 %vm579_vm2, %v3220_v22  ;;  %v2314_v54 = vadd.f32 %v2187_v20, %v11262_v4  ;;  %v3231_v16 = vshll.u32 %v11850_v34, 16 }
 0x2af   : > { %9268 = vmatprep.mubr.msk.bf16.mxu1 %vm9884_vm1, %v14469_v5  ;;  %v8953_v44 = vpop.f32.mrf.mxu0 }
 0x2b0   : > { %v9074_v41 = vpop.f32.mrf.mxu1  ;;  %v11853_v33 = vadd.f32 %v11675_v51, %v2314_v54  ;;  %v274_v54 = vld [vmem:[%s9945_s27 + $0xc0] sm:$0xf]  ;;  %v3233_v48 = vrot.slane %v3231_v16, 1 }
 0x2b1   : > { %v2192_v59 = vpop.f32.mrf.mxu0  ;;  %9147 = vmatmul.mubr.msk.bf16.gmra.mxu0 %vm579_vm2, %v11616_v10  ;;  %v9873_v41 = vld [vmem:[%s9945_s27 + $0xbc] sm:$0xf] }
 0x2b2   : > { %14621 = vst [vmem:[#allocation27_spill] sm:$0xff] %v11853_v33  ;;  %v11857_v4 = vpop.f32.mrf.mxu1  ;;  %v2315_v22 = vadd.f32 %v2192_v59, %v11273_v28  ;;  %9150 = vmatprep.mubr.msk.bf16.mxu0 %vm9884_vm1, %v14469_v5  ;;  %v3230_v59 = vor.u32 %v3228_v53, %v3226_v14  ;;  %v11876_v33 = vcombine.low %v9873_v41, %v274_v54  ;;  %v3235_v53 = vshrl.u32 %v11850_v34, 16 }
 0x2b3   : > { %v8956_v51 = vpop.f32.mrf.mxu0 }
 0x2b4   : > { %v9075_v20 = vpop.f32.mrf.mxu1  ;;  %v11867_v17 = vadd.f32 %v11686_v7, %v2315_v22  ;;  %v3234_v14 = vsel %vm395_vm3, %v3230_v59, %v3233_v48  ;;  %v3238_v16 = vshll.u32 %v11876_v33, 16  ;;  %v3237_v59 = vor.u32 %v3235_v53, %v3233_v48 }
 0x2b5   : > { %v2195_v50 = vpop.f32.mrf.mxu0  ;;  %v3242_v53 = vshrl.u32 %v11876_v33, 16 }
 0x2b6   : > { %14622 = vst [vmem:[#allocation28_spill] sm:$0xff] %v11867_v17  ;;  %v11869_v44 = vpop.f32.mrf.mxu1  ;;  %9269 = vmatmul.mubr.msk.bf16.gmra.mxu1 %vm579_vm2, %v3227_v35  ;;  %v2316_v28 = vadd.f32 %v2195_v50, %v11283_v42  ;;  %v14624_v42 = vld [vmem:[#allocation23_spill] sm:$0xff] }
 0x2b7   : > { %9272 = vmatprep.mubr.msk.bf16.mxu1 %vm9884_vm1, %v14469_v5  ;;  %v8957_v51 = vpop.f32.mrf.mxu0 }
 0x2b8   : > { %v9078_v20 = vpop.f32.mrf.mxu1  ;;  %v11879_v7 = vadd.f32 %v11701_v62, %v2316_v28 }
 0x2b9   : > { %v2200_v22 = vpop.f32.mrf.mxu0  ;;  %9151 = vmatmul.mubr.msk.bf16.gmra.mxu0 %vm579_vm2, %v11642_v12  ;;  %v14626_v20 = vld [vmem:[#allocation3_spill] sm:$0xff] }
 0x2ba   : > { %14623 = vst [vmem:[#allocation30_spill] sm:$0xff] %v11879_v7  ;;  %v11883_v35 = vpop.f32.mrf.mxu1  ;;  %v2317_v50 = vadd.f32 %v2200_v22, %v14624_v42  ;;  %9154 = vmatprep.mubr.msk.bf16.mxu0 %vm9884_vm1, %v14469_v5  ;;  %v3240_v42 = vrot.slane %v3238_v16, 1  ;;  %v11901_v7 = vld [vmem:[%s9945_s27 + $0xc4] sm:$0xff]  }
 0x2bb   : > { %v8960_v62 = vpop.f32.mrf.mxu0  ;;  %14627 = vst [vmem:[#allocation32_spill] sm:$0xff] %v11901_v7 }
 0x2bc   : > { %v9079_v54 = vpop.f32.mrf.mxu1  ;;  %v11892_v28 = vadd.f32 %v11712_v58, %v2317_v50  ;;  %v3241_v48 = vsel %vm395_vm3, %v3237_v59, %v3240_v42  ;;  %v3244_v59 = vor.u32 %v3242_v53, %v3240_v42 }
 0x2bd   : > { %v2203_v41 = vpop.f32.mrf.mxu0 }
 0x2be   : > { %14625 = vst [vmem:[#allocation31_spill] sm:$0xff] %v11892_v28  ;;  %v11894_v51 = vpop.f32.mrf.mxu1  ;;  %9273 = vmatmul.mubr.msk.bf16.gmra.mxu1 %vm579_vm2, %v3234_v14  ;;  %v2318_v22 = vadd.f32 %v2203_v41, %v14626_v20  ;;  %v14629_v14 = vld [vmem:[#allocation4_spill] sm:$0xff] }
 0x2bf   : > { %9276 = vmatprep.mubr.msk.bf16.mxu1 %vm9884_vm1, %v14469_v5  ;;  %v8961_v17 = vpop.f32.mrf.mxu0 }
 0x2c0   : > { %v9082_v62 = vpop.f32.mrf.mxu1  ;;  %v11904_v54 = vadd.f32 %v11727_v32, %v2318_v22  ;;  %v3245_v17 = vshll.u32 %v11901_v7, 16 }
 0x2c1   : > { %v2208_v58 = vpop.f32.mrf.mxu0  ;;  %9155 = vmatmul.mubr.msk.bf16.gmra.mxu0 %vm579_vm2, %v11668_v31 }
 0x2c2   : > { %14628 = vst [vmem:[#allocation33_spill] sm:$0xff] %v11904_v54  ;;  %v11908_v50 = vpop.f32.mrf.mxu1  ;;  %v2319_v41 = vadd.f32 %v2208_v58, %v14629_v14  ;;  %9158 = vmatprep.mubr.msk.bf16.mxu0 %vm9884_vm1, %v14469_v5  ;;  %v14630_v58 = vld [vmem:[#allocation5_spill] sm:$0xff]  ;;  %v3247_v54 = vrot.slane %v3245_v17, 1  ;;  %v3249_v17 = vshrl.u32 %v11901_v7, 16 }
 0x2c3   : > { %v8964_v16 = vpop.f32.mrf.mxu0 }
 0x2c4   : > { %v9083_v32 = vpop.f32.mrf.mxu1  ;;  %v11917_v20 = vadd.f32 %v11738_v57, %v2319_v41  ;;  %v14632_v41 = vld [vmem:[#allocation6_spill] sm:$0xff] }
 0x2c5   : > { %v2211_v22 = vpop.f32.mrf.mxu0 }
 0x2c6   : > { %v11919_v62 = vpop.f32.mrf.mxu1  ;;  %9277 = vmatmul.mubr.msk.bf16.gmra.mxu1 %vm579_vm2, %v3241_v48  ;;  %v2320_v14 = vadd.f32 %v2211_v22, %v14630_v58  ;;  %v3248_v22 = vsel %vm395_vm3, %v3244_v59, %v3247_v54  ;;  %v14634_v58 = vld [vmem:[#allocation29_spill] sm:$0xff] }
 0x2c7   : > { %9280 = vmatprep.mubr.msk.bf16.mxu1 %vm9884_vm1, %v14469_v5  ;;  %v8965_v28 = vpop.f32.mrf.mxu0 }
 0x2c8   : > { %v9086_v31 = vpop.f32.mrf.mxu1  ;;  %v11926_v16 = vadd.f32 %v11753_v1, %v2320_v14 }
 0x2c9   : > { %v2216_v32 = vpop.f32.mrf.mxu0  ;;  %9159 = vmatmul.mubr.msk.bf16.gmra.mxu0 %vm579_vm2, %v11694_v43 }
 0x2ca   : > { %14631 = vst [vmem:[#allocation35_spill] sm:$0xff] %v11926_v16  ;;  %v11930_v57 = vpop.f32.mrf.mxu1  ;;  %v2321_v48 = vadd.f32 %v2216_v32, %v14632_v41  ;;  %9162 = vmatprep.mubr.msk.bf16.mxu0 %vm9884_vm1, %v14469_v5 }
 0x2cb   : > { %v8968_v42 = vpop.f32.mrf.mxu0 }
 0x2cc   : > { %v9087_v53 = vpop.f32.mrf.mxu1  ;;  %v11937_v31 = vadd.f32 %v11764_v40, %v2321_v48  ;;  %v3251_v48 = vor.u32 %v3249_v17, %v3247_v54 }
 0x2cd   : > { %v2219_v1 = vpop.f32.mrf.mxu0 }
 0x2ce   : > { %14633 = vst [vmem:[#allocation36_spill] sm:$0xff] %v11937_v31  ;;  %v11939_v28 = vpop.f32.mrf.mxu1  ;;  %9281 = vmatmul.mubr.msk.bf16.gmra.mxu1 %vm579_vm2, %v3248_v22  ;;  %v2322_v14 = vadd.f32 %v2219_v1, %v14634_v58  ;;  %v14636_v22 = vld [vmem:[#allocation7_spill] sm:$0xff] }
 0x2cf   : > { %9284 = vmatprep.mubr.msk.bf16.mxu1 %vm9884_vm1, %v14469_v5  ;;  %v8969_v32 = vpop.f32.mrf.mxu0 }
 0x2d0   : > { %v9090_v41 = vpop.f32.mrf.mxu1  ;;  %v11947_v59 = vadd.f32 %v11779_v47, %v2322_v14  ;;  %v14637_v14 = vld [vmem:[#allocation8_spill] sm:$0xff] }
 0x2d1   : > { %v2224_v42 = vpop.f32.mrf.mxu0  ;;  %9163 = vmatmul.mubr.msk.bf16.gmra.mxu0 %vm579_vm2, %v11720_v13 }
 0x2d2   : > { %14635 = vst [vmem:[#allocation38_spill] sm:$0xff] %v11947_v59  ;;  %v11951_v40 = vpop.f32.mrf.mxu1  ;;  %v2323_v53 = vadd.f32 %v2224_v42, %v14636_v22  ;;  %9166 = vmatprep.mubr.msk.bf16.mxu0 %vm9884_vm1, %v14469_v5 }
 0x2d3   : > { %v8972_v1 = vpop.f32.mrf.mxu0 }
 0x2d4   : > { %v9091_v58 = vpop.f32.mrf.mxu1  ;;  %v11957_v32 = vadd.f32 %v11790_v55, %v2323_v53  ;;  %v14639_v55 = vld [vmem:[#allocation9_spill] sm:$0xff] }
 0x2d5   : > { %v2227_v41 = vpop.f32.mrf.mxu0 }
 0x2d6   : > { %v11959_v47 = vpop.f32.mrf.mxu1  ;;  %9285 = vmatmul.mubr.msk.bf16.gmra.mxu1 %vm579_vm2, %v3251_v48  ;;  %v2324_v59 = vadd.f32 %v2227_v41, %v14637_v14 }
 0x2d7   : > { %v8973_v31 = vpop.f32.mrf.mxu0 }
 0x2d8   : > { %v9094_v16 = vpop.f32.mrf.mxu1  ;;  %v11964_v54 = vadd.f32 %v11805_v45, %v2324_v59  ;;  %v14641_v45 = vld [vmem:[#allocation10_spill] sm:$0xff] }
 0x2d9   : > { %v2232_v17 = vpop.f32.mrf.mxu0  ;;  %9167 = vmatmul.mubr.msk.bf16.gmra.mxu0 %vm579_vm2, %v11746_v24 }
 0x2da   : > { %14638 = vst [vmem:[#allocation39_spill] sm:$0xff] %v11964_v54  ;;  %v11968_v42 = vpop.f32.mrf.mxu1  ;;  %v2325_v22 = vadd.f32 %v2232_v17, %v14639_v55  ;;  %9170 = vmatprep.mubr.msk.bf16.mxu0 %vm9884_vm1, %v14469_v5  ;;  %v14643_v55 = vld [vmem:[#allocation2_spill] sm:$0xff] }
 0x2db   : > { %v8976_v53 = vpop.f32.mrf.mxu0 }
 0x2dc   : > { %v9095_v48 = vpop.f32.mrf.mxu1  ;;  %v11974_v1 = vadd.f32 %v11816_v23, %v2325_v22 }
 0x2dd   : > { %v2235_v16 = vpop.f32.mrf.mxu0 }
 0x2de   : > { %14640 = vst [vmem:[#allocation41_spill] sm:$0xff] %v11974_v1  ;;  %v11976_v31 = vpop.f32.mrf.mxu1  ;;  %v2326_v59 = vadd.f32 %v2235_v16, %v14641_v45 }
 0x2df   : > { %v8977_v58 = vpop.f32.mrf.mxu0 }
 0x2e0   : > { %v9098_v41 = vpop.f32.mrf.mxu1  ;;  %v11980_v14 = vadd.f32 %v11831_v29, %v2326_v59  ;;  %v14645_v29 = vld [vmem:[#allocation34_spill] sm:$0xff] }
 0x2e1   : > { %v2240_v54 = vpop.f32.mrf.mxu0  ;;  %9171 = vmatmul.mubr.msk.bf16.gmra.mxu0 %vm579_vm2, %v11772_v36 }
 0x2e2   : > { %14642 = vst [vmem:[#allocation42_spill] sm:$0xff] %v11980_v14  ;;  %v11984_v17 = vpop.f32.mrf.mxu1  ;;  %v2327_v53 = vadd.f32 %v2240_v54, %v14643_v55  ;;  %9174 = vmatprep.mubr.msk.bf16.mxu0 %vm9884_vm1, %v14469_v5  ;;  %v14647_v55 = vld [vmem:[#allocation11_spill] sm:$0xff] }
 0x2e3   : > { %v8980_v23 = vpop.f32.mrf.mxu0 }
 0x2e4   : > { %v9099_v22 = vpop.f32.mrf.mxu1  ;;  %v11990_v48 = vadd.f32 %v11842_v37, %v2327_v53 }
 0x2e5   : > { %v2243_v16 = vpop.f32.mrf.mxu0 }
 0x2e6   : > { %14644 = vst [vmem:[#allocation44_spill] sm:$0xff] %v11990_v48  ;;  %v11992_v45 = vpop.f32.mrf.mxu1  ;;  %v2328_v59 = vadd.f32 %v2243_v16, %v14645_v29 }
 0x2e7   : > { %v8981_v58 = vpop.f32.mrf.mxu0 }
 0x2e8   : > { %v9198_v41 = vpop.f32.mrf.mxu1  ;;  %v11996_v14 = vadd.f32 %v11857_v4, %v2328_v59  ;;  %v14649_v4 = vld [vmem:[#allocation12_spill] sm:$0xff] }
 0x2e9   : > { %v2248_v1 = vpop.f32.mrf.mxu0  ;;  %9175 = vmatmul.mubr.msk.bf16.gmra.mxu0 %vm579_vm2, %v11798_v15 }
 0x2ea   : > { %14646 = vst [vmem:[#allocation45_spill] sm:$0xff] %v11996_v14  ;;  %v12000_v54 = vpop.f32.mrf.mxu1  ;;  %v2329_v23 = vadd.f32 %v2248_v1, %v14647_v55  ;;  %9178 = vmatprep.mubr.msk.bf16.mxu0 %vm9884_vm1, %v14469_v5  ;;  %v14651_v55 = vld [vmem:[#allocation37_spill] sm:$0xff] }
 0x2eb   : > { %v8984_v37 = vpop.f32.mrf.mxu0 }
 0x2ec   : > { %v9199_v53 = vpop.f32.mrf.mxu1  ;;  %v12006_v22 = vadd.f32 %v11869_v44, %v2329_v23 }
 0x2ed   : > { %v2251_v16 = vpop.f32.mrf.mxu0 }
 0x2ee   : > { %14648 = vst [vmem:[#allocation23_spill] sm:$0xff] %v12006_v22  ;;  %v12008_v29 = vpop.f32.mrf.mxu1  ;;  %v2330_v59 = vadd.f32 %v2251_v16, %v14649_v4 }
 0x2ef   : > { %v8985_v58 = vpop.f32.mrf.mxu0 }
 0x2f0   : > { %v9202_v41 = vpop.f32.mrf.mxu1  ;;  %v12012_v14 = vadd.f32 %v11883_v35, %v2330_v59  ;;  %v14653_v35 = vld [vmem:[#allocation13_spill] sm:$0xff] }
 0x2f1   : > { %v2256_v48 = vpop.f32.mrf.mxu0  ;;  %9179 = vmatmul.mubr.msk.bf16.gmra.mxu0 %vm579_vm2, %v11824_v61 }
 0x2f2   : > { %14650 = vst [vmem:[#allocation3_spill] sm:$0xff] %v12012_v14  ;;  %v12016_v1 = vpop.f32.mrf.mxu1  ;;  %v2331_v37 = vadd.f32 %v2256_v48, %v14651_v55  ;;  %9182 = vmatprep.mubr.msk.bf16.mxu0 %vm9884_vm1, %v14469_v5  ;;  %v14655_v55 = vld [vmem:[#allocation14_spill] sm:$0xff] }
 0x2f3   : > { %v8988_v44 = vpop.f32.mrf.mxu0 }
 0x2f4   : > { %v9203_v23 = vpop.f32.mrf.mxu1  ;;  %v12022_v53 = vadd.f32 %v11894_v51, %v2331_v37 }
 0x2f5   : > { %v2259_v16 = vpop.f32.mrf.mxu0 }
 0x2f6   : > { %14652 = vst [vmem:[#allocation4_spill] sm:$0xff] %v12022_v53  ;;  %v12024_v4 = vpop.f32.mrf.mxu1  ;;  %v2332_v59 = vadd.f32 %v2259_v16, %v14653_v35 }
 0x2f7   : > { %v8989_v58 = vpop.f32.mrf.mxu0 }
 0x2f8   : > { %v9206_v41 = vpop.f32.mrf.mxu1  ;;  %v12028_v14 = vadd.f32 %v11908_v50, %v2332_v59  ;;  %v14656_v50 = vld [vmem:[#allocation40_spill] sm:$0xff] }
 0x2f9   : > { %v2264_v22 = vpop.f32.mrf.mxu0  ;;  %9183 = vmatmul.mubr.msk.bf16.gmra.mxu0 %vm579_vm2, %v11850_v34 }
 0x2fa   : > { %14654 = vst [vmem:[#allocation5_spill] sm:$0xff] %v12028_v14  ;;  %v12032_v48 = vpop.f32.mrf.mxu1  ;;  %v2333_v44 = vadd.f32 %v2264_v22, %v14655_v55  ;;  %9186 = vmatprep.mubr.msk.bf16.mxu0 %vm9884_vm1, %v14469_v5  ;;  %v14658_v55 = vld [vmem:[#allocation15_spill] sm:$0xff] }
 0x2fb   : > { %v8992_v51 = vpop.f32.mrf.mxu0 }
 0x2fc   : > { %v9207_v37 = vpop.f32.mrf.mxu1  ;;  %v12038_v23 = vadd.f32 %v11919_v62, %v2333_v44  ;;  %v7860_v62 = vld [vmem:[%s14390_s3 + $0x2] sm:$0x3] }
 0x2fd   : > { %v2267_v16 = vpop.f32.mrf.mxu0  ;;  %9762 = vmatprep.subr.msk.bf16.mxu1 %vm4319_vm8, %v7860_v62 }
 0x2fe   : > { %v12040_v35 = vpop.f32.mrf.mxu1  ;;  %v2334_v59 = vadd.f32 %v2267_v16, %v14656_v50  ;;  %v4321_v16 = vsel %vm4319_vm8, %v7860_v62, 0  ;;  %v3589_v62 = vrot.slane %v11337_v46, 1 }
 0x2ff   : > { %v8993_v58 = vpop.f32.mrf.mxu0  ;;  %9383 = vmatpush3.bf16.msra.mxu1 %v4321_v16  ;;  %v3590_v16 = vrot.slane %v11350_v2, 1 }
 0x300   : > { %v9210_v41 = vpop.f32.mrf.mxu1  ;;  %v12044_v14 = vadd.f32 %v11930_v57, %v2334_v59 }
 0x301   : > { %v2272_v53 = vpop.f32.mrf.mxu0  ;;  %9187 = vmatmul.mubr.msk.bf16.gmra.mxu0 %vm579_vm2, %v11876_v33 }
 0x302   : > { %14657 = vst [vmem:[#allocation6_spill] sm:$0xff] %v12044_v14  ;;  %v12048_v22 = vpop.f32.mrf.mxu1  ;;  %v2335_v51 = vadd.f32 %v2272_v53, %v14658_v55  ;;  %9190 = vmatprep.mubr.msk.bf16.mxu0 %vm9884_vm1, %v14469_v5  ;;  %v14660_v53 = vld [vmem:[#allocation16_spill] sm:$0xff] }
 0x303   : > { %v8996_v44 = vpop.f32.mrf.mxu0 }
 0x304   : > { %v9211_v37 = vpop.f32.mrf.mxu1  ;;  %v12058_v57 = vadd.f32 %v11939_v28, %v2335_v51  ;;  %v14662_v28 = vld [vmem:[#allocation43_spill] sm:$0xff] }
 0x305   : > { %v2275_v50 = vpop.f32.mrf.mxu0 }
 0x306   : > { %14659 = vst [vmem:[#allocation29_spill] sm:$0xff] %v12058_v57  ;;  %v12061_v59 = vpop.f32.mrf.mxu1  ;;  %v2336_v58 = vadd.f32 %v2275_v50, %v14660_v53  ;;  %v3591_v57 = vsel %vm1138_vm5, %v3589_v62, %v3590_v16 }
 0x307   : > { %v8997_v41 = vpop.f32.mrf.mxu0 }
 0x308   : > { %v9214_v55 = vpop.f32.mrf.mxu1  ;;  %v12065_v14 = vadd.f32 %v11951_v40, %v2336_v58 }
 0x309   : > { %v2280_v44 = vpop.f32.mrf.mxu0  ;;  %9191 = vmatmul.mubr.msk.bf16.gmra.mxu0 %vm579_vm2, %v11901_v7  ;;  %v14663_v55 = vld [vmem:[#allocation17_spill] sm:$0xff] }
 0x30a   : > { %14661 = vst [vmem:[#allocation7_spill] sm:$0xff] %v12065_v14  ;;  %v12069_v37 = vpop.f32.mrf.mxu1  ;;  %v2337_v51 = vadd.f32 %v2280_v44, %v14662_v28  ;;  %9290 = vmatprep.mubr.msk.bf16.mxu0 %vm9884_vm1, %v14469_v5 }
 0x30b   : > { %v9000_v50 = vpop.f32.mrf.mxu0 }
 0x30c   : > { %v9215_v53 = vpop.f32.mrf.mxu1  ;;  %v12077_v40 = vadd.f32 %v11959_v47, %v2337_v51  ;;  %v3592_v51 = vrot.slane %v11376_v19, 1 }
 0x30d   : > { %v2283_v58 = vpop.f32.mrf.mxu0 }
 0x30e   : > { %v12079_v41 = vpop.f32.mrf.mxu1  ;;  %v2338_v14 = vadd.f32 %v2283_v58, %v14663_v55 }
 0x30f   : > { %v9001_v44 = vpop.f32.mrf.mxu0 }
 0x310   : > { %v9218_v28 = vpop.f32.mrf.mxu1  ;;  %v12084_v7 = vadd.f32 %v11968_v42, %v2338_v14  ;;  %v14664_v14 = vld [vmem:[#allocation18_spill] sm:$0xff] }
 0x311   : > { %v2288_v46 = vpop.f32.mrf.mxu0  ;;  %9291 = vmatmul.mubr.msk.bf16.vlgmr.msra.gmra.mxu0 %vm579_vm2, %v3591_v57  ;;  %v3593_v57 = vsel %vm1138_vm5, %v3590_v16, %v3592_v51 }
 0x312   : > { %v12087_v2 = vpop.f32.mrf.mxu1  ;;  %v2339_v47 = vadd.f32 %v2288_v46, %v11580_v56  ;;  %9294 = vmatprep.mubr.msk.bf16.mxu0 %vm9884_vm1, %v14469_v5 }
 0x313   : > { %v9004_v50 = vpop.f32.mrf.mxu0 }
 0x314   : > { %v9219_v53 = vpop.f32.mrf.mxu1  ;;  %v12094_v62 = vadd.f32 %v11976_v31, %v2339_v47  ;;  %v3594_v47 = vrot.slane %v11402_v26, 1 }
 0x315   : > { %v2291_v58 = vpop.f32.mrf.mxu0 }
 0x316   : > { %v12096_v42 = vpop.f32.mrf.mxu1  ;;  %v2340_v55 = vadd.f32 %v2291_v58, %v14664_v14  ;;  %v14665_v14 = vld [vmem:[#allocation25_spill] sm:$0xff] }
 0x317   : > { %v9005_v44 = vpop.f32.mrf.mxu0 }
 0x318   : > { %v9222_v28 = vpop.f32.mrf.mxu1  ;;  %v12101_v56 = vadd.f32 %v11984_v17, %v2340_v55 }
 0x319   : > { %v2861_v46 = vpop.f32.mrf.mxu0  ;;  %9295 = vmatmul.mubr.msk.bf16.gmra.mxu0 %vm579_vm2, %v3593_v57  ;;  %v3595_v57 = vsel %vm1138_vm5, %v3592_v51, %v3594_v47 }
 0x31a   : > { %v12104_v19 = vpop.f32.mrf.mxu1  ;;  %v3044_v31 = vadd.f32 %v2861_v46, %v11606_v6  ;;  %9298 = vmatprep.mubr.msk.bf16.mxu0 %vm9884_vm1, %v14469_v5 }
 0x31b   : > { %v9104_v50 = vpop.f32.mrf.mxu0 }
 0x31c   : > { %v9223_v53 = vpop.f32.mrf.mxu1  ;;  %v12111_v16 = vadd.f32 %v11992_v45, %v3044_v31  ;;  %v3596_v31 = vrot.slane %v11428_v8, 1 }
 0x31d   : > { %v2864_v58 = vpop.f32.mrf.mxu0 }
 0x31e   : > { %v12113_v17 = vpop.f32.mrf.mxu1  ;;  %v3045_v55 = vadd.f32 %v2864_v58, %v14665_v14  ;;  %v14666_v14 = vld [vmem:[#allocation46_spill] sm:$0xff] }
 0x31f   : > { %v9105_v44 = vpop.f32.mrf.mxu0 }
 0x320   : > { %v9226_v28 = vpop.f32.mrf.mxu1  ;;  %v12118_v6 = vadd.f32 %v12000_v54, %v3045_v55 }
 0x321   : > { %v2869_v46 = vpop.f32.mrf.mxu0  ;;  %9299 = vmatmul.mubr.msk.bf16.gmra.mxu0 %vm579_vm2, %v3595_v57  ;;  %v3597_v57 = vsel %vm1138_vm5, %v3594_v47, %v3596_v31 }
 0x322   : > { %v12121_v26 = vpop.f32.mrf.mxu1  ;;  %v3046_v45 = vadd.f32 %v2869_v46, %v11632_v25  ;;  %9302 = vmatprep.mubr.msk.bf16.mxu0 %vm9884_vm1, %v14469_v5 }
 0x323   : > { %v9108_v50 = vpop.f32.mrf.mxu0 }
 0x324   : > { %v9227_v53 = vpop.f32.mrf.mxu1  ;;  %v12128_v51 = vadd.f32 %v12008_v29, %v3046_v45  ;;  %v3598_v45 = vrot.slane %v11454_v63, 1 }
 0x325   : > { %v2872_v58 = vpop.f32.mrf.mxu0 }
 0x326   : > { %v12130_v54 = vpop.f32.mrf.mxu1  ;;  %v3047_v55 = vadd.f32 %v2872_v58, %v14666_v14  ;;  %v14667_v14 = vld [vmem:[#allocation20_spill] sm:$0xff] }
 0x327   : > { %v9109_v44 = vpop.f32.mrf.mxu0 }
 0x328   : > { %v9230_v28 = vpop.f32.mrf.mxu1  ;;  %v12135_v25 = vadd.f32 %v12016_v1, %v3047_v55 }
 0x329   : > { %v2877_v46 = vpop.f32.mrf.mxu0  ;;  %9303 = vmatmul.mubr.msk.bf16.gmra.mxu0 %vm579_vm2, %v3597_v57  ;;  %v3599_v57 = vsel %vm1138_vm5, %v3596_v31, %v3598_v45 }
 0x32a   : > { %v12138_v8 = vpop.f32.mrf.mxu1  ;;  %v3048_v29 = vadd.f32 %v2877_v46, %v11658_v3  ;;  %9306 = vmatprep.mubr.msk.bf16.mxu0 %vm9884_vm1, %v14469_v5 }
 0x32b   : > { %v9112_v50 = vpop.f32.mrf.mxu0 }
 0x32c   : > { %v9231_v53 = vpop.f32.mrf.mxu1  ;;  %v12145_v47 = vadd.f32 %v12024_v4, %v3048_v29  ;;  %v3600_v29 = vrot.slane %v11482_v11, 1 }
 0x32d   : > { %v2880_v58 = vpop.f32.mrf.mxu0 }
 0x32e   : > { %v12147_v1 = vpop.f32.mrf.mxu1  ;;  %v3049_v55 = vadd.f32 %v2880_v58, %v14667_v14  ;;  %v14668_v14 = vld [vmem:[#allocation47_spill] sm:$0xff] }
 0x32f   : > { %v9113_v44 = vpop.f32.mrf.mxu0 }
 0x330   : > { %v9234_v28 = vpop.f32.mrf.mxu1  ;;  %v12152_v3 = vadd.f32 %v12032_v48, %v3049_v55 }
 0x331   : > { %v2885_v46 = vpop.f32.mrf.mxu0  ;;  %9307 = vmatmul.mubr.msk.bf16.gmra.mxu0 %vm579_vm2, %v3599_v57  ;;  %v3601_v57 = vsel %vm1138_vm5, %v3598_v45, %v3600_v29 }
 0x332   : > { %v12155_v63 = vpop.f32.mrf.mxu1  ;;  %v3050_v4 = vadd.f32 %v2885_v46, %v11684_v21  ;;  %9310 = vmatprep.mubr.msk.bf16.mxu0 %vm9884_vm1, %v14469_v5 }
 0x333   : > { %v9116_v50 = vpop.f32.mrf.mxu0 }
 0x334   : > { %v9235_v53 = vpop.f32.mrf.mxu1  ;;  %v12162_v31 = vadd.f32 %v12040_v35, %v3050_v4  ;;  %v3602_v4 = vrot.slane %v11510_v0, 1 }
 0x335   : > { %v2888_v58 = vpop.f32.mrf.mxu0 }
 0x336   : > { %v12164_v48 = vpop.f32.mrf.mxu1  ;;  %v3051_v55 = vadd.f32 %v2888_v58, %v14668_v14  ;;  %v14669_v14 = vld [vmem:[#allocation21_spill] sm:$0xff] }
 0x337   : > { %v9117_v44 = vpop.f32.mrf.mxu0 }
 0x338   : > { %v9238_v28 = vpop.f32.mrf.mxu1  ;;  %v12169_v21 = vadd.f32 %v12048_v22, %v3051_v55 }
 0x339   : > { %v2893_v46 = vpop.f32.mrf.mxu0  ;;  %9311 = vmatmul.mubr.msk.bf16.gmra.mxu0 %vm579_vm2, %v3601_v57  ;;  %v3603_v57 = vsel %vm1138_vm5, %v3600_v29, %v3602_v4 }
 0x33a   : > { %v12172_v11 = vpop.f32.mrf.mxu1  ;;  %v3052_v35 = vadd.f32 %v2893_v46, %v11710_v27  ;;  %9314 = vmatprep.mubr.msk.bf16.mxu0 %vm9884_vm1, %v14469_v5 }
 0x33b   : > { %v9120_v50 = vpop.f32.mrf.mxu0 }
 0x33c   : > { %v9239_v53 = vpop.f32.mrf.mxu1  ;;  %v12179_v45 = vadd.f32 %v12061_v59, %v3052_v35  ;;  %v3604_v35 = vrot.slane %v11535_v39, 1 }
 0x33d   : > { %v2896_v58 = vpop.f32.mrf.mxu0 }
 0x33e   : > { %v12181_v22 = vpop.f32.mrf.mxu1  ;;  %v3053_v55 = vadd.f32 %v2896_v58, %v14669_v14  ;;  %v14670_v14 = vld [vmem:[#allocation22_spill] sm:$0xff] }
 0x33f   : > { %v9121_v44 = vpop.f32.mrf.mxu0 }
 0x340   : > { %v9242_v28 = vpop.f32.mrf.mxu1  ;;  %v12186_v27 = vadd.f32 %v12069_v37, %v3053_v55 }
 0x341   : > { %v2901_v46 = vpop.f32.mrf.mxu0  ;;  %9315 = vmatmul.mubr.msk.bf16.gmra.mxu0 %vm579_vm2, %v3603_v57  ;;  %v3605_v57 = vsel %vm1138_vm5, %v3602_v4, %v3604_v35 }
 0x342   : > { %v12189_v0 = vpop.f32.mrf.mxu1  ;;  %v3054_v59 = vadd.f32 %v2901_v46, %v11736_v30  ;;  %9318 = vmatprep.mubr.msk.bf16.mxu0 %vm9884_vm1, %v14469_v5 }
 0x343   : > { %v9124_v50 = vpop.f32.mrf.mxu0 }
 0x344   : > { %v9243_v53 = vpop.f32.mrf.mxu1  ;;  %v12196_v29 = vadd.f32 %v12079_v41, %v3054_v59  ;;  %v3606_v59 = vrot.slane %v11563_v38, 1 }
 0x345   : > { %v2904_v58 = vpop.f32.mrf.mxu0 }
 0x346   : > { %v12198_v37 = vpop.f32.mrf.mxu1  ;;  %v3055_v55 = vadd.f32 %v2904_v58, %v14670_v14  ;;  %v14671_v14 = vld [vmem:[#allocation48_spill] sm:$0xff] }
 0x347   : > { %v9125_v44 = vpop.f32.mrf.mxu0 }
 0x348   : > { %v9246_v28 = vpop.f32.mrf.mxu1  ;;  %v12203_v30 = vadd.f32 %v12087_v2, %v3055_v55 }
 0x349   : > { %v2909_v46 = vpop.f32.mrf.mxu0  ;;  %9319 = vmatmul.mubr.msk.bf16.gmra.mxu0 %vm579_vm2, %v3605_v57  ;;  %v3607_v57 = vsel %vm1138_vm5, %v3604_v35, %v3606_v59 }
 0x34a   : > { %v12206_v39 = vpop.f32.mrf.mxu1  ;;  %v3056_v41 = vadd.f32 %v2909_v46, %v11762_v60  ;;  %9322 = vmatprep.mubr.msk.bf16.mxu0 %vm9884_vm1, %v14469_v5 }
 0x34b   : > { %v9128_v50 = vpop.f32.mrf.mxu0 }
 0x34c   : > { %v9247_v53 = vpop.f32.mrf.mxu1  ;;  %v12213_v4 = vadd.f32 %v12096_v42, %v3056_v41  ;;  %v3608_v41 = vrot.slane %v11590_v49, 1 }
 0x34d   : > { %v2912_v58 = vpop.f32.mrf.mxu0 }
 0x34e   : > { %v12215_v2 = vpop.f32.mrf.mxu1  ;;  %v3057_v55 = vadd.f32 %v2912_v58, %v14671_v14  ;;  %v14672_v14 = vld [vmem:[#allocation24_spill] sm:$0xff] }
 0x34f   : > { %v9129_v44 = vpop.f32.mrf.mxu0 }
 0x350   : > { %v9250_v28 = vpop.f32.mrf.mxu1  ;;  %v12220_v60 = vadd.f32 %v12104_v19, %v3057_v55 }
 0x351   : > { %v2917_v46 = vpop.f32.mrf.mxu0  ;;  %9323 = vmatmul.mubr.msk.bf16.gmra.mxu0 %vm579_vm2, %v3607_v57  ;;  %v3609_v57 = vsel %vm1138_vm5, %v3606_v59, %v3608_v41 }
 0x352   : > { %v12223_v38 = vpop.f32.mrf.mxu1  ;;  %v3058_v42 = vadd.f32 %v2917_v46, %v11788_v18  ;;  %9326 = vmatprep.mubr.msk.bf16.mxu0 %vm9884_vm1, %v14469_v5 }
 0x353   : > { %v9132_v50 = vpop.f32.mrf.mxu0 }
 0x354   : > { %v9251_v53 = vpop.f32.mrf.mxu1  ;;  %v12230_v35 = vadd.f32 %v12113_v17, %v3058_v42  ;;  %v3610_v42 = vrot.slane %v11616_v10, 1 }
 0x355   : > { %v2920_v58 = vpop.f32.mrf.mxu0 }
 0x356   : > { %v12232_v19 = vpop.f32.mrf.mxu1  ;;  %v3059_v55 = vadd.f32 %v2920_v58, %v14672_v14 }
 0x357   : > { %v9133_v44 = vpop.f32.mrf.mxu0 }
 0x358   : > { %v9254_v28 = vpop.f32.mrf.mxu1  ;;  %v12237_v18 = vadd.f32 %v12121_v26, %v3059_v55  ;;  %v3611_v55 = vsel %vm1138_vm5, %v3608_v41, %v3610_v42 }
 0x359   : > { %v2925_v46 = vpop.f32.mrf.mxu0  ;;  %9327 = vmatmul.mubr.msk.bf16.gmra.mxu0 %vm579_vm2, %v3609_v57 }
 0x35a   : > { %v12240_v49 = vpop.f32.mrf.mxu1  ;;  %v3060_v17 = vadd.f32 %v2925_v46, %v11814_v52  ;;  %9330 = vmatprep.mubr.msk.bf16.mxu0 %vm9884_vm1, %v14469_v5  ;;  %v14673_v46 = vld [vmem:[#allocation26_spill] sm:$0xff] }
 0x35b   : > { %v9136_v50 = vpop.f32.mrf.mxu0 }
 0x35c   : > { %v9255_v53 = vpop.f32.mrf.mxu1  ;;  %v12247_v59 = vadd.f32 %v12130_v54, %v3060_v17  ;;  %v3612_v17 = vrot.slane %v11642_v12, 1 }
 0x35d   : > { %v2928_v58 = vpop.f32.mrf.mxu0 }
 0x35e   : > { %v12249_v26 = vpop.f32.mrf.mxu1  ;;  %v3061_v14 = vadd.f32 %v2928_v58, %v11827_v9  ;;  %v14675_v58 = vld [vmem:[#allocation27_spill] sm:$0xff] }
 0x35f   : > { %v9137_v57 = vpop.f32.mrf.mxu0 }
 0x360   : > { %v9258_v44 = vpop.f32.mrf.mxu1  ;;  %v12254_v52 = vadd.f32 %v12138_v8, %v3061_v14 }
 0x361   : > { %v2933_v28 = vpop.f32.mrf.mxu0  ;;  %9331 = vmatmul.mubr.msk.bf16.gmra.mxu0 %vm579_vm2, %v3611_v55  ;;  %v3613_v55 = vsel %vm1138_vm5, %v3610_v42, %v3612_v17 }
 0x362   : > { %v12257_v10 = vpop.f32.mrf.mxu1  ;;  %v3062_v54 = vadd.f32 %v2933_v28, %v14673_v46  ;;  %9334 = vmatprep.mubr.msk.bf16.mxu0 %vm9884_vm1, %v14469_v5 }
 0x363   : > { %v9140_v9 = vpop.f32.mrf.mxu0 }
 0x364   : > { %v9259_v50 = vpop.f32.mrf.mxu1  ;;  %v12264_v41 = vadd.f32 %v12147_v1, %v3062_v54  ;;  %v14677_v9 = vld [vmem:[#allocation28_spill] sm:$0xff]  ;;  %v14678_v54 = vld [vmem:[#allocation19_spill] sm:$0xff] }
 0x365   : > { %v2936_v53 = vpop.f32.mrf.mxu0  ;;  %v3614_v50 = vrot.slane %v14678_v54, 1 }
 0x366   : > { %14674 = vst [vmem:[#allocation8_spill] sm:$0xff] %v12264_v41  ;;  %v12266_v8 = vpop.f32.mrf.mxu1  ;;  %v3063_v14 = vadd.f32 %v2936_v53, %v14675_v58 }
 0x367   : > { %v9141_v57 = vpop.f32.mrf.mxu0 }
 0x368   : > { %v9262_v44 = vpop.f32.mrf.mxu1  ;;  %v12271_v28 = vadd.f32 %v12155_v63, %v3063_v14  ;;  %v14679_v14 = vld [vmem:[#allocation30_spill] sm:$0xff] }
 0x369   : > { %v2941_v46 = vpop.f32.mrf.mxu0  ;;  %9335 = vmatmul.mubr.msk.bf16.gmra.mxu0 %vm579_vm2, %v3613_v55  ;;  %v3615_v55 = vsel %vm1138_vm5, %v3612_v17, %v3614_v50 }
 0x36a   : > { %14676 = vst [vmem:[#allocation9_spill] sm:$0xff] %v12271_v28  ;;  %v12274_v12 = vpop.f32.mrf.mxu1  ;;  %v3064_v1 = vadd.f32 %v2941_v46, %v14677_v9  ;;  %9338 = vmatprep.mubr.msk.bf16.mxu0 %vm9884_vm1, %v14469_v5 }
 0x36b   : > { %v9144_v53 = vpop.f32.mrf.mxu0 }
 0x36c   : > { %v9263_v58 = vpop.f32.mrf.mxu1  ;;  %v12281_v42 = vadd.f32 %v12164_v48, %v3064_v1  ;;  %v14680_v53 = vld [vmem:[#allocation31_spill] sm:$0xff]  ;;  %v3616_v1 = vrot.slane %v11694_v43, 1 }
 0x36d   : > { %v2944_v57 = vpop.f32.mrf.mxu0 }
 0x36e   : > { %v12283_v63 = vpop.f32.mrf.mxu1  ;;  %v3065_v44 = vadd.f32 %v2944_v57, %v14679_v14  ;;  %v14681_v14 = vld [vmem:[#allocation33_spill] sm:$0xff] }
 0x36f   : > { %v9145_v28 = vpop.f32.mrf.mxu0 }
 0x370   : > { %v9266_v41 = vpop.f32.mrf.mxu1  ;;  %v12288_v46 = vadd.f32 %v12172_v11, %v3065_v44  ;;  %v7922_v28 = vld [vmem:[%s14390_s3 + $0x6] sm:$0x3] }
 0x371   : > { %v2949_v9 = vpop.f32.mrf.mxu0  ;;  %9339 = vmatmul.mubr.msk.bf16.gmra.mxu0 %vm579_vm2, %v3615_v55  ;;  %v3617_v55 = vsel %vm1138_vm5, %v3614_v50, %v3616_v1  ;;  %9765 = vmatprep.subr.msk.bf16.mxu0 %vm4319_vm8, %v7922_v28  ;;  %v5217_v43 = vsel %vm4319_vm8, %v7922_v28, 0  ;;  %v3618_v50 = vrot.slane %v11720_v13, 1 }
 0x372   : > { %v12291_v54 = vpop.f32.mrf.mxu1  ;;  %v3066_v48 = vadd.f32 %v2949_v9, %v14680_v53  ;;  %9342 = vmatprep.mubr.msk.bf16.mxu0 %vm9884_vm1, %v14469_v5  ;;  %9509 = vmatpush3.bf16.msra.mxu0 %v5217_v43 }
 0x373   : > { %v9148_v58 = vpop.f32.mrf.mxu0 }
 0x374   : > { %v9267_v57 = vpop.f32.mrf.mxu1  ;;  %v12298_v17 = vadd.f32 %v12181_v22, %v3066_v48 }
 0x375   : > { %v2952_v41 = vpop.f32.mrf.mxu0 }
 0x376   : > { %v12300_v11 = vpop.f32.mrf.mxu1  ;;  %v3067_v44 = vadd.f32 %v2952_v41, %v14681_v14 }
 0x377   : > { %v9149_v9 = vpop.f32.mrf.mxu0 }
 0x378   : > { %v9270_v53 = vpop.f32.mrf.mxu1  ;;  %v12310_v22 = vadd.f32 %v12189_v0, %v3067_v44  ;;  %v14683_v44 = vld [vmem:[#allocation35_spill] sm:$0xff] }
 0x379   : > { %v2957_v48 = vpop.f32.mrf.mxu0  ;;  %9343 = vmatmul.mubr.msk.bf16.gmra.mxu0 %vm579_vm2, %v3617_v55  ;;  %v3619_v55 = vsel %vm1138_vm5, %v3616_v1, %v3618_v50 }
 0x37a   : > { %14682 = vst [vmem:[#allocation10_spill] sm:$0xff] %v12310_v22  ;;  %v12313_v58 = vpop.f32.mrf.mxu1  ;;  %v3068_v57 = vadd.f32 %v2957_v48, %v11917_v20  ;;  %9346 = vmatprep.mubr.msk.bf16.mxu0 %vm9884_vm1, %v14469_v5 }
 0x37b   : > { %v9152_v41 = vpop.f32.mrf.mxu0 }
 0x37c   : > { %v9271_v28 = vpop.f32.mrf.mxu1  ;;  %v12320_v14 = vadd.f32 %v12198_v37, %v3068_v57  ;;  %v14685_v41 = vld [vmem:[#allocation36_spill] sm:$0xff]  ;;  %v3620_v57 = vrot.slane %v11746_v24, 1 }
 0x37d   : > { %v2960_v43 = vpop.f32.mrf.mxu0 }
 0x37e   : > { %v12322_v0 = vpop.f32.mrf.mxu1  ;;  %v3069_v9 = vadd.f32 %v2960_v43, %v14683_v44  ;;  %v14686_v44 = vld [vmem:[#allocation38_spill] sm:$0xff] }
 0x37f   : > { %v9153_v53 = vpop.f32.mrf.mxu0 }
 0x380   : > { %v9274_v22 = vpop.f32.mrf.mxu1  ;;  %v12327_v20 = vadd.f32 %v12206_v39, %v3069_v9 }
 0x381   : > { %v2965_v48 = vpop.f32.mrf.mxu0  ;;  %9347 = vmatmul.mubr.msk.bf16.gmra.mxu0 %vm579_vm2, %v3619_v55  ;;  %v3621_v55 = vsel %vm1138_vm5, %v3618_v50, %v3620_v57 }
 0x382   : > { %14684 = vst [vmem:[#allocation2_spill] sm:$0xff] %v12327_v20  ;;  %v12330_v13 = vpop.f32.mrf.mxu1  ;;  %v3070_v37 = vadd.f32 %v2965_v48, %v14685_v41  ;;  %9350 = vmatprep.mubr.msk.bf16.mxu0 %vm9884_vm1, %v14469_v5 }
 0x383   : > { %v9156_v28 = vpop.f32.mrf.mxu0 }
 0x384   : > { %v9275_v43 = vpop.f32.mrf.mxu1  ;;  %v12337_v1 = vadd.f32 %v12215_v2, %v3070_v37  ;;  %v3622_v37 = vrot.slane %v11772_v36, 1 }
 0x385   : > { %v2968_v22 = vpop.f32.mrf.mxu0 }
 0x386   : > { %v12339_v39 = vpop.f32.mrf.mxu1  ;;  %v3071_v9 = vadd.f32 %v2968_v22, %v14686_v44  ;;  %v14687_v22 = vld [vmem:[#allocation39_spill] sm:$0xff] }
 0x387   : > { %v9157_v53 = vpop.f32.mrf.mxu0 }
 0x388   : > { %v9278_v20 = vpop.f32.mrf.mxu1  ;;  %v12344_v48 = vadd.f32 %v12223_v38, %v3071_v9  ;;  %v3623_v9 = vsel %vm1138_vm5, %v3620_v57, %v3622_v37 }
 0x389   : > { %v2973_v41 = vpop.f32.mrf.mxu0  ;;  %9351 = vmatmul.mubr.msk.bf16.gmra.mxu0 %vm579_vm2, %v3621_v55 }
 0x38a   : > { %v12347_v24 = vpop.f32.mrf.mxu1  ;;  %v3072_v2 = vadd.f32 %v2973_v41, %v11957_v32  ;;  %9354 = vmatprep.mubr.msk.bf16.mxu0 %vm9884_vm1, %v14469_v5 }
 0x38b   : > { %v9160_v28 = vpop.f32.mrf.mxu0 }
 0x38c   : > { %v9279_v43 = vpop.f32.mrf.mxu1  ;;  %v12354_v50 = vadd.f32 %v12232_v19, %v3072_v2  ;;  %v14689_v28 = vld [vmem:[#allocation41_spill] sm:$0xff]  ;;  %v3624_v2 = vrot.slane %v11798_v15, 1 }
 0x38d   : > { %v2976_v20 = vpop.f32.mrf.mxu0 }
 0x38e   : > { %v12356_v38 = vpop.f32.mrf.mxu1  ;;  %v3073_v44 = vadd.f32 %v2976_v20, %v14687_v22 }
 0x38f   : > { %v9161_v55 = vpop.f32.mrf.mxu0 }
 0x390   : > { %v9282_v53 = vpop.f32.mrf.mxu1  ;;  %v12361_v32 = vadd.f32 %v12240_v49, %v3073_v44  ;;  %v14690_v44 = vld [vmem:[#allocation42_spill] sm:$0xff] }
 0x391   : > { %v2981_v41 = vpop.f32.mrf.mxu0  ;;  %9355 = vmatmul.mubr.msk.bf16.gmra.mxu0 %vm579_vm2, %v3623_v9  ;;  %v3625_v9 = vsel %vm1138_vm5, %v3622_v37, %v3624_v2 }
 0x392   : > { %14688 = vst [vmem:[#allocation34_spill] sm:$0xff] %v12361_v32  ;;  %v12364_v36 = vpop.f32.mrf.mxu1  ;;  %v3074_v19 = vadd.f32 %v2981_v41, %v14689_v28  ;;  %9358 = vmatprep.mubr.msk.bf16.mxu0 %vm9884_vm1, %v14469_v5 }
 0x393   : > { %v9164_v43 = vpop.f32.mrf.mxu0 }
 0x394   : > { %v9283_v20 = vpop.f32.mrf.mxu1  ;;  %v12371_v57 = vadd.f32 %v12249_v26, %v3074_v19  ;;  %v14692_v43 = vld [vmem:[#allocation44_spill] sm:$0xff]  ;;  %v3626_v19 = vrot.slane %v11824_v61, 1  ;;  %v3628_v61 = vrot.slane %v11850_v34, 1  ;;  %v3630_v34 = vrot.slane %v11876_v33, 1 }
 0x395   : > { %v2984_v22 = vpop.f32.mrf.mxu0  ;;  %v14698_v33 = vld [vmem:[#allocation32_spill] sm:$0xff] }
 0x396   : > { %v12373_v49 = vpop.f32.mrf.mxu1  ;;  %v3075_v55 = vadd.f32 %v2984_v22, %v14690_v44 }
 0x397   : > { %v9165_v53 = vpop.f32.mrf.mxu0 }
 0x398   : > { %v9286_v32 = vpop.f32.mrf.mxu1  ;;  %v12378_v41 = vadd.f32 %v12257_v10, %v3075_v55  ;;  %v14693_v10 = vld [vmem:[#allocation45_spill] sm:$0xff]  ;;  %v3627_v55 = vsel %vm1138_vm5, %v3624_v2, %v3626_v19  ;;  %v14695_v2 = vld [vmem:[#allocation3_spill] sm:$0xff] }
 0x399   : > { %v2989_v28 = vpop.f32.mrf.mxu0  ;;  %9359 = vmatmul.mubr.msk.bf16.gmra.mxu0 %vm579_vm2, %v3625_v9 }
 0x39a   : > { %14691 = vst [vmem:[#allocation11_spill] sm:$0xff] %v12378_v41  ;;  %v12381_v15 = vpop.f32.mrf.mxu1  ;;  %v3076_v26 = vadd.f32 %v2989_v28, %v14692_v43  ;;  %9362 = vmatprep.mubr.msk.bf16.mxu0 %vm9884_vm1, %v14469_v5  ;;  %v14694_v43 = vld [vmem:[#allocation23_spill] sm:$0xff] }
 0x39b   : > { %v9168_v20 = vpop.f32.mrf.mxu0 }
 0x39c   : > { %v9287_v22 = vpop.f32.mrf.mxu1  ;;  %v12388_v37 = vadd.f32 %v12266_v8, %v3076_v26 }
 0x39d   : > { %v2992_v32 = vpop.f32.mrf.mxu0 }
 0x39e   : > { %v3077_v44 = vadd.f32 %v2992_v32, %v14693_v10 }
 0x39f   : > { %v9169_v9 = vpop.f32.mrf.mxu0 }
 0x3a0   : > { %v12393_v53 = vadd.f32 %v12274_v12, %v3077_v44  ;;  %v3629_v12 = vsel %vm1138_vm5, %v3626_v19, %v3628_v61  ;;  %v14697_v19 = vld [vmem:[#allocation5_spill] sm:$0xff] }
 0x3a1   : > { %v2997_v28 = vpop.f32.mrf.mxu0  ;;  %9363 = vmatmul.mubr.msk.bf16.gmra.mxu0 %vm579_vm2, %v3627_v55  ;;  %v14696_v55 = vld [vmem:[#allocation4_spill] sm:$0xff] }
 0x3a2   : > { %v3078_v41 = vadd.f32 %v2997_v28, %v14694_v43  ;;  %9366 = vmatprep.mubr.msk.bf16.mxu0 %vm9884_vm1, %v14469_v5 }
 0x3a3   : > { %v9172_v8 = vpop.f32.mrf.mxu0 }
 0x3a4   : > { %v12401_v26 = vadd.f32 %v12283_v63, %v3078_v41 }
 0x3a5   : > { %v3000_v20 = vpop.f32.mrf.mxu0 }
 0x3a6   : > { %v3079_v22 = vadd.f32 %v3000_v20, %v14695_v2 }
 0x3a7   : > { %v9173_v32 = vpop.f32.mrf.mxu0 }
 0x3a8   : > { %v12406_v10 = vadd.f32 %v12291_v54, %v3079_v22  ;;  %v3631_v54 = vsel %vm1138_vm5, %v3628_v61, %v3630_v34  ;;  %v14699_v61 = vld [vmem:[#allocation6_spill] sm:$0xff] }
 0x3a9   : > { %v3005_v44 = vpop.f32.mrf.mxu0  ;;  %9367 = vmatmul.mubr.msk.bf16.gmra.mxu0 %vm579_vm2, %v3629_v12 }
 0x3aa   : > { %v3080_v9 = vadd.f32 %v3005_v44, %v14696_v55  ;;  %9370 = vmatprep.mubr.msk.bf16.mxu0 %vm9884_vm1, %v14469_v5 }
 0x3ab   : > { %v9176_v63 = vpop.f32.mrf.mxu0 }
 0x3ac   : > { %v12414_v41 = vadd.f32 %v12300_v11, %v3080_v9  ;;  %v3632_v11 = vrot.slane %v14698_v33, 1 }
 0x3ad   : > { %v3008_v28 = vpop.f32.mrf.mxu0 }
 0x3ae   : > { %v3081_v43 = vadd.f32 %v3008_v28, %v14697_v19 }
 0x3af   : > { %v9177_v8 = vpop.f32.mrf.mxu0 }
 0x3b0   : > { %v12419_v20 = vadd.f32 %v12313_v58, %v3081_v43  ;;  %v3633_v58 = vsel %vm1138_vm5, %v3630_v34, %v3632_v11  ;;  %v14701_v8 = vld [vmem:[#allocation7_spill] sm:$0xff] }
 0x3b1   : > { %v3013_v2 = vpop.f32.mrf.mxu0  ;;  %9371 = vmatmul.mubr.msk.bf16.gmra.mxu0 %vm579_vm2, %v3631_v54 }
 0x3b2   : > { %v3082_v22 = vadd.f32 %v3013_v2, %v12038_v23  ;;  %9374 = vmatprep.mubr.msk.bf16.mxu0 %vm9884_vm1, %v14469_v5  ;;  %v14700_v23 = vld [vmem:[#allocation29_spill] sm:$0xff] }
 0x3b3   : > { %v9180_v12 = vpop.f32.mrf.mxu0 }
 0x3b4   : > { %v12427_v32 = vadd.f32 %v12322_v0, %v3082_v22 }
 0x3b5   : > { %v3016_v44 = vpop.f32.mrf.mxu0 }
 0x3b6   : > { %v3083_v55 = vadd.f32 %v3016_v44, %v14699_v61 }
 0x3b7   : > { %v9181_v9 = vpop.f32.mrf.mxu0 }
 0x3b8   : > { %v12432_v63 = vadd.f32 %v12330_v13, %v3083_v55  ;;  %v12445_v13 = vld [vmem:[%s14390_s3] sm:$0x3] }
 0x3b9   : > { %v3021_v28 = vpop.f32.mrf.mxu0  ;;  %9375 = vmatmul.mubr.msk.bf16.gmra.mxu0 %vm579_vm2, %v3633_v58  ;;  %9763 = vmatprep.subr.msk.bf16.mxu1 %vm4319_vm8, %v12445_v13 }
 0x3ba   : > { %v3084_v19 = vadd.f32 %v3021_v28, %v14700_v23  ;;  %9378 = vmatprep.mubr.msk.bf16.mxu0 %vm9884_vm1, %v14469_v5 }
 0x3bb   : > { %v9184_v43 = vpop.f32.mrf.mxu0 }
 0x3bc   : > { %v12439_v0 = vadd.f32 %v12339_v39, %v3084_v19 }
 0x3bd   : > { %v3024_v54 = vpop.f32.mrf.mxu0 }
 0x3be   : > { %v3085_v2 = vadd.f32 %v3024_v54, %v14701_v8 }
 0x3bf   : > { %v9185_v34 = vpop.f32.mrf.mxu0 }
 0x3c0   : > { %v12450_v22 = vadd.f32 %v12347_v24, %v3085_v2 }
 0x3c1   : > { %v3029_v5 = vpop.f32.mrf.mxu0  ;;  %9379 = vmatmul.mubr.msk.bf16.gmra.mxu0 %vm579_vm2, %v3632_v11 }
 0x3c2   : > { %v3086_v39 = vadd.f32 %v3029_v5, %v12077_v40 }
 0x3c3   : > { %v9188_v33 = vpop.f32.mrf.mxu0 }
 0x3c4   : > { %v12455_v12 = vadd.f32 %v12356_v38, %v3086_v39 }
 0x3c5   : > { %v3032_v44 = vpop.f32.mrf.mxu0 }
 0x3c6   : > { %v3087_v61 = vadd.f32 %v3032_v44, %v12084_v7 }
 0x3c7   : > { %v9189_v55 = vpop.f32.mrf.mxu0 }
 0x3c8   : > { %v12459_v58 = vadd.f32 %v12364_v36, %v3087_v61  ;;  %v12473_v36 = vld [vmem:[%s14389_s2] ss:$0 sm:$0xff] }
 0x3c9   : > { %v3037_v9 = vpop.f32.mrf.mxu0 }
 0x3ca   : > { %v3088_v24 = vadd.f32 %v3037_v9, %v12094_v62 }
 0x3cb   : > { %v9192_v28 = vpop.f32.mrf.mxu0 }
 0x3cc   : > { %v12463_v23 = vadd.f32 %v12373_v49, %v3088_v24 }
 0x3cd   : > { %v3040_v11 = vpop.f32.mrf.mxu0 }
 0x3ce   : > { %v3089_v40 = vadd.f32 %v3040_v11, %v12101_v56 }
 0x3cf   : > { %v9193_v19 = vpop.f32.mrf.mxu0 }
 0x3d0   : > { %v12467_v38 = vadd.f32 %v12381_v15, %v3089_v40 }
 0x3d1   : > { %v3740_v43 = vpop.f32.mrf.mxu0 }
 0x3d2   : > { %v3923_v7 = vadd.f32 %v3740_v43, %v12111_v16 }
 0x3d3   : > { %v9292_v62 = vpop.f32.mrf.mxu0 }
 0x3d4   : > { %v3976_v49 = vadd.f32 %v12473_v36, %v3923_v7 }
 0x3d5   : > { %v3743_v54 = vpop.f32.mrf.mxu0 }
 0x3d6   : > { %v3924_v8 = vadd.f32 %v3743_v54, %v12118_v6  ;;  %v4022_v15 = vmax.f32 %v3976_v49, 0.0 }
 0x3d7   : > { %v9293_v2 = vpop.f32.mrf.mxu0 }
 0x3d8   : > { %v3977_v56 = vadd.f32 %v12473_v36, %v3924_v8 }
 0x3d9   : > { %v3748_v34 = vpop.f32.mrf.mxu0 }
 0x3da   : > { %v4023_v5 = vmax.f32 %v3977_v56, 0.0  ;;  %v3925_v39 = vadd.f32 %v3748_v34, %v12128_v51 }
 0x3db   : > { %v9296_v16 = vpop.f32.mrf.mxu0 }
 0x3dc   : > { %v12479_v33 = vpack.c.bf16 %v4023_v5, %v4022_v15  ;;  %v3978_v61 = vadd.f32 %v12473_v36, %v3925_v39 }
 0x3dd   : > { %v3751_v44 = vpop.f32.mrf.mxu0 }
 0x3de   : > { %v3926_v55 = vadd.f32 %v3751_v44, %v12135_v25  ;;  %v4097_v24 = vshll.u32 %v12479_v33, 16  ;;  %v4024_v11 = vmax.f32 %v3978_v61, 0.0  ;;  %v4095_v54 = vshrl.u32 %v12479_v33, 16 }
 0x3df   : > { %v9297_v9 = vpop.f32.mrf.mxu0 }
 0x3e0   : > { %v3979_v6 = vadd.f32 %v12473_v36, %v3926_v55  ;;  %v4099_v51 = vrot.slane %v4097_v24, 1 }
 0x3e1   : > { %v3756_v28 = vpop.f32.mrf.mxu0 }
 0x3e2   : > { %v4025_v40 = vmax.f32 %v3979_v6, 0.0  ;;  %v3927_v19 = vadd.f32 %v3756_v28, %v12145_v47  ;;  %v4100_v34 = vor.u32 %v4099_v51, %v4095_v54 }
 0x3e3   : > { %v9300_v43 = vpop.f32.mrf.mxu0 }
 0x3e4   : > { %v12486_v7 = vpack.c.bf16 %v4025_v40, %v4024_v11  ;;  %v3980_v49 = vadd.f32 %v12473_v36, %v3927_v19 }
 0x3e5   : > { %v3759_v62 = vpop.f32.mrf.mxu0 }
 0x3e6   : > { %v3928_v25 = vadd.f32 %v3759_v62, %v12152_v3  ;;  %v4102_v8 = vshll.u32 %v12486_v7, 16  ;;  %v4106_v2 = vshrl.u32 %v12486_v7, 16  ;;  %v4026_v44 = vmax.f32 %v3980_v49, 0.0 }
 0x3e7   : > { %v9301_v56 = vpop.f32.mrf.mxu0  ;;  %v5115_v11 = vrot.slane %v12486_v7, 2 }
 0x3e8   : > { %v3981_v47 = vadd.f32 %v12473_v36, %v3928_v25  ;;  %v4104_v15 = vrot.slane %v4102_v8, 1  ;;  %v5454_v5 = vrot.slane %v4106_v2, 2  ;;  %v5455_v39 = vrot.slane %v4102_v8, 3 }
 0x3e9   : > { %v3764_v16 = vpop.f32.mrf.mxu0 }
 0x3ea   : > { %v4027_v61 = vmax.f32 %v3981_v47, 0.0  ;;  %v3929_v55 = vadd.f32 %v3764_v16, %v12162_v31  ;;  %v4105_v9 = vsel %vm395_vm3, %v4100_v34, %v4104_v15  ;;  %v5456_v24 = vor.u32 %v5455_v39, %v5454_v5 }
 0x3eb   : > { %v9304_v3 = vpop.f32.mrf.mxu0  ;;  %9384 = vmatprep.mubr.msk.bf16.mxu1 %vm4258_vm9, %v4105_v9  ;;  %v4108_v31 = vor.u32 %v4106_v2, %v4104_v15 }
 0x3ec   : > { %v12497_v6 = vpack.c.bf16 %v4027_v61, %v4026_v44  ;;  %v3982_v40 = vadd.f32 %v12473_v36, %v3929_v55 }
 0x3ed   : > { %v3767_v28 = vpop.f32.mrf.mxu0 }
 0x3ee   : > { %14702 = vst [vmem:[#allocation12_spill] sm:$0xff] %v12497_v6  ;;  %v3930_v19 = vadd.f32 %v3767_v28, %v12169_v21  ;;  %v5116_v43 = vrot.slane %v12497_v6, 2  ;;  %v4110_v51 = vshll.u32 %v12497_v6, 16  ;;  %v4114_v54 = vshrl.u32 %v12497_v6, 16 }
 0x3ef   : > { %v9305_v62 = vpop.f32.mrf.mxu0  ;;  %v4557_v21 = vsel %vm4319_vm8, %v12445_v13, 0  ;;  %v4028_v39 = vmax.f32 %v3982_v40, 0.0 }
 0x3f0   : > { %v3983_v49 = vadd.f32 %v12473_v36, %v3930_v19  ;;  %v5117_v25 = vsel %vm1526_vm4, %v5115_v11, %v5116_v43  ;;  %v4112_v8 = vrot.slane %v4110_v51, 1  ;;  %v6524_v56 = vrot.slane %v4110_v51, 5 }
 0x3f1   : > { %v3772_v34 = vpop.f32.mrf.mxu0  ;;  %9510 = vmatprep.mubr.msk.bf16.mxu0 %vm4258_vm9, %v5117_v25  ;;  %v6523_v47 = vrot.slane %v4114_v54, 4  ;;  %v5457_v5 = vrot.slane %v4114_v54, 2  ;;  %v5458_v55 = vrot.slane %v4110_v51, 3 }
 0x3f2   : > { %v4029_v16 = vmax.f32 %v3983_v49, 0.0  ;;  %v3931_v2 = vadd.f32 %v3772_v34, %v12179_v45  ;;  %v4113_v15 = vsel %vm395_vm3, %v4108_v31, %v4112_v8  ;;  %v4116_v25 = vor.u32 %v4114_v54, %v4112_v8 }
 0x3f3   : > { %v9308_v44 = vpop.f32.mrf.mxu0  ;;  %9385 = vmatmul.mubr.msk.bf16.vlgmr.msra.gmra.mxu1 %vm4258_vm9, %v4113_v15  ;;  %v6525_v61 = vor.u32 %v6524_v56, %v6523_v47  ;;  %v5459_v28 = vor.u32 %v5458_v55, %v5457_v5 }
 0x3f4   : > { %v12513_v9 = vpack.c.bf16 %v4029_v16, %v4028_v39  ;;  %9425 = vmatpush3.bf16.msra.mxu1 %v4557_v21  ;;  %v3984_v13 = vadd.f32 %v12473_v36, %v3931_v2 }
 0x3f5   : > { %v3775_v3 = vpop.f32.mrf.mxu0  ;;  %v12521_v62 = vsel %vm1909_vm6, %v5456_v24, %v5459_v28 }
 0x3f6   : > { %14703 = vst [vmem:[#allocation37_spill] sm:$0xff] %v12513_v9  ;;  %v3932_v11 = vadd.f32 %v3775_v3, %v12186_v27  ;;  %v5118_v40 = vrot.slane %v12513_v9, 2  ;;  %v4118_v45 = vshll.u32 %v12513_v9, 16  ;;  %v4122_v31 = vshrl.u32 %v12513_v9, 16  ;;  %14704 = vst [vmem:[#allocation13_spill] sm:$0xff] %v12521_v62 }
 0x3f7   : > { %v9309_v19 = vpop.f32.mrf.mxu0  ;;  %v4030_v5 = vmax.f32 %v3984_v13, 0.0 }
 0x3f8   : > { %v3985_v51 = vadd.f32 %v12473_v36, %v3932_v11  ;;  %v5119_v49 = vsel %vm1526_vm4, %v5116_v43, %v5118_v40  ;;  %v4120_v56 = vrot.slane %v4118_v45, 1  ;;  %v5462_v27 = vrot.slane %v4118_v45, 3 }
 0x3f9   : > { %v3780_v34 = vpop.f32.mrf.mxu0  ;;  %9511 = vmatmul.mubr.msk.bf16.vlgmr.msra.gmra.mxu0 %vm4258_vm9, %v5119_v49  ;;  %v6526_v21 = vrot.slane %v4122_v31, 4  ;;  %v6527_v47 = vrot.slane %v4118_v45, 5  ;;  %v5461_v43 = vrot.slane %v4122_v31, 2 }
 0x3fa   : > { %v4031_v39 = vmax.f32 %v3985_v51, 0.0  ;;  %v3933_v16 = vadd.f32 %v3780_v34, %v12196_v29  ;;  %v4121_v24 = vsel %vm395_vm3, %v4116_v25, %v4120_v56  ;;  %v4124_v45 = vor.u32 %v4122_v31, %v4120_v56 }
 0x3fb   : > { %v9312_v2 = vpop.f32.mrf.mxu0  ;;  %9388 = vmatprep.mubr.msk.bf16.mxu1 %vm4258_vm9, %v4121_v24  ;;  %v6528_v15 = vor.u32 %v6527_v47, %v6526_v21  ;;  %v5463_v55 = vor.u32 %v5462_v27, %v5461_v43 }
 0x3fc   : > { %v12529_v54 = vpack.c.bf16 %v4031_v39, %v4030_v5  ;;  %v3986_v3 = vadd.f32 %v12473_v36, %v3933_v16 }
 0x3fd   : > { %v3783_v8 = vpop.f32.mrf.mxu0  ;;  %v12532_v44 = vsel %vm6522_vm10, %v6525_v61, %v6528_v15  ;;  %v12540_v49 = vsel %vm1909_vm6, %v5459_v28, %v5463_v55 }
 0x3fe   : > { %14705 = vst [vmem:[#allocation14_spill] sm:$0xff] %v12529_v54  ;;  %v3934_v13 = vadd.f32 %v3783_v8, %v12203_v30  ;;  %v5120_v29 = vrot.slane %v12529_v54, 2  ;;  %v4126_v11 = vshll.u32 %v12529_v54, 16  ;;  %v4130_v51 = vshrl.u32 %v12529_v54, 16  ;;  %14706 = vst [vmem:[#allocation40_spill] sm:$0xff] %v12540_v49 }
 0x3ff   : > { %v9313_v19 = vpop.f32.mrf.mxu0  ;;  %v4032_v5 = vmax.f32 %v3986_v3, 0.0 }
 0x400   : > { %v3987_v25 = vadd.f32 %v12473_v36, %v3934_v13  ;;  %v5121_v61 = vsel %vm1526_vm4, %v5118_v40, %v5120_v29  ;;  %v4128_v34 = vrot.slane %v4126_v11, 1  ;;  %v6531_v27 = vrot.slane %v4126_v11, 5 }
 0x401   : > { %v3788_v21 = vpop.f32.mrf.mxu0  ;;  %9514 = vmatprep.mubr.msk.bf16.mxu0 %vm4258_vm9, %v5121_v61  ;;  %v6530_v30 = vrot.slane %v4130_v51, 4  ;;  %v5465_v47 = vrot.slane %v4130_v51, 2  ;;  %v5466_v24 = vrot.slane %v4126_v11, 3 }
 0x402   : > { %v4033_v39 = vmax.f32 %v3987_v25, 0.0  ;;  %v3935_v31 = vadd.f32 %v3788_v21, %v12213_v4  ;;  %v4129_v56 = vsel %vm395_vm3, %v4124_v45, %v4128_v34  ;;  %v4132_v25 = vor.u32 %v4130_v51, %v4128_v34 }
 0x403   : > { %v9316_v16 = vpop.f32.mrf.mxu0  ;;  %9389 = vmatmul.mubr.msk.bf16.gmra.mxu1 %vm4258_vm9, %v4129_v56  ;;  %v6532_v28 = vor.u32 %v6531_v27, %v6530_v30  ;;  %v5467_v8 = vor.u32 %v5466_v24, %v5465_v47 }
 0x404   : > { %v12548_v2 = vpack.c.bf16 %v4033_v39, %v4032_v5  ;;  %v3988_v13 = vadd.f32 %v12473_v36, %v3935_v31 }
 0x405   : > { %v3791_v40 = vpop.f32.mrf.mxu0  ;;  %v12551_v43 = vsel %vm6522_vm10, %v6528_v15, %v6532_v28  ;;  %v12559_v11 = vsel %vm1909_vm6, %v5463_v55, %v5467_v8 }
 0x406   : > { %14707 = vst [vmem:[#allocation15_spill] sm:$0xff] %v12548_v2  ;;  %v3936_v3 = vadd.f32 %v3791_v40, %v12220_v60  ;;  %v5122_v4 = vrot.slane %v12548_v2, 2  ;;  %v4134_v45 = vshll.u32 %v12548_v2, 16  ;;  %v4138_v61 = vshrl.u32 %v12548_v2, 16  ;;  %14708 = vst [vmem:[#allocation16_spill] sm:$0xff] %v12559_v11 }
 0x407   : > { %v9317_v19 = vpop.f32.mrf.mxu0  ;;  %v4034_v39 = vmax.f32 %v3988_v13, 0.0  ;;  %v7964_v40 = vld [vmem:[%s14390_s3 + $0xa] sm:$0x3] }
 0x408   : > { %v3989_v27 = vadd.f32 %v12473_v36, %v3936_v3  ;;  %v5123_v15 = vsel %vm1526_vm4, %v5120_v29, %v5122_v4  ;;  %v4136_v21 = vrot.slane %v4134_v45, 1  ;;  %v6535_v30 = vrot.slane %v4134_v45, 5  ;;  %v12572_v29 = vld [vmem:[%s14390_s3 + $0x4] sm:$0x3]  ;;  %9767 = vmatprep.subr.msk.bf16.mxu0 %vm4319_vm8, %v7964_v40 }
 0x409   : > { %v3796_v47 = vpop.f32.mrf.mxu0  ;;  %9515 = vmatmul.mubr.msk.bf16.gmra.mxu0 %vm4258_vm9, %v5123_v15  ;;  %v6534_v60 = vrot.slane %v4138_v61, 4  ;;  %v5469_v5 = vrot.slane %v4138_v61, 2  ;;  %v5470_v16 = vrot.slane %v4134_v45, 3  ;;  %9764 = vmatprep.subr.msk.bf16.mxu1 %vm4319_vm8, %v12572_v29 }
 0x40a   : > { %v4035_v31 = vmax.f32 %v3989_v27, 0.0  ;;  %v3937_v51 = vadd.f32 %v3796_v47, %v12230_v35  ;;  %v4137_v34 = vsel %vm395_vm3, %v4132_v25, %v4136_v21  ;;  %v5944_v35 = vsel %vm4319_vm8, %v7964_v40, 0 }
 0x40b   : > { %v9320_v56 = vpop.f32.mrf.mxu0  ;;  %9392 = vmatprep.mubr.msk.bf16.mxu1 %vm4258_vm9, %v4137_v34  ;;  %v6536_v55 = vor.u32 %v6535_v30, %v6534_v60  ;;  %v5471_v45 = vor.u32 %v5470_v16, %v5469_v5  ;;  %9593 = vmatpush3.bf16.msra.mxu0 %v5944_v35  ;;  %v4140_v30 = vor.u32 %v4138_v61, %v4136_v21 }
 0x40c   : > { %v12567_v24 = vpack.c.bf16 %v4035_v31, %v4034_v39  ;;  %v3990_v19 = vadd.f32 %v12473_v36, %v3937_v51 }
 0x40d   : > { %v3799_v13 = vpop.f32.mrf.mxu0  ;;  %v12582_v3 = vsel %vm6522_vm10, %v6532_v28, %v6536_v55  ;;  %v12590_v39 = vsel %vm1909_vm6, %v5467_v8, %v5471_v45 }
 0x40e   : > { %14709 = vst [vmem:[#allocation43_spill] sm:$0xff] %v12567_v24  ;;  %v3938_v25 = vadd.f32 %v3799_v13, %v12237_v18  ;;  %v5124_v27 = vrot.slane %v12567_v24, 2  ;;  %v4142_v15 = vshll.u32 %v12567_v24, 16  ;;  %v4146_v60 = vshrl.u32 %v12567_v24, 16  ;;  %14710 = vst [vmem:[#allocation17_spill] sm:$0xff] %v12590_v39 }
 0x40f   : > { %v9321_v47 = vpop.f32.mrf.mxu0  ;;  %v4036_v16 = vmax.f32 %v3990_v19, 0.0 }
 0x410   : > { %v3991_v28 = vadd.f32 %v12473_v36, %v3938_v25  ;;  %v5125_v5 = vsel %vm1526_vm4, %v5122_v4, %v5124_v27  ;;  %v4144_v31 = vrot.slane %v4142_v15, 1  ;;  %v6539_v51 = vrot.slane %v4142_v15, 5 }
 0x411   : > { %v3804_v34 = vpop.f32.mrf.mxu0  ;;  %9518 = vmatprep.mubr.msk.bf16.mxu0 %vm4258_vm9, %v5125_v5  ;;  %v6538_v18 = vrot.slane %v4146_v60, 4  ;;  %v5473_v56 = vrot.slane %v4146_v60, 2  ;;  %v5474_v35 = vrot.slane %v4142_v15, 3 }
 0x412   : > { %v4037_v40 = vmax.f32 %v3991_v28, 0.0  ;;  %v3939_v61 = vadd.f32 %v3804_v34, %v12247_v59  ;;  %v4145_v21 = vsel %vm395_vm3, %v4140_v30, %v4144_v31  ;;  %v4148_v34 = vor.u32 %v4146_v60, %v4144_v31 }
 0x413   : > { %v9324_v13 = vpop.f32.mrf.mxu0  ;;  %9393 = vmatmul.mubr.msk.bf16.gmra.mxu1 %vm4258_vm9, %v4145_v21  ;;  %v6540_v8 = vor.u32 %v6539_v51, %v6538_v18  ;;  %v5475_v5 = vor.u32 %v5474_v35, %v5473_v56  ;;  %v14713_v35 = vld [vmem:[#allocation8_spill] sm:$0xff] }
 0x414   : > { %v12598_v25 = vpack.c.bf16 %v4037_v40, %v4036_v16  ;;  %v3992_v39 = vadd.f32 %v12473_v36, %v3939_v61 }
 0x415   : > { %v3807_v4 = vpop.f32.mrf.mxu0  ;;  %v12601_v47 = vsel %vm6522_vm10, %v6536_v55, %v6540_v8  ;;  %v12609_v15 = vsel %vm1909_vm6, %v5471_v45, %v5475_v5 }
 0x416   : > { %14711 = vst [vmem:[#allocation18_spill] sm:$0xff] %v12598_v25  ;;  %v3940_v19 = vadd.f32 %v3807_v4, %v12254_v52  ;;  %v5126_v59 = vrot.slane %v12598_v25, 2  ;;  %v4150_v30 = vshll.u32 %v12598_v25, 16  ;;  %v4154_v51 = vshrl.u32 %v12598_v25, 16  ;;  %14712 = vst [vmem:[#allocation25_spill] sm:$0xff] %v12609_v15 }
 0x417   : > { %v9325_v28 = vpop.f32.mrf.mxu0  ;;  %v4038_v21 = vmax.f32 %v3992_v39, 0.0  ;;  %v14715_v39 = vld [vmem:[#allocation9_spill] sm:$0xff] }
 0x418   : > { %v3993_v18 = vadd.f32 %v12473_v36, %v3940_v19  ;;  %v5127_v55 = vsel %vm1526_vm4, %v5124_v27, %v5126_v59  ;;  %v4152_v56 = vrot.slane %v4150_v30, 1  ;;  %v6543_v16 = vrot.slane %v4150_v30, 5 }
 0x419   : > { %v3812_v40 = vpop.f32.mrf.mxu0  ;;  %9519 = vmatmul.mubr.msk.bf16.gmra.mxu0 %vm4258_vm9, %v5127_v55  ;;  %v6542_v52 = vrot.slane %v4154_v51, 4  ;;  %v5477_v61 = vrot.slane %v4154_v51, 2  ;;  %v5478_v19 = vrot.slane %v4150_v30, 3 }
 0x41a   : > { %v4039_v13 = vmax.f32 %v3993_v18, 0.0  ;;  %v3941_v60 = vadd.f32 %v3812_v40, %v14713_v35  ;;  %v4153_v31 = vsel %vm395_vm3, %v4148_v34, %v4152_v56  ;;  %v4156_v35 = vor.u32 %v4154_v51, %v4152_v56 }
 0x41b   : > { %v9328_v4 = vpop.f32.mrf.mxu0  ;;  %9396 = vmatprep.mubr.msk.bf16.mxu1 %vm4258_vm9, %v4153_v31  ;;  %v6544_v45 = vor.u32 %v6543_v16, %v6542_v52  ;;  %v5479_v55 = vor.u32 %v5478_v19, %v5477_v61 }
 0x41c   : > { %v12617_v28 = vpack.c.bf16 %v4039_v13, %v4038_v21  ;;  %v3994_v11 = vadd.f32 %v12473_v36, %v3941_v60 }
 0x41d   : > { %v3815_v27 = vpop.f32.mrf.mxu0  ;;  %v12620_v15 = vsel %vm6522_vm10, %v6540_v8, %v6544_v45  ;;  %v12628_v30 = vsel %vm1909_vm6, %v5475_v5, %v5479_v55 }
 0x41e   : > { %14714 = vst [vmem:[#allocation46_spill] sm:$0xff] %v12617_v28  ;;  %v3942_v18 = vadd.f32 %v3815_v27, %v14715_v39  ;;  %v5128_v40 = vrot.slane %v12617_v28, 2  ;;  %v4158_v34 = vshll.u32 %v12617_v28, 16  ;;  %v4162_v16 = vshrl.u32 %v12617_v28, 16  ;;  %14716 = vst [vmem:[#allocation20_spill] sm:$0xff] %v12628_v30 }
 0x41f   : > { %v9329_v4 = vpop.f32.mrf.mxu0  ;;  %v4040_v19 = vmax.f32 %v3994_v11, 0.0 }
 0x420   : > { %v3995_v52 = vadd.f32 %v12473_v36, %v3942_v18  ;;  %v5129_v8 = vsel %vm1526_vm4, %v5126_v59, %v5128_v40  ;;  %v4160_v61 = vrot.slane %v4158_v34, 1  ;;  %v6547_v21 = vrot.slane %v4158_v34, 5 }
 0x421   : > { %v3820_v13 = vpop.f32.mrf.mxu0  ;;  %9522 = vmatprep.mubr.msk.bf16.mxu0 %vm4258_vm9, %v5129_v8  ;;  %v6546_v60 = vrot.slane %v4162_v16, 4  ;;  %v5481_v31 = vrot.slane %v4162_v16, 2  ;;  %v5482_v18 = vrot.slane %v4158_v34, 3 }
 0x422   : > { %v4041_v27 = vmax.f32 %v3995_v52, 0.0  ;;  %v3943_v51 = vadd.f32 %v3820_v13, %v12281_v42  ;;  %v4161_v56 = vsel %vm395_vm3, %v4156_v35, %v4160_v61  ;;  %v4164_v13 = vor.u32 %v4162_v16, %v4160_v61 }
 0x423   : > { %v9332_v39 = vpop.f32.mrf.mxu0  ;;  %9397 = vmatmul.mubr.msk.bf16.gmra.mxu1 %vm4258_vm9, %v4161_v56  ;;  %v6548_v5 = vor.u32 %v6547_v21, %v6546_v60  ;;  %v5483_v8 = vor.u32 %v5482_v18, %v5481_v31 }
 0x424   : > { %v12636_v4 = vpack.c.bf16 %v4041_v27, %v4040_v19  ;;  %v3996_v49 = vadd.f32 %v12473_v36, %v3943_v51 }
 0x425   : > { %v3823_v59 = vpop.f32.mrf.mxu0  ;;  %v12639_v30 = vsel %vm6522_vm10, %v6544_v45, %v6548_v5  ;;  %v12647_v34 = vsel %vm1909_vm6, %v5479_v55, %v5483_v8 }
 0x426   : > { %14717 = vst [vmem:[#allocation47_spill] sm:$0xff] %v12636_v4  ;;  %v3944_v11 = vadd.f32 %v3823_v59, %v12288_v46  ;;  %v5130_v42 = vrot.slane %v12636_v4, 2  ;;  %v4166_v35 = vshll.u32 %v12636_v4, 16  ;;  %v4170_v21 = vshrl.u32 %v12636_v4, 16  ;;  %14718 = vst [vmem:[#allocation21_spill] sm:$0xff] %v12647_v34 }
 0x427   : > { %v9333_v52 = vpop.f32.mrf.mxu0  ;;  %v4042_v56 = vmax.f32 %v3996_v49, 0.0  ;;  %v14720_v49 = vld [vmem:[#allocation10_spill] sm:$0xff] }
 0x428   : > { %v3997_v60 = vadd.f32 %v12473_v36, %v3944_v11  ;;  %v5131_v45 = vsel %vm1526_vm4, %v5128_v40, %v5130_v42  ;;  %v4168_v31 = vrot.slane %v4166_v35, 1  ;;  %v6551_v19 = vrot.slane %v4166_v35, 5 }
 0x429   : > { %v3828_v27 = vpop.f32.mrf.mxu0  ;;  %9523 = vmatmul.mubr.msk.bf16.gmra.mxu0 %vm4258_vm9, %v5131_v45  ;;  %v6550_v46 = vrot.slane %v4170_v21, 4  ;;  %v5485_v51 = vrot.slane %v4170_v21, 2  ;;  %v5486_v59 = vrot.slane %v4166_v35, 3 }
 0x42a   : > { %v4043_v39 = vmax.f32 %v3997_v60, 0.0  ;;  %v3945_v16 = vadd.f32 %v3828_v27, %v12298_v17  ;;  %v4169_v61 = vsel %vm395_vm3, %v4164_v13, %v4168_v31  ;;  %v4172_v27 = vor.u32 %v4170_v21, %v4168_v31 }
 0x42b   : > { %v9336_v18 = vpop.f32.mrf.mxu0  ;;  %9400 = vmatprep.mubr.msk.bf16.mxu1 %vm4258_vm9, %v4169_v61  ;;  %v6552_v55 = vor.u32 %v6551_v19, %v6550_v46  ;;  %v5487_v45 = vor.u32 %v5486_v59, %v5485_v51 }
 0x42c   : > { %v12655_v11 = vpack.c.bf16 %v4043_v39, %v4042_v56  ;;  %v3998_v34 = vadd.f32 %v12473_v36, %v3945_v16 }
 0x42d   : > { %v3831_v40 = vpop.f32.mrf.mxu0  ;;  %v12658_v52 = vsel %vm6522_vm10, %v6548_v5, %v6552_v55  ;;  %v12666_v35 = vsel %vm1909_vm6, %v5483_v8, %v5487_v45 }
 0x42e   : > { %14719 = vst [vmem:[#allocation22_spill] sm:$0xff] %v12655_v11  ;;  %v3946_v60 = vadd.f32 %v3831_v40, %v14720_v49  ;;  %v5132_v17 = vrot.slane %v12655_v11, 2  ;;  %v4174_v13 = vshll.u32 %v12655_v11, 16  ;;  %v4178_v19 = vshrl.u32 %v12655_v11, 16  ;;  %14721 = vst [vmem:[#allocation48_spill] sm:$0xff] %v12666_v35 }
 0x42f   : > { %v9337_v18 = vpop.f32.mrf.mxu0  ;;  %v4044_v59 = vmax.f32 %v3998_v34, 0.0  ;;  %v14724_v34 = vld [vmem:[#allocation2_spill] sm:$0xff] }
 0x430   : > { %v3999_v46 = vadd.f32 %v12473_v36, %v3946_v60  ;;  %v5133_v5 = vsel %vm1526_vm4, %v5130_v42, %v5132_v17  ;;  %v4176_v51 = vrot.slane %v4174_v13, 1  ;;  %v6555_v56 = vrot.slane %v4174_v13, 5 }
 0x431   : > { %v3836_v39 = vpop.f32.mrf.mxu0  ;;  %9526 = vmatprep.mubr.msk.bf16.mxu0 %vm4258_vm9, %v5133_v5  ;;  %v6554_v16 = vrot.slane %v4178_v19, 4  ;;  %v5489_v61 = vrot.slane %v4178_v19, 2  ;;  %v5490_v60 = vrot.slane %v4174_v13, 3 }
 0x432   : > { %v4045_v40 = vmax.f32 %v3999_v46, 0.0  ;;  %v3947_v21 = vadd.f32 %v3836_v39, %v12320_v14  ;;  %v4177_v31 = vsel %vm395_vm3, %v4172_v27, %v4176_v51 }
 0x433   : > { %v9340_v49 = vpop.f32.mrf.mxu0  ;;  %9401 = vmatmul.mubr.msk.bf16.gmra.mxu1 %vm4258_vm9, %v4177_v31  ;;  %v6556_v8 = vor.u32 %v6555_v56, %v6554_v16  ;;  %v5491_v5 = vor.u32 %v5490_v60, %v5489_v61 }
 0x434   : > { %v12674_v18 = vpack.c.bf16 %v4045_v40, %v4044_v59  ;;  %v4000_v62 = vadd.f32 %v12473_v36, %v3947_v21  ;;  %v4180_v49 = vor.u32 %v4178_v19, %v4176_v51 }
 0x435   : > { %v3839_v42 = vpop.f32.mrf.mxu0  ;;  %v12677_v35 = vsel %vm6522_vm10, %v6552_v55, %v6556_v8  ;;  %v12685_v13 = vsel %vm1909_vm6, %v5487_v45, %v5491_v5 }
 0x436   : > { %14722 = vst [vmem:[#allocation24_spill] sm:$0xff] %v12674_v18  ;;  %14723 = vst [vmem:[#allocation26_spill] sm:$0xff] %v12677_v35  ;;  %v3948_v46 = vadd.f32 %v3839_v42, %v14724_v34  ;;  %v5134_v14 = vrot.slane %v12674_v18, 2  ;;  %v4182_v27 = vshll.u32 %v12674_v18, 16  ;;  %v4186_v56 = vshrl.u32 %v12674_v18, 16 }
 0x437   : > { %v9341_v39 = vpop.f32.mrf.mxu0  ;;  %14725 = vst [vmem:[#allocation27_spill] sm:$0xff] %v12685_v13  ;;  %v4046_v60 = vmax.f32 %v4000_v62, 0.0 }
 0x438   : > { %v4001_v16 = vadd.f32 %v12473_v36, %v3948_v46  ;;  %v5135_v55 = vsel %vm1526_vm4, %v5132_v17, %v5134_v14  ;;  %v4184_v61 = vrot.slane %v4182_v27, 1  ;;  %v6559_v59 = vrot.slane %v4182_v27, 5 }
 0x439   : > { %v3844_v40 = vpop.f32.mrf.mxu0  ;;  %9527 = vmatmul.mubr.msk.bf16.gmra.mxu0 %vm4258_vm9, %v5135_v55  ;;  %v6558_v21 = vrot.slane %v4186_v56, 4  ;;  %v5493_v31 = vrot.slane %v4186_v56, 2  ;;  %v5494_v46 = vrot.slane %v4182_v27, 3 }
 0x43a   : > { %v4047_v42 = vmax.f32 %v4001_v16, 0.0  ;;  %v3949_v19 = vadd.f32 %v3844_v40, %v12337_v1  ;;  %v4185_v51 = vsel %vm395_vm3, %v4180_v49, %v4184_v61  ;;  %v4188_v16 = vor.u32 %v4186_v56, %v4184_v61 }
 0x43b   : > { %v9344_v34 = vpop.f32.mrf.mxu0  ;;  %9404 = vmatprep.mubr.msk.bf16.mxu1 %vm4258_vm9, %v4185_v51  ;;  %v6560_v45 = vor.u32 %v6559_v59, %v6558_v21  ;;  %v5495_v55 = vor.u32 %v5494_v46, %v5493_v31 }
 0x43c   : > { %v12693_v39 = vpack.c.bf16 %v4047_v42, %v4046_v60  ;;  %v4002_v35 = vadd.f32 %v12473_v36, %v3949_v19 }
 0x43d   : > { %v3847_v17 = vpop.f32.mrf.mxu0  ;;  %v12696_v13 = vsel %vm6522_vm10, %v6556_v8, %v6560_v45  ;;  %v12704_v27 = vsel %vm1909_vm6, %v5491_v5, %v5495_v55 }
 0x43e   : > { %14726 = vst [vmem:[#allocation28_spill] sm:$0xff] %v12693_v39  ;;  %v3950_v62 = vadd.f32 %v3847_v17, %v12344_v48  ;;  %v5136_v1 = vrot.slane %v12693_v39, 2  ;;  %v4190_v49 = vshll.u32 %v12693_v39, 16  ;;  %v4194_v59 = vshrl.u32 %v12693_v39, 16  ;;  %14727 = vst [vmem:[#allocation19_spill] sm:$0xff] %v12704_v27 }
 0x43f   : > { %v9345_v40 = vpop.f32.mrf.mxu0  ;;  %v4048_v51 = vmax.f32 %v4002_v35, 0.0  ;;  %v14729_v35 = vld [vmem:[#allocation34_spill] sm:$0xff] }
 0x440   : > { %v4003_v21 = vadd.f32 %v12473_v36, %v3950_v62  ;;  %v5137_v8 = vsel %vm1526_vm4, %v5134_v14, %v5136_v1  ;;  %v4192_v31 = vrot.slane %v4190_v49, 1  ;;  %v6563_v60 = vrot.slane %v4190_v49, 5 }
 0x441   : > { %v3852_v42 = vpop.f32.mrf.mxu0  ;;  %9530 = vmatprep.mubr.msk.bf16.mxu0 %vm4258_vm9, %v5137_v8  ;;  %v6562_v48 = vrot.slane %v4194_v59, 4  ;;  %v5497_v19 = vrot.slane %v4194_v59, 2  ;;  %v5498_v17 = vrot.slane %v4190_v49, 3 }
 0x442   : > { %v4049_v34 = vmax.f32 %v4003_v21, 0.0  ;;  %v3951_v56 = vadd.f32 %v3852_v42, %v12354_v50  ;;  %v4193_v61 = vsel %vm395_vm3, %v4188_v16, %v4192_v31 }
 0x443   : > { %v9348_v46 = vpop.f32.mrf.mxu0  ;;  %9405 = vmatmul.mubr.msk.bf16.gmra.mxu1 %vm4258_vm9, %v4193_v61  ;;  %v6564_v5 = vor.u32 %v6563_v60, %v6562_v48  ;;  %v5499_v8 = vor.u32 %v5498_v17, %v5497_v19 }
 0x444   : > { %v12712_v62 = vpack.c.bf16 %v4049_v34, %v4048_v51  ;;  %v4004_v27 = vadd.f32 %v12473_v36, %v3951_v56  ;;  %v4196_v46 = vor.u32 %v4194_v59, %v4192_v31 }
 0x445   : > { %v3855_v14 = vpop.f32.mrf.mxu0  ;;  %v12715_v40 = vsel %vm6522_vm10, %v6560_v45, %v6564_v5  ;;  %v12723_v49 = vsel %vm1909_vm6, %v5495_v55, %v5499_v8 }
 0x446   : > { %14728 = vst [vmem:[#allocation30_spill] sm:$0xff] %v12715_v40  ;;  %v3952_v21 = vadd.f32 %v3855_v14, %v14729_v35  ;;  %v5138_v50 = vrot.slane %v12712_v62, 2  ;;  %v4198_v16 = vshll.u32 %v12712_v62, 16  ;;  %v4202_v60 = vshrl.u32 %v12712_v62, 16  ;;  %14730 = vst [vmem:[#allocation31_spill] sm:$0xff] %v12723_v49 }
 0x447   : > { %v9349_v42 = vpop.f32.mrf.mxu0  ;;  %v4050_v17 = vmax.f32 %v4004_v27, 0.0  ;;  %v14732_v27 = vld [vmem:[#allocation11_spill] sm:$0xff] }
 0x448   : > { %v4005_v48 = vadd.f32 %v12473_v36, %v3952_v21  ;;  %v5139_v45 = vsel %vm1526_vm4, %v5136_v1, %v5138_v50  ;;  %v4200_v19 = vrot.slane %v4198_v16, 1  ;;  %v6567_v51 = vrot.slane %v4198_v16, 5 }
 0x449   : > { %v3860_v34 = vpop.f32.mrf.mxu0  ;;  %9531 = vmatmul.mubr.msk.bf16.gmra.mxu0 %vm4258_vm9, %v5139_v45  ;;  %v6566_v56 = vrot.slane %v4202_v60, 4  ;;  %v5501_v61 = vrot.slane %v4202_v60, 2  ;;  %v5502_v21 = vrot.slane %v4198_v16, 3 }
 0x44a   : > { %v4051_v14 = vmax.f32 %v4005_v48, 0.0  ;;  %v3953_v59 = vadd.f32 %v3860_v34, %v12371_v57  ;;  %v4201_v31 = vsel %vm395_vm3, %v4196_v46, %v4200_v19  ;;  %v4204_v34 = vor.u32 %v4202_v60, %v4200_v19 }
 0x44b   : > { %v9352_v35 = vpop.f32.mrf.mxu0  ;;  %9408 = vmatprep.mubr.msk.bf16.mxu1 %vm4258_vm9, %v4201_v31  ;;  %v6568_v55 = vor.u32 %v6567_v51, %v6566_v56  ;;  %v5503_v45 = vor.u32 %v5502_v21, %v5501_v61 }
 0x44c   : > { %v12731_v42 = vpack.c.bf16 %v4051_v14, %v4050_v17  ;;  %v4006_v40 = vadd.f32 %v12473_v36, %v3953_v59 }
 0x44d   : > { %v3863_v1 = vpop.f32.mrf.mxu0  ;;  %v12734_v49 = vsel %vm6522_vm10, %v6564_v5, %v6568_v55  ;;  %v12742_v16 = vsel %vm1909_vm6, %v5499_v8, %v5503_v45 }
 0x44e   : > { %14731 = vst [vmem:[#allocation33_spill] sm:$0xff] %v12734_v49  ;;  %v3954_v48 = vadd.f32 %v3863_v1, %v14732_v27  ;;  %v5140_v57 = vrot.slane %v12731_v42, 2  ;;  %v4206_v46 = vshll.u32 %v12731_v42, 16  ;;  %v4210_v51 = vshrl.u32 %v12731_v42, 16  ;;  %14733 = vst [vmem:[#allocation35_spill] sm:$0xff] %v12742_v16 }
 0x44f   : > { %v9353_v35 = vpop.f32.mrf.mxu0  ;;  %v4052_v21 = vmax.f32 %v4006_v40, 0.0 }
 0x450   : > { %v4007_v56 = vadd.f32 %v12473_v36, %v3954_v48  ;;  %v5141_v5 = vsel %vm1526_vm4, %v5138_v50, %v5140_v57  ;;  %v4208_v61 = vrot.slane %v4206_v46, 1  ;;  %v6571_v17 = vrot.slane %v4206_v46, 5 }
 0x451   : > { %v3868_v14 = vpop.f32.mrf.mxu0  ;;  %9534 = vmatprep.mubr.msk.bf16.mxu0 %vm4258_vm9, %v5141_v5  ;;  %v6570_v59 = vrot.slane %v4210_v51, 4  ;;  %v5505_v31 = vrot.slane %v4210_v51, 2  ;;  %v5506_v48 = vrot.slane %v4206_v46, 3 }
 0x452   : > { %v4053_v1 = vmax.f32 %v4007_v56, 0.0  ;;  %v3955_v60 = vadd.f32 %v3868_v14, %v12388_v37  ;;  %v4209_v19 = vsel %vm395_vm3, %v4204_v34, %v4208_v61  ;;  %v4212_v14 = vor.u32 %v4210_v51, %v4208_v61 }
 0x453   : > { %v9356_v27 = vpop.f32.mrf.mxu0  ;;  %9409 = vmatmul.mubr.msk.bf16.gmra.mxu1 %vm4258_vm9, %v4209_v19  ;;  %v6572_v8 = vor.u32 %v6571_v17, %v6570_v59  ;;  %v5507_v5 = vor.u32 %v5506_v48, %v5505_v31 }
 0x454   : > { %v12750_v35 = vpack.c.bf16 %v4053_v1, %v4052_v21  ;;  %v4008_v49 = vadd.f32 %v12473_v36, %v3955_v60 }
 0x455   : > { %v3871_v50 = vpop.f32.mrf.mxu0  ;;  %v12753_v16 = vsel %vm6522_vm10, %v6568_v55, %v6572_v8  ;;  %v12761_v46 = vsel %vm1909_vm6, %v5503_v45, %v5507_v5 }
 0x456   : > { %v3956_v40 = vadd.f32 %v3871_v50, %v12393_v53  ;;  %v5142_v37 = vrot.slane %v12750_v35, 2  ;;  %v4214_v34 = vshll.u32 %v12750_v35, 16  ;;  %v4218_v17 = vshrl.u32 %v12750_v35, 16  ;;  %14734 = vst [vmem:[#allocation36_spill] sm:$0xff] %v12761_v46 }
 0x457   : > { %v9357_v56 = vpop.f32.mrf.mxu0  ;;  %v4054_v19 = vmax.f32 %v4008_v49, 0.0 }
 0x458   : > { %v4009_v59 = vadd.f32 %v12473_v36, %v3956_v40  ;;  %v5143_v55 = vsel %vm1526_vm4, %v5140_v57, %v5142_v37  ;;  %v4216_v31 = vrot.slane %v4214_v34, 1  ;;  %v6575_v21 = vrot.slane %v4214_v34, 5  ;;  %v12774_v56 = vld [vmem:[%s14390_s3 + $0xe] sm:$0x3] }
 0x459   : > { %v3876_v1 = vpop.f32.mrf.mxu0  ;;  %9535 = vmatmul.mubr.msk.bf16.gmra.mxu0 %vm4258_vm9, %v5143_v55  ;;  %v6574_v53 = vrot.slane %v4218_v17, 4  ;;  %v5509_v60 = vrot.slane %v4218_v17, 2  ;;  %v5510_v50 = vrot.slane %v4214_v34, 3  ;;  %9769 = vmatprep.subr.msk.bf16.mxu0 %vm4319_vm8, %v12774_v56 }
 0x45a   : > { %v4055_v27 = vmax.f32 %v4009_v59, 0.0  ;;  %v3957_v51 = vadd.f32 %v3876_v1, %v12401_v26  ;;  %v4217_v61 = vsel %vm395_vm3, %v4212_v14, %v4216_v31 }
 0x45b   : > { %v9360_v48 = vpop.f32.mrf.mxu0  ;;  %9412 = vmatprep.mubr.msk.bf16.mxu1 %vm4258_vm9, %v4217_v61  ;;  %v6576_v45 = vor.u32 %v6575_v21, %v6574_v53  ;;  %v5511_v59 = vor.u32 %v5510_v50, %v5509_v60  ;;  %v4220_v21 = vor.u32 %v4218_v17, %v4216_v31 }
 0x45c   : > { %v12769_v40 = vpack.c.bf16 %v4055_v27, %v4054_v19  ;;  %v4010_v26 = vadd.f32 %v12473_v36, %v3957_v51 }
 0x45d   : > { %v3879_v57 = vpop.f32.mrf.mxu0  ;;  %v12777_v49 = vsel %vm6522_vm10, %v6572_v8, %v6576_v45  ;;  %v12790_v61 = vsel %vm1909_vm6, %v5507_v5, %v5511_v59 }
 0x45e   : > { %14735 = vst [vmem:[#allocation38_spill] sm:$0xff] %v12777_v49  ;;  %v3958_v14 = vadd.f32 %v3879_v57, %v12406_v10  ;;  %v5144_v55 = vrot.slane %v12769_v40, 2  ;;  %v4222_v34 = vshll.u32 %v12769_v40, 16  ;;  %v4226_v53 = vshrl.u32 %v12769_v40, 16  ;;  %14736 = vst [vmem:[#allocation39_spill] sm:$0xff] %v12790_v61 }
 0x45f   : > { %v9361_v1 = vpop.f32.mrf.mxu0  ;;  %v4056_v48 = vmax.f32 %v4010_v26, 0.0 }
 0x460   : > { %v4011_v19 = vadd.f32 %v12473_v36, %v3958_v14  ;;  %v5145_v8 = vsel %vm1526_vm4, %v5142_v37, %v5144_v55  ;;  %v4224_v60 = vrot.slane %v4222_v34, 1  ;;  %v6579_v27 = vrot.slane %v4222_v34, 5 }
 0x461   : > { %v3884_v51 = vpop.f32.mrf.mxu0  ;;  %9538 = vmatprep.mubr.msk.bf16.mxu0 %vm4258_vm9, %v5145_v8  ;;  %v6578_v10 = vrot.slane %v4226_v53, 4  ;;  %v5513_v37 = vrot.slane %v4226_v53, 2  ;;  %v5514_v1 = vrot.slane %v4222_v34, 3 }
 0x462   : > { %v4057_v50 = vmax.f32 %v4011_v19, 0.0  ;;  %v3959_v17 = vadd.f32 %v3884_v51, %v12414_v41  ;;  %v4225_v31 = vsel %vm395_vm3, %v4220_v21, %v4224_v60 }
 0x463   : > { %v9364_v57 = vpop.f32.mrf.mxu0  ;;  %9413 = vmatmul.mubr.msk.bf16.gmra.mxu1 %vm4258_vm9, %v4225_v31  ;;  %v6580_v14 = vor.u32 %v6579_v27, %v6578_v10  ;;  %v5515_v5 = vor.u32 %v5514_v1, %v5513_v37  ;;  %v4228_v31 = vor.u32 %v4226_v53, %v4224_v60 }
 0x464   : > { %v12795_v46 = vpack.c.bf16 %v4057_v50, %v4056_v48  ;;  %v4012_v26 = vadd.f32 %v12473_v36, %v3959_v17 }
 0x465   : > { %v3887_v49 = vpop.f32.mrf.mxu0  ;;  %v12798_v8 = vsel %vm6522_vm10, %v6576_v45, %v6580_v14  ;;  %v12806_v34 = vsel %vm1909_vm6, %v5511_v59, %v5515_v5 }
 0x466   : > { %v3960_v19 = vadd.f32 %v3887_v49, %v12419_v20  ;;  %v5146_v41 = vrot.slane %v12795_v46, 2  ;;  %v4230_v21 = vshll.u32 %v12795_v46, 16  ;;  %v4234_v27 = vshrl.u32 %v12795_v46, 16  ;;  %14737 = vst [vmem:[#allocation41_spill] sm:$0xff] %v12806_v34 }
 0x467   : > { %v9365_v51 = vpop.f32.mrf.mxu0  ;;  %v4058_v57 = vmax.f32 %v4012_v26, 0.0 }
 0x468   : > { %v4013_v10 = vadd.f32 %v12473_v36, %v3960_v19  ;;  %v5147_v45 = vsel %vm1526_vm4, %v5144_v55, %v5146_v41  ;;  %v4232_v48 = vrot.slane %v4230_v21, 1  ;;  %v6583_v50 = vrot.slane %v4230_v21, 5 }
 0x469   : > { %v3892_v17 = vpop.f32.mrf.mxu0  ;;  %9539 = vmatmul.mubr.msk.bf16.gmra.mxu0 %vm4258_vm9, %v5147_v45  ;;  %v6582_v20 = vrot.slane %v4234_v27, 4  ;;  %v5517_v49 = vrot.slane %v4234_v27, 2  ;;  %v5518_v19 = vrot.slane %v4230_v21, 3 }
 0x46a   : > { %v4059_v37 = vmax.f32 %v4013_v10, 0.0  ;;  %v3961_v53 = vadd.f32 %v3892_v17, %v12427_v32  ;;  %v4233_v60 = vsel %vm395_vm3, %v4228_v31, %v4232_v48  ;;  %v4236_v10 = vor.u32 %v4234_v27, %v4232_v48 }
 0x46b   : > { %v9368_v1 = vpop.f32.mrf.mxu0  ;;  %9416 = vmatprep.mubr.msk.bf16.mxu1 %vm4258_vm9, %v4233_v60  ;;  %v6584_v59 = vor.u32 %v6583_v50, %v6582_v20  ;;  %v5519_v45 = vor.u32 %v5518_v19, %v5517_v49 }
 0x46c   : > { %v12814_v51 = vpack.c.bf16 %v4059_v37, %v4058_v57  ;;  %v4014_v61 = vadd.f32 %v12473_v36, %v3961_v53 }
 0x46d   : > { %v3895_v55 = vpop.f32.mrf.mxu0  ;;  %v12817_v34 = vsel %vm6522_vm10, %v6580_v14, %v6584_v59  ;;  %v12825_v21 = vsel %vm1909_vm6, %v5515_v5, %v5519_v45  ;;  %v12830_v14 = vld [vmem:[%s14389_s2] ss:$0 sm:$0xff] }
 0x46e   : > { %v3962_v26 = vadd.f32 %v3895_v55, %v12432_v63  ;;  %v5148_v32 = vrot.slane %v12814_v51, 2  ;;  %v4238_v31 = vshll.u32 %v12814_v51, 16  ;;  %v4242_v50 = vshrl.u32 %v12814_v51, 16  ;;  %14738 = vst [vmem:[#allocation42_spill] sm:$0xff] %v12825_v21 }
 0x46f   : > { %v9369_v17 = vpop.f32.mrf.mxu0  ;;  %v4060_v37 = vmax.f32 %v4014_v61, 0.0 }
 0x470   : > { %v4015_v36 = vadd.f32 %v12830_v14, %v3962_v26  ;;  %v5149_v63 = vsel %vm1526_vm4, %v5146_v41, %v5148_v32  ;;  %v4240_v20 = vrot.slane %v4238_v31, 1  ;;  %v6587_v49 = vrot.slane %v4238_v31, 5 }
 0x471   : > { %v3900_v57 = vpop.f32.mrf.mxu0  ;;  %9542 = vmatprep.mubr.msk.bf16.mxu0 %vm4258_vm9, %v5149_v63  ;;  %v6586_v27 = vrot.slane %v4242_v50, 4  ;;  %v5521_v48 = vrot.slane %v4242_v50, 2  ;;  %v5522_v55 = vrot.slane %v4238_v31, 3 }
 0x472   : > { %v4061_v53 = vmax.f32 %v4015_v36, 0.0  ;;  %v3963_v5 = vadd.f32 %v3900_v57, %v12439_v0  ;;  %v4241_v60 = vsel %vm395_vm3, %v4236_v10, %v4240_v20  ;;  %v4244_v57 = vor.u32 %v4242_v50, %v4240_v20 }
 0x473   : > { %v9372_v1 = vpop.f32.mrf.mxu0  ;;  %9417 = vmatmul.mubr.msk.bf16.gmra.mxu1 %vm4258_vm9, %v4241_v60  ;;  %v6588_v19 = vor.u32 %v6587_v49, %v6586_v27  ;;  %v5523_v63 = vor.u32 %v5522_v55, %v5521_v48 }
 0x474   : > { %v12838_v26 = vpack.c.bf16 %v4061_v53, %v4060_v37  ;;  %v4016_v21 = vadd.f32 %v12830_v14, %v3963_v5 }
 0x475   : > { %v3903_v41 = vpop.f32.mrf.mxu0  ;;  %v12841_v17 = vsel %vm6522_vm10, %v6584_v59, %v6588_v19  ;;  %v12849_v31 = vsel %vm1909_vm6, %v5519_v45, %v5523_v63 }
 0x476   : > { %v3964_v61 = vadd.f32 %v3903_v41, %v12450_v22  ;;  %v5150_v0 = vrot.slane %v12838_v26, 2  ;;  %v4246_v10 = vshll.u32 %v12838_v26, 16  ;;  %v4250_v49 = vshrl.u32 %v12838_v26, 16  ;;  %14739 = vst [vmem:[#allocation44_spill] sm:$0xff] %v12849_v31 }
 0x477   : > { %v9373_v36 = vpop.f32.mrf.mxu0  ;;  %v4062_v60 = vmax.f32 %v4016_v21, 0.0 }
 0x478   : > { %v4017_v27 = vadd.f32 %v12830_v14, %v3964_v61  ;;  %v5151_v59 = vsel %vm1526_vm4, %v5148_v32, %v5150_v0  ;;  %v4248_v48 = vrot.slane %v4246_v10, 1  ;;  %v6591_v37 = vrot.slane %v4246_v10, 5 }
 0x479   : > { %v3908_v53 = vpop.f32.mrf.mxu0  ;;  %9543 = vmatmul.mubr.msk.bf16.gmra.mxu0 %vm4258_vm9, %v5151_v59  ;;  %v6590_v22 = vrot.slane %v4250_v49, 4  ;;  %v5525_v5 = vrot.slane %v4250_v49, 2  ;;  %v5526_v41 = vrot.slane %v4246_v10, 3 }
 0x47a   : > { %v4063_v1 = vmax.f32 %v4017_v27, 0.0  ;;  %v3965_v50 = vadd.f32 %v3908_v53, %v12455_v12  ;;  %v4249_v20 = vsel %vm395_vm3, %v4244_v57, %v4248_v48  ;;  %v4252_v27 = vor.u32 %v4250_v49, %v4248_v48 }
 0x47b   : > { %v9376_v55 = vpop.f32.mrf.mxu0  ;;  %9420 = vmatprep.mubr.msk.bf16.mxu1 %vm4258_vm9, %v4249_v20  ;;  %v6592_v45 = vor.u32 %v6591_v37, %v6590_v22  ;;  %v5527_v31 = vor.u32 %v5526_v41, %v5525_v5  ;;  %v14439_v37 = vrot.slane %v12497_v6, 3  ;;  %v5842_v49 = vrot.slane %v12486_v7, 3 }
 0x47c   : > { %v12857_v61 = vpack.c.bf16 %v4063_v1, %v4062_v60  ;;  %v4018_v32 = vadd.f32 %v12830_v14, %v3965_v50 }
 0x47d   : > { %v3911_v36 = vpop.f32.mrf.mxu0  ;;  %v12861_v59 = vsel %vm6522_vm10, %v6588_v19, %v6592_v45  ;;  %v12869_v22 = vsel %vm1909_vm6, %v5523_v63, %v5527_v31 }
 0x47e   : > { %14740 = vst [vmem:[#allocation45_spill] sm:$0xff] %v12857_v61  ;;  %v3966_v21 = vadd.f32 %v3911_v36, %v12459_v58  ;;  %v5152_v12 = vrot.slane %v12857_v61, 2  ;;  %v4254_v57 = vshll.u32 %v12857_v61, 16  ;;  %v5529_v10 = vshrl.u32 %v12857_v61, 16 }
 0x47f   : > { %v9377_v53 = vpop.f32.mrf.mxu0  ;;  %v4064_v58 = vmax.f32 %v4018_v32, 0.0  ;;  %v5844_v32 = vsel %vm2343_vm7, %v5842_v49, %v14439_v37 }
 0x480   : > { %v4019_v60 = vadd.f32 %v12830_v14, %v3966_v21  ;;  %v5153_v19 = vsel %vm1526_vm4, %v5150_v0, %v5152_v12  ;;  %v4256_v5 = vrot.slane %v4254_v57, 1  ;;  %v6595_v1 = vrot.slane %v4254_v57, 5 }
 0x481   : > { %v3916_v50 = vpop.f32.mrf.mxu0  ;;  %9546 = vmatprep.mubr.msk.bf16.mxu0 %vm4258_vm9, %v5153_v19  ;;  %v6594_v48 = vrot.slane %v5529_v10, 4  ;;  %v5531_v20 = vrot.slane %v5529_v10, 2  ;;  %v5532_v36 = vrot.slane %v4254_v57, 3  ;;  %v4877_v10 = vsel %vm4319_vm8, %v12572_v29, 0 }
 0x482   : > { %v4065_v55 = vmax.f32 %v4019_v60, 0.0  ;;  %v3967_v41 = vadd.f32 %v3916_v50, %v12463_v23  ;;  %v4257_v63 = vsel %vm395_vm3, %v4252_v27, %v4256_v5  ;;  %v5879_v57 = vrot.slane %v12857_v61, 3 }
 0x483   : > { %v9380_v53 = vpop.f32.mrf.mxu0  ;;  %9421 = vmatmul.mubr.msk.bf16.gmra.mxu1 %vm4258_vm9, %v4257_v63  ;;  %v6596_v0 = vor.u32 %v6595_v1, %v6594_v48  ;;  %v5533_v23 = vor.u32 %v5532_v36, %v5531_v20  ;;  %v14440_v19 = vrot.slane %v12857_v61, 4 }
 0x484   : > { %v4089_v21 = vpack.c.bf16 %v4065_v55, %v4064_v58  ;;  %9426 = vmatprep.mubr.msk.bf16.mxu1 %vm4258_vm9, %v12479_v33  ;;  %v4020_v1 = vadd.f32 %v12830_v14, %v3967_v41 }
 0x485   : > { %v3919_v60 = vpop.f32.mrf.mxu0  ;;  %v12887_v27 = vsel %vm6522_vm10, %v6592_v45, %v6596_v0  ;;  %v12894_v20 = vsel %vm1909_vm6, %v5527_v31, %v5533_v23 }
 0x486   : > { %v3968_v58 = vadd.f32 %v3919_v60, %v12467_v38  ;;  %v5154_v50 = vrot.slane %v4089_v21, 2  ;;  %v5881_v49 = vrot.slane %v4089_v21, 3  ;;  %v5536_v55 = vshrl.u32 %v4089_v21, 16 }
 0x487   : > { %v9381_v48 = vpop.f32.mrf.mxu0  ;;  %v5539_v29 = vshll.u32 %v4089_v21, 16  ;;  %v6220_v63 = vrot.slane %v4089_v21, 4  ;;  %v6947_v41 = vrot.slane %v4089_v21, 5  ;;  %v4066_v5 = vmax.f32 %v4020_v1, 0.0 }
 0x488   : > { %v4021_v45 = vadd.f32 %v12830_v14, %v3968_v58  ;;  %v5155_v36 = vsel %vm1526_vm4, %v5152_v12, %v5154_v50  ;;  %v12901_v53 = vsel %vm2343_vm7, %v5879_v57, %v5881_v49  ;;  %v6598_v38 = vrot.slane %v5536_v55, 4  ;;  %v12908_v14 = vld [vmem:[%s14390_s3 + $0x8] sm:$0x3] }
 0x489   : > { %9547 = vmatmul.mubr.msk.bf16.gmra.mxu0 %vm4258_vm9, %v5155_v36  ;;  %v6599_v60 = vrot.slane %v5539_v29, 5  ;;  %v5538_v48 = vrot.slane %v5536_v55, 2  ;;  %v5541_v37 = vrot.slane %v5539_v29, 3  ;;  %v12913_v12 = vsel %vm649_vm0, %v14440_v19, %v6220_v63 }
 0x48a   : > { %v4067_v31 = vmax.f32 %v4021_v45, 0.0  ;;  %9594 = vmatprep.mubr.msk.bf16.mxu0 %vm4258_vm9, %v5844_v32  ;;  %14741 = vst [vmem:[#allocation23_spill] sm:$0xff] %v12913_v12  ;;  %v14742_v21 = vrot.slane %v12857_v61, 5  ;;  %v5845_v32 = vrot.slane %v12513_v9, 3  ;;  %v5847_v55 = vrot.slane %v12529_v54, 3 }
 0x48b   : > { %9427 = vmatmul.mubr.msk.bf16.vlgmr.msra.gmra.mxu1 %vm4258_vm9, %v12486_v7  ;;  %v6600_v1 = vor.u32 %v6599_v60, %v6598_v38  ;;  %v5542_v50 = vor.u32 %v5541_v37, %v5538_v48  ;;  %v6672_v60 = vsel %vm4319_vm8, %v12774_v56, 0  ;;  %v5849_v56 = vrot.slane %v12548_v2, 3 }
 0x48c   : > { %v12918_v58 = vsel %vm6909_vm11, %v14742_v21, %v6947_v41  ;;  %v4090_v49 = vpack.c.bf16 %v4067_v31, %v4066_v5  ;;  %9467 = vmatpush3.bf16.msra.mxu1 %v4877_v10  ;;  %9430 = vmatprep.mubr.msk.bf16.mxu1 %vm4258_vm9, %v12497_v6  ;;  %v14744_v10 = vrot.slane %v12497_v6, 3 }
 0x48d   : > { %14743 = vst [vmem:[#allocation3_spill] sm:$0xff] %v12918_v58  ;;  %9766 = vmatprep.subr.msk.bf16.mxu1 %vm4319_vm8, %v12908_v14  ;;  %v12929_v29 = vsel %vm6522_vm10, %v6596_v0, %v6600_v1  ;;  %v12932_v45 = vsel %vm1909_vm6, %v5533_v23, %v5542_v50  ;;  %v5848_v23 = vsel %vm2343_vm7, %v5845_v32, %v5847_v55 }
 0x48e   : > { %v6603_v36 = vshrl.u32 %v4090_v49, 16  ;;  %v6606_v21 = vshll.u32 %v4090_v49, 16  ;;  %v6222_v38 = vrot.slane %v4090_v49, 4  ;;  %v6949_v37 = vrot.slane %v4090_v49, 5 }
 0x48f   : > { %v5846_v5 = vsel %vm2343_vm7, %v14744_v10, %v5845_v32  ;;  %v5850_v49 = vsel %vm2343_vm7, %v5847_v55, %v5849_v56 }
 0x490   : > { %v6605_v48 = vrot.slane %v6603_v36, 4  ;;  %v6608_v31 = vrot.slane %v6606_v21, 5  ;;  %v12940_v19 = vsel %vm649_vm0, %v6220_v63, %v6222_v38  ;;  %v12943_v0 = vsel %vm6909_vm11, %v6947_v41, %v6949_v37 }
 0x491   : > { %14745 = vst [vmem:[#allocation4_spill] sm:$0xff] %v12940_v19  ;;  %14746 = vst [vmem:[#allocation5_spill] sm:$0xff] %v12943_v0  ;;  %9595 = vmatmul.mubr.msk.bf16.vlgmr.msra.gmra.mxu0 %vm4258_vm9, %v5846_v5  ;;  %v5851_v41 = vrot.slane %v12567_v24, 3  ;;  %v5853_v36 = vrot.slane %v12598_v25, 3  ;;  %v5857_v38 = vrot.slane %v12636_v4, 3  ;;  %v5859_v37 = vrot.slane %v12655_v11, 3 }
 0x492   : > { %9598 = vmatprep.mubr.msk.bf16.mxu0 %vm4258_vm9, %v5848_v23  ;;  %9677 = vmatpush3.bf16.msra.mxu0 %v6672_v60  ;;  %v6609_v50 = vor.u32 %v6608_v31, %v6605_v48  ;;  %v5861_v60 = vrot.slane %v12674_v18, 3  ;;  %v5863_v48 = vrot.slane %v12693_v39, 3 }
 0x493   : > { %9431 = vmatmul.mubr.msk.bf16.gmra.mxu1 %vm4258_vm9, %v12513_v9  ;;  %v5852_v32 = vsel %vm2343_vm7, %v5849_v56, %v5851_v41  ;;  %v5854_v21 = vsel %vm2343_vm7, %v5851_v41, %v5853_v36  ;;  %v5860_v5 = vsel %vm2343_vm7, %v5857_v38, %v5859_v37  ;;  %v5867_v56 = vrot.slane %v12731_v42, 3 }
 0x494   : > { %9434 = vmatprep.mubr.msk.bf16.mxu1 %vm4258_vm9, %v12529_v54  ;;  %v12954_v63 = vsel %vm6522_vm10, %v6600_v1, %v6609_v50  ;;  %v5855_v1 = vrot.slane %v12617_v28, 3  ;;  %v5862_v31 = vsel %vm2343_vm7, %v5859_v37, %v5861_v60  ;;  %v5864_v23 = vsel %vm2343_vm7, %v5861_v60, %v5863_v48 }
 0x495   : > { %v5865_v50 = vrot.slane %v12712_v62, 3  ;;  %v5875_v37 = vrot.slane %v12814_v51, 3 }
 0x496   : > { %v5856_v55 = vsel %vm2343_vm7, %v5853_v36, %v5855_v1  ;;  %v5858_v10 = vsel %vm2343_vm7, %v5855_v1, %v5857_v38  ;;  %v5871_v36 = vrot.slane %v12769_v40, 3 }
 0x497   : > { %v5866_v41 = vsel %vm2343_vm7, %v5863_v48, %v5865_v50  ;;  %v5877_v48 = vrot.slane %v12838_v26, 3 }
 0x499   : > { %9599 = vmatmul.mubr.msk.bf16.gmra.mxu0 %vm4258_vm9, %v5850_v49  ;;  %v5868_v49 = vsel %vm2343_vm7, %v5865_v50, %v5867_v56  ;;  %v5878_v50 = vsel %vm2343_vm7, %v5875_v37, %v5877_v48 }
 0x49a   : > { %9602 = vmatprep.mubr.msk.bf16.mxu0 %vm4258_vm9, %v5852_v32  ;;  %v5869_v32 = vrot.slane %v12750_v35, 3 }
 0x49b   : > { %9435 = vmatmul.mubr.msk.bf16.gmra.mxu1 %vm4258_vm9, %v12548_v2 }
 0x49c   : > { %9438 = vmatprep.mubr.msk.bf16.mxu1 %vm4258_vm9, %v12567_v24  ;;  %v5870_v1 = vsel %vm2343_vm7, %v5867_v56, %v5869_v32 }
 0x4a1   : > { %9603 = vmatmul.mubr.msk.bf16.gmra.mxu0 %vm4258_vm9, %v5854_v21  ;;  %v5872_v21 = vsel %vm2343_vm7, %v5869_v32, %v5871_v36 }
 0x4a2   : > { %9606 = vmatprep.mubr.msk.bf16.mxu0 %vm4258_vm9, %v5856_v55  ;;  %v5873_v55 = vrot.slane %v12795_v46, 3 }
 0x4a3   : > { %9439 = vmatmul.mubr.msk.bf16.gmra.mxu1 %vm4258_vm9, %v12598_v25 }
 0x4a4   : > { %9442 = vmatprep.mubr.msk.bf16.mxu1 %vm4258_vm9, %v12617_v28  ;;  %v5876_v60 = vsel %vm2343_vm7, %v5873_v55, %v5875_v37 }
 0x4a9   : > { %9607 = vmatmul.mubr.msk.bf16.gmra.mxu0 %vm4258_vm9, %v5858_v10  ;;  %v5874_v10 = vsel %vm2343_vm7, %v5871_v36, %v5873_v55  ;;  %v4778_v36 = vrot.slane %v12497_v6, 1  ;;  %v13062_v55 = vld [vmem:[%s14390_s3 + $0xc] sm:$0x3] }
 0x4aa   : > { %9610 = vmatprep.mubr.msk.bf16.mxu0 %vm4258_vm9, %v5860_v5 }
 0x4ab   : > { %9443 = vmatmul.mubr.msk.bf16.gmra.mxu1 %vm4258_vm9, %v12636_v4 }
 0x4ac   : > { %9446 = vmatprep.mubr.msk.bf16.mxu1 %vm4258_vm9, %v12655_v11 }
 0x4b1   : > { %9611 = vmatmul.mubr.msk.bf16.gmra.mxu0 %vm4258_vm9, %v5862_v31 }
 0x4b2   : > { %9614 = vmatprep.mubr.msk.bf16.mxu0 %vm4258_vm9, %v5864_v23  ;;  %v4776_v23 = vrot.slane %v12486_v7, 1 }
 0x4b3   : > { %9447 = vmatmul.mubr.msk.bf16.gmra.mxu1 %vm4258_vm9, %v12674_v18  ;;  %v13016_v38 = vpop.f32.mrf.mxu1 }
 0x4b4   : > { %9450 = vmatprep.mubr.msk.bf16.mxu1 %vm4258_vm9, %v12693_v39 }
 0x4b5   : > { %v13020_v5 = vpop.f32.mrf.mxu1 }
 0x4b7   : > { %v13030_v31 = vpop.f32.mrf.mxu1 }
 0x4b9   : > { %9615 = vmatmul.mubr.msk.bf16.gmra.mxu0 %vm4258_vm9, %v5866_v41  ;;  %v13034_v56 = vpop.f32.mrf.mxu1  ;;  %v5880_v41 = vsel %vm2343_vm7, %v5877_v48, %v5879_v57  ;;  %v4779_v57 = vsel %vm1138_vm5, %v4776_v23, %v4778_v36 }
 0x4ba   : > { %9618 = vmatprep.mubr.msk.bf16.mxu0 %vm4258_vm9, %v5868_v49  ;;  %v4775_v49 = vrot.slane %v12479_v33, 1  ;;  %v5605_v33 = vsel %vm4319_vm8, %v12908_v14, 0  ;;  %v4784_v14 = vrot.slane %v12548_v2, 1 }
 0x4bb   : > { %9451 = vmatmul.mubr.msk.bf16.gmra.mxu1 %vm4258_vm9, %v12712_v62 }
 0x4bc   : > { %9454 = vmatprep.mubr.msk.bf16.mxu1 %vm4258_vm9, %v12731_v42  ;;  %v4777_v7 = vsel %vm1138_vm5, %v4775_v49, %v4776_v23  ;;  %v4788_v49 = vrot.slane %v12598_v25, 1 }
 0x4c1   : > { %9619 = vmatmul.mubr.msk.bf16.gmra.mxu0 %vm4258_vm9, %v5870_v1 }
 0x4c2   : > { %9622 = vmatprep.mubr.msk.bf16.mxu0 %vm4258_vm9, %v5872_v21  ;;  %v4780_v21 = vrot.slane %v12513_v9, 1 }
 0x4c3   : > { %9455 = vmatmul.mubr.msk.bf16.gmra.mxu1 %vm4258_vm9, %v12750_v35  ;;  %v13042_v32 = vpop.f32.mrf.mxu1 }
 0x4c4   : > { %9458 = vmatprep.mubr.msk.bf16.mxu1 %vm4258_vm9, %v12769_v40 }
 0x4c5   : > { %v13049_v1 = vpop.f32.mrf.mxu1 }
 0x4c7   : > { %v13064_v37 = vpop.f32.mrf.mxu1 }
 0x4c9   : > { %9623 = vmatmul.mubr.msk.bf16.gmra.mxu0 %vm4258_vm9, %v5874_v10  ;;  %v4781_v10 = vsel %vm1138_vm5, %v4778_v36, %v4780_v21 }
 0x4ca   : > { %9626 = vmatprep.mubr.msk.bf16.mxu0 %vm4258_vm9, %v5876_v60 }
 0x4cb   : > { %9459 = vmatmul.mubr.msk.bf16.gmra.mxu1 %vm4258_vm9, %v12795_v46 }
 0x4cc   : > { %9462 = vmatprep.mubr.msk.bf16.mxu1 %vm4258_vm9, %v12814_v51 }
 0x4d1   : > { %9627 = vmatmul.mubr.msk.bf16.gmra.mxu0 %vm4258_vm9, %v5878_v50 }
 0x4d2   : > { %9630 = vmatprep.mubr.msk.bf16.mxu0 %vm4258_vm9, %v5880_v41  ;;  %v4786_v41 = vrot.slane %v12567_v24, 1 }
 0x4d3   : > { %9463 = vmatmul.mubr.msk.bf16.gmra.mxu1 %vm4258_vm9, %v12838_v26 }
 0x4d4   : > { %9468 = vmatprep.mubr.msk.bf16.mxu1 %vm4258_vm9, %v4777_v7 }
 0x4d9   : > { %9631 = vmatmul.mubr.msk.bf16.gmra.mxu0 %vm4258_vm9, %v12901_v53  ;;  %v13072_v53 = vpop.f32.mrf.mxu1 }
 0x4da   : > { %9678 = vmatprep.mubr.msk.bf16.mxu0 %vm4258_vm9, %v12532_v44  ;;  %v4782_v44 = vrot.slane %v12529_v54, 1 }
 0x4db   : > { %9469 = vmatmul.mubr.msk.bf16.vlgmr.msra.gmra.mxu1 %vm4258_vm9, %v4779_v57  ;;  %v13075_v60 = vpop.f32.mrf.mxu1  ;;  %v4792_v57 = vrot.slane %v12636_v4, 1 }
 0x4dc   : > { %9551 = vmatpush3.bf16.msra.mxu1 %v5605_v33  ;;  %9472 = vmatprep.mubr.msk.bf16.mxu1 %vm4258_vm9, %v4781_v10  ;;  %v4783_v48 = vsel %vm1138_vm5, %v4780_v21, %v4782_v44  ;;  %v4785_v23 = vsel %vm1138_vm5, %v4782_v44, %v4784_v14  ;;  %v4790_v21 = vrot.slane %v12617_v28, 1  ;;  %v4794_v44 = vrot.slane %v12655_v11, 1 }
 0x4dd   : > { %9768 = vmatprep.subr.msk.bf16.mxu1 %vm4319_vm8, %v13062_v55  ;;  %v13085_v50 = vpop.f32.mrf.mxu1 }
 0x4de   : > { %v4793_v10 = vsel %vm1138_vm5, %v4790_v21, %v4792_v57 }
 0x4df   : > { %v13089_v7 = vpop.f32.mrf.mxu1 }
 0x4e1   : > { %9679 = vmatmul.mubr.msk.bf16.vlgmr.msra.gmra.mxu0 %vm4258_vm9, %v12551_v43  ;;  %v4787_v43 = vsel %vm1138_vm5, %v4784_v14, %v4786_v41  ;;  %v13099_v36 = vpop.f32.mrf.mxu1 }
 0x4e2   : > { %9682 = vmatprep.mubr.msk.bf16.mxu0 %vm4258_vm9, %v12582_v3  ;;  %v4789_v3 = vsel %vm1138_vm5, %v4786_v41, %v4788_v49 }
 0x4e3   : > { %9473 = vmatmul.mubr.msk.bf16.gmra.mxu1 %vm4258_vm9, %v4783_v48  ;;  %v13102_v33 = vpop.f32.mrf.mxu1  ;;  %v4796_v48 = vrot.slane %v12674_v18, 1 }
 0x4e4   : > { %9476 = vmatprep.mubr.msk.bf16.mxu1 %vm4258_vm9, %v4785_v23 }
 0x4e5   : > { %v4797_v41 = vsel %vm1138_vm5, %v4794_v44, %v4796_v48 }
 0x4e9   : > { %9683 = vmatmul.mubr.msk.bf16.gmra.mxu0 %vm4258_vm9, %v12601_v47  ;;  %v4791_v47 = vsel %vm1138_vm5, %v4788_v49, %v4790_v21 }
 0x4ea   : > { %9686 = vmatprep.mubr.msk.bf16.mxu0 %vm4258_vm9, %v12620_v15  ;;  %v13110_v15 = vpop.f32.mrf.mxu1 }
 0x4eb   : > { %9477 = vmatmul.mubr.msk.bf16.gmra.mxu1 %vm4258_vm9, %v4787_v43  ;;  %v4798_v43 = vrot.slane %v12693_v39, 1 }
 0x4ec   : > { %9480 = vmatprep.mubr.msk.bf16.mxu1 %vm4258_vm9, %v4789_v3  ;;  %v13116_v14 = vpop.f32.mrf.mxu1  ;;  %v4800_v3 = vrot.slane %v12712_v62, 1 }
 0x4ee   : > { %v13124_v23 = vpop.f32.mrf.mxu1 }
 0x4f1   : > { %9687 = vmatmul.mubr.msk.bf16.gmra.mxu0 %vm4258_vm9, %v12639_v30  ;;  %v14747_v30 = vld [vmem:[#allocation26_spill] sm:$0xff] }
 0x4f2   : > { %9690 = vmatprep.mubr.msk.bf16.mxu0 %vm4258_vm9, %v12658_v52  ;;  %v4795_v52 = vsel %vm1138_vm5, %v4792_v57, %v4794_v44  ;;  %v4799_v57 = vsel %vm1138_vm5, %v4796_v48, %v4798_v43 }
 0x4f3   : > { %9481 = vmatmul.mubr.msk.bf16.gmra.mxu1 %vm4258_vm9, %v4791_v47  ;;  %v13129_v49 = vpop.f32.mrf.mxu1  ;;  %v14749_v47 = vld [vmem:[#allocation30_spill] sm:$0xff] }
 0x4f4   : > { %9484 = vmatprep.mubr.msk.bf16.mxu1 %vm4258_vm9, %v4793_v10  ;;  %v4801_v10 = vsel %vm1138_vm5, %v4798_v43, %v4800_v3 }
 0x4f5   : > { %v13133_v21 = vpop.f32.mrf.mxu1 }
 0x4f6   : > { %14748 = vst [vmem:[#allocation32_spill] sm:$0xff] %v13133_v21  ;;  %v6183_v21 = vrot.slane %v12497_v6, 4  ;;  %v6188_v6 = vrot.slane %v12548_v2, 4 }
 0x4f7   : > { %v13143_v44 = vpop.f32.mrf.mxu1 }
 0x4f8   : > { %14751 = vst [vmem:[#allocation6_spill] sm:$0xff] %v13143_v44 }
 0x4f9   : > { %9691 = vmatmul.mubr.msk.bf16.gmra.mxu0 %vm4258_vm9, %v14747_v30  ;;  %v4802_v30 = vrot.slane %v12731_v42, 1 }
 0x4fa   : > { %9694 = vmatprep.mubr.msk.bf16.mxu0 %vm4258_vm9, %v12696_v13  ;;  %v14750_v13 = vld [vmem:[#allocation33_spill] sm:$0xff] }
 0x4fb   : > { %9485 = vmatmul.mubr.msk.bf16.gmra.mxu1 %vm4258_vm9, %v4795_v52  ;;  %v4804_v52 = vrot.slane %v12750_v35, 1  ;;  %v4803_v48 = vsel %vm1138_vm5, %v4800_v3, %v4802_v30 }
 0x4fc   : > { %9488 = vmatprep.mubr.msk.bf16.mxu1 %vm4258_vm9, %v4797_v41  ;;  %v13147_v41 = vpop.f32.mrf.mxu1 }
 0x4fd   : > { %14752 = vst [vmem:[#allocation29_spill] sm:$0xff] %v13147_v41  ;;  %v4805_v43 = vsel %vm1138_vm5, %v4802_v30, %v4804_v52 }
 0x501   : > { %9695 = vmatmul.mubr.msk.bf16.gmra.mxu0 %vm4258_vm9, %v14749_v47  ;;  %v14753_v47 = vld [vmem:[#allocation38_spill] sm:$0xff] }
 0x502   : > { %9698 = vmatprep.mubr.msk.bf16.mxu0 %vm4258_vm9, %v14750_v13 }
 0x503   : > { %9489 = vmatmul.mubr.msk.bf16.gmra.mxu1 %vm4258_vm9, %v4799_v57  ;;  %v13154_v13 = vpop.f32.mrf.mxu1  ;;  %v13158_v57 = vpop.f32.mrf.mxu0 }
 0x504   : > { %9492 = vmatprep.mubr.msk.bf16.mxu1 %vm4258_vm9, %v4801_v10  ;;  %14754 = vst [vmem:[#allocation7_spill] sm:$0xff] %v13154_v13  ;;  %14755 = vst [vmem:[#allocation8_spill] sm:$0xff] %v13158_v57  ;;  %v4806_v10 = vrot.slane %v12769_v40, 1 }
 0x505   : > { %v13162_v0 = vpop.f32.mrf.mxu1  ;;  %v13165_v58 = vpop.f32.mrf.mxu0 }
 0x506   : > { %14756 = vst [vmem:[#allocation9_spill] sm:$0xff] %v13162_v0  ;;  %14757 = vst [vmem:[#allocation10_spill] sm:$0xff] %v13165_v58  ;;  %v4807_v3 = vsel %vm1138_vm5, %v4804_v52, %v4806_v10 }
 0x507   : > { %v13172_v30 = vpop.f32.mrf.mxu1 }
 0x508   : > { %14758 = vst [vmem:[#allocation2_spill] sm:$0xff] %v13172_v30 }
 0x509   : > { %9699 = vmatmul.mubr.msk.bf16.gmra.mxu0 %vm4258_vm9, %v12753_v16  ;;  %v4808_v16 = vrot.slane %v12795_v46, 1  ;;  %v13180_v58 = vpop.f32.mrf.mxu1 }
 0x50a   : > { %9702 = vmatprep.mubr.msk.bf16.mxu0 %vm4258_vm9, %v14753_v47  ;;  %14760 = vst [vmem:[#allocation11_spill] sm:$0xff] %v13180_v58 }
 0x50b   : > { %9493 = vmatmul.mubr.msk.bf16.gmra.mxu1 %vm4258_vm9, %v4803_v48  ;;  %v4809_v47 = vsel %vm1138_vm5, %v4806_v10, %v4808_v16  ;;  %v13176_v48 = vpop.f32.mrf.mxu0 }
 0x50c   : > { %9496 = vmatprep.mubr.msk.bf16.mxu1 %vm4258_vm9, %v4805_v43  ;;  %14759 = vst [vmem:[#allocation34_spill] sm:$0xff] %v13176_v48  ;;  %v4810_v43 = vrot.slane %v12814_v51, 1  ;;  %v4814_v48 = vrot.slane %v12857_v61, 1 }
 0x50d   : > { %v13183_v57 = vpop.f32.mrf.mxu0 }
 0x50e   : > { %14761 = vst [vmem:[#allocation26_spill] sm:$0xff] %v13183_v57  ;;  %v4811_v10 = vsel %vm1138_vm5, %v4808_v16, %v4810_v43 }
 0x50f   : > { %v13189_v52 = vpop.f32.mrf.mxu0 }
 0x510   : > { %14763 = vst [vmem:[#allocation33_spill] sm:$0xff] %v13189_v52 }
 0x511   : > { %9703 = vmatmul.mubr.msk.bf16.gmra.mxu0 %vm4258_vm9, %v12798_v8  ;;  %v4812_v8 = vrot.slane %v12838_v26, 1  ;;  %v13199_v57 = vpop.f32.mrf.mxu0 }
 0x512   : > { %9706 = vmatprep.mubr.msk.bf16.mxu0 %vm4258_vm9, %v12817_v34  ;;  %14765 = vst [vmem:[#allocation49_spill] sm:$0xff] %v13199_v57 }
 0x513   : > { %9497 = vmatmul.mubr.msk.bf16.gmra.mxu1 %vm4258_vm9, %v4807_v3  ;;  %v13185_v34 = vpop.f32.mrf.mxu1  ;;  %v4813_v3 = vsel %vm1138_vm5, %v4810_v43, %v4812_v8  ;;  %v4815_v16 = vsel %vm1138_vm5, %v4812_v8, %v4814_v48  ;;  %v14768_v43 = vld [vmem:[#allocation13_spill] sm:$0xff]  ;;  %v14774_v8 = vld [vmem:[#allocation40_spill] sm:$0xff] }
 0x514   : > { %9500 = vmatprep.mubr.msk.bf16.mxu1 %vm4258_vm9, %v4809_v47  ;;  %14762 = vst [vmem:[#allocation30_spill] sm:$0xff] %v13185_v34  ;;  %v14811_v34 = vld [vmem:[#allocation41_spill] sm:$0xff] }
 0x515   : > { %v13197_v47 = vpop.f32.mrf.mxu1 }
 0x516   : > { %14764 = vst [vmem:[#allocation38_spill] sm:$0xff] %v13197_v47 }
 0x519   : > { %9707 = vmatmul.mubr.msk.bf16.gmra.mxu0 %vm4258_vm9, %v12841_v17  ;;  %v13202_v17 = vpop.f32.mrf.mxu1 }
 0x51a   : > { %9710 = vmatprep.mubr.msk.bf16.mxu0 %vm4258_vm9, %v12861_v59  ;;  %14766 = vst [vmem:[#allocation50_spill] sm:$0xff] %v13202_v17  ;;  %v13206_v59 = vpop.f32.mrf.mxu0 }
 0x51b   : > { %9501 = vmatmul.mubr.msk.bf16.gmra.mxu1 %vm4258_vm9, %v4811_v10  ;;  %14767 = vst [vmem:[#allocation51_spill] sm:$0xff] %v13206_v59  ;;  %v13214_v10 = vpop.f32.mrf.mxu1 }
 0x51c   : > { %9504 = vmatprep.mubr.msk.bf16.mxu1 %vm4258_vm9, %v4813_v3  ;;  %14769 = vst [vmem:[#allocation13_spill] sm:$0xff] %v13214_v10  ;;  %v13216_v3 = vpop.f32.mrf.mxu0 }
 0x51d   : > { %14770 = vst [vmem:[#allocation52_spill] sm:$0xff] %v13216_v3  ;;  %v14780_v3 = vld [vmem:[#allocation17_spill] sm:$0xff] }
 0x51e   : > { %v13220_v52 = vpop.f32.mrf.mxu0 }
 0x51f   : > { %14772 = vst [vmem:[#allocation54_spill] sm:$0xff] %v13220_v52 }
 0x521   : > { %9711 = vmatmul.mubr.msk.bf16.gmra.mxu0 %vm4258_vm9, %v12887_v27  ;;  %v6285_v27 = vsel %vm4319_vm8, %v13062_v55, 0 }
 0x522   : > { %9714 = vmatprep.mubr.msk.bf16.mxu0 %vm4258_vm9, %v12929_v29  ;;  %v13229_v29 = vld [vmem:[%s14390_s3 + $0x10] sm:$0x3] }
 0x523   : > { %9505 = vmatmul.mubr.msk.bf16.gmra.mxu1 %vm4258_vm9, %v4815_v16  ;;  %v13218_v57 = vpop.f32.mrf.mxu1  ;;  %v13235_v16 = vpop.f32.mrf.mxu0 }
 0x524   : > { %9552 = vmatprep.mubr.msk.bf16.mxu1 %vm4258_vm9, %v14768_v43  ;;  %14771 = vst [vmem:[#allocation53_spill] sm:$0xff] %v13218_v57  ;;  %14775 = vst [vmem:[#allocation40_spill] sm:$0xff] %v13235_v16  ;;  %v14776_v43 = vld [vmem:[#allocation16_spill] sm:$0xff]  ;;  %v14806_v57 = vld [vmem:[#allocation35_spill] sm:$0xff] }
 0x525   : > { %v13231_v48 = vpop.f32.mrf.mxu1  ;;  %v13243_v55 = vpop.f32.mrf.mxu0 }
 0x526   : > { %14773 = vst [vmem:[#allocation55_spill] sm:$0xff] %v13231_v48  ;;  %14778 = vst [vmem:[#allocation56_spill] sm:$0xff] %v13243_v55  ;;  %v14788_v55 = vld [vmem:[#allocation21_spill] sm:$0xff] }
 0x527   : > { %v13249_v59 = vpop.f32.mrf.mxu0 }
 0x528   : > { %14781 = vst [vmem:[#allocation17_spill] sm:$0xff] %v13249_v59 }
 0x529   : > { %9715 = vmatmul.mubr.msk.bf16.gmra.mxu0 %vm4258_vm9, %v12954_v63  ;;  %v13241_v63 = vpop.f32.mrf.mxu1 }
 0x52a   : > { %14777 = vst [vmem:[#allocation16_spill] sm:$0xff] %v13241_v63  ;;  %v14787_v63 = vld [vmem:[#allocation20_spill] sm:$0xff] }
 0x52b   : > { %9553 = vmatmul.mubr.msk.bf16.vlgmr.msra.gmra.mxu1 %vm4258_vm9, %v14774_v8  ;;  %v13245_v52 = vpop.f32.mrf.mxu1  ;;  %v14782_v8 = vld [vmem:[#allocation25_spill] sm:$0xff] }
 0x52c   : > { %9635 = vmatpush3.bf16.msra.mxu1 %v6285_v27  ;;  %9556 = vmatprep.mubr.msk.bf16.mxu1 %vm4258_vm9, %v14776_v43  ;;  %14779 = vst [vmem:[#allocation57_spill] sm:$0xff] %v13245_v52  ;;  %v13255_v43 = vpop.f32.mrf.mxu0 }
 0x52d   : > { %9770 = vmatprep.subr.msk.bf16.mxu1 %vm4319_vm8, %v13229_v29  ;;  %14784 = vst [vmem:[#allocation58_spill] sm:$0xff] %v13255_v43  ;;  %v14794_v43 = vld [vmem:[#allocation48_spill] sm:$0xff] }
 0x52e   : > { %v13259_v48 = vpop.f32.mrf.mxu0 }
 0x52f   : > { %14786 = vst [vmem:[#allocation60_spill] sm:$0xff] %v13259_v48 }
 0x530   : > { %v13267_v59 = vpop.f32.mrf.mxu0 }
 0x531   : > { %14790 = vst [vmem:[#allocation21_spill] sm:$0xff] %v13267_v59 }
 0x533   : > { %9557 = vmatmul.mubr.msk.bf16.gmra.mxu1 %vm4258_vm9, %v14780_v3  ;;  %v13253_v27 = vpop.f32.mrf.mxu1 }
 0x534   : > { %9560 = vmatprep.mubr.msk.bf16.mxu1 %vm4258_vm9, %v14782_v8  ;;  %14783 = vst [vmem:[#allocation25_spill] sm:$0xff] %v13253_v27  ;;  %v13271_v8 = vpop.f32.mrf.mxu0 }
 0x535   : > { %v13257_v16 = vpop.f32.mrf.mxu1  ;;  %14792 = vst [vmem:[#allocation62_spill] sm:$0xff] %v13271_v8  ;;  %v14801_v8 = vld [vmem:[#allocation19_spill] sm:$0xff] }
 0x536   : > { %14785 = vst [vmem:[#allocation59_spill] sm:$0xff] %v13257_v16  ;;  %v13277_v48 = vpop.f32.mrf.mxu0  ;;  %v14796_v16 = vld [vmem:[#allocation27_spill] sm:$0xff] }
 0x537   : > { %v13265_v3 = vpop.f32.mrf.mxu1  ;;  %14795 = vst [vmem:[#allocation48_spill] sm:$0xff] %v13277_v48 }
 0x538   : > { %14789 = vst [vmem:[#allocation20_spill] sm:$0xff] %v13265_v3  ;;  %v13285_v3 = vpop.f32.mrf.mxu0 }
 0x539   : > { %v13269_v52 = vpop.f32.mrf.mxu1  ;;  %14799 = vst [vmem:[#allocation65_spill] sm:$0xff] %v13285_v3 }
 0x53a   : > { %14791 = vst [vmem:[#allocation61_spill] sm:$0xff] %v13269_v52 }
 0x53b   : > { %9561 = vmatmul.mubr.msk.bf16.gmra.mxu1 %vm4258_vm9, %v14787_v63 }
 0x53c   : > { %9564 = vmatprep.mubr.msk.bf16.mxu1 %vm4258_vm9, %v14788_v55 }
 0x543   : > { %v13273_v27 = vpop.f32.mrf.mxu1  ;;  %9565 = vmatmul.mubr.msk.bf16.gmra.mxu1 %vm4258_vm9, %v14794_v43  ;;  %v14803_v43 = vld [vmem:[#allocation31_spill] sm:$0xff] }
 0x544   : > { %14793 = vst [vmem:[#allocation63_spill] sm:$0xff] %v13273_v27  ;;  %9568 = vmatprep.mubr.msk.bf16.mxu1 %vm4258_vm9, %v14796_v16  ;;  %v13293_v27 = vpop.f32.mrf.mxu0 }
 0x545   : > { %v13281_v63 = vpop.f32.mrf.mxu1  ;;  %14802 = vst [vmem:[#allocation19_spill] sm:$0xff] %v13293_v27 }
 0x546   : > { %14797 = vst [vmem:[#allocation27_spill] sm:$0xff] %v13281_v63  ;;  %v13301_v63 = vpop.f32.mrf.mxu0 }
 0x547   : > { %v13283_v55 = vpop.f32.mrf.mxu1  ;;  %14804 = vst [vmem:[#allocation31_spill] sm:$0xff] %v13301_v63 }
 0x548   : > { %14798 = vst [vmem:[#allocation64_spill] sm:$0xff] %v13283_v55  ;;  %v13305_v3 = vpop.f32.mrf.mxu0 }
 0x549   : > { %v13287_v59 = vpop.f32.mrf.mxu1  ;;  %14805 = vst [vmem:[#allocation67_spill] sm:$0xff] %v13305_v3  ;;  %v14810_v3 = vld [vmem:[#allocation39_spill] sm:$0xff] }
 0x54a   : > { %14800 = vst [vmem:[#allocation66_spill] sm:$0xff] %v13287_v59 }
 0x54b   : > { %v13289_v52 = vpop.f32.mrf.mxu1  ;;  %9569 = vmatmul.mubr.msk.bf16.gmra.mxu1 %vm4258_vm9, %v14801_v8  ;;  %v14807_v8 = vld [vmem:[#allocation36_spill] sm:$0xff] }
 0x54c   : > { %9572 = vmatprep.mubr.msk.bf16.mxu1 %vm4258_vm9, %v14803_v43  ;;  %v13315_v43 = vpop.f32.mrf.mxu0 }
 0x54d   : > { %v13297_v48 = vpop.f32.mrf.mxu1  ;;  %14808 = vst [vmem:[#allocation35_spill] sm:$0xff] %v13315_v43 }
 0x54e   : > { %v13321_v63 = vpop.f32.mrf.mxu0 }
 0x54f   : > { %v13299_v16 = vpop.f32.mrf.mxu1  ;;  %14809 = vst [vmem:[#allocation36_spill] sm:$0xff] %v13321_v63  ;;  %v14814_v63 = vld [vmem:[#allocation42_spill] sm:$0xff] }
 0x551   : > { %v13303_v55 = vpop.f32.mrf.mxu1 }
 0x553   : > { %v13307_v59 = vpop.f32.mrf.mxu1  ;;  %9573 = vmatmul.mubr.msk.bf16.gmra.mxu1 %vm4258_vm9, %v14806_v57 }
 0x554   : > { %9576 = vmatprep.mubr.msk.bf16.mxu1 %vm4258_vm9, %v14807_v8  ;;  %v13331_v8 = vpop.f32.mrf.mxu0 }
 0x555   : > { %v13313_v27 = vpop.f32.mrf.mxu1  ;;  %14812 = vst [vmem:[#allocation39_spill] sm:$0xff] %v13331_v8 }
 0x556   : > { %v13335_v43 = vpop.f32.mrf.mxu0 }
 0x557   : > { %v13317_v10 = vpop.f32.mrf.mxu1  ;;  %14813 = vst [vmem:[#allocation41_spill] sm:$0xff] %v13335_v43 }
 0x558   : > { %v13343_v19 = vpop.f32.mrf.mxu0 }
 0x559   : > { %v13319_v17 = vpop.f32.mrf.mxu1  ;;  %14815 = vst [vmem:[#allocation42_spill] sm:$0xff] %v13343_v19 }
 0x55a   : > { %v13351_v8 = vpop.f32.mrf.mxu0 }
 0x55b   : > { %v13323_v47 = vpop.f32.mrf.mxu1  ;;  %9577 = vmatmul.mubr.msk.bf16.gmra.mxu1 %vm4258_vm9, %v14810_v3  ;;  %v14816_v3 = vld [vmem:[#allocation44_spill] sm:$0xff] }
 0x55c   : > { %9580 = vmatprep.mubr.msk.bf16.mxu1 %vm4258_vm9, %v14811_v34  ;;  %14817 = vst [vmem:[#allocation44_spill] sm:$0xff] %v13351_v8  ;;  %v13359_v44 = vpop.f32.mrf.mxu0  ;;  %v6184_v8 = vrot.slane %v12513_v9, 4  ;;  %v6186_v9 = vrot.slane %v12529_v54, 4 }
 0x55d   : > { %v13329_v57 = vpop.f32.mrf.mxu1  ;;  %14818 = vst [vmem:[#allocation68_spill] sm:$0xff] %v13359_v44 }
 0x55f   : > { %v13333_v58 = vpop.f32.mrf.mxu1 }
 0x561   : > { %v13337_v30 = vpop.f32.mrf.mxu1 }
 0x563   : > { %v13339_v0 = vpop.f32.mrf.mxu1  ;;  %9581 = vmatmul.mubr.msk.bf16.gmra.mxu1 %vm4258_vm9, %v14814_v63 }
 0x564   : > { %9584 = vmatprep.mubr.msk.bf16.mxu1 %vm4258_vm9, %v14816_v3  ;;  %v13365_v3 = vpop.f32.mrf.mxu0 }
 0x565   : > { %v13347_v34 = vpop.f32.mrf.mxu1  ;;  %14819 = vst [vmem:[#allocation69_spill] sm:$0xff] %v13365_v3 }
 0x566   : > { %v13373_v61 = vpop.f32.mrf.mxu0 }
 0x567   : > { %v13349_v13 = vpop.f32.mrf.mxu1  ;;  %14821 = vst [vmem:[#allocation71_spill] sm:$0xff] %v13373_v61 }
 0x568   : > { %v13383_v44 = vpop.f32.mrf.mxu0 }
 0x569   : > { %v13353_v41 = vpop.f32.mrf.mxu1  ;;  %14823 = vst [vmem:[#allocation73_spill] sm:$0xff] %v13383_v44  ;;  %v6189_v44 = vsel %vm649_vm0, %v6186_v9, %v6188_v6 }
 0x56b   : > { %v13355_v43 = vpop.f32.mrf.mxu1  ;;  %9585 = vmatmul.mubr.msk.bf16.gmra.mxu1 %vm4258_vm9, %v12869_v22 }
 0x56c   : > { %9588 = vmatprep.mubr.msk.bf16.mxu1 %vm4258_vm9, %v12894_v20  ;;  %v6185_v20 = vsel %vm649_vm0, %v6183_v21, %v6184_v8  ;;  %v6187_v21 = vsel %vm649_vm0, %v6184_v8, %v6186_v9 }
 0x56d   : > { %v13363_v63 = vpop.f32.mrf.mxu1 }
 0x56f   : > { %v13367_v19 = vpop.f32.mrf.mxu1 }
 0x571   : > { %v13370_v12 = vpop.f32.mrf.mxu1 }
 0x572   : > { %14820 = vst [vmem:[#allocation70_spill] sm:$0xff] %v13370_v12 }
 0x573   : > { %v13375_v22 = vpop.f32.mrf.mxu1  ;;  %9589 = vmatmul.mubr.msk.bf16.gmra.mxu1 %vm4258_vm9, %v12932_v45  ;;  %v13393_v45 = vpop.f32.mrf.mxu0 }
 0x574   : > { %14822 = vst [vmem:[#allocation72_spill] sm:$0xff] %v13375_v22  ;;  %9636 = vmatprep.mubr.msk.bf16.mxu1 %vm4258_vm9, %v6185_v20  ;;  %v7012_v22 = vsel %vm4319_vm8, %v13229_v29, 0  ;;  %14825 = vst [vmem:[#allocation75_spill] sm:$0xff] %v13393_v45  ;;  %v6192_v45 = vrot.slane %v12598_v25, 4  ;;  %v6194_v25 = vrot.slane %v12617_v28, 4 }
 0x575   : > { %v13381_v3 = vpop.f32.mrf.mxu1  ;;  %v13400_v54 = vpop.f32.mrf.mxu0 }
 0x576   : > { %14827 = vst [vmem:[#allocation77_spill] sm:$0xff] %v13400_v54 }
 0x577   : > { %v13386_v12 = vpop.f32.mrf.mxu1  ;;  %v13409_v8 = vpop.f32.mrf.mxu0 }
 0x578   : > { %14828 = vst [vmem:[#allocation78_spill] sm:$0xff] %v13409_v8  ;;  %v6196_v8 = vrot.slane %v12636_v4, 4 }
 0x579   : > { %v13389_v61 = vpop.f32.mrf.mxu1 }
 0x57a   : > { %14824 = vst [vmem:[#allocation74_spill] sm:$0xff] %v13389_v61  ;;  %v6190_v61 = vrot.slane %v12567_v24, 4 }
 0x57b   : > { %v13396_v20 = vpop.f32.mrf.mxu1  ;;  %9637 = vmatmul.mubr.msk.bf16.vlgmr.msra.gmra.mxu1 %vm4258_vm9, %v6187_v21 }
 0x57c   : > { %14826 = vst [vmem:[#allocation76_spill] sm:$0xff] %v13396_v20  ;;  %9719 = vmatpush3.bf16.msra.mxu1 %v7012_v22  ;;  %9640 = vmatprep.mubr.msk.bf16.mxu1 %vm4258_vm9, %v6189_v44  ;;  %v6191_v21 = vsel %vm649_vm0, %v6188_v6, %v6190_v61  ;;  %v6193_v44 = vsel %vm649_vm0, %v6190_v61, %v6192_v45  ;;  %v13418_v22 = vpop.f32.mrf.mxu0 }
 0x57d   : > { %v13403_v2 = vpop.f32.mrf.mxu1  ;;  %14831 = vst [vmem:[#allocation81_spill] sm:$0xff] %v13418_v22  ;;  %v6195_v61 = vsel %vm649_vm0, %v6192_v45, %v6194_v25 }
 0x57f   : > { %v13406_v29 = vpop.f32.mrf.mxu1 }
 0x581   : > { %v13411_v20 = vpop.f32.mrf.mxu1 }
 0x582   : > { %14829 = vst [vmem:[#allocation79_spill] sm:$0xff] %v13411_v20  ;;  %v13427_v20 = vpop.f32.mrf.mxu0 }
 0x583   : > { %v13414_v9 = vpop.f32.mrf.mxu1  ;;  %9641 = vmatmul.mubr.msk.bf16.gmra.mxu1 %vm4258_vm9, %v6191_v21  ;;  %14832 = vst [vmem:[#allocation82_spill] sm:$0xff] %v13427_v20  ;;  %v6198_v20 = vrot.slane %v12655_v11, 4 }
 0x584   : > { %14830 = vst [vmem:[#allocation80_spill] sm:$0xff] %v13414_v9  ;;  %9644 = vmatprep.mubr.msk.bf16.mxu1 %vm4258_vm9, %v6193_v44  ;;  %v13431_v9 = vpop.f32.mrf.mxu0  ;;  %v6197_v44 = vsel %vm649_vm0, %v6194_v25, %v6196_v8 }
 0x585   : > { %v13421_v54 = vpop.f32.mrf.mxu1  ;;  %14834 = vst [vmem:[#allocation84_spill] sm:$0xff] %v13431_v9  ;;  %v6200_v9 = vrot.slane %v12674_v18, 4  ;;  %v6202_v18 = vrot.slane %v12693_v39, 4  ;;  %v4594_v39 = vadd.f32 %v13297_v48, %v13020_v5  ;;  %v4597_v5 = vadd.f32 %v13303_v55, %v13034_v56 }
 0x586   : > { %v13441_v28 = vpop.f32.mrf.mxu0  ;;  %v4610_v56 = vadd.f32 %v13313_v27, %v13049_v1  ;;  %v4613_v1 = vadd.f32 %v13319_v17, %v13072_v53  ;;  %v4626_v53 = vadd.f32 %v13329_v57, %v13085_v50  ;;  %v4629_v50 = vadd.f32 %v13337_v30, %v13099_v36 }
 0x587   : > { %v13424_v24 = vpop.f32.mrf.mxu1  ;;  %14836 = vst [vmem:[#allocation86_spill] sm:$0xff] %v13441_v28  ;;  %v6201_v25 = vsel %vm649_vm0, %v6198_v20, %v6200_v9  ;;  %v4642_v36 = vadd.f32 %v13347_v34, %v13110_v15  ;;  %v4666_v34 = vadd.f32 %v13355_v43, %v13129_v49  ;;  %v14856_v49 = vld [vmem:[#allocation6_spill] sm:$0xff] }
 0x588   : > { %v13449_v45 = vpop.f32.mrf.mxu0  ;;  %v4669_v43 = vadd.f32 %v13367_v19, %v14856_v49  ;;  %v14865_v49 = vld [vmem:[#allocation9_spill] sm:$0xff] }
 0x589   : > { %v13429_v6 = vpop.f32.mrf.mxu1  ;;  %14838 = vst [vmem:[#allocation88_spill] sm:$0xff] %v13449_v45  ;;  %v6204_v45 = vrot.slane %v12712_v62, 4 }
 0x58a   : > { %14833 = vst [vmem:[#allocation83_spill] sm:$0xff] %v13429_v6  ;;  %v13459_v28 = vpop.f32.mrf.mxu0 }
 0x58b   : > { %v13434_v21 = vpop.f32.mrf.mxu1  ;;  %9645 = vmatmul.mubr.msk.bf16.gmra.mxu1 %vm4258_vm9, %v6195_v61  ;;  %v6199_v61 = vsel %vm649_vm0, %v6196_v8, %v6198_v20  ;;  %14839 = vst [vmem:[#allocation89_spill] sm:$0xff] %v13459_v28  ;;  %v4602_v8 = vadd.f32 %v13289_v52, %v13016_v38  ;;  %v6203_v20 = vsel %vm649_vm0, %v6200_v9, %v6202_v18  ;;  %v6206_v9 = vrot.slane %v12731_v42, 4 }
 0x58c   : > { %14835 = vst [vmem:[#allocation85_spill] sm:$0xff] %v13434_v21  ;;  %9648 = vmatprep.mubr.msk.bf16.mxu1 %vm4258_vm9, %v6197_v44  ;;  %v6205_v28 = vsel %vm649_vm0, %v6202_v18, %v6204_v45  ;;  %v4605_v38 = vadd.f32 %v13299_v16, %v13030_v31  ;;  %v6208_v18 = vrot.slane %v12750_v35, 4 }
 0x58d   : > { %v13439_v22 = vpop.f32.mrf.mxu1 }
 0x58f   : > { %v13444_v4 = vpop.f32.mrf.mxu1 }
 0x591   : > { %v13447_v6 = vpop.f32.mrf.mxu1 }
 0x592   : > { %14837 = vst [vmem:[#allocation87_spill] sm:$0xff] %v13447_v6 }
 0x593   : > { %v13452_v21 = vpop.f32.mrf.mxu1  ;;  %9649 = vmatmul.mubr.msk.bf16.gmra.mxu1 %vm4258_vm9, %v6199_v61  ;;  %v13469_v61 = vpop.f32.mrf.mxu0 }
 0x594   : > { %9652 = vmatprep.mubr.msk.bf16.mxu1 %vm4258_vm9, %v6201_v25  ;;  %14842 = vst [vmem:[#allocation92_spill] sm:$0xff] %v13469_v61 }
 0x595   : > { %v13457_v44 = vpop.f32.mrf.mxu1  ;;  %v13481_v52 = vpop.f32.mrf.mxu0 }
 0x596   : > { %14843 = vst [vmem:[#allocation93_spill] sm:$0xff] %v13481_v52 }
 0x597   : > { %v13462_v11 = vpop.f32.mrf.mxu1 }
 0x598   : > { %14840 = vst [vmem:[#allocation90_spill] sm:$0xff] %v13462_v11 }
 0x599   : > { %v13465_v6 = vpop.f32.mrf.mxu1 }
 0x59a   : > { %14841 = vst [vmem:[#allocation91_spill] sm:$0xff] %v13465_v6 }
 0x59b   : > { %v9470_v25 = vpop.f32.mrf.mxu1  ;;  %9653 = vmatmul.mubr.msk.bf16.gmra.mxu1 %vm4258_vm9, %v6203_v20 }
 0x59c   : > { %v13476_v11 = vadd.f32 %v9470_v25, %v4602_v8  ;;  %9656 = vmatprep.mubr.msk.bf16.mxu1 %vm4258_vm9, %v6205_v28  ;;  %v4618_v28 = vadd.f32 %v13307_v59, %v13042_v32  ;;  %v13493_v25 = vpop.f32.mrf.mxu0  ;;  %v4621_v32 = vadd.f32 %v13317_v10, %v13064_v37  ;;  %v4634_v37 = vadd.f32 %v13323_v47, %v13075_v60 }
 0x59d   : > { %v4913_v6 = vpop.f32.mrf.mxu1  ;;  %14844 = vst [vmem:[#allocation94_spill] sm:$0xff] %v13493_v25  ;;  %v4637_v60 = vadd.f32 %v13333_v58, %v13089_v7 }
 0x59e   : > { %v13483_v61 = vadd.f32 %v4913_v6, %v4594_v39  ;;  %v6207_v39 = vsel %vm649_vm0, %v6204_v45, %v6206_v9  ;;  %v6209_v6 = vsel %vm649_vm0, %v6206_v9, %v6208_v18  ;;  %v13507_v59 = vpop.f32.mrf.mxu0  ;;  %v6210_v45 = vrot.slane %v12769_v40, 4 }
 0x59f   : > { %v9471_v20 = vpop.f32.mrf.mxu1  ;;  %14845 = vst [vmem:[#allocation95_spill] sm:$0xff] %v13507_v59  ;;  %v6212_v9 = vrot.slane %v12795_v46, 4 }
 0x5a0   : > { %v13489_v48 = vadd.f32 %v9471_v20, %v4605_v38 }
 0x5a1   : > { %v4916_v8 = vpop.f32.mrf.mxu1 }
 0x5a2   : > { %v13495_v31 = vadd.f32 %v4916_v8, %v4597_v5 }
 0x5a3   : > { %v9474_v16 = vpop.f32.mrf.mxu1  ;;  %9657 = vmatmul.mubr.msk.bf16.gmra.mxu1 %vm4258_vm9, %v6207_v39  ;;  %v6211_v39 = vsel %vm649_vm0, %v6208_v18, %v6210_v45  ;;  %v6214_v18 = vrot.slane %v12814_v51, 4 }
 0x5a4   : > { %v13502_v55 = vadd.f32 %v9474_v16, %v4618_v28  ;;  %9660 = vmatprep.mubr.msk.bf16.mxu1 %vm4258_vm9, %v6209_v6  ;;  %v13517_v28 = vpop.f32.mrf.mxu0  ;;  %v6213_v6 = vsel %vm649_vm0, %v6210_v45, %v6212_v9  ;;  %v6216_v45 = vrot.slane %v12838_v26, 4 }
 0x5a5   : > { %v4929_v38 = vpop.f32.mrf.mxu1  ;;  %14846 = vst [vmem:[#allocation96_spill] sm:$0xff] %v13517_v28  ;;  %v6215_v58 = vsel %vm649_vm0, %v6212_v9, %v6214_v18 }
 0x5a6   : > { %v13509_v20 = vadd.f32 %v4929_v38, %v4610_v56  ;;  %v13531_v38 = vpop.f32.mrf.mxu0 }
 0x5a7   : > { %v9475_v5 = vpop.f32.mrf.mxu1  ;;  %14847 = vst [vmem:[#allocation97_spill] sm:$0xff] %v13531_v38 }
 0x5a8   : > { %v13515_v27 = vadd.f32 %v9475_v5, %v4621_v32 }
 0x5a9   : > { %v4932_v8 = vpop.f32.mrf.mxu1 }
 0x5aa   : > { %v13521_v10 = vadd.f32 %v4932_v8, %v4613_v1  ;;  %v13543_v1 = vpop.f32.mrf.mxu0  ;;  %v4650_v8 = vadd.f32 %v13339_v0, %v13102_v33  ;;  %v4653_v0 = vadd.f32 %v13349_v13, %v13116_v14 }
 0x5ab   : > { %v9478_v16 = vpop.f32.mrf.mxu1  ;;  %9661 = vmatmul.mubr.msk.bf16.gmra.mxu1 %vm4258_vm9, %v6211_v39  ;;  %14848 = vst [vmem:[#allocation98_spill] sm:$0xff] %v13543_v1  ;;  %v6217_v39 = vsel %vm649_vm0, %v6214_v18, %v6216_v45 }
 0x5ac   : > { %v13528_v17 = vadd.f32 %v9478_v16, %v4634_v37  ;;  %9664 = vmatprep.mubr.msk.bf16.mxu1 %vm4258_vm9, %v6213_v6  ;;  %v13557_v6 = vpop.f32.mrf.mxu0 }
 0x5ad   : > { %v4945_v56 = vpop.f32.mrf.mxu1  ;;  %14849 = vst [vmem:[#allocation99_spill] sm:$0xff] %v13557_v6 }
 0x5ae   : > { %v13535_v47 = vadd.f32 %v4945_v56, %v4626_v53  ;;  %v4645_v53 = vadd.f32 %v13353_v41, %v13124_v23  ;;  %v13567_v15 = vpop.f32.mrf.mxu0 }
 0x5af   : > { %v9479_v32 = vpop.f32.mrf.mxu1  ;;  %14850 = vst [vmem:[#allocation100_spill] sm:$0xff] %v13567_v15  ;;  %v14871_v15 = vld [vmem:[#allocation74_spill] sm:$0xff] }
 0x5b0   : > { %v13541_v57 = vadd.f32 %v9479_v32, %v4637_v60  ;;  %v14851_v32 = vld [vmem:[#allocation45_spill] sm:$0xff] }
 0x5b1   : > { %v4948_v5 = vpop.f32.mrf.mxu1 }
 0x5b2   : > { %v13547_v37 = vadd.f32 %v4948_v5, %v4629_v50  ;;  %v14852_v50 = vrot.slane %v14851_v32, 4  ;;  %v14853_v5 = vld [vmem:[#allocation32_spill] sm:$0xff] }
 0x5b3   : > { %v9482_v7 = vpop.f32.mrf.mxu1  ;;  %9665 = vmatmul.mubr.msk.bf16.gmra.mxu1 %vm4258_vm9, %v6215_v58  ;;  %v4658_v23 = vadd.f32 %v13363_v63, %v14853_v5  ;;  %v14863_v5 = vld [vmem:[#allocation72_spill] sm:$0xff] }
 0x5b4   : > { %v13554_v30 = vadd.f32 %v9482_v7, %v4650_v8  ;;  %9668 = vmatprep.mubr.msk.bf16.mxu1 %vm4258_vm9, %v6217_v39  ;;  %v6219_v14 = vsel %vm649_vm0, %v6216_v45, %v14852_v50  ;;  %v14854_v8 = vld [vmem:[#allocation23_spill] sm:$0xff]  ;;  %v13583_v7 = vpop.f32.mrf.mxu0 }
 0x5b5   : > { %v4961_v16 = vpop.f32.mrf.mxu1  ;;  %14855 = vst [vmem:[#allocation45_spill] sm:$0xff] %v13583_v7 }
 0x5b6   : > { %v13561_v33 = vadd.f32 %v4961_v16, %v4642_v36  ;;  %v14857_v36 = vld [vmem:[#allocation37_spill] sm:$0xff] }
 0x5b7   : > { %v9483_v9 = vpop.f32.mrf.mxu1  ;;  %v6911_v16 = vrot.slane %v14857_v36, 5 }
 0x5b8   : > { %v13565_v56 = vadd.f32 %v9483_v9, %v4653_v0  ;;  %v14858_v0 = vld [vmem:[#allocation29_spill] sm:$0xff]  ;;  %v14859_v9 = vld [vmem:[#allocation70_spill] sm:$0xff] }
 0x5b9   : > { %v4964_v60 = vpop.f32.mrf.mxu1 }
 0x5ba   : > { %v13571_v18 = vadd.f32 %v4964_v60, %v4645_v53  ;;  %v4661_v53 = vadd.f32 %v14859_v9, %v14858_v0  ;;  %v14867_v9 = vld [vmem:[#allocation2_spill] sm:$0xff] }
 0x5bb   : > { %v9486_v13 = vpop.f32.mrf.mxu1  ;;  %9669 = vmatmul.mubr.msk.bf16.gmra.mxu1 %vm4258_vm9, %v6219_v14  ;;  %v13595_v14 = vpop.f32.mrf.mxu0 }
 0x5bc   : > { %v13579_v41 = vadd.f32 %v9486_v13, %v4666_v34  ;;  %9672 = vmatprep.mubr.msk.bf16.mxu1 %vm4258_vm9, %v14854_v8  ;;  %v14860_v34 = vld [vmem:[#allocation12_spill] sm:$0xff]  ;;  %14861 = vst [vmem:[#allocation32_spill] sm:$0xff] %v13595_v14  ;;  %v14862_v13 = vld [vmem:[#allocation7_spill] sm:$0xff] }
 0x5bd   : > { %v4977_v58 = vpop.f32.mrf.mxu1  ;;  %v6910_v50 = vrot.slane %v14860_v34, 5  ;;  %v4682_v8 = vadd.f32 %v14863_v5, %v14862_v13  ;;  %v13609_v0 = vpop.f32.mrf.mxu0  ;;  %v14868_v34 = vld [vmem:[#allocation14_spill] sm:$0xff]  ;;  %v14870_v14 = vld [vmem:[#allocation11_spill] sm:$0xff] }
 0x5be   : > { %v13587_v39 = vadd.f32 %v4977_v58, %v4658_v23  ;;  %v14864_v23 = vld [vmem:[#allocation4_spill] sm:$0xff]  ;;  %14866 = vst [vmem:[#allocation23_spill] sm:$0xff] %v13609_v0  ;;  %v6913_v13 = vrot.slane %v14868_v34, 5 }
 0x5bf   : > { %v9487_v45 = vpop.f32.mrf.mxu1  ;;  %v6912_v58 = vsel %vm6909_vm11, %v6910_v50, %v6911_v16  ;;  %v14874_v0 = vld [vmem:[#allocation76_spill] sm:$0xff] }
 0x5c0   : > { %v13592_v63 = vadd.f32 %v9487_v45, %v4669_v43  ;;  %v4674_v43 = vadd.f32 %v13381_v3, %v14865_v49  ;;  %v4677_v3 = vadd.f32 %v14871_v15, %v14870_v14  ;;  %v14873_v49 = vld [vmem:[#allocation30_spill] sm:$0xff] }
 0x5c1   : > { %v4980_v60 = vpop.f32.mrf.mxu1  ;;  %v4698_v6 = vadd.f32 %v14874_v0, %v14873_v49  ;;  %v14877_v0 = vld [vmem:[#allocation50_spill] sm:$0xff] }
 0x5c2   : > { %v13599_v7 = vadd.f32 %v4980_v60, %v4661_v53  ;;  %v4685_v53 = vadd.f32 %v13386_v12, %v14867_v9  ;;  %v6914_v12 = vsel %vm6909_vm11, %v6911_v16, %v6913_v13  ;;  %v14875_v9 = vld [vmem:[#allocation38_spill] sm:$0xff]  ;;  %v14878_v16 = vld [vmem:[#allocation43_spill] sm:$0xff] }
 0x5c3   : > { %v9490_v19 = vpop.f32.mrf.mxu1  ;;  %9673 = vmatmul.mubr.msk.bf16.gmra.mxu1 %vm4258_vm9, %v14864_v23  ;;  %v14869_v23 = vld [vmem:[#allocation15_spill] sm:$0xff]  ;;  %v4690_v15 = vadd.f32 %v13403_v2, %v14875_v9  ;;  %v14879_v49 = vld [vmem:[#allocation18_spill] sm:$0xff]  ;;  %v14883_v9 = vld [vmem:[#allocation53_spill] sm:$0xff] }
 0x5c4   : > { %v13606_v45 = vadd.f32 %v9490_v19, %v4682_v8  ;;  %9720 = vmatprep.mubr.msk.bf16.mxu1 %vm4258_vm9, %v6912_v58  ;;  %v6915_v50 = vrot.slane %v14869_v23, 5  ;;  %v13621_v58 = vpop.f32.mrf.mxu0 }
 0x5c5   : > { %v4993_v36 = vpop.f32.mrf.mxu1  ;;  %14872 = vst [vmem:[#allocation6_spill] sm:$0xff] %v13621_v58  ;;  %v14881_v58 = vld [vmem:[#allocation79_spill] sm:$0xff] }
 0x5c6   : > { %v13613_v60 = vadd.f32 %v4993_v36, %v4674_v43  ;;  %v6916_v36 = vsel %vm6909_vm11, %v6913_v13, %v6915_v50  ;;  %v13635_v34 = vpop.f32.mrf.mxu0  ;;  %v6919_v13 = vrot.slane %v14879_v49, 5 }
 0x5c7   : > { %v9491_v5 = vpop.f32.mrf.mxu1  ;;  %14876 = vst [vmem:[#allocation37_spill] sm:$0xff] %v13635_v34  ;;  %v14884_v34 = vld [vmem:[#allocation80_spill] sm:$0xff] }
 0x5c8   : > { %v13619_v8 = vadd.f32 %v9491_v5, %v4685_v53  ;;  %v4701_v5 = vadd.f32 %v13406_v29, %v14877_v0  ;;  %v4714_v38 = vadd.f32 %v14884_v34, %v14883_v9  ;;  %v14885_v0 = vld [vmem:[#allocation55_spill] sm:$0xff]  ;;  %v14887_v34 = vld [vmem:[#allocation16_spill] sm:$0xff] }
 0x5c9   : > { %v4996_v19 = vpop.f32.mrf.mxu1  ;;  %v4717_v49 = vadd.f32 %v13424_v24, %v14887_v34  ;;  %v14889_v9 = vld [vmem:[#allocation47_spill] sm:$0xff] }
 0x5ca   : > { %v13625_v1 = vadd.f32 %v4996_v19, %v4677_v3  ;;  %v6917_v3 = vrot.slane %v14878_v16, 5  ;;  %v14895_v34 = vld [vmem:[#allocation59_spill] sm:$0xff] }
 0x5cb   : > { %v9494_v43 = vpop.f32.mrf.mxu1  ;;  %9721 = vmatmul.mubr.msk.bf16.vlgmr.msra.gmra.mxu1 %vm4258_vm9, %v6914_v12  ;;  %v14880_v12 = vld [vmem:[#allocation13_spill] sm:$0xff] }
 0x5cc   : > { %v13632_v14 = vadd.f32 %v9494_v43, %v4698_v6  ;;  %9724 = vmatprep.mubr.msk.bf16.mxu1 %vm4258_vm9, %v6916_v36  ;;  %v4693_v2 = vadd.f32 %v14881_v58, %v14880_v12  ;;  %v13647_v36 = vpop.f32.mrf.mxu0  ;;  %v6918_v29 = vsel %vm6909_vm11, %v6915_v50, %v6917_v3  ;;  %v4706_v58 = vadd.f32 %v13421_v54, %v14885_v0  ;;  %v14888_v50 = vld [vmem:[#allocation46_spill] sm:$0xff]  ;;  %v14893_v0 = vld [vmem:[#allocation25_spill] sm:$0xff] }
 0x5cd   : > { %v5009_v53 = vpop.f32.mrf.mxu1  ;;  %14882 = vst [vmem:[#allocation29_spill] sm:$0xff] %v13647_v36  ;;  %v14891_v36 = vld [vmem:[#allocation83_spill] sm:$0xff] }
 0x5ce   : > { %v13639_v23 = vadd.f32 %v5009_v53, %v4690_v15  ;;  %v6920_v53 = vsel %vm6909_vm11, %v6917_v3, %v6919_v13  ;;  %v6923_v3 = vrot.slane %v14889_v9, 5 }
 0x5cf   : > { %v9495_v19 = vpop.f32.mrf.mxu1 }
 0x5d0   : > { %v13645_v6 = vadd.f32 %v9495_v19, %v4701_v5  ;;  %v13661_v19 = vpop.f32.mrf.mxu0 }
 0x5d1   : > { %v5012_v43 = vpop.f32.mrf.mxu1  ;;  %14886 = vst [vmem:[#allocation70_spill] sm:$0xff] %v13661_v19  ;;  %v14894_v19 = vld [vmem:[#allocation85_spill] sm:$0xff] }
 0x5d2   : > { %v13651_v28 = vadd.f32 %v5012_v43, %v4693_v2  ;;  %v6921_v2 = vrot.slane %v14888_v50, 5  ;;  %v4730_v59 = vadd.f32 %v14894_v19, %v14893_v0  ;;  %v14897_v19 = vld [vmem:[#allocation20_spill] sm:$0xff] }
 0x5d3   : > { %v9498_v15 = vpop.f32.mrf.mxu1  ;;  %9725 = vmatmul.mubr.msk.bf16.gmra.mxu1 %vm4258_vm9, %v6918_v29  ;;  %v14890_v29 = vld [vmem:[#allocation57_spill] sm:$0xff]  ;;  %v4733_v9 = vadd.f32 %v13444_v4, %v14897_v19  ;;  %v14899_v0 = vld [vmem:[#allocation24_spill] sm:$0xff]  ;;  %v14904_v19 = vld [vmem:[#allocation27_spill] sm:$0xff] }
 0x5d4   : > { %v13658_v5 = vadd.f32 %v9498_v15, %v4714_v38  ;;  %9728 = vmatprep.mubr.msk.bf16.mxu1 %vm4258_vm9, %v6920_v53  ;;  %v4709_v54 = vadd.f32 %v14891_v36, %v14890_v29  ;;  %v13673_v53 = vpop.f32.mrf.mxu0  ;;  %v6922_v24 = vsel %vm6909_vm11, %v6919_v13, %v6921_v2  ;;  %v4722_v36 = vadd.f32 %v13439_v22, %v14895_v34  ;;  %v14898_v13 = vld [vmem:[#allocation22_spill] sm:$0xff]  ;;  %v14903_v34 = vld [vmem:[#allocation63_spill] sm:$0xff] }
 0x5d5   : > { %v5025_v16 = vpop.f32.mrf.mxu1  ;;  %14892 = vst [vmem:[#allocation12_spill] sm:$0xff] %v13673_v53  ;;  %v14901_v53 = vld [vmem:[#allocation87_spill] sm:$0xff] }
 0x5d6   : > { %v13665_v12 = vadd.f32 %v5025_v16, %v4706_v58  ;;  %v6924_v16 = vsel %vm6909_vm11, %v6921_v2, %v6923_v3  ;;  %v6927_v2 = vrot.slane %v14899_v0, 5  ;;  %v14907_v0 = vld [vmem:[#allocation90_spill] sm:$0xff] }
 0x5d7   : > { %v9499_v43 = vpop.f32.mrf.mxu1 }
 0x5d8   : > { %v13671_v38 = vadd.f32 %v9499_v43, %v4717_v49  ;;  %v13687_v43 = vpop.f32.mrf.mxu0 }
 0x5d9   : > { %v5028_v15 = vpop.f32.mrf.mxu1  ;;  %14896 = vst [vmem:[#allocation7_spill] sm:$0xff] %v13687_v43  ;;  %v4746_v43 = vadd.f32 %v13452_v21, %v14903_v34  ;;  %v14906_v21 = vld [vmem:[#allocation64_spill] sm:$0xff] }
 0x5da   : > { %v13677_v25 = vadd.f32 %v5028_v15, %v4709_v54  ;;  %v6925_v54 = vrot.slane %v14898_v13, 5 }
 0x5db   : > { %v9502_v58 = vpop.f32.mrf.mxu1  ;;  %9729 = vmatmul.mubr.msk.bf16.gmra.mxu1 %vm4258_vm9, %v6922_v24  ;;  %v14900_v24 = vld [vmem:[#allocation61_spill] sm:$0xff] }
 0x5dc   : > { %v13684_v49 = vadd.f32 %v9502_v58, %v4730_v59  ;;  %9732 = vmatprep.mubr.msk.bf16.mxu1 %vm4258_vm9, %v6924_v16  ;;  %v4725_v22 = vadd.f32 %v14901_v53, %v14900_v24  ;;  %v13699_v16 = vpop.f32.mrf.mxu0  ;;  %v6926_v4 = vsel %vm6909_vm11, %v6923_v3, %v6925_v54  ;;  %v4738_v53 = vadd.f32 %v13457_v44, %v14904_v19  ;;  %v14908_v3 = vld [vmem:[#allocation28_spill] sm:$0xff] }
 0x5dd   : > { %v5041_v50 = vpop.f32.mrf.mxu1  ;;  %14902 = vst [vmem:[#allocation72_spill] sm:$0xff] %v13699_v16  ;;  %v4749_v24 = vadd.f32 %v14907_v0, %v14906_v21  ;;  %v14910_v16 = vld [vmem:[#allocation91_spill] sm:$0xff] }
 0x5de   : > { %v13691_v29 = vadd.f32 %v5041_v50, %v4722_v36  ;;  %v6928_v50 = vsel %vm6909_vm11, %v6925_v54, %v6927_v2  ;;  %v6931_v54 = vrot.slane %v12712_v62, 5 }
 0x5df   : > { %v9503_v15 = vpop.f32.mrf.mxu1 }
 0x5e0   : > { %v13697_v59 = vadd.f32 %v9503_v15, %v4733_v9  ;;  %v13713_v15 = vpop.f32.mrf.mxu0 }
 0x5e1   : > { %v5044_v58 = vpop.f32.mrf.mxu1  ;;  %14905 = vst [vmem:[#allocation4_spill] sm:$0xff] %v13713_v15  ;;  %v14911_v15 = vld [vmem:[#allocation8_spill] sm:$0xff] }
 0x5e2   : > { %v13703_v52 = vadd.f32 %v5044_v58, %v4725_v22  ;;  %v6929_v58 = vrot.slane %v14908_v3, 5  ;;  %v5414_v21 = vadd.f32 %v14911_v15, %v13476_v11  ;;  %v14913_v11 = vld [vmem:[#allocation34_spill] sm:$0xff]  ;;  %v6933_v15 = vrot.slane %v12731_v42, 5 }
 0x5e3   : > { %v9506_v36 = vpop.f32.mrf.mxu1  ;;  %9733 = vmatmul.mubr.msk.bf16.gmra.mxu1 %vm4258_vm9, %v6926_v4  ;;  %v14909_v4 = vld [vmem:[#allocation66_spill] sm:$0xff] }
 0x5e4   : > { %v13710_v9 = vadd.f32 %v9506_v36, %v4746_v43  ;;  %9736 = vmatprep.mubr.msk.bf16.mxu1 %vm4258_vm9, %v6928_v50  ;;  %v4741_v44 = vadd.f32 %v14910_v16, %v14909_v4  ;;  %v13725_v50 = vpop.f32.mrf.mxu0  ;;  %v6932_v62 = vsel %vm6909_vm11, %v6929_v58, %v6931_v54  ;;  %v14912_v16 = vld [vmem:[#allocation10_spill] sm:$0xff] }
 0x5e5   : > { %v5057_v13 = vpop.f32.mrf.mxu1 }
 0x5e6   : > { %v13717_v22 = vadd.f32 %v5057_v13, %v4738_v53  ;;  %v6930_v53 = vsel %vm6909_vm11, %v6927_v2, %v6929_v58  ;;  %v5415_v2 = vadd.f32 %v14913_v11, %v13489_v48  ;;  %v6935_v58 = vrot.slane %v12750_v35, 5 }
 0x5e7   : > { %v9507_v34 = vpop.f32.mrf.mxu1  ;;  %v6934_v48 = vsel %vm6909_vm11, %v6931_v54, %v6933_v15 }
 0x5e8   : > { %v13723_v43 = vadd.f32 %v9507_v34, %v4749_v24  ;;  %v5412_v24 = vadd.f32 %v14912_v16, %v13483_v61  ;;  %v13739_v34 = vpop.f32.mrf.mxu0  ;;  %v14915_v16 = vld [vmem:[#allocation33_spill] sm:$0xff]  ;;  %v6936_v42 = vsel %vm6909_vm11, %v6933_v15, %v6935_v58  ;;  %v6939_v15 = vrot.slane %v12795_v46, 5 }
 0x5e9   : > { %v5060_v36 = vpop.f32.mrf.mxu1 }
 0x5ea   : > { %v13727_v19 = vadd.f32 %v5060_v36, %v4741_v44  ;;  %v13751_v61 = vpop.f32.mrf.mxu0 }
 0x5eb   : > { %v9554_v13 = vpop.f32.mrf.mxu1  ;;  %9737 = vmatmul.mubr.msk.bf16.gmra.mxu1 %vm4258_vm9, %v6930_v53 }
 0x5ec   : > { %v13734_v0 = vadd.f32 %v9554_v13, %v5414_v21  ;;  %9740 = vmatprep.mubr.msk.bf16.mxu1 %vm4258_vm9, %v6932_v62  ;;  %v14914_v21 = vld [vmem:[#allocation26_spill] sm:$0xff] }
 0x5ed   : > { %v5641_v3 = vpop.f32.mrf.mxu1  ;;  %v5413_v53 = vadd.f32 %v14914_v21, %v13495_v31  ;;  %v14916_v31 = vld [vmem:[#allocation49_spill] sm:$0xff] }
 0x5ee   : > { %v13741_v4 = vadd.f32 %v5641_v3, %v5412_v24  ;;  %v5418_v24 = vadd.f32 %v14915_v16, %v13502_v55  ;;  %v5416_v11 = vadd.f32 %v14916_v31, %v13509_v20  ;;  %v14917_v55 = vld [vmem:[#allocation51_spill] sm:$0xff]  ;;  %v14919_v31 = vld [vmem:[#allocation54_spill] sm:$0xff] }
 0x5ef   : > { %v9555_v44 = vpop.f32.mrf.mxu1  ;;  %v5419_v54 = vadd.f32 %v14917_v55, %v13515_v27 }
 0x5f0   : > { %v13747_v36 = vadd.f32 %v9555_v44, %v5415_v2  ;;  %v13765_v44 = vpop.f32.mrf.mxu0 }
 0x5f1   : > { %v5644_v13 = vpop.f32.mrf.mxu1 }
 0x5f2   : > { %v13753_v62 = vadd.f32 %v5644_v13, %v5413_v53  ;;  %v6937_v53 = vrot.slane %v12769_v40, 5  ;;  %v13777_v20 = vpop.f32.mrf.mxu0 }
 0x5f3   : > { %v9558_v3 = vpop.f32.mrf.mxu1  ;;  %9741 = vmatmul.mubr.msk.bf16.gmra.mxu1 %vm4258_vm9, %v6934_v48 }
 0x5f4   : > { %v13760_v35 = vadd.f32 %v9558_v3, %v5418_v24  ;;  %9744 = vmatprep.mubr.msk.bf16.mxu1 %vm4258_vm9, %v6936_v42  ;;  %v14918_v24 = vld [vmem:[#allocation52_spill] sm:$0xff]  ;;  %v6938_v27 = vsel %vm6909_vm11, %v6935_v58, %v6937_v53  ;;  %v6940_v46 = vsel %vm6909_vm11, %v6937_v53, %v6939_v15  ;;  %v6943_v53 = vrot.slane %v12838_v26, 5 }
 0x5f5   : > { %v5657_v2 = vpop.f32.mrf.mxu1  ;;  %v5417_v48 = vadd.f32 %v14918_v24, %v13521_v10  ;;  %v14920_v10 = vld [vmem:[#allocation40_spill] sm:$0xff] }
 0x5f6   : > { %v13767_v21 = vadd.f32 %v5657_v2, %v5416_v11  ;;  %v5422_v11 = vadd.f32 %v14919_v31, %v13528_v17  ;;  %v5420_v55 = vadd.f32 %v14920_v10, %v13535_v47  ;;  %v14921_v17 = vld [vmem:[#allocation56_spill] sm:$0xff]  ;;  %v14923_v10 = vld [vmem:[#allocation58_spill] sm:$0xff] }
 0x5f7   : > { %v9559_v13 = vpop.f32.mrf.mxu1  ;;  %v5423_v58 = vadd.f32 %v14921_v17, %v13541_v57 }
 0x5f8   : > { %v13773_v16 = vadd.f32 %v9559_v13, %v5419_v54  ;;  %v13791_v13 = vpop.f32.mrf.mxu0 }
 0x5f9   : > { %v5660_v3 = vpop.f32.mrf.mxu1 }
 0x5fa   : > { %v13779_v42 = vadd.f32 %v5660_v3, %v5417_v48  ;;  %v6941_v48 = vrot.slane %v12814_v51, 5  ;;  %v13803_v47 = vpop.f32.mrf.mxu0 }
 0x5fb   : > { %v9562_v2 = vpop.f32.mrf.mxu1  ;;  %9745 = vmatmul.mubr.msk.bf16.gmra.mxu1 %vm4258_vm9, %v6938_v27 }
 0x5fc   : > { %v13786_v40 = vadd.f32 %v9562_v2, %v5422_v11  ;;  %9748 = vmatprep.mubr.msk.bf16.mxu1 %vm4258_vm9, %v6940_v46  ;;  %v14922_v11 = vld [vmem:[#allocation17_spill] sm:$0xff]  ;;  %v6942_v57 = vsel %vm6909_vm11, %v6939_v15, %v6941_v48  ;;  %v6944_v51 = vsel %vm6909_vm11, %v6941_v48, %v6943_v53  ;;  %v14926_v48 = vld [vmem:[#allocation62_spill] sm:$0xff] }
 0x5fd   : > { %v5673_v54 = vpop.f32.mrf.mxu1  ;;  %v5421_v27 = vadd.f32 %v14922_v11, %v13547_v37  ;;  %v14924_v37 = vld [vmem:[#allocation60_spill] sm:$0xff] }
 0x5fe   : > { %v13793_v24 = vadd.f32 %v5673_v54, %v5420_v55  ;;  %v5426_v55 = vadd.f32 %v14923_v10, %v13554_v30  ;;  %v5424_v17 = vadd.f32 %v14924_v37, %v13561_v33  ;;  %v14925_v30 = vld [vmem:[#allocation21_spill] sm:$0xff]  ;;  %v5425_v10 = vadd.f32 %v14926_v48, %v13571_v18  ;;  %v14927_v33 = vld [vmem:[#allocation48_spill] sm:$0xff] }
 0x5ff   : > { %v9563_v3 = vpop.f32.mrf.mxu1  ;;  %v5427_v15 = vadd.f32 %v14925_v30, %v13565_v56  ;;  %v14928_v37 = vrot.slane %v14851_v32, 5  ;;  %v14929_v30 = vld [vmem:[#allocation3_spill] sm:$0xff]  ;;  %v14930_v18 = vld [vmem:[#allocation65_spill] sm:$0xff] }
 0x600   : > { %v13799_v31 = vadd.f32 %v9563_v3, %v5423_v58  ;;  %v13817_v3 = vpop.f32.mrf.mxu0  ;;  %v14931_v32 = vld [vmem:[#allocation19_spill] sm:$0xff] }
 0x601   : > { %v5676_v2 = vpop.f32.mrf.mxu1 }
 0x602   : > { %v13805_v46 = vadd.f32 %v5676_v2, %v5421_v27 }
 0x603   : > { %v9566_v54 = vpop.f32.mrf.mxu1  ;;  %9749 = vmatmul.mubr.msk.bf16.gmra.mxu1 %vm4258_vm9, %v6942_v57  ;;  %v13827_v57 = vpop.f32.mrf.mxu0 }
 0x604   : > { %v13812_v26 = vadd.f32 %v9566_v54, %v5426_v55  ;;  %9752 = vmatprep.mubr.msk.bf16.mxu1 %vm4258_vm9, %v6944_v51  ;;  %v5430_v51 = vadd.f32 %v14927_v33, %v13579_v41  ;;  %v5431_v41 = vadd.f32 %v14931_v32, %v13592_v63  ;;  %v14932_v33 = vld [vmem:[#allocation31_spill] sm:$0xff] }
 0x605   : > { %v5689_v58 = vpop.f32.mrf.mxu1  ;;  %v13843_v48 = vpop.f32.mrf.mxu0  ;;  %v14936_v63 = vld [vmem:[#allocation35_spill] sm:$0xff] }
 0x606   : > { %v13819_v11 = vadd.f32 %v5689_v58, %v5424_v17  ;;  %v6946_v17 = vsel %vm6909_vm11, %v6943_v53, %v14928_v37  ;;  %v5432_v32 = vadd.f32 %v14936_v63, %v13613_v60  ;;  %v14941_v60 = vld [vmem:[#allocation41_spill] sm:$0xff] }
 0x607   : > { %v9567_v27 = vpop.f32.mrf.mxu1  ;;  %v5438_v63 = vadd.f32 %v14941_v60, %v13632_v14 }
 0x608   : > { %v13823_v2 = vadd.f32 %v9567_v27, %v5427_v15  ;;  %v5428_v15 = vadd.f32 %v14930_v18, %v13587_v39  ;;  %v14934_v39 = vld [vmem:[#allocation67_spill] sm:$0xff] }
 0x609   : > { %v5692_v55 = vpop.f32.mrf.mxu1 }
 0x60a   : > { %v13829_v54 = vadd.f32 %v5692_v55, %v5425_v10 }
 0x60b   : > { %v9570_v58 = vpop.f32.mrf.mxu1  ;;  %9753 = vmatmul.mubr.msk.bf16.gmra.mxu1 %vm4258_vm9, %v6946_v17  ;;  %v13853_v17 = vpop.f32.mrf.mxu0 }
 0x60c   : > { %v13837_v56 = vadd.f32 %v9570_v58, %v5430_v51  ;;  %9756 = vmatprep.mubr.msk.bf16.mxu1 %vm4258_vm9, %v14929_v30  ;;  %v5429_v51 = vadd.f32 %v14932_v33, %v13599_v7  ;;  %14933 = vst [vmem:[#allocation9_spill] sm:$0xff] %v13853_v17  ;;  %v5434_v30 = vadd.f32 %v14934_v39, %v13606_v45  ;;  %v14938_v33 = vld [vmem:[#allocation36_spill] sm:$0xff]  ;;  %v14939_v45 = vld [vmem:[#allocation39_spill] sm:$0xff] }
 0x60d   : > { %v5705_v27 = vpop.f32.mrf.mxu1  ;;  %v5433_v39 = vadd.f32 %v14939_v45, %v13625_v1  ;;  %v14944_v1 = vld [vmem:[#allocation44_spill] sm:$0xff] }
 0x60e   : > { %v13845_v10 = vadd.f32 %v5705_v27, %v5428_v15  ;;  %v14935_v15 = vld [vmem:[#allocation5_spill] sm:$0xff]  ;;  %v5439_v45 = vadd.f32 %v14944_v1, %v13645_v6 }
 0x60f   : > { %v9571_v53 = vpop.f32.mrf.mxu1 }
 0x610   : > { %v13849_v55 = vadd.f32 %v9571_v53, %v5431_v41  ;;  %v13865_v53 = vpop.f32.mrf.mxu0 }
 0x611   : > { %v5708_v37 = vpop.f32.mrf.mxu1  ;;  %14937 = vst [vmem:[#allocation2_spill] sm:$0xff] %v13865_v53 }
 0x612   : > { %v13855_v58 = vadd.f32 %v5708_v37, %v5429_v51  ;;  %v5435_v51 = vadd.f32 %v14938_v33, %v13619_v8 }
 0x613   : > { %v9574_v18 = vpop.f32.mrf.mxu1  ;;  %9757 = vmatmul.mubr.msk.bf16.gmra.mxu1 %vm4258_vm9, %v14935_v15 }
 0x614   : > { %v13861_v27 = vadd.f32 %v9574_v18, %v5434_v30  ;;  %v13875_v30 = vpop.f32.mrf.mxu0 }
 0x615   : > { %v5721_v41 = vpop.f32.mrf.mxu1  ;;  %14940 = vst [vmem:[#allocation14_spill] sm:$0xff] %v13875_v30 }
 0x616   : > { %v13867_v7 = vadd.f32 %v5721_v41, %v5432_v32  ;;  %v14942_v41 = vld [vmem:[#allocation42_spill] sm:$0xff] }
 0x617   : > { %v9575_v37 = vpop.f32.mrf.mxu1  ;;  %v5436_v8 = vadd.f32 %v14942_v41, %v13639_v23  ;;  %v14947_v23 = vld [vmem:[#allocation69_spill] sm:$0xff] }
 0x618   : > { %v13871_v17 = vadd.f32 %v9575_v37, %v5435_v51  ;;  %v13885_v51 = vpop.f32.mrf.mxu0  ;;  %v5442_v41 = vadd.f32 %v14947_v23, %v13658_v5 }
 0x619   : > { %v5724_v15 = vpop.f32.mrf.mxu1  ;;  %14943 = vst [vmem:[#allocation15_spill] sm:$0xff] %v13885_v51 }
 0x61a   : > { %v13877_v18 = vadd.f32 %v5724_v15, %v5433_v39  ;;  %v14945_v15 = vld [vmem:[#allocation68_spill] sm:$0xff] }
 0x61b   : > { %v9578_v53 = vpop.f32.mrf.mxu1  ;;  %v5437_v14 = vadd.f32 %v14945_v15, %v13651_v28  ;;  %v14950_v28 = vld [vmem:[#allocation73_spill] sm:$0xff] }
 0x61c   : > { %v13881_v32 = vadd.f32 %v9578_v53, %v5438_v63  ;;  %v13895_v53 = vpop.f32.mrf.mxu0  ;;  %v5443_v15 = vadd.f32 %v14950_v28, %v13671_v38 }
 0x61d   : > { %v5737_v33 = vpop.f32.mrf.mxu1  ;;  %14946 = vst [vmem:[#allocation11_spill] sm:$0xff] %v13895_v53 }
 0x61e   : > { %v13887_v37 = vadd.f32 %v5737_v33, %v5436_v8  ;;  %v14948_v33 = vld [vmem:[#allocation71_spill] sm:$0xff] }
 0x61f   : > { %v9579_v30 = vpop.f32.mrf.mxu1  ;;  %v5440_v6 = vadd.f32 %v14948_v33, %v13665_v12  ;;  %v14953_v12 = vld [vmem:[#allocation77_spill] sm:$0xff] }
 0x620   : > { %v13891_v39 = vadd.f32 %v9579_v30, %v5439_v45  ;;  %v13905_v30 = vpop.f32.mrf.mxu0  ;;  %v5446_v33 = vadd.f32 %v14953_v12, %v13684_v49 }
 0x621   : > { %v5740_v60 = vpop.f32.mrf.mxu1  ;;  %14949 = vst [vmem:[#allocation74_spill] sm:$0xff] %v13905_v30 }
 0x622   : > { %v13897_v63 = vadd.f32 %v5740_v60, %v5437_v14  ;;  %v14951_v60 = vld [vmem:[#allocation75_spill] sm:$0xff] }
 0x623   : > { %v9582_v51 = vpop.f32.mrf.mxu1  ;;  %v5441_v5 = vadd.f32 %v14951_v60, %v13677_v25  ;;  %v14956_v25 = vld [vmem:[#allocation81_spill] sm:$0xff] }
 0x624   : > { %v13901_v8 = vadd.f32 %v9582_v51, %v5442_v41  ;;  %v13915_v51 = vpop.f32.mrf.mxu0  ;;  %v5447_v60 = vadd.f32 %v14956_v25, %v13697_v59 }
 0x625   : > { %v5753_v1 = vpop.f32.mrf.mxu1  ;;  %14952 = vst [vmem:[#allocation30_spill] sm:$0xff] %v13915_v51 }
 0x626   : > { %v13907_v45 = vadd.f32 %v5753_v1, %v5440_v6  ;;  %v14954_v1 = vld [vmem:[#allocation78_spill] sm:$0xff] }
 0x627   : > { %v9583_v53 = vpop.f32.mrf.mxu1  ;;  %v5444_v38 = vadd.f32 %v14954_v1, %v13691_v29  ;;  %v14959_v29 = vld [vmem:[#allocation84_spill] sm:$0xff] }
 0x628   : > { %v13911_v14 = vadd.f32 %v9583_v53, %v5443_v15  ;;  %v13925_v53 = vpop.f32.mrf.mxu0  ;;  %v5450_v1 = vadd.f32 %v14959_v29, %v13710_v9 }
 0x629   : > { %v5756_v23 = vpop.f32.mrf.mxu1  ;;  %14955 = vst [vmem:[#allocation76_spill] sm:$0xff] %v13925_v53 }
 0x62a   : > { %v13917_v41 = vadd.f32 %v5756_v23, %v5441_v5  ;;  %v14957_v23 = vld [vmem:[#allocation82_spill] sm:$0xff] }
 0x62b   : > { %v9586_v30 = vpop.f32.mrf.mxu1  ;;  %v5445_v49 = vadd.f32 %v14957_v23, %v13703_v52  ;;  %v14962_v52 = vld [vmem:[#allocation88_spill] sm:$0xff] }
 0x62c   : > { %v13921_v6 = vadd.f32 %v9586_v30, %v5446_v33  ;;  %v13935_v30 = vpop.f32.mrf.mxu0  ;;  %v5451_v23 = vadd.f32 %v14962_v52, %v13723_v43 }
 0x62d   : > { %v5769_v28 = vpop.f32.mrf.mxu1  ;;  %14958 = vst [vmem:[#allocation38_spill] sm:$0xff] %v13935_v30 }
 0x62e   : > { %v13927_v15 = vadd.f32 %v5769_v28, %v5444_v38  ;;  %v14960_v28 = vld [vmem:[#allocation86_spill] sm:$0xff] }
 0x62f   : > { %v9587_v51 = vpop.f32.mrf.mxu1  ;;  %v5448_v59 = vadd.f32 %v14960_v28, %v13717_v22  ;;  %v14965_v22 = vld [vmem:[#allocation92_spill] sm:$0xff] }
 0x630   : > { %v13931_v5 = vadd.f32 %v9587_v51, %v5447_v60  ;;  %v13945_v51 = vpop.f32.mrf.mxu0  ;;  %v6141_v28 = vadd.f32 %v14965_v22, %v13734_v0 }
 0x631   : > { %v5772_v12 = vpop.f32.mrf.mxu1  ;;  %14961 = vst [vmem:[#allocation50_spill] sm:$0xff] %v13945_v51 }
 0x632   : > { %v13937_v33 = vadd.f32 %v5772_v12, %v5445_v49  ;;  %v14963_v12 = vld [vmem:[#allocation89_spill] sm:$0xff] }
 0x633   : > { %v9590_v53 = vpop.f32.mrf.mxu1  ;;  %v5449_v9 = vadd.f32 %v14963_v12, %v13727_v19  ;;  %v14968_v19 = vld [vmem:[#allocation94_spill] sm:$0xff] }
 0x634   : > { %v13941_v38 = vadd.f32 %v9590_v53, %v5450_v1  ;;  %v13955_v53 = vpop.f32.mrf.mxu0  ;;  %v6142_v12 = vadd.f32 %v14968_v19, %v13747_v36 }
 0x635   : > { %v5785_v25 = vpop.f32.mrf.mxu1  ;;  %14964 = vst [vmem:[#allocation43_spill] sm:$0xff] %v13955_v53 }
 0x636   : > { %v13947_v60 = vadd.f32 %v5785_v25, %v5448_v59  ;;  %v14966_v25 = vld [vmem:[#allocation93_spill] sm:$0xff] }
 0x637   : > { %v9591_v30 = vpop.f32.mrf.mxu1  ;;  %v6139_v43 = vadd.f32 %v14966_v25, %v13741_v4  ;;  %v14971_v4 = vld [vmem:[#allocation96_spill] sm:$0xff] }
 0x638   : > { %v13951_v49 = vadd.f32 %v9591_v30, %v5451_v23  ;;  %v13965_v30 = vpop.f32.mrf.mxu0  ;;  %v6145_v25 = vadd.f32 %v14971_v4, %v13760_v35 }
 0x639   : > { %v5788_v29 = vpop.f32.mrf.mxu1  ;;  %14967 = vst [vmem:[#allocation18_spill] sm:$0xff] %v13965_v30 }
 0x63a   : > { %v13957_v1 = vadd.f32 %v5788_v29, %v5449_v9  ;;  %v14969_v29 = vld [vmem:[#allocation95_spill] sm:$0xff] }
 0x63b   : > { %v9638_v51 = vpop.f32.mrf.mxu1  ;;  %v6140_v0 = vadd.f32 %v14969_v29, %v13753_v62  ;;  %v14974_v62 = vld [vmem:[#allocation98_spill] sm:$0xff] }
 0x63c   : > { %v13961_v59 = vadd.f32 %v9638_v51, %v6141_v28  ;;  %v13975_v51 = vpop.f32.mrf.mxu0  ;;  %v6146_v29 = vadd.f32 %v14974_v62, %v13773_v16 }
 0x63d   : > { %v6321_v52 = vpop.f32.mrf.mxu1  ;;  %14970 = vst [vmem:[#allocation13_spill] sm:$0xff] %v13975_v51 }
 0x63e   : > { %v13967_v23 = vadd.f32 %v6321_v52, %v6139_v43  ;;  %v14973_v52 = vld [vmem:[#allocation97_spill] sm:$0xff] }
 0x63f   : > { %v9639_v53 = vpop.f32.mrf.mxu1  ;;  %v6143_v36 = vadd.f32 %v14973_v52, %v13767_v21  ;;  %v14977_v21 = vld [vmem:[#allocation100_spill] sm:$0xff] }
 0x640   : > { %v13971_v9 = vadd.f32 %v9639_v53, %v6142_v12  ;;  %v13985_v53 = vpop.f32.mrf.mxu0  ;;  %v6149_v52 = vadd.f32 %v14977_v21, %v13786_v40 }
 0x641   : > { %v6324_v22 = vpop.f32.mrf.mxu1 }
 0x642   : > { %v13977_v28 = vadd.f32 %v6324_v22, %v6140_v0  ;;  %v14976_v22 = vld [vmem:[#allocation99_spill] sm:$0xff] }
 0x643   : > { %v9642_v30 = vpop.f32.mrf.mxu1  ;;  %v6144_v35 = vadd.f32 %v14976_v22, %v13779_v42  ;;  %v14980_v42 = vld [vmem:[#allocation32_spill] sm:$0xff] }
 0x644   : > { %v13981_v43 = vadd.f32 %v9642_v30, %v6145_v25  ;;  %v13995_v30 = vpop.f32.mrf.mxu0  ;;  %v6150_v22 = vadd.f32 %v14980_v42, %v13799_v31 }
 0x645   : > { %v6337_v19 = vpop.f32.mrf.mxu1 }
 0x646   : > { %14972 = vst [vmem:[#allocation79_spill] sm:$0xff] %v13981_v43  ;;  %v13987_v12 = vadd.f32 %v6337_v19, %v6143_v36  ;;  %v14979_v19 = vld [vmem:[#allocation45_spill] sm:$0xff] }
 0x647   : > { %v9643_v51 = vpop.f32.mrf.mxu1  ;;  %v6147_v16 = vadd.f32 %v14979_v19, %v13793_v24  ;;  %v14983_v24 = vld [vmem:[#allocation6_spill] sm:$0xff] }
 0x648   : > { %v13991_v0 = vadd.f32 %v9643_v51, %v6146_v29  ;;  %v14005_v51 = vpop.f32.mrf.mxu0  ;;  %v6153_v19 = vadd.f32 %v14983_v24, %v13812_v26 }
 0x649   : > { %v6340_v4 = vpop.f32.mrf.mxu1 }
 0x64a   : > { %14975 = vst [vmem:[#allocation53_spill] sm:$0xff] %v13991_v0  ;;  %v13997_v25 = vadd.f32 %v6340_v4, %v6144_v35  ;;  %v14982_v4 = vld [vmem:[#allocation23_spill] sm:$0xff] }
 0x64b   : > { %v9646_v43 = vpop.f32.mrf.mxu1  ;;  %v6148_v40 = vadd.f32 %v14982_v4, %v13805_v46  ;;  %v14986_v46 = vld [vmem:[#allocation29_spill] sm:$0xff] }
 0x64c   : > { %v14001_v36 = vadd.f32 %v9646_v43, %v6149_v52  ;;  %v14015_v43 = vpop.f32.mrf.mxu0  ;;  %v6154_v4 = vadd.f32 %v14986_v46, %v13823_v2 }
 0x64d   : > { %v6353_v62 = vpop.f32.mrf.mxu1 }
 0x64e   : > { %14978 = vst [vmem:[#allocation80_spill] sm:$0xff] %v14001_v36  ;;  %v14007_v29 = vadd.f32 %v6353_v62, %v6147_v16  ;;  %v14985_v62 = vld [vmem:[#allocation37_spill] sm:$0xff] }
 0x64f   : > { %v9647_v0 = vpop.f32.mrf.mxu1  ;;  %v6151_v31 = vadd.f32 %v14985_v62, %v13819_v11  ;;  %v14989_v11 = vld [vmem:[#allocation12_spill] sm:$0xff] }
 0x650   : > { %v14011_v35 = vadd.f32 %v9647_v0, %v6150_v22  ;;  %v14025_v0 = vpop.f32.mrf.mxu0  ;;  %v6157_v62 = vadd.f32 %v14989_v11, %v13837_v56 }
 0x651   : > { %v6356_v21 = vpop.f32.mrf.mxu1 }
 0x652   : > { %14981 = vst [vmem:[#allocation55_spill] sm:$0xff] %v14011_v35  ;;  %v14017_v52 = vadd.f32 %v6356_v21, %v6148_v40  ;;  %v14988_v21 = vld [vmem:[#allocation70_spill] sm:$0xff] }
 0x653   : > { %v9650_v36 = vpop.f32.mrf.mxu1  ;;  %v6152_v26 = vadd.f32 %v14988_v21, %v13829_v54  ;;  %v14991_v54 = vld [vmem:[#allocation72_spill] sm:$0xff] }
 0x654   : > { %v14021_v16 = vadd.f32 %v9650_v36, %v6153_v19  ;;  %v14035_v36 = vpop.f32.mrf.mxu0  ;;  %v6158_v21 = vadd.f32 %v14991_v54, %v13849_v55  ;;  %v6159_v55 = vadd.f32 %v13739_v34, %v13867_v7  ;;  %v6165_v34 = vadd.f32 %v13777_v20, %v13881_v32 }
 0x655   : > { %v6369_v42 = vpop.f32.mrf.mxu1  ;;  %v6164_v20 = vadd.f32 %v13817_v3, %v13897_v63  ;;  %v14993_v3 = vld [vmem:[#allocation9_spill] sm:$0xff] }
 0x656   : > { %14984 = vst [vmem:[#allocation16_spill] sm:$0xff] %v14021_v16  ;;  %v14027_v22 = vadd.f32 %v6369_v42, %v6151_v31  ;;  %v14990_v42 = vld [vmem:[#allocation7_spill] sm:$0xff]  ;;  %v6170_v63 = vadd.f32 %v14993_v3, %v13911_v14 }
 0x657   : > { %v9651_v35 = vpop.f32.mrf.mxu1  ;;  %v6155_v2 = vadd.f32 %v14990_v42, %v13845_v10  ;;  %v6161_v10 = vadd.f32 %v13725_v50, %v13861_v27  ;;  %v6160_v50 = vadd.f32 %v13765_v44, %v13877_v18  ;;  %v6166_v44 = vadd.f32 %v13803_v47, %v13891_v39 }
 0x658   : > { %v14031_v40 = vadd.f32 %v9651_v35, %v6154_v4  ;;  %v14045_v35 = vpop.f32.mrf.mxu0  ;;  %v6167_v47 = vadd.f32 %v13843_v48, %v13907_v45  ;;  %v14995_v48 = vld [vmem:[#allocation14_spill] sm:$0xff] }
 0x659   : > { %v6372_v24 = vpop.f32.mrf.mxu1  ;;  %v6173_v45 = vadd.f32 %v14995_v48, %v13921_v6 }
 0x65a   : > { %14987 = vst [vmem:[#allocation46_spill] sm:$0xff] %v14031_v40  ;;  %v14037_v19 = vadd.f32 %v6372_v24, %v6152_v26  ;;  %v14992_v24 = vld [vmem:[#allocation4_spill] sm:$0xff] }
 0x65b   : > { %v9654_v16 = vpop.f32.mrf.mxu1  ;;  %v6156_v56 = vadd.f32 %v14992_v24, %v13855_v58  ;;  %v6162_v58 = vadd.f32 %v13751_v61, %v13871_v17  ;;  %v6163_v61 = vadd.f32 %v13791_v13, %v13887_v37  ;;  %v6169_v13 = vadd.f32 %v13827_v57, %v13901_v8 }
 0x65c   : > { %v14041_v31 = vadd.f32 %v9654_v16, %v6157_v62  ;;  %v14055_v16 = vpop.f32.mrf.mxu0 }
 0x65d   : > { %v6385_v46 = vpop.f32.mrf.mxu1 }
 0x65e   : > { %v14047_v4 = vadd.f32 %v6385_v46, %v6155_v2 }
 0x65f   : > { %v9655_v40 = vpop.f32.mrf.mxu1 }
 0x660   : > { %v14051_v26 = vadd.f32 %v9655_v40, %v6158_v21  ;;  %v14065_v40 = vpop.f32.mrf.mxu0 }
 0x661   : > { %v6388_v11 = vpop.f32.mrf.mxu1 }
 0x662   : > { %v14057_v62 = vadd.f32 %v6388_v11, %v6156_v56  ;;  %v14075_v56 = vpop.f32.mrf.mxu0 }
 0x663   : > { %v9658_v42 = vpop.f32.mrf.mxu1 }
 0x664   : > { %v14061_v2 = vadd.f32 %v9658_v42, %v6161_v10  ;;  %v14085_v42 = vpop.f32.mrf.mxu0 }
 0x665   : > { %v6401_v46 = vpop.f32.mrf.mxu1 }
 0x666   : > { %v14067_v54 = vadd.f32 %v6401_v46, %v6159_v55 }
 0x667   : > { %v9659_v21 = vpop.f32.mrf.mxu1 }
 0x668   : > { %v14071_v24 = vadd.f32 %v9659_v21, %v6162_v58  ;;  %v14095_v58 = vpop.f32.mrf.mxu0 }
 0x669   : > { %v6404_v27 = vpop.f32.mrf.mxu1 }
 0x66a   : > { %v14077_v11 = vadd.f32 %v6404_v27, %v6160_v50  ;;  %v14105_v27 = vpop.f32.mrf.mxu0 }
 0x66b   : > { %v9662_v7 = vpop.f32.mrf.mxu1 }
 0x66c   : > { %v14081_v10 = vadd.f32 %v9662_v7, %v6165_v34 }
 0x66d   : > { %v6417_v17 = vpop.f32.mrf.mxu1 }
 0x66e   : > { %v14087_v55 = vadd.f32 %v6417_v17, %v6163_v61  ;;  %v14994_v17 = vld [vmem:[#allocation2_spill] sm:$0xff] }
 0x66f   : > { %v9663_v18 = vpop.f32.mrf.mxu1  ;;  %v6168_v57 = vadd.f32 %v14994_v17, %v13917_v41  ;;  %v14997_v41 = vld [vmem:[#allocation11_spill] sm:$0xff]  ;;  %v14998_v17 = vld [vmem:[#allocation74_spill] sm:$0xff] }
 0x670   : > { %v14091_v46 = vadd.f32 %v9663_v18, %v6166_v44  ;;  %v14115_v44 = vpop.f32.mrf.mxu0  ;;  %v6174_v3 = vadd.f32 %v14997_v41, %v13931_v5  ;;  %v6172_v6 = vadd.f32 %v14998_v17, %v13937_v33  ;;  %v15002_v33 = vld [vmem:[#allocation38_spill] sm:$0xff] }
 0x671   : > { %v6420_v32 = vpop.f32.mrf.mxu1 }
 0x672   : > { %v14097_v21 = vadd.f32 %v6420_v32, %v6164_v20 }
 0x673   : > { %v9666_v37 = vpop.f32.mrf.mxu1 }
 0x674   : > { %v14101_v50 = vadd.f32 %v9666_v37, %v6169_v13  ;;  %v14996_v13 = vld [vmem:[#allocation15_spill] sm:$0xff] }
 0x675   : > { %v6433_v39 = vpop.f32.mrf.mxu1  ;;  %v6171_v14 = vadd.f32 %v14996_v13, %v13927_v15  ;;  %v14999_v15 = vld [vmem:[#allocation30_spill] sm:$0xff] }
 0x676   : > { %v14107_v34 = vadd.f32 %v6433_v39, %v6167_v47  ;;  %v14125_v47 = vpop.f32.mrf.mxu0 }
 0x677   : > { %v9667_v7 = vpop.f32.mrf.mxu1 }
 0x678   : > { %v14111_v61 = vadd.f32 %v9667_v7, %v6170_v63 }
 0x679   : > { %v6436_v8 = vpop.f32.mrf.mxu1 }
 0x67a   : > { %v14117_v18 = vadd.f32 %v6436_v8, %v6168_v57  ;;  %v14135_v8 = vpop.f32.mrf.mxu0 }
 0x67b   : > { %v9670_v20 = vpop.f32.mrf.mxu1 }
 0x67c   : > { %v14121_v32 = vadd.f32 %v9670_v20, %v6173_v45  ;;  %v6177_v45 = vadd.f32 %v14999_v15, %v13941_v38  ;;  %v14145_v41 = vpop.f32.mrf.mxu0  ;;  %v15004_v38 = vld [vmem:[#allocation50_spill] sm:$0xff] }
 0x67d   : > { %v6449_v37 = vpop.f32.mrf.mxu1 }
 0x67e   : > { %v14127_v39 = vadd.f32 %v6449_v37, %v6171_v14  ;;  %v15001_v14 = vld [vmem:[#allocation76_spill] sm:$0xff] }
 0x67f   : > { %v9671_v63 = vpop.f32.mrf.mxu1  ;;  %v6175_v5 = vadd.f32 %v15001_v14, %v13947_v60  ;;  %v15006_v60 = vld [vmem:[#allocation43_spill] sm:$0xff] }
 0x680   : > { %v14131_v7 = vadd.f32 %v9671_v63, %v6174_v3  ;;  %v6178_v63 = vadd.f32 %v15002_v33, %v13951_v49  ;;  %v6869_v14 = vadd.f32 %v15006_v60, %v13961_v59 }
 0x681   : > { %v6452_v57 = vpop.f32.mrf.mxu1 }
 0x682   : > { %v14137_v48 = vadd.f32 %v6452_v57, %v6172_v6  ;;  %v6176_v57 = vadd.f32 %v15004_v38, %v13957_v1 }
 0x683   : > { %v9674_v20 = vpop.f32.mrf.mxu1 }
 0x684   : > { %v14141_v13 = vadd.f32 %v9674_v20, %v6177_v45  ;;  %v14155_v45 = vpop.f32.mrf.mxu0 }
 0x685   : > { %v6465_v37 = vpop.f32.mrf.mxu1 }
 0x686   : > { %15000 = vst [vmem:[#allocation47_spill] sm:$0xff] %v14141_v13  ;;  %v14147_v3 = vadd.f32 %v6465_v37, %v6175_v5  ;;  %v14164_v5 = vld [vmem:[%s14391_s4] ss:$0 sm:$0xff] }
 0x687   : > { %v9675_v17 = vpop.f32.mrf.mxu1  ;;  %v15007_v37 = vld [vmem:[#allocation18_spill] sm:$0xff] }
 0x688   : > { %v14151_v6 = vadd.f32 %v9675_v17, %v6178_v63  ;;  %v6867_v33 = vadd.f32 %v15007_v37, %v13967_v23  ;;  %v14169_v63 = vpop.f32.mrf.mxu0 }
 0x689   : > { %v6468_v15 = vpop.f32.mrf.mxu1 }
 0x68a   : > { %15003 = vst [vmem:[#allocation57_spill] sm:$0xff] %v14151_v6  ;;  %v14157_v20 = vadd.f32 %v6468_v15, %v6176_v57  ;;  %v15008_v57 = vld [vmem:[#allocation13_spill] sm:$0xff] }
 0x68b   : > { %v9722_v13 = vpop.f32.mrf.mxu1  ;;  %v6870_v59 = vadd.f32 %v15008_v57, %v13971_v9  ;;  %v14184_v9 = vpop.f32.mrf.mxu0 }
 0x68c   : > { %15005 = vst [vmem:[#allocation83_spill] sm:$0xff] %v14157_v20  ;;  %v7209_v49 = vadd.f32 %v9722_v13, %v6869_v14  ;;  %v6868_v13 = vadd.f32 %v13985_v53, %v13977_v28  ;;  %v15009_v14 = vld [vmem:[#allocation79_spill] sm:$0xff]  ;;  %v6871_v53 = vadd.f32 %v14005_v51, %v13987_v12 }
 0x68d   : > { %v7048_v1 = vpop.f32.mrf.mxu1 }
 0x68e   : > { %v7256_v17 = vadd.f32 %v14164_v5, %v7209_v49  ;;  %v7207_v38 = vadd.f32 %v7048_v1, %v6867_v33  ;;  %v6873_v49 = vadd.f32 %v13995_v30, %v15009_v14  ;;  %v15010_v14 = vld [vmem:[#allocation53_spill] sm:$0xff] }
 0x68f   : > { %v9723_v15 = vpop.f32.mrf.mxu1 }
 0x690   : > { %v7296_v60 = vmax.f32 %v7256_v17, 0.0  ;;  %v7254_v20 = vadd.f32 %v14164_v5, %v7207_v38  ;;  %v7210_v6 = vadd.f32 %v9723_v15, %v6870_v59 }
 0x691   : > { %v7051_v23 = vpop.f32.mrf.mxu1 }
 0x692   : > { %v8093_v37 = vpack.c.bf16 %v7296_v60, %v7296_v60  ;;  %v7294_v33 = vmax.f32 %v7254_v20, 0.0  ;;  %v7257_v1 = vadd.f32 %v14164_v5, %v7210_v6  ;;  %v7208_v17 = vadd.f32 %v7051_v23, %v6868_v13  ;;  %v14194_v20 = vpop.f32.mrf.mxu0 }
 0x693   : > { %v9726_v28 = vpop.f32.mrf.mxu1  ;;  %v6874_v60 = vadd.f32 %v14015_v43, %v15010_v14 }
 0x694   : > { %7497 = vst.msk [vmem:[%s14180_s19 + $0x8] sm:$0xf] %vm7494_vm12, %v8093_v37  ;;  %v8091_v38 = vpack.c.bf16 %v7294_v33, %v7294_v33  ;;  %v7297_v57 = vmax.f32 %v7257_v1, 0.0  ;;  %v7255_v59 = vadd.f32 %v14164_v5, %v7208_v17  ;;  %v7213_v30 = vadd.f32 %v9726_v28, %v6873_v49  ;;  %v15011_v28 = vld [vmem:[#allocation80_spill] sm:$0xff] }
 0x695   : > { %v7064_v15 = vpop.f32.mrf.mxu1  ;;  %v6872_v37 = vadd.f32 %v14025_v0, %v13997_v25 }
 0x696   : > { %7495 = vst.msk [vmem:[%s14180_s19] sm:$0xf] %vm7494_vm12, %v8091_v38  ;;  %v8094_v6 = vpack.c.bf16 %v7297_v57, %v7297_v57  ;;  %v7295_v13 = vmax.f32 %v7255_v59, 0.0  ;;  %v7260_v12 = vadd.f32 %v14164_v5, %v7213_v30  ;;  %v7211_v51 = vadd.f32 %v7064_v15, %v6871_v53  ;;  %v14206_v57 = vpop.f32.mrf.mxu0 }
 0x697   : > { %v9727_v23 = vpop.f32.mrf.mxu1  ;;  %v6877_v38 = vadd.f32 %v14035_v36, %v15011_v28  ;;  %v6875_v15 = vadd.f32 %v14045_v35, %v14007_v29 }
 0x698   : > { %7498 = vst.msk [vmem:[%s14180_s19 + $0xc] sm:$0xf] %vm7494_vm12, %v8094_v6  ;;  %v8092_v49 = vpack.c.bf16 %v7295_v13, %v7295_v13  ;;  %v7300_v33 = vmax.f32 %v7260_v12, 0.0  ;;  %v7258_v43 = vadd.f32 %v14164_v5, %v7211_v51  ;;  %v7214_v1 = vadd.f32 %v9727_v23, %v6874_v60  ;;  %v15012_v12 = vld [vmem:[#allocation55_spill] sm:$0xff]  ;;  %v14218_v23 = vpop.f32.mrf.mxu0 }
 0x699   : > { %v7067_v17 = vpop.f32.mrf.mxu1  ;;  %v6878_v51 = vadd.f32 %v14055_v16, %v15012_v12  ;;  %v15014_v12 = vld [vmem:[#allocation46_spill] sm:$0xff] }
 0x69a   : > { %7496 = vst.msk [vmem:[%s14180_s19 + $0x4] sm:$0xf] %vm7494_vm12, %v8092_v49  ;;  %v8097_v53 = vpack.c.bf16 %v7300_v33, %v7300_v33  ;;  %v7298_v59 = vmax.f32 %v7258_v43, 0.0  ;;  %v7261_v25 = vadd.f32 %v14164_v5, %v7214_v1  ;;  %v7212_v0 = vadd.f32 %v7067_v17, %v6872_v37 }
 0x69b   : > { %v9730_v30 = vpop.f32.mrf.mxu1  ;;  %v6876_v43 = vadd.f32 %v14065_v40, %v14017_v52 }
 0x69c   : > { %7501 = vst.msk [vmem:[%s14180_s19 + $0x18] sm:$0xf] %vm7494_vm12, %v8097_v53  ;;  %v8095_v14 = vpack.c.bf16 %v7298_v59, %v7298_v59  ;;  %v7301_v60 = vmax.f32 %v7261_v25, 0.0  ;;  %v7259_v36 = vadd.f32 %v14164_v5, %v7212_v0  ;;  %v7217_v6 = vadd.f32 %v9730_v30, %v6877_v38  ;;  %v15013_v53 = vld [vmem:[#allocation16_spill] sm:$0xff]  ;;  %v14230_v25 = vpop.f32.mrf.mxu0 }
 0x69d   : > { %v7080_v13 = vpop.f32.mrf.mxu1  ;;  %v6881_v59 = vadd.f32 %v14075_v56, %v15013_v53 }
 0x69e   : > { %7499 = vst.msk [vmem:[%s14180_s19 + $0x10] sm:$0xf] %vm7494_vm12, %v8095_v14  ;;  %v8098_v37 = vpack.c.bf16 %v7301_v60, %v7301_v60  ;;  %v7299_v49 = vmax.f32 %v7259_v36, 0.0  ;;  %v7264_v29 = vadd.f32 %v14164_v5, %v7217_v6  ;;  %v7215_v35 = vadd.f32 %v7080_v13, %v6875_v15 }
 0x69f   : > { %v9731_v33 = vpop.f32.mrf.mxu1  ;;  %v6879_v14 = vadd.f32 %v14085_v42, %v14027_v22 }
 0x6a0   : > { %7502 = vst.msk [vmem:[%s14180_s19 + $0x1c] sm:$0xf] %vm7494_vm12, %v8098_v37  ;;  %v8096_v1 = vpack.c.bf16 %v7299_v49, %v7299_v49  ;;  %v7304_v17 = vmax.f32 %v7264_v29, 0.0  ;;  %v7262_v16 = vadd.f32 %v14164_v5, %v7215_v35  ;;  %v7218_v28 = vadd.f32 %v9731_v33, %v6878_v51  ;;  %v14242_v37 = vpop.f32.mrf.mxu0 }
 0x6a1   : > { %v7083_v38 = vpop.f32.mrf.mxu1  ;;  %v6882_v51 = vadd.f32 %v14095_v58, %v15014_v12  ;;  %v6880_v33 = vadd.f32 %v14105_v27, %v14037_v19 }
 0x6a2   : > { %7500 = vst.msk [vmem:[%s14180_s19 + $0x14] sm:$0xf] %vm7494_vm12, %v8096_v1  ;;  %v8101_v0 = vpack.c.bf16 %v7304_v17, %v7304_v17  ;;  %v7302_v30 = vmax.f32 %v7262_v16, 0.0  ;;  %v7265_v52 = vadd.f32 %v14164_v5, %v7218_v28  ;;  %v7216_v40 = vadd.f32 %v7083_v38, %v6876_v43  ;;  %v14254_v38 = vpop.f32.mrf.mxu0 }
 0x6a3   : > { %v9734_v15 = vpop.f32.mrf.mxu1  ;;  %v6885_v28 = vadd.f32 %v14115_v44, %v14041_v31 }
 0x6a4   : > { %7505 = vst.msk [vmem:[%s14180_s19 + $0x28] sm:$0xf] %vm7494_vm12, %v8101_v0  ;;  %v8099_v60 = vpack.c.bf16 %v7302_v30, %v7302_v30  ;;  %v7305_v36 = vmax.f32 %v7265_v52, 0.0  ;;  %v7263_v56 = vadd.f32 %v14164_v5, %v7216_v40  ;;  %v7221_v6 = vadd.f32 %v9734_v15, %v6881_v59 }
 0x6a5   : > { %v7096_v13 = vpop.f32.mrf.mxu1  ;;  %v6883_v30 = vadd.f32 %v14125_v47, %v14047_v4 }
 0x6a6   : > { %7503 = vst.msk [vmem:[%s14180_s19 + $0x20] sm:$0xf] %vm7494_vm12, %v8099_v60  ;;  %v8102_v49 = vpack.c.bf16 %v7305_v36, %v7305_v36  ;;  %v7303_v29 = vmax.f32 %v7263_v56, 0.0  ;;  %v7268_v22 = vadd.f32 %v14164_v5, %v7221_v6  ;;  %v7219_v42 = vadd.f32 %v7096_v13, %v6879_v14  ;;  %v14266_v60 = vpop.f32.mrf.mxu0 }
 0x6a7   : > { %v9735_v35 = vpop.f32.mrf.mxu1  ;;  %v6886_v14 = vadd.f32 %v14135_v8, %v14051_v26  ;;  %v6884_v13 = vadd.f32 %v14145_v41, %v14057_v62 }
 0x6a8   : > { %7506 = vst.msk [vmem:[%s14180_s19 + $0x2c] sm:$0xf] %vm7494_vm12, %v8102_v49  ;;  %v8100_v43 = vpack.c.bf16 %v7303_v29, %v7303_v29  ;;  %v7308_v1 = vmax.f32 %v7268_v22, 0.0  ;;  %v7266_v58 = vadd.f32 %v14164_v5, %v7219_v42  ;;  %v7222_v17 = vadd.f32 %v9735_v35, %v6882_v51  ;;  %v14278_v22 = vpop.f32.mrf.mxu0 }
 0x6a9   : > { %v7099_v16 = vpop.f32.mrf.mxu1  ;;  %v6889_v29 = vadd.f32 %v14155_v45, %v14061_v2 }
 0x6aa   : > { %7504 = vst.msk [vmem:[%s14180_s19 + $0x24] sm:$0xf] %vm7494_vm12, %v8100_v43  ;;  %v8105_v53 = vpack.c.bf16 %v7308_v1, %v7308_v1  ;;  %v7306_v59 = vmax.f32 %v7266_v58, 0.0  ;;  %v7269_v19 = vadd.f32 %v14164_v5, %v7222_v17  ;;  %v7220_v27 = vadd.f32 %v7099_v16, %v6880_v33 }
 0x6ab   : > { %v9738_v0 = vpop.f32.mrf.mxu1  ;;  %v6887_v43 = vadd.f32 %v14169_v63, %v14067_v54  ;;  %v6890_v16 = vadd.f32 %v14184_v9, %v14071_v24 }
 0x6ac   : > { %7509 = vst.msk [vmem:[%s14180_s19 + $0x38] sm:$0xf] %vm7494_vm12, %v8105_v53  ;;  %v8103_v52 = vpack.c.bf16 %v7306_v59, %v7306_v59  ;;  %v7309_v40 = vmax.f32 %v7269_v19, 0.0  ;;  %v7267_v31 = vadd.f32 %v14164_v5, %v7220_v27  ;;  %v7225_v44 = vadd.f32 %v9738_v0, %v6885_v28  ;;  %v14290_v28 = vpop.f32.mrf.mxu0 }
 0x6ad   : > { %v7112_v15 = vpop.f32.mrf.mxu1  ;;  %v6888_v27 = vadd.f32 %v14194_v20, %v14077_v11 }
 0x6ae   : > { %7507 = vst.msk [vmem:[%s14180_s19 + $0x30] sm:$0xf] %vm7494_vm12, %v8103_v52  ;;  %v8106_v36 = vpack.c.bf16 %v7309_v40, %v7309_v40  ;;  %v7307_v56 = vmax.f32 %v7267_v31, 0.0  ;;  %v7272_v4 = vadd.f32 %v14164_v5, %v7225_v44  ;;  %v7223_v47 = vadd.f32 %v7112_v15, %v6883_v30  ;;  %v9712_v31 = vpop.f32.mrf.mxu0 }
 0x6af   : > { %v9739_v6 = vpop.f32.mrf.mxu1  ;;  %v6893_v40 = vadd.f32 %v14206_v57, %v14081_v10 }
 0x6b0   : > { %7510 = vst.msk [vmem:[%s14180_s19 + $0x3c] sm:$0xf] %vm7494_vm12, %v8106_v36  ;;  %v8104_v12 = vpack.c.bf16 %v7307_v56, %v7307_v56  ;;  %v7312_v51 = vmax.f32 %v7272_v4, 0.0  ;;  %v7270_v26 = vadd.f32 %v14164_v5, %v7223_v47  ;;  %v7226_v8 = vadd.f32 %v9739_v6, %v6886_v14 }
 0x6b1   : > { %v7115_v49 = vpop.f32.mrf.mxu1  ;;  %v6891_v36 = vadd.f32 %v14218_v23, %v14087_v55  ;;  %v6894_v6 = vadd.f32 %v14230_v25, %v14091_v46 }
 0x6b2   : > { %7508 = vst.msk [vmem:[%s14180_s19 + $0x34] sm:$0xf] %vm7494_vm12, %v8104_v12  ;;  %v8109_v42 = vpack.c.bf16 %v7312_v51, %v7312_v51  ;;  %v7310_v35 = vmax.f32 %v7270_v26, 0.0  ;;  %v7273_v62 = vadd.f32 %v14164_v5, %v7226_v8  ;;  %v7224_v41 = vadd.f32 %v7115_v49, %v6884_v13  ;;  %v6836_v13 = vpop.f32.mrf.mxu0 }
 0x6b3   : > { %v9742_v33 = vpop.f32.mrf.mxu1  ;;  %v6892_v8 = vadd.f32 %v14242_v37, %v14097_v21 }
 0x6b4   : > { %7513 = vst.msk [vmem:[%s14180_s19 + $0x48] sm:$0xf] %vm7494_vm12, %v8109_v42  ;;  %v8107_v1 = vpack.c.bf16 %v7310_v35, %v7310_v35  ;;  %v7313_v58 = vmax.f32 %v7273_v62, 0.0  ;;  %v7271_v2 = vadd.f32 %v14164_v5, %v7224_v41  ;;  %v7229_v45 = vadd.f32 %v9742_v33, %v6889_v29  ;;  %v9713_v62 = vpop.f32.mrf.mxu0 }
 0x6b5   : > { %v7128_v17 = vpop.f32.mrf.mxu1  ;;  %v6897_v35 = vadd.f32 %v14254_v38, %v14101_v50 }
 0x6b6   : > { %7511 = vst.msk [vmem:[%s14180_s19 + $0x40] sm:$0xf] %vm7494_vm12, %v8107_v1  ;;  %v8110_v53 = vpack.c.bf16 %v7313_v58, %v7313_v58  ;;  %v7311_v59 = vmax.f32 %v7271_v2, 0.0  ;;  %v7276_v54 = vadd.f32 %v14164_v5, %v7229_v45  ;;  %v7227_v63 = vadd.f32 %v7128_v17, %v6887_v43 }
 0x6b7   : > { %v9743_v19 = vpop.f32.mrf.mxu1  ;;  %v6895_v1 = vadd.f32 %v14266_v60, %v14107_v34  ;;  %v6898_v17 = vadd.f32 %v14278_v22, %v14111_v61 }
 0x6b8   : > { %7514 = vst.msk [vmem:[%s14180_s19 + $0x4c] sm:$0xf] %vm7494_vm12, %v8110_v53  ;;  %v8108_v0 = vpack.c.bf16 %v7311_v59, %v7311_v59  ;;  %v7316_v30 = vmax.f32 %v7276_v54, 0.0  ;;  %v7274_v24 = vadd.f32 %v14164_v5, %v7227_v63  ;;  %v7230_v9 = vadd.f32 %v9743_v19, %v6890_v16  ;;  %v6839_v16 = vpop.f32.mrf.mxu0 }
 0x6b9   : > { %v7131_v52 = vpop.f32.mrf.mxu1  ;;  %v6896_v63 = vadd.f32 %v14290_v28, %v14117_v18 }
 0x6ba   : > { %7512 = vst.msk [vmem:[%s14180_s19 + $0x44] sm:$0xf] %vm7494_vm12, %v8108_v0  ;;  %v8113_v44 = vpack.c.bf16 %v7316_v30, %v7316_v30  ;;  %v7314_v15 = vmax.f32 %v7274_v24, 0.0  ;;  %v7277_v11 = vadd.f32 %v14164_v5, %v7230_v9  ;;  %v7228_v20 = vadd.f32 %v7131_v52, %v6888_v27  ;;  %v9716_v24 = vpop.f32.mrf.mxu0 }
 0x6bb   : > { %v9746_v14 = vpop.f32.mrf.mxu1  ;;  %v6901_v30 = vadd.f32 %v9712_v31, %v14121_v32 }
 0x6bc   : > { %7517 = vst.msk [vmem:[%s14180_s19 + $0x58] sm:$0xf] %vm7494_vm12, %v8113_v44  ;;  %v8111_v56 = vpack.c.bf16 %v7314_v15, %v7314_v15  ;;  %v7317_v4 = vmax.f32 %v7277_v11, 0.0  ;;  %v7275_v10 = vadd.f32 %v14164_v5, %v7228_v20  ;;  %v7233_v57 = vadd.f32 %v9746_v14, %v6893_v40 }
 0x6bd   : > { %v7144_v47 = vpop.f32.mrf.mxu1  ;;  %v6899_v44 = vadd.f32 %v6836_v13, %v14127_v39  ;;  %v6902_v14 = vadd.f32 %v9713_v62, %v14131_v7 }
 0x6be   : > { %7515 = vst.msk [vmem:[%s14180_s19 + $0x50] sm:$0xf] %vm7494_vm12, %v8111_v56  ;;  %v8114_v12 = vpack.c.bf16 %v7317_v4, %v7317_v4  ;;  %v7315_v51 = vmax.f32 %v7275_v10, 0.0  ;;  %v7280_v55 = vadd.f32 %v14164_v5, %v7233_v57  ;;  %v7231_v23 = vadd.f32 %v7144_v47, %v6891_v36  ;;  %v6852_v36 = vpop.f32.mrf.mxu0 }
 0x6bf   : > { %v9747_v26 = vpop.f32.mrf.mxu1  ;;  %v6900_v47 = vadd.f32 %v6839_v16, %v14137_v48 }
 0x6c0   : > { %7518 = vst.msk [vmem:[%s14180_s19 + $0x5c] sm:$0xf] %vm7494_vm12, %v8114_v12  ;;  %v8112_v49 = vpack.c.bf16 %v7315_v51, %v7315_v51  ;;  %v7320_v29 = vmax.f32 %v7280_v55, 0.0  ;;  %v7278_v46 = vadd.f32 %v14164_v5, %v7231_v23  ;;  %v7234_v25 = vadd.f32 %v9747_v26, %v6894_v6  ;;  %v15015_v55 = vld [vmem:[#allocation47_spill] sm:$0xff]  ;;  %v9717_v26 = vpop.f32.mrf.mxu0 }
 0x6c1   : > { %v7147_v42 = vpop.f32.mrf.mxu1  ;;  %v6905_v23 = vadd.f32 %v9716_v24, %v15015_v55 }
 0x6c2   : > { %7516 = vst.msk [vmem:[%s14180_s19 + $0x54] sm:$0xf] %vm7494_vm12, %v8112_v49  ;;  %v8117_v41 = vpack.c.bf16 %v7320_v29, %v7320_v29  ;;  %v7318_v33 = vmax.f32 %v7278_v46, 0.0  ;;  %v7281_v21 = vadd.f32 %v14164_v5, %v7234_v25  ;;  %v7232_v37 = vadd.f32 %v7147_v42, %v6892_v8 }
 0x6c3   : > { %v9750_v43 = vpop.f32.mrf.mxu1  ;;  %v6903_v25 = vadd.f32 %v6852_v36, %v14147_v3 }
 0x6c4   : > { %7521 = vst.msk [vmem:[%s14180_s19 + $0x68] sm:$0xf] %vm7494_vm12, %v8117_v41  ;;  %v8115_v58 = vpack.c.bf16 %v7318_v33, %v7318_v33  ;;  %v7321_v2 = vmax.f32 %v7281_v21, 0.0  ;;  %v7279_v50 = vadd.f32 %v14164_v5, %v7232_v37  ;;  %v7237_v38 = vadd.f32 %v9750_v43, %v6897_v35  ;;  %v15016_v21 = vld [vmem:[#allocation57_spill] sm:$0xff]  ;;  %v6855_v43 = vpop.f32.mrf.mxu0 }
 0x6c5   : > { %v7160_v45 = vpop.f32.mrf.mxu1  ;;  %v6906_v37 = vadd.f32 %v9717_v26, %v15016_v21 }
 0x6c6   : > { %7519 = vst.msk [vmem:[%s14180_s19 + $0x60] sm:$0xf] %vm7494_vm12, %v8115_v58  ;;  %v8118_v53 = vpack.c.bf16 %v7321_v2, %v7321_v2  ;;  %v7319_v59 = vmax.f32 %v7279_v50, 0.0  ;;  %v7284_v34 = vadd.f32 %v14164_v5, %v7237_v38  ;;  %v7235_v60 = vadd.f32 %v7160_v45, %v6895_v1  ;;  %v15017_v38 = vld [vmem:[#allocation83_spill] sm:$0xff] }
 0x6c7   : > { %v9751_v54 = vpop.f32.mrf.mxu1  ;;  %v6904_v45 = vadd.f32 %v6855_v43, %v15017_v38 }
 0x6c8   : > { %7522 = vst.msk [vmem:[%s14180_s19 + $0x6c] sm:$0xf] %vm7494_vm12, %v8118_v53  ;;  %v8116_v19 = vpack.c.bf16 %v7319_v59, %v7319_v59  ;;  %v7324_v27 = vmax.f32 %v7284_v34, 0.0  ;;  %v7282_v61 = vadd.f32 %v14164_v5, %v7235_v60  ;;  %v7238_v22 = vadd.f32 %v9751_v54, %v6898_v17 }
 0x6c9   : > { %v7163_v0 = vpop.f32.mrf.mxu1 }
 0x6ca   : > { %7520 = vst.msk [vmem:[%s14180_s19 + $0x64] sm:$0xf] %vm7494_vm12, %v8116_v19  ;;  %v8121_v9 = vpack.c.bf16 %v7324_v27, %v7324_v27  ;;  %v7322_v52 = vmax.f32 %v7282_v61, 0.0  ;;  %v7285_v40 = vadd.f32 %v14164_v5, %v7238_v22  ;;  %v7236_v18 = vadd.f32 %v7163_v0, %v6896_v63 }
 0x6cb   : > { %v9754_v28 = vpop.f32.mrf.mxu1 }
 0x6cc   : > { %7525 = vst.msk [vmem:[%s14180_s19 + $0x78] sm:$0xf] %vm7494_vm12, %v8121_v9  ;;  %v8119_v15 = vpack.c.bf16 %v7322_v52, %v7322_v52  ;;  %v7325_v11 = vmax.f32 %v7285_v40, 0.0  ;;  %v7283_v20 = vadd.f32 %v14164_v5, %v7236_v18  ;;  %v7241_v32 = vadd.f32 %v9754_v28, %v6901_v30 }
 0x6cd   : > { %v7176_v31 = vpop.f32.mrf.mxu1 }
 0x6ce   : > { %7523 = vst.msk [vmem:[%s14180_s19 + $0x70] sm:$0xf] %vm7494_vm12, %v8119_v15  ;;  %v8122_v56 = vpack.c.bf16 %v7325_v11, %v7325_v11  ;;  %v7323_v4 = vmax.f32 %v7283_v20, 0.0  ;;  %v7288_v10 = vadd.f32 %v14164_v5, %v7241_v32  ;;  %v7239_v39 = vadd.f32 %v7176_v31, %v6899_v44 }
 0x6cf   : > { %v9755_v57 = vpop.f32.mrf.mxu1 }
 0x6d0   : > { %7526 = vst.msk [vmem:[%s14180_s19 + $0x7c] sm:$0xf] %vm7494_vm12, %v8122_v56  ;;  %v8120_v6 = vpack.c.bf16 %v7323_v4, %v7323_v4  ;;  %v7328_v13 = vmax.f32 %v7288_v10, 0.0  ;;  %v7286_v12 = vadd.f32 %v14164_v5, %v7239_v39  ;;  %v7242_v7 = vadd.f32 %v9755_v57, %v6902_v14 }
 0x6d1   : > { %v7179_v51 = vpop.f32.mrf.mxu1 }
 0x6d2   : > { %7524 = vst.msk [vmem:[%s14180_s19 + $0x74] sm:$0xf] %vm7494_vm12, %v8120_v6  ;;  %v8125_v8 = vpack.c.bf16 %v7328_v13, %v7328_v13  ;;  %v7326_v49 = vmax.f32 %v7286_v12, 0.0  ;;  %v7289_v29 = vadd.f32 %v14164_v5, %v7242_v7  ;;  %v7240_v48 = vadd.f32 %v7179_v51, %v6900_v47 }
 0x6d3   : > { %v9758_v46 = vpop.f32.mrf.mxu1 }
 0x6d4   : > { %7529 = vst.msk [vmem:[%s14180_s19 + $0x88] sm:$0xf] %vm7494_vm12, %v8125_v8  ;;  %v8123_v42 = vpack.c.bf16 %v7326_v49, %v7326_v49  ;;  %v7329_v35 = vmax.f32 %v7289_v29, 0.0  ;;  %v7287_v62 = vadd.f32 %v14164_v5, %v7240_v48  ;;  %v7245_v41 = vadd.f32 %v9758_v46, %v6905_v23 }
 0x6d5   : > { %v7192_v33 = vpop.f32.mrf.mxu1 }
 0x6d6   : > { %7527 = vst.msk [vmem:[%s14180_s19 + $0x80] sm:$0xf] %vm7494_vm12, %v8123_v42  ;;  %v8126_v1 = vpack.c.bf16 %v7329_v35, %v7329_v35  ;;  %v7327_v58 = vmax.f32 %v7287_v62, 0.0  ;;  %v7292_v3 = vadd.f32 %v14164_v5, %v7245_v41  ;;  %v7243_v2 = vadd.f32 %v7192_v33, %v6903_v25 }
 0x6d7   : > { %v9759_v50 = vpop.f32.mrf.mxu1 }
 0x6d8   : > { %7530 = vst.msk [vmem:[%s14180_s19 + $0x8c] sm:$0xf] %vm7494_vm12, %v8126_v1  ;;  %v8124_v17 = vpack.c.bf16 %v7327_v58, %v7327_v58  ;;  %v7332_v16 = vmax.f32 %v7292_v3, 0.0  ;;  %v7290_v53 = vadd.f32 %v14164_v5, %v7243_v2  ;;  %v7246_v59 = vadd.f32 %v9759_v50, %v6906_v37 }
 0x6d9   : > { %v7195_v34 = vpop.f32.mrf.mxu1 }
 0x6da   : > { %7528 = vst.msk [vmem:[%s14180_s19 + $0x84] sm:$0xf] %vm7494_vm12, %v8124_v17  ;;  %v8129_v60 = vpack.c.bf16 %v7332_v16, %v7332_v16  ;;  %v7330_v54 = vmax.f32 %v7290_v53, 0.0  ;;  %v7293_v63 = vadd.f32 %v14164_v5, %v7246_v59  ;;  %v7244_v19 = vadd.f32 %v7195_v34, %v6904_v45 }
 0x6dc   : > { %7533 = vst.msk [vmem:[%s14180_s19 + $0x98] sm:$0xf] %vm7494_vm12, %v8129_v60  ;;  %v8127_v27 = vpack.c.bf16 %v7330_v54, %v7330_v54  ;;  %v7333_v61 = vmax.f32 %v7293_v63, 0.0  ;;  %v7291_v22 = vadd.f32 %v14164_v5, %v7244_v19 }
 0x6de   : > { %7531 = vst.msk [vmem:[%s14180_s19 + $0x90] sm:$0xf] %vm7494_vm12, %v8127_v27  ;;  %v8130_v0 = vpack.c.bf16 %v7333_v61, %v7333_v61  ;;  %v7331_v30 = vmax.f32 %v7291_v22, 0.0 }
 0x6e0   : > { %7534 = vst.msk [vmem:[%s14180_s19 + $0x9c] sm:$0xf] %vm7494_vm12, %v8130_v0  ;;  %v8128_v24 = vpack.c.bf16 %v7331_v30, %v7331_v30 }
 0x6e2   : > { %7532 = vst.msk [vmem:[%s14180_s19 + $0x94] sm:$0xf] %vm7494_vm12, %v8128_v24 }
 0x6e3 PF: > { %s15_s18 = sadd.s32 1, %s9881_s18  }
 0x6e4   : > { %p12_p4 = scmp.ge.s32.totalorder %s15_s18, 4  }
 0x6e6   :  { %14 = sbr.rel (!%p12_p4) target bundleno = 1 (0x1), region = 86 }

</bundles_post_ra>
